<compile_context>
chip_gen: v7x
topology: tpu7x:2x2x1
jax: 0.10.0
libtpu: 0.0.40
codegen_flags: <defaults>
</compile_context>

<pallas_src>
import functools
import math

import jax
import jax.numpy as jnp
import numpy as np
from jax import lax
from jax.experimental import pallas as pl
from jax.experimental.pallas import tpu as pltpu

_LN_EPS = 1e-5


def _layer_norm(h, gamma, beta, eps=_LN_EPS):
    mu = jnp.mean(h, axis=-1, keepdims=True)
    var = jnp.mean((h - mu) ** 2, axis=-1, keepdims=True)
    return (h - mu) * lax.rsqrt(var + eps) * gamma + beta


def encoder_layer_kernel(
    xf_ref,      # [1, S, D]  bf16  full sequence (resident across the q-tile axis)
    xq_ref,      # [1, tq, D] f32   current query tile (streamed)
    ln1_g_ref, ln1_b_ref,
    wq_ref, bq_ref, wk_ref, bk_ref, wv_ref, bv_ref, wo_ref, bo_ref,
    ln2_g_ref, ln2_b_ref,
    w1_ref, b1_ref, w2_ref, b2_ref,
    o_ref,       # [1, tq, D]
    k_scr,       # [S, H, Dh] bf16 VMEM scratch (persists across grid steps)
    v_scr,       # [S, H, Dh] bf16 VMEM scratch
    *, n_head, dim_per_head, kv_tile,
):
    f32 = jnp.float32
    bf16 = jnp.bfloat16
    H, Dh = n_head, dim_per_head
    HD = H * Dh
    S = xf_ref.shape[1]
    tq = xq_ref.shape[1]
    scale = 1.0 / math.sqrt(Dh)
    n_kv = S // kv_tile

    ln1_g = ln1_g_ref[0]
    ln1_b = ln1_b_ref[0]

    # ---- K/V cache fill: once per batch element (first q-tile), reused afterwards.
    @pl.when(pl.program_id(1) == 0)
    def _fill_kv():
        x_full = xf_ref[0].astype(f32)                          # [S, D]
        h_kv = _layer_norm(x_full, ln1_g, ln1_b).astype(bf16)   # [S, D]
        k = jnp.dot(h_kv, wk_ref[...], preferred_element_type=f32) + bk_ref[0]
        v = jnp.dot(h_kv, wv_ref[...], preferred_element_type=f32) + bv_ref[0]
        k_scr[...] = k.astype(bf16).reshape(S, H, Dh)           # inline bf16 cast
        v_scr[...] = v.astype(bf16).reshape(S, H, Dh)

    # ---- Q projection for this tile (1/sqrt(Dh) folded into Q once).
    x_q = xq_ref[0]                                             # [tq, D] f32
    h_q = _layer_norm(x_q, ln1_g, ln1_b).astype(bf16)
    q = (jnp.dot(h_q, wq_ref[...], preferred_element_type=f32) + bq_ref[0]) * scale
    q_h = q.astype(bf16).reshape(tq, H, Dh)                     # [tq, H, Dh]

    # ---- Flash-style attention over KV tiles (head-batched, bounded live ranges).
    def kv_step(i, carry):
        m_i, l_i, acc = carry
        start = pl.multiple_of(i * kv_tile, kv_tile)
        k_t = k_scr[pl.ds(start, kv_tile)]                      # [tkv, H, Dh] bf16
        v_t = v_scr[pl.ds(start, kv_tile)]
        s = jnp.einsum("qhd,khd->hqk", q_h, k_t,
                       preferred_element_type=f32)              # [H, tq, tkv] f32
        m_new = jnp.maximum(m_i, jnp.max(s, axis=-1, keepdims=True))
        alpha = jnp.exp(m_i - m_new)
        p = jnp.exp(s - m_new)
        l_new = alpha * l_i + jnp.sum(p, axis=-1, keepdims=True)
        acc_new = alpha * acc + jnp.einsum("hqk,khd->hqd", p.astype(bf16), v_t,
                                           preferred_element_type=f32)
        return m_new, l_new, acc_new

    m0 = jnp.full((H, tq, 1), -jnp.inf, f32)
    l0 = jnp.zeros((H, tq, 1), f32)
    a0 = jnp.zeros((H, tq, Dh), f32)
    _, l_f, acc = lax.fori_loop(0, n_kv, kv_step, (m0, l0, a0))

    ctx = acc * pl.reciprocal(l_f, approx=True)                 # [H, tq, Dh]
    ctx = jnp.transpose(ctx, (1, 0, 2)).reshape(tq, HD).astype(bf16)

    # Fused output projection over all heads.
    attn_out = jnp.dot(ctx, wo_ref[...], preferred_element_type=f32) + bo_ref[0]

    # TODO(synk): dropout (Drop-Res / attention dropout) is identity (eval mode).
    # TODO(synk): slf_attn_mask is assumed None (no padding mask support).
    x1 = x_q + attn_out                                         # [tq, D] f32

    # ---- FFN block (pre-LN): out = x1 + W2(relu(W1(LN2(x1)))).
    h2 = _layer_norm(x1, ln2_g_ref[0], ln2_b_ref[0]).astype(bf16)
    ff = jnp.dot(h2, w1_ref[...], preferred_element_type=f32) + b1_ref[0]
    ff = jnp.maximum(ff, 0.0).astype(bf16)
    ff = jnp.dot(ff, w2_ref[...], preferred_element_type=f32) + b2_ref[0]

    o_ref[0] = (x1 + ff).astype(o_ref.dtype)


def _vmem_limit_bytes():
    """Generation-aware VMEM limit (leave headroom for compiler internal scratch)."""
    cap = 128 * 1024 * 1024
    try:
        cap = int(pltpu.get_tpu_info().vmem_capacity_bytes)
    except Exception:
        pass
    return min((cap * 3) // 4, 96 * 1024 * 1024)


def encoder_layer(x, params, *, n_head, dim_per_head, q_tile=None, kv_tile=None):
    B, S, D = x.shape
    F = params["w1"].shape[1]
    HD = n_head * dim_per_head

    if q_tile is None:
        q_tile = S if S <= 256 else 256
    assert S % q_tile == 0, "seq_len must be divisible by q_tile"
    nqt = S // q_tile
    if kv_tile is None:
        kv_tile = S if S <= 512 else 512
    assert S % kv_tile == 0, "seq_len must be divisible by kv_tile"

    bf16 = jnp.bfloat16
    # bf16 matmul weights and bf16 full-sequence x (halves VMEM/DMA);
    # biases, LN params and the per-tile residual x stay f32.
    x_bf = x.astype(bf16)
    wq = params["wq"].astype(bf16)
    wk = params["wk"].astype(bf16)
    wv = params["wv"].astype(bf16)
    wo = params["wo"].astype(bf16)
    w1 = params["w1"].astype(bf16)
    w2 = params["w2"].astype(bf16)

    kernel = functools.partial(
        encoder_layer_kernel, n_head=n_head, dim_per_head=dim_per_head,
        kv_tile=kv_tile)

    # Advisory cost estimate for XLA scheduling around the custom call.
    flops = int(B * (2 * S * D * HD * 3      # Q/K/V projections
                     + 4 * S * S * HD        # scores + P@V
                     + 2 * S * HD * D        # output projection
                     + 4 * S * D * F))       # FFN
    transcendentals = int(B * n_head * S * S + 6 * B * S)
    wbytes = 2 * (3 * D * HD + HD * D + 2 * D * F) + 4 * (3 * HD + 3 * D + F)
    bytes_accessed = int(B * S * D * (2 + 4 + 4) + wbytes)

    def build(single_buffer_weights):
        if single_buffer_weights and hasattr(pl, "Buffered"):
            def const_spec(shape):
                # Weights never change across the grid: single-buffer them.
                return pl.BlockSpec(shape, lambda b, qi: (0,) * len(shape),
                                    pipeline_mode=pl.Buffered(1))
        else:
            def const_spec(shape):
                return pl.BlockSpec(shape, lambda b, qi: (0,) * len(shape))

        in_specs = [
            pl.BlockSpec((1, S, D), lambda b, qi: (b, 0, 0)),        # x full seq (bf16)
            pl.BlockSpec((1, q_tile, D), lambda b, qi: (b, qi, 0)),  # x q-tile (f32)
            const_spec((1, D)), const_spec((1, D)),                  # ln1 gamma / beta
            const_spec((D, HD)), const_spec((1, HD)),                # Wq, bq
            const_spec((D, HD)), const_spec((1, HD)),                # Wk, bk
            const_spec((D, HD)), const_spec((1, HD)),                # Wv, bv
            const_spec((HD, D)), const_spec((1, D)),                 # Wo, bo
            const_spec((1, D)), const_spec((1, D)),                  # ln2 gamma / beta
            const_spec((D, F)), const_spec((1, F)),                  # W1, b1
            const_spec((F, D)), const_spec((1, D)),                  # W2, b2
        ]

        return pl.pallas_call(
            kernel,
            out_shape=jax.ShapeDtypeStruct((B, S, D), x.dtype),
            grid_spec=pltpu.PrefetchScalarGridSpec(
                num_scalar_prefetch=0,
                grid=(B, nqt),
                in_specs=in_specs,
                out_specs=pl.BlockSpec((1, q_tile, D), lambda b, qi: (b, qi, 0)),
                scratch_shapes=[
                    pltpu.VMEM((S, n_head, dim_per_head), bf16),   # K cache
                    pltpu.VMEM((S, n_head, dim_per_head), bf16),   # V cache
                ],
            ),
            compiler_params=pltpu.CompilerParams(
                # B is 'parallel' (megacore); q-tile axis must be 'arbitrary' because
                # the K/V scratch filled at qi == 0 is reused by later q-tiles.
                # TODO(synk): with B == 1 only one TensorCore is used on v7x.
                dimension_semantics=("parallel", "arbitrary"),
                vmem_limit_bytes=_vmem_limit_bytes(),
            ),
            cost_estimate=pl.CostEstimate(
                flops=flops, transcendentals=transcendentals,
                bytes_accessed=bytes_accessed),
        )

    args = (
        x_bf, x,
        params["ln1_g"], params["ln1_b"],
        wq, params["bq"], wk, params["bk"],
        wv, params["bv"], wo, params["bo"],
        params["ln2_g"], params["ln2_b"],
        w1, params["b1"], w2, params["b2"],
    )

    try:
        return build(single_buffer_weights=True)(*args)
    except Exception:
        # Fallback if this JAX/Mosaic build rejects single-buffered BlockSpecs.
        return build(single_buffer_weights=False)(*args)


def reference_encoder_layer(x, p, *, n_head, dim_per_head):
    """Pure-JAX f32 reference (same math as the PyTorch module, eval mode)."""
    def ln(h, g, b):
        mu = jnp.mean(h, axis=-1, keepdims=True)
        var = jnp.mean((h - mu) ** 2, axis=-1, keepdims=True)
        return (h - mu) * lax.rsqrt(var + _LN_EPS) * g[0] + b[0]

    h = ln(x, p["ln1_g"], p["ln1_b"])
    q = h @ p["wq"] + p["bq"][0]
    k = h @ p["wk"] + p["bk"][0]
    v = h @ p["wv"] + p["bv"][0]
    B, S, _ = x.shape
    H, Dh = n_head, dim_per_head
    qh = q.reshape(B, S, H, Dh).transpose(0, 2, 1, 3) / math.sqrt(Dh)
    kh = k.reshape(B, S, H, Dh).transpose(0, 2, 1, 3)
    vh = v.reshape(B, S, H, Dh).transpose(0, 2, 1, 3)
    scores = jnp.einsum("bhsd,bhtd->bhst", qh, kh)
    attn = jax.nn.softmax(scores, axis=-1)
    ctx = jnp.einsum("bhst,bhtd->bhsd", attn, vh).transpose(0, 2, 1, 3).reshape(B, S, H * Dh)
    x1 = x + ctx @ p["wo"] + p["bo"][0]
    h2 = ln(x1, p["ln2_g"], p["ln2_b"])
    ff = jnp.maximum(h2 @ p["w1"] + p["b1"][0], 0.0) @ p["w2"] + p["b2"][0]
    return x1 + ff


def make_params(key, d_model, d_inner, n_head, dim_per_head):
    hd = n_head * dim_per_head
    keys = jax.random.split(key, 8)
    s = 0.02
    f32 = jnp.float32
    return {
        "ln1_g": jnp.ones((1, d_model), f32),
        "ln1_b": jnp.zeros((1, d_model), f32),
        "wq": s * jax.random.normal(keys[0], (d_model, hd), f32),
        "bq": s * jax.random.normal(keys[1], (1, hd), f32),
        "wk": s * jax.random.normal(keys[2], (d_model, hd), f32),
        "bk": jnp.zeros((1, hd), f32),
        "wv": s * jax.random.normal(keys[3], (d_model, hd), f32),
        "bv": jnp.zeros((1, hd), f32),
        "wo": s * jax.random.normal(keys[4], (hd, d_model), f32),
        "bo": jnp.zeros((1, d_model), f32),
        "ln2_g": jnp.ones((1, d_model), f32),
        "ln2_b": jnp.zeros((1, d_model), f32),
        "w1": s * jax.random.normal(keys[5], (d_model, d_inner), f32),
        "b1": s * jax.random.normal(keys[6], (1, d_inner), f32),
        "w2": s * jax.random.normal(keys[7], (d_inner, d_model), f32),
        "b2": jnp.zeros((1, d_model), f32),
    }


if __name__ == "__main__":
    # Small, lane-friendly shapes; q_tile/kv_tile chosen to exercise the cached-K/V
    # 'arbitrary' q-tile axis (2 tiles) and the online-softmax KV loop (2 tiles).
    B, S = 2, 16
    d_model, d_inner = 128, 256
    n_head, dim_per_head = 2, 128

    key = jax.random.PRNGKey(0)
    kx, kp = jax.random.split(key)
    x = jax.random.normal(kx, (B, S, d_model), jnp.float32)
    params = make_params(kp, d_model, d_inner, n_head, dim_per_head)

    out = encoder_layer(x, params, n_head=n_head, dim_per_head=dim_per_head,
                        q_tile=8, kv_tile=8)
    out = jax.block_until_ready(out)

    ref = reference_encoder_layer(x, params, n_head=n_head, dim_per_head=dim_per_head)
    # bf16 matmul operands + approx reciprocal -> looser tolerance than f32.
    np.testing.assert_allclose(np.asarray(out), np.asarray(ref), rtol=2e-2, atol=2e-2)

    print("KERNEL_OK")
</pallas_src>

<mosaic_0001>
module attributes {stable_mosaic.version = 11 : i64} {
  func.func @encoder_layer_kernel(%arg0: i32, %arg1: i32, %arg2: memref<1x16x128xbf16, #tpu.memory_space<vmem>>, %arg3: memref<1x8x128xf32, #tpu.memory_space<vmem>>, %arg4: memref<1x128xf32, #tpu.memory_space<vmem>>, %arg5: memref<1x128xf32, #tpu.memory_space<vmem>>, %arg6: memref<128x256xbf16, #tpu.memory_space<vmem>>, %arg7: memref<1x256xf32, #tpu.memory_space<vmem>>, %arg8: memref<128x256xbf16, #tpu.memory_space<vmem>>, %arg9: memref<1x256xf32, #tpu.memory_space<vmem>>, %arg10: memref<128x256xbf16, #tpu.memory_space<vmem>>, %arg11: memref<1x256xf32, #tpu.memory_space<vmem>>, %arg12: memref<256x128xbf16, #tpu.memory_space<vmem>>, %arg13: memref<1x128xf32, #tpu.memory_space<vmem>>, %arg14: memref<1x128xf32, #tpu.memory_space<vmem>>, %arg15: memref<1x128xf32, #tpu.memory_space<vmem>>, %arg16: memref<128x256xbf16, #tpu.memory_space<vmem>>, %arg17: memref<1x256xf32, #tpu.memory_space<vmem>>, %arg18: memref<256x128xbf16, #tpu.memory_space<vmem>>, %arg19: memref<1x128xf32, #tpu.memory_space<vmem>>, %arg20: memref<1x8x128xf32, #tpu.memory_space<vmem>>, %arg21: memref<16x2x128xbf16, #tpu.memory_space<vmem>>, %arg22: memref<16x2x128xbf16, #tpu.memory_space<vmem>>) attributes {dimension_semantics = [#tpu.dimension_semantics<parallel>, #tpu.dimension_semantics<arbitrary>], iteration_bounds = array<i64: 2, 2>, scalar_prefetch = 0 : i64, scratch_operands = 2 : i64, tpu.core_type = #tpu.core_type<tc>, window_params = [{transform_indices = @transform_0, window_bounds = array<i64: 1, 16, 128>}, {transform_indices = @transform_1, window_bounds = array<i64: 1, 8, 128>}, {pipeline_mode = #tpu.pipeline_mode<synchronous>, transform_indices = @transform_2, window_bounds = array<i64: 1, 128>}, {pipeline_mode = #tpu.pipeline_mode<synchronous>, transform_indices = @transform_3, window_bounds = array<i64: 1, 128>}, {pipeline_mode = #tpu.pipeline_mode<synchronous>, transform_indices = @transform_4, window_bounds = array<i64: 128, 256>}, {pipeline_mode = #tpu.pipeline_mode<synchronous>, transform_indices = @transform_5, window_bounds = array<i64: 1, 256>}, {pipeline_mode = #tpu.pipeline_mode<synchronous>, transform_indices = @transform_6, window_bounds = array<i64: 128, 256>}, {pipeline_mode = #tpu.pipeline_mode<synchronous>, transform_indices = @transform_7, window_bounds = array<i64: 1, 256>}, {pipeline_mode = #tpu.pipeline_mode<synchronous>, transform_indices = @transform_8, window_bounds = array<i64: 128, 256>}, {pipeline_mode = #tpu.pipeline_mode<synchronous>, transform_indices = @transform_9, window_bounds = array<i64: 1, 256>}, {pipeline_mode = #tpu.pipeline_mode<synchronous>, transform_indices = @transform_10, window_bounds = array<i64: 256, 128>}, {pipeline_mode = #tpu.pipeline_mode<synchronous>, transform_indices = @transform_11, window_bounds = array<i64: 1, 128>}, {pipeline_mode = #tpu.pipeline_mode<synchronous>, transform_indices = @transform_12, window_bounds = array<i64: 1, 128>}, {pipeline_mode = #tpu.pipeline_mode<synchronous>, transform_indices = @transform_13, window_bounds = array<i64: 1, 128>}, {pipeline_mode = #tpu.pipeline_mode<synchronous>, transform_indices = @transform_14, window_bounds = array<i64: 128, 256>}, {pipeline_mode = #tpu.pipeline_mode<synchronous>, transform_indices = @transform_15, window_bounds = array<i64: 1, 256>}, {pipeline_mode = #tpu.pipeline_mode<synchronous>, transform_indices = @transform_16, window_bounds = array<i64: 256, 128>}, {pipeline_mode = #tpu.pipeline_mode<synchronous>, transform_indices = @transform_17, window_bounds = array<i64: 1, 128>}, {transform_indices = @transform_18, window_bounds = array<i64: 1, 8, 128>}]} {
    %c0 = arith.constant 0 : index
    %c0_0 = arith.constant 0 : index
    %0 = vector.load %arg4[%c0, %c0_0] : memref<1x128xf32, #tpu.memory_space<vmem>>, vector<1x128xf32>
    %1 = vector.shape_cast %0 : vector<1x128xf32> to vector<128xf32>
    %c0_1 = arith.constant 0 : index
    %c0_2 = arith.constant 0 : index
    %2 = vector.load %arg5[%c0_1, %c0_2] : memref<1x128xf32, #tpu.memory_space<vmem>>, vector<1x128xf32>
    %3 = vector.shape_cast %2 : vector<1x128xf32> to vector<128xf32>
    %c0_i32 = arith.constant 0 : i32
    %4 = arith.cmpi eq, %arg1, %c0_i32 : i32
    %5 = arith.extui %4 : i1 to i32
    %c0_i32_3 = arith.constant 0 : i32
    %6 = arith.cmpi ne, %5, %c0_i32_3 : i32
    scf.if %6 {
      %c0_50 = arith.constant 0 : index
      %c0_51 = arith.constant 0 : index
      %c0_52 = arith.constant 0 : index
      %114 = vector.load %arg2[%c0_50, %c0_51, %c0_52] : memref<1x16x128xbf16, #tpu.memory_space<vmem>>, vector<1x16x128xbf16>
      %115 = vector.shape_cast %114 : vector<1x16x128xbf16> to vector<16x128xbf16>
      %116 = arith.extf %115 : vector<16x128xbf16> to vector<16x128xf32>
      %cst_53 = arith.constant dense<0.000000e+00> : vector<16xf32>
      %117 = vector.multi_reduction <add>, %116, %cst_53 [1] : vector<16x128xf32> to vector<16xf32>
      %118 = vector.shape_cast %117 : vector<16xf32> to vector<16x1xf32>
      %cst_54 = arith.constant 1.280000e+02 : f32
      %119 = vector.broadcast %cst_54 : f32 to vector<16x1xf32>
      %120 = arith.divf %118, %119 : vector<16x1xf32>
      %121 = vector.broadcast %120 : vector<16x1xf32> to vector<16x128xf32>
      %122 = arith.subf %116, %121 : vector<16x128xf32>
      %123 = arith.mulf %122, %122 : vector<16x128xf32>
      %cst_55 = arith.constant dense<0.000000e+00> : vector<16xf32>
      %124 = vector.multi_reduction <add>, %123, %cst_55 [1] : vector<16x128xf32> to vector<16xf32>
      %125 = vector.shape_cast %124 : vector<16xf32> to vector<16x1xf32>
      %cst_56 = arith.constant 1.280000e+02 : f32
      %126 = vector.broadcast %cst_56 : f32 to vector<16x1xf32>
      %127 = arith.divf %125, %126 : vector<16x1xf32>
      %128 = vector.broadcast %120 : vector<16x1xf32> to vector<16x128xf32>
      %129 = arith.subf %116, %128 : vector<16x128xf32>
      %cst_57 = arith.constant 9.99999974E-6 : f32
      %130 = vector.broadcast %cst_57 : f32 to vector<16x1xf32>
      %131 = arith.addf %127, %130 : vector<16x1xf32>
      %132 = math.rsqrt %131 : vector<16x1xf32>
      %133 = vector.broadcast %132 : vector<16x1xf32> to vector<16x128xf32>
      %134 = arith.mulf %129, %133 : vector<16x128xf32>
      %135 = vector.shape_cast %1 : vector<128xf32> to vector<1x128xf32>
      %136 = vector.broadcast %135 : vector<1x128xf32> to vector<16x128xf32>
      %137 = arith.mulf %134, %136 : vector<16x128xf32>
      %138 = vector.shape_cast %3 : vector<128xf32> to vector<1x128xf32>
      %139 = vector.broadcast %138 : vector<1x128xf32> to vector<16x128xf32>
      %140 = arith.addf %137, %139 : vector<16x128xf32>
      %141 = arith.truncf %140 : vector<16x128xf32> to vector<16x128xbf16>
      %c0_58 = arith.constant 0 : index
      %c0_59 = arith.constant 0 : index
      %142 = vector.load %arg8[%c0_58, %c0_59] : memref<128x256xbf16, #tpu.memory_space<vmem>>, vector<128x256xbf16>
      %cst_60 = arith.constant dense<0.000000e+00> : vector<16x256xf32>
      %143 = tpu.matmul %141, %142, %cst_60 {dimension_numbers = #tpu.dot_dimension_numbers<[1], [0], [0], [1], [0, 0, 1, 1], [], []>} : vector<16x128xbf16>, vector<128x256xbf16>, vector<16x256xf32> -> vector<16x256xf32>
      %c0_61 = arith.constant 0 : index
      %c0_62 = arith.constant 0 : index
      %144 = vector.load %arg9[%c0_61, %c0_62] : memref<1x256xf32, #tpu.memory_space<vmem>>, vector<1x256xf32>
      %145 = vector.shape_cast %144 : vector<1x256xf32> to vector<256xf32>
      %146 = vector.shape_cast %145 : vector<256xf32> to vector<1x256xf32>
      %147 = vector.broadcast %146 : vector<1x256xf32> to vector<16x256xf32>
      %148 = arith.addf %143, %147 : vector<16x256xf32>
      %c0_63 = arith.constant 0 : index
      %c0_64 = arith.constant 0 : index
      %149 = vector.load %arg10[%c0_63, %c0_64] : memref<128x256xbf16, #tpu.memory_space<vmem>>, vector<128x256xbf16>
      %cst_65 = arith.constant dense<0.000000e+00> : vector<16x256xf32>
      %150 = tpu.matmul %141, %149, %cst_65 {dimension_numbers = #tpu.dot_dimension_numbers<[1], [0], [0], [1], [0, 0, 1, 1], [], []>} : vector<16x128xbf16>, vector<128x256xbf16>, vector<16x256xf32> -> vector<16x256xf32>
      %c0_66 = arith.constant 0 : index
      %c0_67 = arith.constant 0 : index
      %151 = vector.load %arg11[%c0_66, %c0_67] : memref<1x256xf32, #tpu.memory_space<vmem>>, vector<1x256xf32>
      %152 = vector.shape_cast %151 : vector<1x256xf32> to vector<256xf32>
      %153 = vector.shape_cast %152 : vector<256xf32> to vector<1x256xf32>
      %154 = vector.broadcast %153 : vector<1x256xf32> to vector<16x256xf32>
      %155 = arith.addf %150, %154 : vector<16x256xf32>
      %156 = arith.truncf %148 : vector<16x256xf32> to vector<16x256xbf16>
      %157 = vector.shape_cast %156 : vector<16x256xbf16> to vector<16x2x128xbf16>
      %c0_68 = arith.constant 0 : index
      %c0_69 = arith.constant 0 : index
      %c0_70 = arith.constant 0 : index
      %158 = vector.load %arg21[%c0_68, %c0_69, %c0_70] : memref<16x2x128xbf16, #tpu.memory_space<vmem>>, vector<16x2x128xbf16>
      tpu.vector_store %arg21[%c0_68, %c0_69, %c0_70], %157 {strides = array<i32>} : memref<16x2x128xbf16, #tpu.memory_space<vmem>>, vector<16x2x128xbf16>,
      %159 = arith.truncf %155 : vector<16x256xf32> to vector<16x256xbf16>
      %160 = vector.shape_cast %159 : vector<16x256xbf16> to vector<16x2x128xbf16>
      %c0_71 = arith.constant 0 : index
      %c0_72 = arith.constant 0 : index
      %c0_73 = arith.constant 0 : index
      %161 = vector.load %arg22[%c0_71, %c0_72, %c0_73] : memref<16x2x128xbf16, #tpu.memory_space<vmem>>, vector<16x2x128xbf16>
      tpu.vector_store %arg22[%c0_71, %c0_72, %c0_73], %160 {strides = array<i32>} : memref<16x2x128xbf16, #tpu.memory_space<vmem>>, vector<16x2x128xbf16>,
    } else {
    }
    %c0_4 = arith.constant 0 : index
    %c0_5 = arith.constant 0 : index
    %c0_6 = arith.constant 0 : index
    %7 = vector.load %arg3[%c0_4, %c0_5, %c0_6] : memref<1x8x128xf32, #tpu.memory_space<vmem>>, vector<1x8x128xf32>
    %8 = vector.shape_cast %7 : vector<1x8x128xf32> to vector<8x128xf32>
    %cst = arith.constant dense<0.000000e+00> : vector<8xf32>
    %9 = vector.multi_reduction <add>, %8, %cst [1] : vector<8x128xf32> to vector<8xf32>
    %10 = vector.shape_cast %9 : vector<8xf32> to vector<8x1xf32>
    %cst_7 = arith.constant 1.280000e+02 : f32
    %11 = vector.broadcast %cst_7 : f32 to vector<8x1xf32>
    %12 = arith.divf %10, %11 : vector<8x1xf32>
    %13 = vector.broadcast %12 : vector<8x1xf32> to vector<8x128xf32>
    %14 = arith.subf %8, %13 : vector<8x128xf32>
    %15 = arith.mulf %14, %14 : vector<8x128xf32>
    %cst_8 = arith.constant dense<0.000000e+00> : vector<8xf32>
    %16 = vector.multi_reduction <add>, %15, %cst_8 [1] : vector<8x128xf32> to vector<8xf32>
    %17 = vector.shape_cast %16 : vector<8xf32> to vector<8x1xf32>
    %cst_9 = arith.constant 1.280000e+02 : f32
    %18 = vector.broadcast %cst_9 : f32 to vector<8x1xf32>
    %19 = arith.divf %17, %18 : vector<8x1xf32>
    %20 = vector.broadcast %12 : vector<8x1xf32> to vector<8x128xf32>
    %21 = arith.subf %8, %20 : vector<8x128xf32>
    %cst_10 = arith.constant 9.99999974E-6 : f32
    %22 = vector.broadcast %cst_10 : f32 to vector<8x1xf32>
    %23 = arith.addf %19, %22 : vector<8x1xf32>
    %24 = math.rsqrt %23 : vector<8x1xf32>
    %25 = vector.broadcast %24 : vector<8x1xf32> to vector<8x128xf32>
    %26 = arith.mulf %21, %25 : vector<8x128xf32>
    %27 = vector.shape_cast %1 : vector<128xf32> to vector<1x128xf32>
    %28 = vector.broadcast %27 : vector<1x128xf32> to vector<8x128xf32>
    %29 = arith.mulf %26, %28 : vector<8x128xf32>
    %30 = vector.shape_cast %3 : vector<128xf32> to vector<1x128xf32>
    %31 = vector.broadcast %30 : vector<1x128xf32> to vector<8x128xf32>
    %32 = arith.addf %29, %31 : vector<8x128xf32>
    %33 = arith.truncf %32 : vector<8x128xf32> to vector<8x128xbf16>
    %c0_11 = arith.constant 0 : index
    %c0_12 = arith.constant 0 : index
    %34 = vector.load %arg6[%c0_11, %c0_12] : memref<128x256xbf16, #tpu.memory_space<vmem>>, vector<128x256xbf16>
    %cst_13 = arith.constant dense<0.000000e+00> : vector<8x256xf32>
    %35 = tpu.matmul %33, %34, %cst_13 {dimension_numbers = #tpu.dot_dimension_numbers<[1], [0], [0], [1], [0, 0, 1, 1], [], []>} : vector<8x128xbf16>, vector<128x256xbf16>, vector<8x256xf32> -> vector<8x256xf32>
    %c0_14 = arith.constant 0 : index
    %c0_15 = arith.constant 0 : index
    %36 = vector.load %arg7[%c0_14, %c0_15] : memref<1x256xf32, #tpu.memory_space<vmem>>, vector<1x256xf32>
    %37 = vector.shape_cast %36 : vector<1x256xf32> to vector<256xf32>
    %38 = vector.shape_cast %37 : vector<256xf32> to vector<1x256xf32>
    %39 = vector.broadcast %38 : vector<1x256xf32> to vector<8x256xf32>
    %40 = arith.addf %35, %39 : vector<8x256xf32>
    %cst_16 = arith.constant 0.0883883461 : f32
    %41 = vector.broadcast %cst_16 : f32 to vector<8x256xf32>
    %42 = arith.mulf %40, %41 : vector<8x256xf32>
    %43 = arith.truncf %42 : vector<8x256xf32> to vector<8x256xbf16>
    %44 = vector.shape_cast %43 : vector<8x256xbf16> to vector<8x2x128xbf16>
    %cst_17 = arith.constant 0xFF800000 : f32
    %45 = vector.broadcast %cst_17 : f32 to vector<2x8x1xf32>
    %cst_18 = arith.constant 0.000000e+00 : f32
    %46 = vector.broadcast %cst_18 : f32 to vector<2x8x1xf32>
    %cst_19 = arith.constant 0.000000e+00 : f32
    %47 = vector.broadcast %cst_19 : f32 to vector<2x8x128xf32>
    %c0_i32_20 = arith.constant 0 : i32
    %c2_i32 = arith.constant 2 : i32
    %48 = arith.addi %c0_i32_20, %c2_i32 : i32
    %c1_i32 = arith.constant 1 : i32
    %49:3 = scf.for %arg23 = %c0_i32_20 to %48 step %c1_i32 iter_args(%arg24 = %45, %arg25 = %46, %arg26 = %47) -> (vector<2x8x1xf32>, vector<2x8x1xf32>, vector<2x8x128xf32>)  : i32 {
      %c8_i32 = arith.constant 8 : i32
      %114 = arith.muli %arg23, %c8_i32 : i32
      %115 = tpu.assume_multiple %114, 8 : i32
      %116 = arith.index_cast %115 : i32 to index
      %c0_50 = arith.constant 0 : index
      %c0_51 = arith.constant 0 : index
      %117 = vector.load %arg21[%116, %c0_50, %c0_51] : memref<16x2x128xbf16, #tpu.memory_space<vmem>>, vector<8x2x128xbf16>
      %118 = arith.index_cast %115 : i32 to index
      %c0_52 = arith.constant 0 : index
      %c0_53 = arith.constant 0 : index
      %119 = vector.load %arg22[%118, %c0_52, %c0_53] : memref<16x2x128xbf16, #tpu.memory_space<vmem>>, vector<8x2x128xbf16>
      "tpu.trace_start"() <{level = 10 : i32, message = "qhd,khd->hqk"}> : () -> ()
      %cst_54 = arith.constant dense<0.000000e+00> : vector<2x8x8xf32>
      %120 = tpu.matmul %44, %117, %cst_54 {dimension_numbers = #tpu.dot_dimension_numbers<[2], [2], [0], [0], [0, 1, 0, 0, 1, 0], [1], [1]>} : vector<8x2x128xbf16>, vector<8x2x128xbf16>, vector<2x8x8xf32> -> vector<2x8x8xf32>
      "tpu.trace_stop"() : () -> ()
      %cst_55 = arith.constant dense<0xFF800000> : vector<2x8xf32>
      %121 = vector.multi_reduction <maximumf>, %120, %cst_55 [2] : vector<2x8x8xf32> to vector<2x8xf32>
      %122 = vector.shape_cast %121 : vector<2x8xf32> to vector<2x8x1xf32>
      %123 = arith.maximumf %arg24, %122 : vector<2x8x1xf32>
      %124 = arith.subf %arg24, %123 : vector<2x8x1xf32>
      %125 = math.exp %124 : vector<2x8x1xf32>
      %126 = vector.broadcast %123 : vector<2x8x1xf32> to vector<2x8x8xf32>
      %127 = arith.subf %120, %126 : vector<2x8x8xf32>
      %128 = math.exp %127 : vector<2x8x8xf32>
      %129 = arith.mulf %125, %arg25 : vector<2x8x1xf32>
      %cst_56 = arith.constant dense<0.000000e+00> : vector<2x8xf32>
      %130 = vector.multi_reduction <add>, %128, %cst_56 [2] : vector<2x8x8xf32> to vector<2x8xf32>
      %131 = vector.shape_cast %130 : vector<2x8xf32> to vector<2x8x1xf32>
      %132 = arith.addf %129, %131 : vector<2x8x1xf32>
      %133 = vector.broadcast %125 : vector<2x8x1xf32> to vector<2x8x128xf32>
      %134 = arith.mulf %133, %arg26 : vector<2x8x128xf32>
      %135 = arith.truncf %128 : vector<2x8x8xf32> to vector<2x8x8xbf16>
      "tpu.trace_start"() <{level = 10 : i32, message = "hqk,khd->hqd"}> : () -> ()
      %cst_57 = arith.constant dense<0.000000e+00> : vector<2x8x128xf32>
      %136 = tpu.matmul %135, %119, %cst_57 {dimension_numbers = #tpu.dot_dimension_numbers<[2], [0], [1], [2], [0, 0, 0, 1, 1, 2], [0], [1]>} : vector<2x8x8xbf16>, vector<8x2x128xbf16>, vector<2x8x128xf32> -> vector<2x8x128xf32>
      "tpu.trace_stop"() : () -> ()
      %137 = arith.addf %134, %136 : vector<2x8x128xf32>
      scf.yield %123, %132, %137 : vector<2x8x1xf32>, vector<2x8x1xf32>, vector<2x8x128xf32>
    }
    %c2_i32_21 = arith.constant 2 : i32
    %50 = tpu.reciprocal %49#1 {approx = true} : vector<2x8x1xf32> -> vector<2x8x1xf32>
    %51 = vector.broadcast %50 : vector<2x8x1xf32> to vector<2x8x128xf32>
    %52 = arith.mulf %49#2, %51 : vector<2x8x128xf32>
    %53 = tpu.transpose %52, [1, 0, 2] : vector<2x8x128xf32> -> vector<8x2x128xf32>
    %54 = vector.shape_cast %53 : vector<8x2x128xf32> to vector<8x256xf32>
    %55 = arith.truncf %54 : vector<8x256xf32> to vector<8x256xbf16>
    %c0_22 = arith.constant 0 : index
    %c0_23 = arith.constant 0 : index
    %56 = vector.load %arg12[%c0_22, %c0_23] : memref<256x128xbf16, #tpu.memory_space<vmem>>, vector<256x128xbf16>
    %cst_24 = arith.constant dense<0.000000e+00> : vector<8x128xf32>
    %57 = tpu.matmul %55, %56, %cst_24 {dimension_numbers = #tpu.dot_dimension_numbers<[1], [0], [0], [1], [0, 0, 1, 1], [], []>} : vector<8x256xbf16>, vector<256x128xbf16>, vector<8x128xf32> -> vector<8x128xf32>
    %c0_25 = arith.constant 0 : index
    %c0_26 = arith.constant 0 : index
    %58 = vector.load %arg13[%c0_25, %c0_26] : memref<1x128xf32, #tpu.memory_space<vmem>>, vector<1x128xf32>
    %59 = vector.shape_cast %58 : vector<1x128xf32> to vector<128xf32>
    %60 = vector.shape_cast %59 : vector<128xf32> to vector<1x128xf32>
    %61 = vector.broadcast %60 : vector<1x128xf32> to vector<8x128xf32>
    %62 = arith.addf %57, %61 : vector<8x128xf32>
    %63 = arith.addf %8, %62 : vector<8x128xf32>
    %c0_27 = arith.constant 0 : index
    %c0_28 = arith.constant 0 : index
    %64 = vector.load %arg14[%c0_27, %c0_28] : memref<1x128xf32, #tpu.memory_space<vmem>>, vector<1x128xf32>
    %65 = vector.shape_cast %64 : vector<1x128xf32> to vector<128xf32>
    %c0_29 = arith.constant 0 : index
    %c0_30 = arith.constant 0 : index
    %66 = vector.load %arg15[%c0_29, %c0_30] : memref<1x128xf32, #tpu.memory_space<vmem>>, vector<1x128xf32>
    %67 = vector.shape_cast %66 : vector<1x128xf32> to vector<128xf32>
    %cst_31 = arith.constant dense<0.000000e+00> : vector<8xf32>
    %68 = vector.multi_reduction <add>, %63, %cst_31 [1] : vector<8x128xf32> to vector<8xf32>
    %69 = vector.shape_cast %68 : vector<8xf32> to vector<8x1xf32>
    %cst_32 = arith.constant 1.280000e+02 : f32
    %70 = vector.broadcast %cst_32 : f32 to vector<8x1xf32>
    %71 = arith.divf %69, %70 : vector<8x1xf32>
    %72 = vector.broadcast %71 : vector<8x1xf32> to vector<8x128xf32>
    %73 = arith.subf %63, %72 : vector<8x128xf32>
    %74 = arith.mulf %73, %73 : vector<8x128xf32>
    %cst_33 = arith.constant dense<0.000000e+00> : vector<8xf32>
    %75 = vector.multi_reduction <add>, %74, %cst_33 [1] : vector<8x128xf32> to vector<8xf32>
    %76 = vector.shape_cast %75 : vector<8xf32> to vector<8x1xf32>
    %cst_34 = arith.constant 1.280000e+02 : f32
    %77 = vector.broadcast %cst_34 : f32 to vector<8x1xf32>
    %78 = arith.divf %76, %77 : vector<8x1xf32>
    %79 = vector.broadcast %71 : vector<8x1xf32> to vector<8x128xf32>
    %80 = arith.subf %63, %79 : vector<8x128xf32>
    %cst_35 = arith.constant 9.99999974E-6 : f32
    %81 = vector.broadcast %cst_35 : f32 to vector<8x1xf32>
    %82 = arith.addf %78, %81 : vector<8x1xf32>
    %83 = math.rsqrt %82 : vector<8x1xf32>
    %84 = vector.broadcast %83 : vector<8x1xf32> to vector<8x128xf32>
    %85 = arith.mulf %80, %84 : vector<8x128xf32>
    %86 = vector.shape_cast %65 : vector<128xf32> to vector<1x128xf32>
    %87 = vector.broadcast %86 : vector<1x128xf32> to vector<8x128xf32>
    %88 = arith.mulf %85, %87 : vector<8x128xf32>
    %89 = vector.shape_cast %67 : vector<128xf32> to vector<1x128xf32>
    %90 = vector.broadcast %89 : vector<1x128xf32> to vector<8x128xf32>
    %91 = arith.addf %88, %90 : vector<8x128xf32>
    %92 = arith.truncf %91 : vector<8x128xf32> to vector<8x128xbf16>
    %c0_36 = arith.constant 0 : index
    %c0_37 = arith.constant 0 : index
    %93 = vector.load %arg16[%c0_36, %c0_37] : memref<128x256xbf16, #tpu.memory_space<vmem>>, vector<128x256xbf16>
    %cst_38 = arith.constant dense<0.000000e+00> : vector<8x256xf32>
    %94 = tpu.matmul %92, %93, %cst_38 {dimension_numbers = #tpu.dot_dimension_numbers<[1], [0], [0], [1], [0, 0, 1, 1], [], []>} : vector<8x128xbf16>, vector<128x256xbf16>, vector<8x256xf32> -> vector<8x256xf32>
    %c0_39 = arith.constant 0 : index
    %c0_40 = arith.constant 0 : index
    %95 = vector.load %arg17[%c0_39, %c0_40] : memref<1x256xf32, #tpu.memory_space<vmem>>, vector<1x256xf32>
    %96 = vector.shape_cast %95 : vector<1x256xf32> to vector<256xf32>
    %97 = vector.shape_cast %96 : vector<256xf32> to vector<1x256xf32>
    %98 = vector.broadcast %97 : vector<1x256xf32> to vector<8x256xf32>
    %99 = arith.addf %94, %98 : vector<8x256xf32>
    %cst_41 = arith.constant 0.000000e+00 : f32
    %100 = vector.broadcast %cst_41 : f32 to vector<8x256xf32>
    %101 = arith.maximumf %99, %100 : vector<8x256xf32>
    %102 = arith.truncf %101 : vector<8x256xf32> to vector<8x256xbf16>
    %c0_42 = arith.constant 0 : index
    %c0_43 = arith.constant 0 : index
    %103 = vector.load %arg18[%c0_42, %c0_43] : memref<256x128xbf16, #tpu.memory_space<vmem>>, vector<256x128xbf16>
    %cst_44 = arith.constant dense<0.000000e+00> : vector<8x128xf32>
    %104 = tpu.matmul %102, %103, %cst_44 {dimension_numbers = #tpu.dot_dimension_numbers<[1], [0], [0], [1], [0, 0, 1, 1], [], []>} : vector<8x256xbf16>, vector<256x128xbf16>, vector<8x128xf32> -> vector<8x128xf32>
    %c0_45 = arith.constant 0 : index
    %c0_46 = arith.constant 0 : index
    %105 = vector.load %arg19[%c0_45, %c0_46] : memref<1x128xf32, #tpu.memory_space<vmem>>, vector<1x128xf32>
    %106 = vector.shape_cast %105 : vector<1x128xf32> to vector<128xf32>
    %107 = vector.shape_cast %106 : vector<128xf32> to vector<1x128xf32>
    %108 = vector.broadcast %107 : vector<1x128xf32> to vector<8x128xf32>
    %109 = arith.addf %104, %108 : vector<8x128xf32>
    %110 = arith.addf %63, %109 : vector<8x128xf32>
    %c0_47 = arith.constant 0 : index
    %c0_48 = arith.constant 0 : index
    %c0_49 = arith.constant 0 : index
    %111 = vector.load %arg20[%c0_47, %c0_48, %c0_49] : memref<1x8x128xf32, #tpu.memory_space<vmem>>, vector<1x8x128xf32>
    %112 = vector.shape_cast %111 : vector<1x8x128xf32> to vector<8x128xf32>
    %113 = vector.shape_cast %110 : vector<8x128xf32> to vector<1x8x128xf32>
    tpu.vector_store %arg20[%c0_47, %c0_48, %c0_49], %113 {strides = array<i32>} : memref<1x8x128xf32, #tpu.memory_space<vmem>>, vector<1x8x128xf32>,
    return
  }
  func.func @transform_0(%arg0: i32, %arg1: i32) -> (i32, i32, i32) {
    %c0_i32 = arith.constant 0 : i32
    %c0_i32_0 = arith.constant 0 : i32
    %c0_i32_1 = arith.constant 0 : i32
    return %arg0, %c0_i32, %c0_i32_0 : i32, i32, i32
  }
  func.func @transform_1(%arg0: i32, %arg1: i32) -> (i32, i32, i32) {
    %c0_i32 = arith.constant 0 : i32
    %c0_i32_0 = arith.constant 0 : i32
    return %arg0, %arg1, %c0_i32 : i32, i32, i32
  }
  func.func @transform_2(%arg0: i32, %arg1: i32) -> (i32, i32) {
    %c0_i32 = arith.constant 0 : i32
    %c0_i32_0 = arith.constant 0 : i32
    %c0_i32_1 = arith.constant 0 : i32
    return %c0_i32, %c0_i32_0 : i32, i32
  }
  func.func @transform_3(%arg0: i32, %arg1: i32) -> (i32, i32) {
    %c0_i32 = arith.constant 0 : i32
    %c0_i32_0 = arith.constant 0 : i32
    %c0_i32_1 = arith.constant 0 : i32
    return %c0_i32, %c0_i32_0 : i32, i32
  }
  func.func @transform_4(%arg0: i32, %arg1: i32) -> (i32, i32) {
    %c0_i32 = arith.constant 0 : i32
    %c0_i32_0 = arith.constant 0 : i32
    %c0_i32_1 = arith.constant 0 : i32
    return %c0_i32, %c0_i32_0 : i32, i32
  }
  func.func @transform_5(%arg0: i32, %arg1: i32) -> (i32, i32) {
    %c0_i32 = arith.constant 0 : i32
    %c0_i32_0 = arith.constant 0 : i32
    %c0_i32_1 = arith.constant 0 : i32
    return %c0_i32, %c0_i32_0 : i32, i32
  }
  func.func @transform_6(%arg0: i32, %arg1: i32) -> (i32, i32) {
    %c0_i32 = arith.constant 0 : i32
    %c0_i32_0 = arith.constant 0 : i32
    %c0_i32_1 = arith.constant 0 : i32
    return %c0_i32, %c0_i32_0 : i32, i32
  }
  func.func @transform_7(%arg0: i32, %arg1: i32) -> (i32, i32) {
    %c0_i32 = arith.constant 0 : i32
    %c0_i32_0 = arith.constant 0 : i32
    %c0_i32_1 = arith.constant 0 : i32
    return %c0_i32, %c0_i32_0 : i32, i32
  }
  func.func @transform_8(%arg0: i32, %arg1: i32) -> (i32, i32) {
    %c0_i32 = arith.constant 0 : i32
    %c0_i32_0 = arith.constant 0 : i32
    %c0_i32_1 = arith.constant 0 : i32
    return %c0_i32, %c0_i32_0 : i32, i32
  }
  func.func @transform_9(%arg0: i32, %arg1: i32) -> (i32, i32) {
    %c0_i32 = arith.constant 0 : i32
    %c0_i32_0 = arith.constant 0 : i32
    %c0_i32_1 = arith.constant 0 : i32
    return %c0_i32, %c0_i32_0 : i32, i32
  }
  func.func @transform_10(%arg0: i32, %arg1: i32) -> (i32, i32) {
    %c0_i32 = arith.constant 0 : i32
    %c0_i32_0 = arith.constant 0 : i32
    %c0_i32_1 = arith.constant 0 : i32
    return %c0_i32, %c0_i32_0 : i32, i32
  }
  func.func @transform_11(%arg0: i32, %arg1: i32) -> (i32, i32) {
    %c0_i32 = arith.constant 0 : i32
    %c0_i32_0 = arith.constant 0 : i32
    %c0_i32_1 = arith.constant 0 : i32
    return %c0_i32, %c0_i32_0 : i32, i32
  }
  func.func @transform_12(%arg0: i32, %arg1: i32) -> (i32, i32) {
    %c0_i32 = arith.constant 0 : i32
    %c0_i32_0 = arith.constant 0 : i32
    %c0_i32_1 = arith.constant 0 : i32
    return %c0_i32, %c0_i32_0 : i32, i32
  }
  func.func @transform_13(%arg0: i32, %arg1: i32) -> (i32, i32) {
    %c0_i32 = arith.constant 0 : i32
    %c0_i32_0 = arith.constant 0 : i32
    %c0_i32_1 = arith.constant 0 : i32
    return %c0_i32, %c0_i32_0 : i32, i32
  }
  func.func @transform_14(%arg0: i32, %arg1: i32) -> (i32, i32) {
    %c0_i32 = arith.constant 0 : i32
    %c0_i32_0 = arith.constant 0 : i32
    %c0_i32_1 = arith.constant 0 : i32
    return %c0_i32, %c0_i32_0 : i32, i32
  }
  func.func @transform_15(%arg0: i32, %arg1: i32) -> (i32, i32) {
    %c0_i32 = arith.constant 0 : i32
    %c0_i32_0 = arith.constant 0 : i32
    %c0_i32_1 = arith.constant 0 : i32
    return %c0_i32, %c0_i32_0 : i32, i32
  }
  func.func @transform_16(%arg0: i32, %arg1: i32) -> (i32, i32) {
    %c0_i32 = arith.constant 0 : i32
    %c0_i32_0 = arith.constant 0 : i32
    %c0_i32_1 = arith.constant 0 : i32
    return %c0_i32, %c0_i32_0 : i32, i32
  }
  func.func @transform_17(%arg0: i32, %arg1: i32) -> (i32, i32) {
    %c0_i32 = arith.constant 0 : i32
    %c0_i32_0 = arith.constant 0 : i32
    %c0_i32_1 = arith.constant 0 : i32
    return %c0_i32, %c0_i32_0 : i32, i32
  }
  func.func @transform_18(%arg0: i32, %arg1: i32) -> (i32, i32, i32) {
    %c0_i32 = arith.constant 0 : i32
    %c0_i32_0 = arith.constant 0 : i32
    return %arg0, %arg1, %c0_i32 : i32, i32, i32
  }
}

module attributes {stable_mosaic.version = 11 : i64} {
  func.func @encoder_layer_kernel(%arg0: i32, %arg1: i32, %arg2: memref<1x16x128xbf16, #tpu.memory_space<vmem>>, %arg3: memref<1x8x128xf32, #tpu.memory_space<vmem>>, %arg4: memref<1x128xf32, #tpu.memory_space<vmem>>, %arg5: memref<1x128xf32, #tpu.memory_space<vmem>>, %arg6: memref<128x256xbf16, #tpu.memory_space<vmem>>, %arg7: memref<1x256xf32, #tpu.memory_space<vmem>>, %arg8: memref<128x256xbf16, #tpu.memory_space<vmem>>, %arg9: memref<1x256xf32, #tpu.memory_space<vmem>>, %arg10: memref<128x256xbf16, #tpu.memory_space<vmem>>, %arg11: memref<1x256xf32, #tpu.memory_space<vmem>>, %arg12: memref<256x128xbf16, #tpu.memory_space<vmem>>, %arg13: memref<1x128xf32, #tpu.memory_space<vmem>>, %arg14: memref<1x128xf32, #tpu.memory_space<vmem>>, %arg15: memref<1x128xf32, #tpu.memory_space<vmem>>, %arg16: memref<128x256xbf16, #tpu.memory_space<vmem>>, %arg17: memref<1x256xf32, #tpu.memory_space<vmem>>, %arg18: memref<256x128xbf16, #tpu.memory_space<vmem>>, %arg19: memref<1x128xf32, #tpu.memory_space<vmem>>, %arg20: memref<1x8x128xf32, #tpu.memory_space<vmem>>, %arg21: memref<16x2x128xbf16, #tpu.memory_space<vmem>>, %arg22: memref<16x2x128xbf16, #tpu.memory_space<vmem>>) attributes {dimension_semantics = [#tpu.dimension_semantics<parallel>, #tpu.dimension_semantics<arbitrary>], iteration_bounds = array<i64: 2, 2>, scalar_prefetch = 0 : i64, scratch_operands = 2 : i64, tpu.core_type = #tpu.core_type<tc>, window_params = [{transform_indices = @transform_0, window_bounds = array<i64: 1, 16, 128>}, {transform_indices = @transform_1, window_bounds = array<i64: 1, 8, 128>}, {pipeline_mode = #tpu.pipeline_mode<synchronous>, transform_indices = @transform_2, window_bounds = array<i64: 1, 128>}, {pipeline_mode = #tpu.pipeline_mode<synchronous>, transform_indices = @transform_3, window_bounds = array<i64: 1, 128>}, {pipeline_mode = #tpu.pipeline_mode<synchronous>, transform_indices = @transform_4, window_bounds = array<i64: 128, 256>}, {pipeline_mode = #tpu.pipeline_mode<synchronous>, transform_indices = @transform_5, window_bounds = array<i64: 1, 256>}, {pipeline_mode = #tpu.pipeline_mode<synchronous>, transform_indices = @transform_6, window_bounds = array<i64: 128, 256>}, {pipeline_mode = #tpu.pipeline_mode<synchronous>, transform_indices = @transform_7, window_bounds = array<i64: 1, 256>}, {pipeline_mode = #tpu.pipeline_mode<synchronous>, transform_indices = @transform_8, window_bounds = array<i64: 128, 256>}, {pipeline_mode = #tpu.pipeline_mode<synchronous>, transform_indices = @transform_9, window_bounds = array<i64: 1, 256>}, {pipeline_mode = #tpu.pipeline_mode<synchronous>, transform_indices = @transform_10, window_bounds = array<i64: 256, 128>}, {pipeline_mode = #tpu.pipeline_mode<synchronous>, transform_indices = @transform_11, window_bounds = array<i64: 1, 128>}, {pipeline_mode = #tpu.pipeline_mode<synchronous>, transform_indices = @transform_12, window_bounds = array<i64: 1, 128>}, {pipeline_mode = #tpu.pipeline_mode<synchronous>, transform_indices = @transform_13, window_bounds = array<i64: 1, 128>}, {pipeline_mode = #tpu.pipeline_mode<synchronous>, transform_indices = @transform_14, window_bounds = array<i64: 128, 256>}, {pipeline_mode = #tpu.pipeline_mode<synchronous>, transform_indices = @transform_15, window_bounds = array<i64: 1, 256>}, {pipeline_mode = #tpu.pipeline_mode<synchronous>, transform_indices = @transform_16, window_bounds = array<i64: 256, 128>}, {pipeline_mode = #tpu.pipeline_mode<synchronous>, transform_indices = @transform_17, window_bounds = array<i64: 1, 128>}, {transform_indices = @transform_18, window_bounds = array<i64: 1, 8, 128>}]} {
    %c0 = arith.constant 0 : index
    %c0_0 = arith.constant 0 : index
    %0 = vector.load %arg4[%c0, %c0_0] : memref<1x128xf32, #tpu.memory_space<vmem>>, vector<1x128xf32>
    %1 = vector.shape_cast %0 : vector<1x128xf32> to vector<128xf32>
    %c0_1 = arith.constant 0 : index
    %c0_2 = arith.constant 0 : index
    %2 = vector.load %arg5[%c0_1, %c0_2] : memref<1x128xf32, #tpu.memory_space<vmem>>, vector<1x128xf32>
    %3 = vector.shape_cast %2 : vector<1x128xf32> to vector<128xf32>
    %c0_i32 = arith.constant 0 : i32
    %4 = arith.cmpi eq, %arg1, %c0_i32 : i32
    %5 = arith.extui %4 : i1 to i32
    %c0_i32_3 = arith.constant 0 : i32
    %6 = arith.cmpi ne, %5, %c0_i32_3 : i32
    scf.if %6 {
      %c0_50 = arith.constant 0 : index
      %c0_51 = arith.constant 0 : index
      %c0_52 = arith.constant 0 : index
      %114 = vector.load %arg2[%c0_50, %c0_51, %c0_52] : memref<1x16x128xbf16, #tpu.memory_space<vmem>>, vector<1x16x128xbf16>
      %115 = vector.shape_cast %114 : vector<1x16x128xbf16> to vector<16x128xbf16>
      %116 = arith.extf %115 : vector<16x128xbf16> to vector<16x128xf32>
      %cst_53 = arith.constant dense<0.000000e+00> : vector<16xf32>
      %117 = vector.multi_reduction <add>, %116, %cst_53 [1] : vector<16x128xf32> to vector<16xf32>
      %118 = vector.shape_cast %117 : vector<16xf32> to vector<16x1xf32>
      %cst_54 = arith.constant 1.280000e+02 : f32
      %119 = vector.broadcast %cst_54 : f32 to vector<16x1xf32>
      %120 = arith.divf %118, %119 : vector<16x1xf32>
      %121 = vector.broadcast %120 : vector<16x1xf32> to vector<16x128xf32>
      %122 = arith.subf %116, %121 : vector<16x128xf32>
      %123 = arith.mulf %122, %122 : vector<16x128xf32>
      %cst_55 = arith.constant dense<0.000000e+00> : vector<16xf32>
      %124 = vector.multi_reduction <add>, %123, %cst_55 [1] : vector<16x128xf32> to vector<16xf32>
      %125 = vector.shape_cast %124 : vector<16xf32> to vector<16x1xf32>
      %cst_56 = arith.constant 1.280000e+02 : f32
      %126 = vector.broadcast %cst_56 : f32 to vector<16x1xf32>
      %127 = arith.divf %125, %126 : vector<16x1xf32>
      %128 = vector.broadcast %120 : vector<16x1xf32> to vector<16x128xf32>
      %129 = arith.subf %116, %128 : vector<16x128xf32>
      %cst_57 = arith.constant 9.99999974E-6 : f32
      %130 = vector.broadcast %cst_57 : f32 to vector<16x1xf32>
      %131 = arith.addf %127, %130 : vector<16x1xf32>
      %132 = math.rsqrt %131 : vector<16x1xf32>
      %133 = vector.broadcast %132 : vector<16x1xf32> to vector<16x128xf32>
      %134 = arith.mulf %129, %133 : vector<16x128xf32>
      %135 = vector.shape_cast %1 : vector<128xf32> to vector<1x128xf32>
      %136 = vector.broadcast %135 : vector<1x128xf32> to vector<16x128xf32>
      %137 = arith.mulf %134, %136 : vector<16x128xf32>
      %138 = vector.shape_cast %3 : vector<128xf32> to vector<1x128xf32>
      %139 = vector.broadcast %138 : vector<1x128xf32> to vector<16x128xf32>
      %140 = arith.addf %137, %139 : vector<16x128xf32>
      %141 = arith.truncf %140 : vector<16x128xf32> to vector<16x128xbf16>
      %c0_58 = arith.constant 0 : index
      %c0_59 = arith.constant 0 : index
      %142 = vector.load %arg8[%c0_58, %c0_59] : memref<128x256xbf16, #tpu.memory_space<vmem>>, vector<128x256xbf16>
      %cst_60 = arith.constant dense<0.000000e+00> : vector<16x256xf32>
      %143 = tpu.matmul %141, %142, %cst_60 {dimension_numbers = #tpu.dot_dimension_numbers<[1], [0], [0], [1], [0, 0, 1, 1], [], []>} : vector<16x128xbf16>, vector<128x256xbf16>, vector<16x256xf32> -> vector<16x256xf32>
      %c0_61 = arith.constant 0 : index
      %c0_62 = arith.constant 0 : index
      %144 = vector.load %arg9[%c0_61, %c0_62] : memref<1x256xf32, #tpu.memory_space<vmem>>, vector<1x256xf32>
      %145 = vector.shape_cast %144 : vector<1x256xf32> to vector<256xf32>
      %146 = vector.shape_cast %145 : vector<256xf32> to vector<1x256xf32>
      %147 = vector.broadcast %146 : vector<1x256xf32> to vector<16x256xf32>
      %148 = arith.addf %143, %147 : vector<16x256xf32>
      %c0_63 = arith.constant 0 : index
      %c0_64 = arith.constant 0 : index
      %149 = vector.load %arg10[%c0_63, %c0_64] : memref<128x256xbf16, #tpu.memory_space<vmem>>, vector<128x256xbf16>
      %cst_65 = arith.constant dense<0.000000e+00> : vector<16x256xf32>
      %150 = tpu.matmul %141, %149, %cst_65 {dimension_numbers = #tpu.dot_dimension_numbers<[1], [0], [0], [1], [0, 0, 1, 1], [], []>} : vector<16x128xbf16>, vector<128x256xbf16>, vector<16x256xf32> -> vector<16x256xf32>
      %c0_66 = arith.constant 0 : index
      %c0_67 = arith.constant 0 : index
      %151 = vector.load %arg11[%c0_66, %c0_67] : memref<1x256xf32, #tpu.memory_space<vmem>>, vector<1x256xf32>
      %152 = vector.shape_cast %151 : vector<1x256xf32> to vector<256xf32>
      %153 = vector.shape_cast %152 : vector<256xf32> to vector<1x256xf32>
      %154 = vector.broadcast %153 : vector<1x256xf32> to vector<16x256xf32>
      %155 = arith.addf %150, %154 : vector<16x256xf32>
      %156 = arith.truncf %148 : vector<16x256xf32> to vector<16x256xbf16>
      %157 = vector.shape_cast %156 : vector<16x256xbf16> to vector<16x2x128xbf16>
      %c0_68 = arith.constant 0 : index
      %c0_69 = arith.constant 0 : index
      %c0_70 = arith.constant 0 : index
      %158 = vector.load %arg21[%c0_68, %c0_69, %c0_70] : memref<16x2x128xbf16, #tpu.memory_space<vmem>>, vector<16x2x128xbf16>
      tpu.vector_store %arg21[%c0_68, %c0_69, %c0_70], %157 {strides = array<i32>} : memref<16x2x128xbf16, #tpu.memory_space<vmem>>, vector<16x2x128xbf16>,
      %159 = arith.truncf %155 : vector<16x256xf32> to vector<16x256xbf16>
      %160 = vector.shape_cast %159 : vector<16x256xbf16> to vector<16x2x128xbf16>
      %c0_71 = arith.constant 0 : index
      %c0_72 = arith.constant 0 : index
      %c0_73 = arith.constant 0 : index
      %161 = vector.load %arg22[%c0_71, %c0_72, %c0_73] : memref<16x2x128xbf16, #tpu.memory_space<vmem>>, vector<16x2x128xbf16>
      tpu.vector_store %arg22[%c0_71, %c0_72, %c0_73], %160 {strides = array<i32>} : memref<16x2x128xbf16, #tpu.memory_space<vmem>>, vector<16x2x128xbf16>,
    } else {
    }
    %c0_4 = arith.constant 0 : index
    %c0_5 = arith.constant 0 : index
    %c0_6 = arith.constant 0 : index
    %7 = vector.load %arg3[%c0_4, %c0_5, %c0_6] : memref<1x8x128xf32, #tpu.memory_space<vmem>>, vector<1x8x128xf32>
    %8 = vector.shape_cast %7 : vector<1x8x128xf32> to vector<8x128xf32>
    %cst = arith.constant dense<0.000000e+00> : vector<8xf32>
    %9 = vector.multi_reduction <add>, %8, %cst [1] : vector<8x128xf32> to vector<8xf32>
    %10 = vector.shape_cast %9 : vector<8xf32> to vector<8x1xf32>
    %cst_7 = arith.constant 1.280000e+02 : f32
    %11 = vector.broadcast %cst_7 : f32 to vector<8x1xf32>
    %12 = arith.divf %10, %11 : vector<8x1xf32>
    %13 = vector.broadcast %12 : vector<8x1xf32> to vector<8x128xf32>
    %14 = arith.subf %8, %13 : vector<8x128xf32>
    %15 = arith.mulf %14, %14 : vector<8x128xf32>
    %cst_8 = arith.constant dense<0.000000e+00> : vector<8xf32>
    %16 = vector.multi_reduction <add>, %15, %cst_8 [1] : vector<8x128xf32> to vector<8xf32>
    %17 = vector.shape_cast %16 : vector<8xf32> to vector<8x1xf32>
    %cst_9 = arith.constant 1.280000e+02 : f32
    %18 = vector.broadcast %cst_9 : f32 to vector<8x1xf32>
    %19 = arith.divf %17, %18 : vector<8x1xf32>
    %20 = vector.broadcast %12 : vector<8x1xf32> to vector<8x128xf32>
    %21 = arith.subf %8, %20 : vector<8x128xf32>
    %cst_10 = arith.constant 9.99999974E-6 : f32
    %22 = vector.broadcast %cst_10 : f32 to vector<8x1xf32>
    %23 = arith.addf %19, %22 : vector<8x1xf32>
    %24 = math.rsqrt %23 : vector<8x1xf32>
    %25 = vector.broadcast %24 : vector<8x1xf32> to vector<8x128xf32>
    %26 = arith.mulf %21, %25 : vector<8x128xf32>
    %27 = vector.shape_cast %1 : vector<128xf32> to vector<1x128xf32>
    %28 = vector.broadcast %27 : vector<1x128xf32> to vector<8x128xf32>
    %29 = arith.mulf %26, %28 : vector<8x128xf32>
    %30 = vector.shape_cast %3 : vector<128xf32> to vector<1x128xf32>
    %31 = vector.broadcast %30 : vector<1x128xf32> to vector<8x128xf32>
    %32 = arith.addf %29, %31 : vector<8x128xf32>
    %33 = arith.truncf %32 : vector<8x128xf32> to vector<8x128xbf16>
    %c0_11 = arith.constant 0 : index
    %c0_12 = arith.constant 0 : index
    %34 = vector.load %arg6[%c0_11, %c0_12] : memref<128x256xbf16, #tpu.memory_space<vmem>>, vector<128x256xbf16>
    %cst_13 = arith.constant dense<0.000000e+00> : vector<8x256xf32>
    %35 = tpu.matmul %33, %34, %cst_13 {dimension_numbers = #tpu.dot_dimension_numbers<[1], [0], [0], [1], [0, 0, 1, 1], [], []>} : vector<8x128xbf16>, vector<128x256xbf16>, vector<8x256xf32> -> vector<8x256xf32>
    %c0_14 = arith.constant 0 : index
    %c0_15 = arith.constant 0 : index
    %36 = vector.load %arg7[%c0_14, %c0_15] : memref<1x256xf32, #tpu.memory_space<vmem>>, vector<1x256xf32>
    %37 = vector.shape_cast %36 : vector<1x256xf32> to vector<256xf32>
    %38 = vector.shape_cast %37 : vector<256xf32> to vector<1x256xf32>
    %39 = vector.broadcast %38 : vector<1x256xf32> to vector<8x256xf32>
    %40 = arith.addf %35, %39 : vector<8x256xf32>
    %cst_16 = arith.constant 0.0883883461 : f32
    %41 = vector.broadcast %cst_16 : f32 to vector<8x256xf32>
    %42 = arith.mulf %40, %41 : vector<8x256xf32>
    %43 = arith.truncf %42 : vector<8x256xf32> to vector<8x256xbf16>
    %44 = vector.shape_cast %43 : vector<8x256xbf16> to vector<8x2x128xbf16>
    %cst_17 = arith.constant 0xFF800000 : f32
    %45 = vector.broadcast %cst_17 : f32 to vector<2x8x1xf32>
    %cst_18 = arith.constant 0.000000e+00 : f32
    %46 = vector.broadcast %cst_18 : f32 to vector<2x8x1xf32>
    %cst_19 = arith.constant 0.000000e+00 : f32
    %47 = vector.broadcast %cst_19 : f32 to vector<2x8x128xf32>
    %c0_i32_20 = arith.constant 0 : i32
    %c2_i32 = arith.constant 2 : i32
    %48 = arith.addi %c0_i32_20, %c2_i32 : i32
    %c1_i32 = arith.constant 1 : i32
    %49:3 = scf.for %arg23 = %c0_i32_20 to %48 step %c1_i32 iter_args(%arg24 = %45, %arg25 = %46, %arg26 = %47) -> (vector<2x8x1xf32>, vector<2x8x1xf32>, vector<2x8x128xf32>)  : i32 {
      %c8_i32 = arith.constant 8 : i32
      %114 = arith.muli %arg23, %c8_i32 : i32
      %115 = tpu.assume_multiple %114, 8 : i32
      %116 = arith.index_cast %115 : i32 to index
      %c0_50 = arith.constant 0 : index
      %c0_51 = arith.constant 0 : index
      %117 = vector.load %arg21[%116, %c0_50, %c0_51] : memref<16x2x128xbf16, #tpu.memory_space<vmem>>, vector<8x2x128xbf16>
      %118 = arith.index_cast %115 : i32 to index
      %c0_52 = arith.constant 0 : index
      %c0_53 = arith.constant 0 : index
      %119 = vector.load %arg22[%118, %c0_52, %c0_53] : memref<16x2x128xbf16, #tpu.memory_space<vmem>>, vector<8x2x128xbf16>
      "tpu.trace_start"() <{level = 10 : i32, message = "qhd,khd->hqk"}> : () -> ()
      %cst_54 = arith.constant dense<0.000000e+00> : vector<2x8x8xf32>
      %120 = tpu.matmul %44, %117, %cst_54 {dimension_numbers = #tpu.dot_dimension_numbers<[2], [2], [0], [0], [0, 1, 0, 0, 1, 0], [1], [1]>} : vector<8x2x128xbf16>, vector<8x2x128xbf16>, vector<2x8x8xf32> -> vector<2x8x8xf32>
      "tpu.trace_stop"() : () -> ()
      %cst_55 = arith.constant dense<0xFF800000> : vector<2x8xf32>
      %121 = vector.multi_reduction <maximumf>, %120, %cst_55 [2] : vector<2x8x8xf32> to vector<2x8xf32>
      %122 = vector.shape_cast %121 : vector<2x8xf32> to vector<2x8x1xf32>
      %123 = arith.maximumf %arg24, %122 : vector<2x8x1xf32>
      %124 = arith.subf %arg24, %123 : vector<2x8x1xf32>
      %125 = math.exp %124 : vector<2x8x1xf32>
      %126 = vector.broadcast %123 : vector<2x8x1xf32> to vector<2x8x8xf32>
      %127 = arith.subf %120, %126 : vector<2x8x8xf32>
      %128 = math.exp %127 : vector<2x8x8xf32>
      %129 = arith.mulf %125, %arg25 : vector<2x8x1xf32>
      %cst_56 = arith.constant dense<0.000000e+00> : vector<2x8xf32>
      %130 = vector.multi_reduction <add>, %128, %cst_56 [2] : vector<2x8x8xf32> to vector<2x8xf32>
      %131 = vector.shape_cast %130 : vector<2x8xf32> to vector<2x8x1xf32>
      %132 = arith.addf %129, %131 : vector<2x8x1xf32>
      %133 = vector.broadcast %125 : vector<2x8x1xf32> to vector<2x8x128xf32>
      %134 = arith.mulf %133, %arg26 : vector<2x8x128xf32>
      %135 = arith.truncf %128 : vector<2x8x8xf32> to vector<2x8x8xbf16>
      "tpu.trace_start"() <{level = 10 : i32, message = "hqk,khd->hqd"}> : () -> ()
      %cst_57 = arith.constant dense<0.000000e+00> : vector<2x8x128xf32>
      %136 = tpu.matmul %135, %119, %cst_57 {dimension_numbers = #tpu.dot_dimension_numbers<[2], [0], [1], [2], [0, 0, 0, 1, 1, 2], [0], [1]>} : vector<2x8x8xbf16>, vector<8x2x128xbf16>, vector<2x8x128xf32> -> vector<2x8x128xf32>
      "tpu.trace_stop"() : () -> ()
      %137 = arith.addf %134, %136 : vector<2x8x128xf32>
      scf.yield %123, %132, %137 : vector<2x8x1xf32>, vector<2x8x1xf32>, vector<2x8x128xf32>
    }
    %c2_i32_21 = arith.constant 2 : i32
    %50 = tpu.reciprocal %49#1 {approx = true} : vector<2x8x1xf32> -> vector<2x8x1xf32>
    %51 = vector.broadcast %50 : vector<2x8x1xf32> to vector<2x8x128xf32>
    %52 = arith.mulf %49#2, %51 : vector<2x8x128xf32>
    %53 = tpu.transpose %52, [1, 0, 2] : vector<2x8x128xf32> -> vector<8x2x128xf32>
    %54 = vector.shape_cast %53 : vector<8x2x128xf32> to vector<8x256xf32>
    %55 = arith.truncf %54 : vector<8x256xf32> to vector<8x256xbf16>
    %c0_22 = arith.constant 0 : index
    %c0_23 = arith.constant 0 : index
    %56 = vector.load %arg12[%c0_22, %c0_23] : memref<256x128xbf16, #tpu.memory_space<vmem>>, vector<256x128xbf16>
    %cst_24 = arith.constant dense<0.000000e+00> : vector<8x128xf32>
    %57 = tpu.matmul %55, %56, %cst_24 {dimension_numbers = #tpu.dot_dimension_numbers<[1], [0], [0], [1], [0, 0, 1, 1], [], []>} : vector<8x256xbf16>, vector<256x128xbf16>, vector<8x128xf32> -> vector<8x128xf32>
    %c0_25 = arith.constant 0 : index
    %c0_26 = arith.constant 0 : index
    %58 = vector.load %arg13[%c0_25, %c0_26] : memref<1x128xf32, #tpu.memory_space<vmem>>, vector<1x128xf32>
    %59 = vector.shape_cast %58 : vector<1x128xf32> to vector<128xf32>
    %60 = vector.shape_cast %59 : vector<128xf32> to vector<1x128xf32>
    %61 = vector.broadcast %60 : vector<1x128xf32> to vector<8x128xf32>
    %62 = arith.addf %57, %61 : vector<8x128xf32>
    %63 = arith.addf %8, %62 : vector<8x128xf32>
    %c0_27 = arith.constant 0 : index
    %c0_28 = arith.constant 0 : index
    %64 = vector.load %arg14[%c0_27, %c0_28] : memref<1x128xf32, #tpu.memory_space<vmem>>, vector<1x128xf32>
    %65 = vector.shape_cast %64 : vector<1x128xf32> to vector<128xf32>
    %c0_29 = arith.constant 0 : index
    %c0_30 = arith.constant 0 : index
    %66 = vector.load %arg15[%c0_29, %c0_30] : memref<1x128xf32, #tpu.memory_space<vmem>>, vector<1x128xf32>
    %67 = vector.shape_cast %66 : vector<1x128xf32> to vector<128xf32>
    %cst_31 = arith.constant dense<0.000000e+00> : vector<8xf32>
    %68 = vector.multi_reduction <add>, %63, %cst_31 [1] : vector<8x128xf32> to vector<8xf32>
    %69 = vector.shape_cast %68 : vector<8xf32> to vector<8x1xf32>
    %cst_32 = arith.constant 1.280000e+02 : f32
    %70 = vector.broadcast %cst_32 : f32 to vector<8x1xf32>
    %71 = arith.divf %69, %70 : vector<8x1xf32>
    %72 = vector.broadcast %71 : vector<8x1xf32> to vector<8x128xf32>
    %73 = arith.subf %63, %72 : vector<8x128xf32>
    %74 = arith.mulf %73, %73 : vector<8x128xf32>
    %cst_33 = arith.constant dense<0.000000e+00> : vector<8xf32>
    %75 = vector.multi_reduction <add>, %74, %cst_33 [1] : vector<8x128xf32> to vector<8xf32>
    %76 = vector.shape_cast %75 : vector<8xf32> to vector<8x1xf32>
    %cst_34 = arith.constant 1.280000e+02 : f32
    %77 = vector.broadcast %cst_34 : f32 to vector<8x1xf32>
    %78 = arith.divf %76, %77 : vector<8x1xf32>
    %79 = vector.broadcast %71 : vector<8x1xf32> to vector<8x128xf32>
    %80 = arith.subf %63, %79 : vector<8x128xf32>
    %cst_35 = arith.constant 9.99999974E-6 : f32
    %81 = vector.broadcast %cst_35 : f32 to vector<8x1xf32>
    %82 = arith.addf %78, %81 : vector<8x1xf32>
    %83 = math.rsqrt %82 : vector<8x1xf32>
    %84 = vector.broadcast %83 : vector<8x1xf32> to vector<8x128xf32>
    %85 = arith.mulf %80, %84 : vector<8x128xf32>
    %86 = vector.shape_cast %65 : vector<128xf32> to vector<1x128xf32>
    %87 = vector.broadcast %86 : vector<1x128xf32> to vector<8x128xf32>
    %88 = arith.mulf %85, %87 : vector<8x128xf32>
    %89 = vector.shape_cast %67 : vector<128xf32> to vector<1x128xf32>
    %90 = vector.broadcast %89 : vector<1x128xf32> to vector<8x128xf32>
    %91 = arith.addf %88, %90 : vector<8x128xf32>
    %92 = arith.truncf %91 : vector<8x128xf32> to vector<8x128xbf16>
    %c0_36 = arith.constant 0 : index
    %c0_37 = arith.constant 0 : index
    %93 = vector.load %arg16[%c0_36, %c0_37] : memref<128x256xbf16, #tpu.memory_space<vmem>>, vector<128x256xbf16>
    %cst_38 = arith.constant dense<0.000000e+00> : vector<8x256xf32>
    %94 = tpu.matmul %92, %93, %cst_38 {dimension_numbers = #tpu.dot_dimension_numbers<[1], [0], [0], [1], [0, 0, 1, 1], [], []>} : vector<8x128xbf16>, vector<128x256xbf16>, vector<8x256xf32> -> vector<8x256xf32>
    %c0_39 = arith.constant 0 : index
    %c0_40 = arith.constant 0 : index
    %95 = vector.load %arg17[%c0_39, %c0_40] : memref<1x256xf32, #tpu.memory_space<vmem>>, vector<1x256xf32>
    %96 = vector.shape_cast %95 : vector<1x256xf32> to vector<256xf32>
    %97 = vector.shape_cast %96 : vector<256xf32> to vector<1x256xf32>
    %98 = vector.broadcast %97 : vector<1x256xf32> to vector<8x256xf32>
    %99 = arith.addf %94, %98 : vector<8x256xf32>
    %cst_41 = arith.constant 0.000000e+00 : f32
    %100 = vector.broadcast %cst_41 : f32 to vector<8x256xf32>
    %101 = arith.maximumf %99, %100 : vector<8x256xf32>
    %102 = arith.truncf %101 : vector<8x256xf32> to vector<8x256xbf16>
    %c0_42 = arith.constant 0 : index
    %c0_43 = arith.constant 0 : index
    %103 = vector.load %arg18[%c0_42, %c0_43] : memref<256x128xbf16, #tpu.memory_space<vmem>>, vector<256x128xbf16>
    %cst_44 = arith.constant dense<0.000000e+00> : vector<8x128xf32>
    %104 = tpu.matmul %102, %103, %cst_44 {dimension_numbers = #tpu.dot_dimension_numbers<[1], [0], [0], [1], [0, 0, 1, 1], [], []>} : vector<8x256xbf16>, vector<256x128xbf16>, vector<8x128xf32> -> vector<8x128xf32>
    %c0_45 = arith.constant 0 : index
    %c0_46 = arith.constant 0 : index
    %105 = vector.load %arg19[%c0_45, %c0_46] : memref<1x128xf32, #tpu.memory_space<vmem>>, vector<1x128xf32>
    %106 = vector.shape_cast %105 : vector<1x128xf32> to vector<128xf32>
    %107 = vector.shape_cast %106 : vector<128xf32> to vector<1x128xf32>
    %108 = vector.broadcast %107 : vector<1x128xf32> to vector<8x128xf32>
    %109 = arith.addf %104, %108 : vector<8x128xf32>
    %110 = arith.addf %63, %109 : vector<8x128xf32>
    %c0_47 = arith.constant 0 : index
    %c0_48 = arith.constant 0 : index
    %c0_49 = arith.constant 0 : index
    %111 = vector.load %arg20[%c0_47, %c0_48, %c0_49] : memref<1x8x128xf32, #tpu.memory_space<vmem>>, vector<1x8x128xf32>
    %112 = vector.shape_cast %111 : vector<1x8x128xf32> to vector<8x128xf32>
    %113 = vector.shape_cast %110 : vector<8x128xf32> to vector<1x8x128xf32>
    tpu.vector_store %arg20[%c0_47, %c0_48, %c0_49], %113 {strides = array<i32>} : memref<1x8x128xf32, #tpu.memory_space<vmem>>, vector<1x8x128xf32>,
    return
  }
  func.func @transform_0(%arg0: i32, %arg1: i32) -> (i32, i32, i32) {
    %c0_i32 = arith.constant 0 : i32
    %c0_i32_0 = arith.constant 0 : i32
    %c0_i32_1 = arith.constant 0 : i32
    return %arg0, %c0_i32, %c0_i32_0 : i32, i32, i32
  }
  func.func @transform_1(%arg0: i32, %arg1: i32) -> (i32, i32, i32) {
    %c0_i32 = arith.constant 0 : i32
    %c0_i32_0 = arith.constant 0 : i32
    return %arg0, %arg1, %c0_i32 : i32, i32, i32
  }
  func.func @transform_2(%arg0: i32, %arg1: i32) -> (i32, i32) {
    %c0_i32 = arith.constant 0 : i32
    %c0_i32_0 = arith.constant 0 : i32
    %c0_i32_1 = arith.constant 0 : i32
    return %c0_i32, %c0_i32_0 : i32, i32
  }
  func.func @transform_3(%arg0: i32, %arg1: i32) -> (i32, i32) {
    %c0_i32 = arith.constant 0 : i32
    %c0_i32_0 = arith.constant 0 : i32
    %c0_i32_1 = arith.constant 0 : i32
    return %c0_i32, %c0_i32_0 : i32, i32
  }
  func.func @transform_4(%arg0: i32, %arg1: i32) -> (i32, i32) {
    %c0_i32 = arith.constant 0 : i32
    %c0_i32_0 = arith.constant 0 : i32
    %c0_i32_1 = arith.constant 0 : i32
    return %c0_i32, %c0_i32_0 : i32, i32
  }
  func.func @transform_5(%arg0: i32, %arg1: i32) -> (i32, i32) {
    %c0_i32 = arith.constant 0 : i32
    %c0_i32_0 = arith.constant 0 : i32
    %c0_i32_1 = arith.constant 0 : i32
    return %c0_i32, %c0_i32_0 : i32, i32
  }
  func.func @transform_6(%arg0: i32, %arg1: i32) -> (i32, i32) {
    %c0_i32 = arith.constant 0 : i32
    %c0_i32_0 = arith.constant 0 : i32
    %c0_i32_1 = arith.constant 0 : i32
    return %c0_i32, %c0_i32_0 : i32, i32
  }
  func.func @transform_7(%arg0: i32, %arg1: i32) -> (i32, i32) {
    %c0_i32 = arith.constant 0 : i32
    %c0_i32_0 = arith.constant 0 : i32
    %c0_i32_1 = arith.constant 0 : i32
    return %c0_i32, %c0_i32_0 : i32, i32
  }
  func.func @transform_8(%arg0: i32, %arg1: i32) -> (i32, i32) {
    %c0_i32 = arith.constant 0 : i32
    %c0_i32_0 = arith.constant 0 : i32
    %c0_i32_1 = arith.constant 0 : i32
    return %c0_i32, %c0_i32_0 : i32, i32
  }
  func.func @transform_9(%arg0: i32, %arg1: i32) -> (i32, i32) {
    %c0_i32 = arith.constant 0 : i32
    %c0_i32_0 = arith.constant 0 : i32
    %c0_i32_1 = arith.constant 0 : i32
    return %c0_i32, %c0_i32_0 : i32, i32
  }
  func.func @transform_10(%arg0: i32, %arg1: i32) -> (i32, i32) {
    %c0_i32 = arith.constant 0 : i32
    %c0_i32_0 = arith.constant 0 : i32
    %c0_i32_1 = arith.constant 0 : i32
    return %c0_i32, %c0_i32_0 : i32, i32
  }
  func.func @transform_11(%arg0: i32, %arg1: i32) -> (i32, i32) {
    %c0_i32 = arith.constant 0 : i32
    %c0_i32_0 = arith.constant 0 : i32
    %c0_i32_1 = arith.constant 0 : i32
    return %c0_i32, %c0_i32_0 : i32, i32
  }
  func.func @transform_12(%arg0: i32, %arg1: i32) -> (i32, i32) {
    %c0_i32 = arith.constant 0 : i32
    %c0_i32_0 = arith.constant 0 : i32
    %c0_i32_1 = arith.constant 0 : i32
    return %c0_i32, %c0_i32_0 : i32, i32
  }
  func.func @transform_13(%arg0: i32, %arg1: i32) -> (i32, i32) {
    %c0_i32 = arith.constant 0 : i32
    %c0_i32_0 = arith.constant 0 : i32
    %c0_i32_1 = arith.constant 0 : i32
    return %c0_i32, %c0_i32_0 : i32, i32
  }
  func.func @transform_14(%arg0: i32, %arg1: i32) -> (i32, i32) {
    %c0_i32 = arith.constant 0 : i32
    %c0_i32_0 = arith.constant 0 : i32
    %c0_i32_1 = arith.constant 0 : i32
    return %c0_i32, %c0_i32_0 : i32, i32
  }
  func.func @transform_15(%arg0: i32, %arg1: i32) -> (i32, i32) {
    %c0_i32 = arith.constant 0 : i32
    %c0_i32_0 = arith.constant 0 : i32
    %c0_i32_1 = arith.constant 0 : i32
    return %c0_i32, %c0_i32_0 : i32, i32
  }
  func.func @transform_16(%arg0: i32, %arg1: i32) -> (i32, i32) {
    %c0_i32 = arith.constant 0 : i32
    %c0_i32_0 = arith.constant 0 : i32
    %c0_i32_1 = arith.constant 0 : i32
    return %c0_i32, %c0_i32_0 : i32, i32
  }
  func.func @transform_17(%arg0: i32, %arg1: i32) -> (i32, i32) {
    %c0_i32 = arith.constant 0 : i32
    %c0_i32_0 = arith.constant 0 : i32
    %c0_i32_1 = arith.constant 0 : i32
    return %c0_i32, %c0_i32_0 : i32, i32
  }
  func.func @transform_18(%arg0: i32, %arg1: i32) -> (i32, i32, i32) {
    %c0_i32 = arith.constant 0 : i32
    %c0_i32_0 = arith.constant 0 : i32
    return %arg0, %arg1, %c0_i32 : i32, i32, i32
  }
}

</mosaic_0001>

<bundles_post_ra>
// kernel: tpu_custom_call.1
= control target key start
LH: loop header
LB: loop body
LE: loop exit
PB: predicated region body
PF: predicated region fallthrough
CT: control target
= control target key end

     0   :  { %s10313_s0 = inlined_call_operand.hbm [shape: bf16[2,16,128], index: 0, kind: input, shape index: {}]   ;;  %s10314_s1 = inlined_call_operand.hbm [shape: f32[2,16,128], index: 1, kind: input, shape index: {}]   ;;  %s10315_s2 = inlined_call_operand.hbm [shape: f32[1,128], index: 2, kind: input, shape index: {}]   ;;  %s10316_s3 = inlined_call_operand.hbm [shape: f32[1,128], index: 3, kind: input, shape index: {}]   ;;  %s10317_s4 = inlined_call_operand.hbm [shape: bf16[128,256], index: 4, kind: input, shape index: {}]   ;;  %s10318_s5 = inlined_call_operand.hbm [shape: f32[1,256], index: 5, kind: input, shape index: {}]   ;;  %s10319_s6 = inlined_call_operand.hbm [shape: bf16[128,256], index: 6, kind: input, shape index: {}]   ;;  %s10320_s7 = inlined_call_operand.hbm [shape: f32[1,256], index: 7, kind: input, shape index: {}]   ;;  %s10321_s8 = inlined_call_operand.hbm [shape: bf16[128,256], index: 8, kind: input, shape index: {}]   ;;  %s10322_s9 = inlined_call_operand.hbm [shape: f32[1,256], index: 9, kind: input, shape index: {}]   ;;  %s10323_s10 = inlined_call_operand.hbm [shape: bf16[256,128], index: 10, kind: input, shape index: {}]   ;;  %s10324_s11 = inlined_call_operand.hbm [shape: f32[1,128], index: 11, kind: input, shape index: {}]   ;;  %s10325_s12 = inlined_call_operand.hbm [shape: f32[1,128], index: 12, kind: input, shape index: {}]   ;;  %s10326_s13 = inlined_call_operand.hbm [shape: f32[1,128], index: 13, kind: input, shape index: {}]   ;;  %s10327_s14 = inlined_call_operand.hbm [shape: bf16[128,256], index: 14, kind: input, shape index: {}]   ;;  %s10328_s15 = inlined_call_operand.hbm [shape: f32[1,256], index: 15, kind: input, shape index: {}]   ;;  %s10329_s16 = inlined_call_operand.hbm [shape: bf16[256,128], index: 16, kind: input, shape index: {}]   ;;  %s10330_s17 = inlined_call_operand.hbm [shape: f32[1,128], index: 17, kind: input, shape index: {}]   ;;  %s10331_s18 = inlined_call_operand.hbm [shape: f32[2,16,128], index: 18, kind: output, shape index: {}]  }
   0x1   :  { %10373 = sst [smem:[#allocation75_spill]] %s10313_s0 }
   0x2   :  { %10374 = sst [smem:[#allocation76_spill]] %s10314_s1 }
   0x3   :  { %10375 = sst [smem:[#allocation77_spill]] %s10315_s2 }
   0x4   :  { %10376 = sst [smem:[#allocation78_spill]] %s10316_s3 }
   0x5   :  { %10377 = sst [smem:[#allocation79_spill]] %s10317_s4 }
   0x6   :  { %10378 = sst [smem:[#allocation80_spill]] %s10318_s5 }
   0x7   :  { %10379 = sst [smem:[#allocation81_spill]] %s10319_s6 }
   0x8   :  { %10380 = sst [smem:[#allocation82_spill]] %s10320_s7 }
   0x9   :  { %10381 = sst [smem:[#allocation83_spill]] %s10321_s8 }
   0xa   :  { %10382 = sst [smem:[#allocation84_spill]] %s10322_s9 }
   0xb   :  { %10383 = sst [smem:[#allocation85_spill]] %s10323_s10 }
   0xc   :  { %10384 = sst [smem:[#allocation86_spill]] %s10324_s11 }
   0xd   :  { %10385 = sst [smem:[#allocation87_spill]] %s10325_s12 }
   0xe   :  { %10386 = sst [smem:[#allocation88_spill]] %s10326_s13 }
   0xf   :  { %10387 = sst [smem:[#allocation89_spill]] %s10327_s14 }
  0x10   :  { %10388 = sst [smem:[#allocation90_spill]] %s10328_s15 }
  0x11   :  { %10389 = sst [smem:[#allocation91_spill]] %s10329_s16 }
  0x12   :  { %10390 = sst [smem:[#allocation92_spill]] %s10330_s17 }
  0x13   :  { %10391 = sst [smem:[#allocation93_spill]] %s10331_s18 }
  0x14   :  { %23 = vsyncpa [#allocation5], 0 }
  0x15   :  { %25 = vsyncpa [#allocation5 + $0x1], 0 }
  0x16   :  { %26 = vsyncpa [#allocation8], 0 }
  0x17   :  { %28 = vsyncpa [#allocation8 + $0x1], 0 }
  0x18   :  { %29 = vsyncpa [#allocation11], 0 }
  0x19   :  { %30 = vsyncpa [#allocation14], 0 }
  0x1a   :  { %31 = vsyncpa [#allocation17], 0 }
  0x1b   :  { %32 = vsyncpa [#allocation20], 0 }
  0x1c   :  { %33 = vsyncpa [#allocation23], 0 }
  0x1d   :  { %34 = vsyncpa [#allocation26], 0 }
  0x1e   :  { %35 = vsyncpa [#allocation29], 0 }
  0x1f   :  { %36 = vsyncpa [#allocation32], 0 }
  0x20   :  { %37 = vsyncpa [#allocation6], 0 }
  0x21   :  { %39 = vsyncpa [#allocation6 + $0x1], 0  ;;  %s8687_s27 = smov 0   ;;  %s8689_s28 = smov 0  }
  0x22   :  { %s8691_s29 = smov 0   ;;  %s8693_s30 = smov 0  }
  0x23   :  { %s8695_s0 = smov 0   ;;  %s8697_s19 = smov 0  }
  0x24   :  { %s8699_s1 = smov 0   ;;  %s8701_s20 = smov 0  }
  0x25   :  { %s8703_s21 = smov 0   ;;  %s8705_s22 = smov 0  }
  0x26   :  { %s8707_s2 = smov 0  }
  0x27 LB: > { %10392 = sst [smem:[#allocation46_spill]] %s8490_s27  ;;  %s8743_s23 = sadd.s32 4294967295, %s8530_s2   ;;  %s8530_s2 = sphi %s8707_s2, %s10539_s2   ;;  %s8526_s22 = sphi %s8705_s22, %s10538_s22   ;;  %s8522_s21 = sphi %s8703_s21, %s10537_s21   ;;  %s8518_s20 = sphi %s8701_s20, %s10529_s20   ;;  %s8514_s1 = sphi %s8699_s1, %s10536_s1   ;;  %s8510_s19 = sphi %s8697_s19, %s10535_s19   ;;  %s8506_s0 = sphi %s8695_s0, %s10534_s0   ;;  %s8502_s30 = sphi %s8693_s30, %s10527_s30   ;;  %s8498_s29 = sphi %s8691_s29, %s10533_s29   ;;  %s8494_s28 = sphi %s8689_s28, %s10532_s28   ;;  %s8490_s27 = sphi %s8687_s27, %s10525_s27  }
  0x28   : > { %10393 = sst [smem:[#allocation47_spill]] %s8494_s28  ;;  %p7065_p0 = scmp.ge.s32.totalorder %s8530_s2, 1 }
  0x29   : > { %10394 = sst [smem:[#allocation48_spill]] %s8498_s29  ;;  %p10345_p1 = scmp.eq.s32.totalorder %s8743_s23, 0 }
  0x2a   : > { %10395 = sst [smem:[#allocation49_spill]] %s8502_s30  ;;  %p480_p2 = scmp.lt.s32.totalorder %s8530_s2, 5 }
  0x2b   : > { %10396 = sst [smem:[#allocation50_spill]] %s8506_s0  ;;  %s8560_s25 = smov [#allocation9]  }
  0x2c   : > { %10397 = sst [smem:[#allocation51_spill]] %s8514_s1  ;;  %p8748_p3 = pnand %p7065_p0, %p480_p2 }
  0x2d   : > { %10398 = sst [smem:[#allocation52_spill]] %s8518_s20  ;;  %s493_s26 = sshll.u32 %s8560_s25, 4  ;;  %s494_s26 = int_to_ptr.vmem [resolvable:$true] %s493_s26 }
  0x2e   : > { %10399 = sst [smem:[#allocation53_spill]] %s8522_s21  ;;  %p7417_p4 = pneg %p8748_p3 }
  0x2f   : > { %10400 = sst [smem:[#allocation54_spill]] %s8526_s22  ;;  %s8561_s18 = smov [#allocation10]  }
  0x30   : > { %10401 = sst [smem:[#allocation55_spill]] %s8530_s2  ;;  %s504_s20 = sshll.u32 %s8561_s18, 4  ;;  %s8760_s20 = int_to_ptr.vmem [resolvable:$true] %s504_s20 }
  0x31   : > { %10402 = sst [smem:[#allocation56_spill]] %s8743_s23  ;;  %p8756_p5 = pnand %p7417_p4, %p10345_p1 }
  0x32   : > { %s10403_s24 = scalar_select %p8748_p3, 1, 0 }
  0x33   : > { %s8562_s27 = smov [#allocation13]   ;;  %s10406_s25 = sld [smem:[#allocation77_spill]] }
  0x34   : > { %10404 = sst [smem:[#allocation57_spill]] %s10403_s24  ;;  %s528_s28 = sshll.u32 %s8562_s27, 4  ;;  %s8762_s28 = int_to_ptr.vmem [resolvable:$true] %s528_s28 }
  0x35   : > { %p8772_p7 = pneg %p8756_p5 }
  0x39   : > { %s7832_s22 = scalar_lea.hbm %s10406_s25, 16 }
  0x3a   : > { %p7833_p6 = scmp.ne.s32.totalorder %s10406_s25, %s7832_s22  ;;  %p7839_p10 = scmp.lt.u32.totalorder %s7832_s22, %s10406_s25 }
  0x3c   : > { %p7835_p8 = pnand %p8772_p7, %p7833_p6 }
  0x3e   : > { %p7836_p9 = pneg %p7835_p8 }
  0x40   : > { %p7841_p11 = pnand %p7839_p10, %p7836_p9 }
  0x42   : > { %7844 = shalt.err (!%p7841_p11)
}
  0x43   : > { %s7845_s29 = scalar_lea.vmem %s494_s26, 16  ;;  %s7852_s30 = scalar_lea.vmem %s494_s26, 32 }
  0x44   : > { %p7846_p12 = scmp.ne.s32.totalorder %s494_s26, %s7845_s29  ;;  %p7853_p2 = scmp.lt.s32.totalorder %s494_s26, %s494_s26 }
  0x45   : > { %p7854_p4 = scmp.lt.s32.totalorder %s7852_s30, %s7845_s29 }
  0x46   : > { %p7848_p13 = pnand %p7846_p12, %p8772_p7 }
  0x47   : > { %p7855_p1 = por %p7854_p4, %p7853_p2 }
  0x48   : > { %p7849_p0 = pneg %p7848_p13 }
  0x4a   : > { %p7856_p3 = pnand %p7855_p1, %p7849_p0 }
  0x4c   : > { %7859 = shalt.err (!%p7856_p3)
}
  0x4d   : > { %7420 = dma.hbm_to_vmem [thread:$0]  (!%p8756_p5), %s10406_s25, 16, %s494_s26, [#allocation8]  }
  0x4e   : > { %s10408_s3 = sld [smem:[#allocation78_spill]] }
  0x54   : > { %s7860_s27 = scalar_lea.hbm %s10408_s3, 16 }
  0x55   : > { %p7861_p6 = scmp.ne.s32.totalorder %s10408_s3, %s7860_s27  ;;  %p7867_p1 = scmp.lt.u32.totalorder %s7860_s27, %s10408_s3 }
  0x57   : > { %p7863_p8 = pnand %p7861_p6, %p8772_p7 }
  0x59   : > { %p7864_p9 = pneg %p7863_p8 }
  0x5b   : > { %p7869_p3 = pnand %p7867_p1, %p7864_p9 }
  0x5d   : > { %7872 = shalt.err (!%p7869_p3)
}
  0x5e   : > { %s7873_s26 = scalar_lea.vmem %s8760_s20, 16  ;;  %s7880_s0 = scalar_lea.vmem %s8760_s20, 32 }
  0x5f   : > { %p7874_p10 = scmp.ne.s32.totalorder %s8760_s20, %s7873_s26  ;;  %p7881_p13 = scmp.lt.s32.totalorder %s8760_s20, %s8760_s20 }
  0x60   : > { %p7882_p0 = scmp.lt.s32.totalorder %s7880_s0, %s7873_s26 }
  0x61   : > { %p7876_p11 = pnand %p7874_p10, %p8772_p7 }
  0x62   : > { %p7883_p2 = por %p7882_p0, %p7881_p13 }
  0x63   : > { %p7877_p12 = pneg %p7876_p11 }
  0x65   : > { %p7884_p4 = pnand %p7883_p2, %p7877_p12 }
  0x67   : > { %7887 = shalt.err (!%p7884_p4)
}
  0x68   : > { %7423 = dma.hbm_to_vmem [thread:$0]  (!%p8756_p5), %s10408_s3, 16, %s8760_s20, [#allocation11]  }
  0x69   : > { %s10409_s5 = sld [smem:[#allocation80_spill]] }
  0x6f   : > { %s7888_s23 = scalar_lea.hbm %s10409_s5, 32 }
  0x70   : > { %p7889_p6 = scmp.ne.s32.totalorder %s10409_s5, %s7888_s23  ;;  %p7895_p1 = scmp.lt.u32.totalorder %s7888_s23, %s10409_s5 }
  0x72   : > { %p7891_p8 = pnand %p7889_p6, %p8772_p7 }
  0x74   : > { %p7892_p9 = pneg %p7891_p8 }
  0x76   : > { %p7897_p3 = pnand %p7895_p1, %p7892_p9 }
  0x78   : > { %7900 = shalt.err (!%p7897_p3)
}
  0x79   : > { %s7901_s20 = scalar_lea.vmem %s8762_s28, 32  ;;  %p7909_p13 = scmp.lt.s32.totalorder %s8762_s28, %s8762_s28 }
  0x7a   : > { %p7902_p10 = scmp.ne.s32.totalorder %s8762_s28, %s7901_s20  ;;  %p7910_p0 = scmp.lt.s32.totalorder %s7901_s20, %s7901_s20 }
  0x7c   : > { %p7904_p11 = pnand %p7902_p10, %p8772_p7  ;;  %p7911_p2 = por %p7910_p0, %p7909_p13 }
  0x7e   : > { %p7905_p12 = pneg %p7904_p11 }
  0x80   : > { %p7912_p4 = pnand %p7911_p2, %p7905_p12 }
  0x82   : > { %7915 = shalt.err (!%p7912_p4)
}
  0x83   : > { %7429 = dma.hbm_to_vmem [thread:$0]  (!%p8756_p5), %s10409_s5, 32, %s8762_s28, [#allocation14]  }
  0x84   : > { %s8563_s21 = smov [#allocation16]   ;;  %s8564_s22 = smov [#allocation19]  }
  0x85   : > { %s552_s24 = sshll.u32 %s8563_s21, 4  ;;  %s576_s23 = sshll.u32 %s8564_s22, 4  ;;  %s553_s24 = int_to_ptr.vmem [resolvable:$true] %s552_s24  ;;  %s577_s23 = int_to_ptr.vmem [resolvable:$true] %s576_s23 }
  0x86   : > { %s10410_s7 = sld [smem:[#allocation82_spill]] }
  0x8c   : > { %s7916_s30 = scalar_lea.hbm %s10410_s7, 32 }
  0x8d   : > { %p7917_p6 = scmp.ne.s32.totalorder %s10410_s7, %s7916_s30  ;;  %p7923_p1 = scmp.lt.u32.totalorder %s7916_s30, %s10410_s7 }
  0x8f   : > { %p7919_p8 = pnand %p7917_p6, %p8772_p7 }
  0x91   : > { %p7920_p9 = pneg %p7919_p8 }
  0x93   : > { %p7925_p3 = pnand %p7923_p1, %p7920_p9 }
  0x95   : > { %7928 = shalt.err (!%p7925_p3)
}
  0x96   : > { %s7929_s28 = scalar_lea.vmem %s553_s24, 32  ;;  %p7937_p13 = scmp.lt.s32.totalorder %s553_s24, %s553_s24 }
  0x97   : > { %p7930_p10 = scmp.ne.s32.totalorder %s553_s24, %s7929_s28  ;;  %p7938_p0 = scmp.lt.s32.totalorder %s7929_s28, %s7929_s28 }
  0x99   : > { %p7932_p11 = pnand %p7930_p10, %p8772_p7  ;;  %p7939_p2 = por %p7938_p0, %p7937_p13 }
  0x9b   : > { %p7933_p12 = pneg %p7932_p11 }
  0x9d   : > { %p7940_p4 = pnand %p7939_p2, %p7933_p12 }
  0x9f   : > { %7943 = shalt.err (!%p7940_p4)
}
  0xa0   : > { %7435 = dma.hbm_to_vmem [thread:$0]  (!%p8756_p5), %s10410_s7, 32, %s553_s24, [#allocation17]  }
  0xa1   : > { %s10411_s9 = sld [smem:[#allocation84_spill]] }
  0xa7   : > { %s7944_s27 = scalar_lea.hbm %s10411_s9, 32 }
  0xa8   : > { %p7945_p6 = scmp.ne.s32.totalorder %s10411_s9, %s7944_s27  ;;  %p7951_p1 = scmp.lt.u32.totalorder %s7944_s27, %s10411_s9 }
  0xaa   : > { %p7947_p8 = pnand %p7945_p6, %p8772_p7 }
  0xac   : > { %p7948_p9 = pneg %p7947_p8 }
  0xae   : > { %p7953_p3 = pnand %p7951_p1, %p7948_p9 }
  0xb0   : > { %7956 = shalt.err (!%p7953_p3)
}
  0xb1   : > { %s7957_s0 = scalar_lea.vmem %s577_s23, 32  ;;  %p7965_p13 = scmp.lt.s32.totalorder %s577_s23, %s577_s23 }
  0xb2   : > { %p7958_p10 = scmp.ne.s32.totalorder %s577_s23, %s7957_s0  ;;  %p7966_p0 = scmp.lt.s32.totalorder %s7957_s0, %s7957_s0 }
  0xb4   : > { %p7960_p11 = pnand %p7958_p10, %p8772_p7  ;;  %p7967_p2 = por %p7966_p0, %p7965_p13 }
  0xb6   : > { %p7961_p12 = pneg %p7960_p11 }
  0xb8   : > { %p7968_p4 = pnand %p7967_p2, %p7961_p12 }
  0xba   : > { %7971 = shalt.err (!%p7968_p4)
}
  0xbb   : > { %7441 = dma.hbm_to_vmem [thread:$0]  (!%p8756_p5), %s10411_s9, 32, %s577_s23, [#allocation20]  }
  0xbc   : > { %s8565_s2 = smov [#allocation22]   ;;  %s8566_s3 = smov [#allocation25]  }
  0xbd   : > { %s600_s21 = sshll.u32 %s8565_s2, 4  ;;  %s622_s22 = sshll.u32 %s8566_s3, 4  ;;  %s601_s21 = int_to_ptr.vmem [resolvable:$true] %s600_s21  ;;  %s623_s22 = int_to_ptr.vmem [resolvable:$true] %s622_s22 }
  0xbe   : > { %s10412_s11 = sld [smem:[#allocation86_spill]] }
  0xc4   : > { %s7972_s30 = scalar_lea.hbm %s10412_s11, 16 }
  0xc5   : > { %p7973_p6 = scmp.ne.s32.totalorder %s10412_s11, %s7972_s30  ;;  %p7979_p1 = scmp.lt.u32.totalorder %s7972_s30, %s10412_s11 }
  0xc7   : > { %p7975_p8 = pnand %p7973_p6, %p8772_p7 }
  0xc9   : > { %p7976_p9 = pneg %p7975_p8 }
  0xcb   : > { %p7981_p3 = pnand %p7979_p1, %p7976_p9 }
  0xcd   : > { %7984 = shalt.err (!%p7981_p3)
}
  0xce   : > { %s7985_s23 = scalar_lea.vmem %s601_s21, 16  ;;  %s7992_s28 = scalar_lea.vmem %s601_s21, 32 }
  0xcf   : > { %p7986_p10 = scmp.ne.s32.totalorder %s601_s21, %s7985_s23  ;;  %p7993_p13 = scmp.lt.s32.totalorder %s601_s21, %s601_s21 }
  0xd0   : > { %p7994_p0 = scmp.lt.s32.totalorder %s7992_s28, %s7985_s23 }
  0xd1   : > { %p7988_p11 = pnand %p7986_p10, %p8772_p7 }
  0xd2   : > { %p7995_p2 = por %p7994_p0, %p7993_p13 }
  0xd3   : > { %p7989_p12 = pneg %p7988_p11 }
  0xd5   : > { %p7996_p4 = pnand %p7995_p2, %p7989_p12 }
  0xd7   : > { %7999 = shalt.err (!%p7996_p4)
}
  0xd8   : > { %7447 = dma.hbm_to_vmem [thread:$0]  (!%p8756_p5), %s10412_s11, 16, %s601_s21, [#allocation23]  }
  0xd9   : > { %s10413_s13 = sld [smem:[#allocation88_spill]] }
  0xdf   : > { %s8000_s30 = scalar_lea.hbm %s10413_s13, 16 }
  0xe0   : > { %p8001_p6 = scmp.ne.s32.totalorder %s10413_s13, %s8000_s30  ;;  %p8007_p1 = scmp.lt.u32.totalorder %s8000_s30, %s10413_s13 }
  0xe2   : > { %p8003_p8 = pnand %p8001_p6, %p8772_p7 }
  0xe4   : > { %p8004_p9 = pneg %p8003_p8 }
  0xe6   : > { %p8009_p3 = pnand %p8007_p1, %p8004_p9 }
  0xe8   : > { %8012 = shalt.err (!%p8009_p3)
}
  0xe9   : > { %s8013_s23 = scalar_lea.vmem %s623_s22, 16  ;;  %s8020_s21 = scalar_lea.vmem %s623_s22, 32 }
  0xea   : > { %p8014_p10 = scmp.ne.s32.totalorder %s623_s22, %s8013_s23  ;;  %p8021_p13 = scmp.lt.s32.totalorder %s623_s22, %s623_s22 }
  0xeb   : > { %p8022_p0 = scmp.lt.s32.totalorder %s8020_s21, %s8013_s23 }
  0xec   : > { %p8016_p11 = pnand %p8014_p10, %p8772_p7 }
  0xed   : > { %p8023_p2 = por %p8022_p0, %p8021_p13 }
  0xee   : > { %p8017_p12 = pneg %p8016_p11 }
  0xf0   : > { %p8024_p4 = pnand %p8023_p2, %p8017_p12 }
  0xf2   : > { %8027 = shalt.err (!%p8024_p4)
}
  0xf3   : > { %7453 = dma.hbm_to_vmem [thread:$0]  (!%p8756_p5), %s10413_s13, 16, %s623_s22, [#allocation26]  }
  0xf4   : > { %s8567_s3 = smov [#allocation28]   ;;  %s8568_s29 = smov [#allocation12]  }
  0xf5   : > { %s646_s27 = sshll.u32 %s8567_s3, 4  ;;  %s514_s30 = sshll.u32 %s8568_s29, 4  ;;  %s647_s27 = int_to_ptr.vmem [resolvable:$true] %s646_s27  ;;  %s515_s30 = int_to_ptr.vmem [resolvable:$true] %s514_s30 }
  0xf6   : > { %s10414_s15 = sld [smem:[#allocation90_spill]] }
  0xfc   : > { %s8028_s0 = scalar_lea.hbm %s10414_s15, 32 }
  0xfd   : > { %p8029_p6 = scmp.ne.s32.totalorder %s10414_s15, %s8028_s0  ;;  %p8035_p1 = scmp.lt.u32.totalorder %s8028_s0, %s10414_s15 }
  0xff   : > { %p8031_p8 = pnand %p8029_p6, %p8772_p7 }
 0x101   : > { %p8032_p9 = pneg %p8031_p8 }
 0x103   : > { %p8037_p3 = pnand %p8035_p1, %p8032_p9 }
 0x105   : > { %8040 = shalt.err (!%p8037_p3)
}
 0x106   : > { %s8041_s22 = scalar_lea.vmem %s647_s27, 32  ;;  %p8049_p13 = scmp.lt.s32.totalorder %s647_s27, %s647_s27 }
 0x107   : > { %p8042_p10 = scmp.ne.s32.totalorder %s647_s27, %s8041_s22  ;;  %p8050_p0 = scmp.lt.s32.totalorder %s8041_s22, %s8041_s22 }
 0x109   : > { %p8044_p11 = pnand %p8042_p10, %p8772_p7  ;;  %p8051_p2 = por %p8050_p0, %p8049_p13 }
 0x10b   : > { %p8045_p12 = pneg %p8044_p11 }
 0x10d   : > { %p8052_p4 = pnand %p8051_p2, %p8045_p12 }
 0x10f   : > { %8055 = shalt.err (!%p8052_p4)
}
 0x110   : > { %7459 = dma.hbm_to_vmem [thread:$0]  (!%p8756_p5), %s10414_s15, 32, %s647_s27, [#allocation29]  }
 0x111   : > { %s10415_s4 = sld [smem:[#allocation79_spill]] }
 0x117   : > { %s8056_s20 = scalar_lea.hbm %s10415_s4, 2048 }
 0x118   : > { %p8057_p6 = scmp.ne.s32.totalorder %s10415_s4, %s8056_s20  ;;  %p8063_p1 = scmp.lt.u32.totalorder %s8056_s20, %s10415_s4 }
 0x11a   : > { %p8059_p8 = pnand %p8057_p6, %p8772_p7 }
 0x11c   : > { %p8060_p9 = pneg %p8059_p8 }
 0x11e   : > { %p8065_p3 = pnand %p8063_p1, %p8060_p9 }
 0x120   : > { %8068 = shalt.err (!%p8065_p3)
}
 0x121   : > { %s8069_s28 = scalar_lea.vmem %s515_s30, 2048  ;;  %p8077_p13 = scmp.lt.s32.totalorder %s515_s30, %s515_s30 }
 0x122   : > { %p8070_p10 = scmp.ne.s32.totalorder %s515_s30, %s8069_s28  ;;  %p8078_p0 = scmp.lt.s32.totalorder %s8069_s28, %s8069_s28 }
 0x124   : > { %p8072_p11 = pnand %p8070_p10, %p8772_p7  ;;  %p8079_p2 = por %p8078_p0, %p8077_p13 }
 0x126   : > { %p8073_p12 = pneg %p8072_p11 }
 0x128   : > { %p8080_p4 = pnand %p8079_p2, %p8073_p12 }
 0x12a   : > { %8083 = shalt.err (!%p8080_p4)
}
 0x12b   : > { %s8569_s27 = smov 128   ;;  %s8570_s22 = smov 8  }
 0x12c   : > { %7426 = dma.hbm_to_vmem [thread:$0]  (!%p8756_p5), %s10415_s4, 2048, %s515_s30, [#allocation11], %s8569_s27, %s8569_s27, %s8570_s22  }
 0x12d   : > { %s8571_s29 = smov [#allocation15]   ;;  %s8572_s20 = smov [#allocation18]  }
 0x12e   : > { %s538_s26 = sshll.u32 %s8571_s29, 4  ;;  %s562_s0 = sshll.u32 %s8572_s20, 4  ;;  %s539_s26 = int_to_ptr.vmem [resolvable:$true] %s538_s26  ;;  %s563_s0 = int_to_ptr.vmem [resolvable:$true] %s562_s0 }
 0x12f   : > { %s10416_s6 = sld [smem:[#allocation81_spill]] }
 0x135   : > { %s8084_s21 = scalar_lea.hbm %s10416_s6, 2048 }
 0x136   : > { %p8085_p6 = scmp.ne.s32.totalorder %s10416_s6, %s8084_s21  ;;  %p8091_p1 = scmp.lt.u32.totalorder %s8084_s21, %s10416_s6 }
 0x138   : > { %p8087_p8 = pnand %p8085_p6, %p8772_p7 }
 0x13a   : > { %p8088_p9 = pneg %p8087_p8 }
 0x13c   : > { %p8093_p3 = pnand %p8091_p1, %p8088_p9 }
 0x13e   : > { %8096 = shalt.err (!%p8093_p3)
}
 0x13f   : > { %s8097_s30 = scalar_lea.vmem %s539_s26, 2048  ;;  %p8105_p13 = scmp.lt.s32.totalorder %s539_s26, %s539_s26 }
 0x140   : > { %p8098_p10 = scmp.ne.s32.totalorder %s539_s26, %s8097_s30  ;;  %p8106_p0 = scmp.lt.s32.totalorder %s8097_s30, %s8097_s30 }
 0x142   : > { %p8100_p11 = pnand %p8098_p10, %p8772_p7  ;;  %p8107_p2 = por %p8106_p0, %p8105_p13 }
 0x144   : > { %p8101_p12 = pneg %p8100_p11 }
 0x146   : > { %p8108_p4 = pnand %p8107_p2, %p8101_p12 }
 0x148   : > { %8111 = shalt.err (!%p8108_p4)
}
 0x149   : > { %7432 = dma.hbm_to_vmem [thread:$0]  (!%p8756_p5), %s10416_s6, 2048, %s539_s26, [#allocation14], %s8569_s27, %s8569_s27, %s8570_s22  }
 0x14a   : > { %s10417_s8 = sld [smem:[#allocation83_spill]] }
 0x150   : > { %s8112_s3 = scalar_lea.hbm %s10417_s8, 2048 }
 0x151   : > { %p8113_p6 = scmp.ne.s32.totalorder %s10417_s8, %s8112_s3  ;;  %p8119_p1 = scmp.lt.u32.totalorder %s8112_s3, %s10417_s8 }
 0x153   : > { %p8115_p8 = pnand %p8113_p6, %p8772_p7 }
 0x155   : > { %p8116_p9 = pneg %p8115_p8 }
 0x157   : > { %p8121_p3 = pnand %p8119_p1, %p8116_p9 }
 0x159   : > { %8124 = shalt.err (!%p8121_p3)
}
 0x15a   : > { %s8125_s21 = scalar_lea.vmem %s563_s0, 2048  ;;  %p8133_p13 = scmp.lt.s32.totalorder %s563_s0, %s563_s0 }
 0x15b   : > { %p8126_p10 = scmp.ne.s32.totalorder %s563_s0, %s8125_s21  ;;  %p8134_p0 = scmp.lt.s32.totalorder %s8125_s21, %s8125_s21 }
 0x15d   : > { %p8128_p11 = pnand %p8126_p10, %p8772_p7  ;;  %p8135_p2 = por %p8134_p0, %p8133_p13 }
 0x15f   : > { %p8129_p12 = pneg %p8128_p11 }
 0x161   : > { %p8136_p4 = pnand %p8135_p2, %p8129_p12 }
 0x163   : > { %8139 = shalt.err (!%p8136_p4)
}
 0x164   : > { %7438 = dma.hbm_to_vmem [thread:$0]  (!%p8756_p5), %s10417_s8, 2048, %s563_s0, [#allocation17], %s8569_s27, %s8569_s27, %s8570_s22  }
 0x165   : > { %s8573_s30 = smov [#allocation21]   ;;  %s10418_s10 = sld [smem:[#allocation85_spill]] }
 0x166   : > { %s586_s5 = sshll.u32 %s8573_s30, 4  ;;  %s587_s5 = int_to_ptr.vmem [resolvable:$true] %s586_s5 }
 0x16b   : > { %s8140_s2 = scalar_lea.hbm %s10418_s10, 2048 }
 0x16c   : > { %p8141_p6 = scmp.ne.s32.totalorder %s10418_s10, %s8140_s2  ;;  %p8147_p1 = scmp.lt.u32.totalorder %s8140_s2, %s10418_s10 }
 0x16e   : > { %p8143_p8 = pnand %p8141_p6, %p8772_p7 }
 0x170   : > { %p8144_p9 = pneg %p8143_p8 }
 0x172   : > { %p8149_p3 = pnand %p8147_p1, %p8144_p9 }
 0x174   : > { %8152 = shalt.err (!%p8149_p3)
}
 0x175   : > { %s8153_s0 = scalar_lea.vmem %s587_s5, 2048  ;;  %p8161_p13 = scmp.lt.s32.totalorder %s587_s5, %s587_s5 }
 0x176   : > { %p8154_p10 = scmp.ne.s32.totalorder %s587_s5, %s8153_s0  ;;  %p8162_p0 = scmp.lt.s32.totalorder %s8153_s0, %s8153_s0 }
 0x178   : > { %p8156_p11 = pnand %p8154_p10, %p8772_p7  ;;  %p8163_p2 = por %p8162_p0, %p8161_p13 }
 0x17a   : > { %p8157_p12 = pneg %p8156_p11 }
 0x17c   : > { %p8164_p4 = pnand %p8163_p2, %p8157_p12 }
 0x17e   : > { %8167 = shalt.err (!%p8164_p4)
}
 0x17f   : > { %s10351_s23 = smov 64   ;;  %s8575_s21 = smov 4  }
 0x180   : > { %7444 = dma.hbm_to_vmem [thread:$0]  (!%p8756_p5), %s10418_s10, 2048, %s587_s5, [#allocation20], %s10351_s23, %s10351_s23, %s8575_s21  }
 0x181   : > { %s8576_s30 = smov [#allocation24]   ;;  %s8577_s9 = smov [#allocation27]  }
 0x182   : > { %s611_s7 = sshll.u32 %s8576_s30, 4  ;;  %s632_s2 = sshll.u32 %s8577_s9, 4  ;;  %s612_s7 = int_to_ptr.vmem [resolvable:$true] %s611_s7  ;;  %s9009_s2 = int_to_ptr.vmem [resolvable:$true] %s632_s2 }
 0x183   : > { %s10419_s12 = sld [smem:[#allocation87_spill]] }
 0x189   : > { %s8168_s20 = scalar_lea.hbm %s10419_s12, 16 }
 0x18a   : > { %p8169_p6 = scmp.ne.s32.totalorder %s10419_s12, %s8168_s20  ;;  %p8175_p1 = scmp.lt.u32.totalorder %s8168_s20, %s10419_s12 }
 0x18c   : > { %p8171_p8 = pnand %p8169_p6, %p8772_p7 }
 0x18e   : > { %p8172_p9 = pneg %p8171_p8 }
 0x190   : > { %p8177_p3 = pnand %p8175_p1, %p8172_p9 }
 0x192   : > { %8180 = shalt.err (!%p8177_p3)
}
 0x193   : > { %s8181_s28 = scalar_lea.vmem %s612_s7, 16  ;;  %s8188_s30 = scalar_lea.vmem %s612_s7, 32 }
 0x194   : > { %p8182_p10 = scmp.ne.s32.totalorder %s612_s7, %s8181_s28  ;;  %p8189_p13 = scmp.lt.s32.totalorder %s612_s7, %s612_s7 }
 0x195   : > { %p8190_p0 = scmp.lt.s32.totalorder %s8188_s30, %s8181_s28 }
 0x196   : > { %p8184_p11 = pnand %p8182_p10, %p8772_p7 }
 0x197   : > { %p8191_p2 = por %p8190_p0, %p8189_p13 }
 0x198   : > { %p8185_p12 = pneg %p8184_p11 }
 0x19a   : > { %p8192_p4 = pnand %p8191_p2, %p8185_p12 }
 0x19c   : > { %8195 = shalt.err (!%p8192_p4)
}
 0x19d   : > { %7450 = dma.hbm_to_vmem [thread:$0]  (!%p8756_p5), %s10419_s12, 16, %s612_s7, [#allocation23]  }
 0x19e   : > { %s10420_s14 = sld [smem:[#allocation89_spill]] }
 0x1a4   : > { %s8196_s24 = scalar_lea.hbm %s10420_s14, 2048 }
 0x1a5   : > { %p8197_p6 = scmp.ne.s32.totalorder %s10420_s14, %s8196_s24  ;;  %p8203_p1 = scmp.lt.u32.totalorder %s8196_s24, %s10420_s14 }
 0x1a7   : > { %p8199_p8 = pnand %p8197_p6, %p8772_p7 }
 0x1a9   : > { %p8200_p9 = pneg %p8199_p8 }
 0x1ab   : > { %p8205_p3 = pnand %p8203_p1, %p8200_p9 }
 0x1ad   : > { %8208 = shalt.err (!%p8205_p3)
}
 0x1ae   : > { %s8209_s7 = scalar_lea.vmem %s9009_s2, 2048  ;;  %p8217_p13 = scmp.lt.s32.totalorder %s9009_s2, %s9009_s2 }
 0x1af   : > { %p8210_p10 = scmp.ne.s32.totalorder %s9009_s2, %s8209_s7  ;;  %p8218_p0 = scmp.lt.s32.totalorder %s8209_s7, %s8209_s7 }
 0x1b1   : > { %p8212_p11 = pnand %p8210_p10, %p8772_p7  ;;  %p8219_p2 = por %p8218_p0, %p8217_p13 }
 0x1b3   : > { %p8213_p12 = pneg %p8212_p11 }
 0x1b5   : > { %p8220_p4 = pnand %p8219_p2, %p8213_p12 }
 0x1b7   : > { %8223 = shalt.err (!%p8220_p4)
}
 0x1b8   : > { %7456 = dma.hbm_to_vmem [thread:$0]  (!%p8756_p5), %s10420_s14, 2048, %s9009_s2, [#allocation26], %s8569_s27, %s8569_s27, %s8570_s22  }
 0x1b9   : > { %s8578_s3 = smov [#allocation30]   ;;  %s8579_s20 = smov [#allocation31]  }
 0x1ba   : > { %s656_s29 = sshll.u32 %s8578_s3, 4  ;;  %s670_s24 = sshll.u32 %s8579_s20, 4  ;;  %s657_s29 = int_to_ptr.vmem [resolvable:$true] %s656_s29  ;;  %s9055_s24 = int_to_ptr.vmem [resolvable:$true] %s670_s24 }
 0x1bb   : > { %s10421_s16 = sld [smem:[#allocation91_spill]] }
 0x1c1   : > { %s8224_s5 = scalar_lea.hbm %s10421_s16, 2048 }
 0x1c2   : > { %p8225_p6 = scmp.ne.s32.totalorder %s10421_s16, %s8224_s5  ;;  %p8231_p1 = scmp.lt.u32.totalorder %s8224_s5, %s10421_s16 }
 0x1c4   : > { %p8227_p8 = pnand %p8225_p6, %p8772_p7 }
 0x1c6   : > { %p8228_p9 = pneg %p8227_p8 }
 0x1c8   : > { %p8233_p3 = pnand %p8231_p1, %p8228_p9 }
 0x1ca   : > { %8236 = shalt.err (!%p8233_p3)
}
 0x1cb   : > { %s8237_s22 = scalar_lea.vmem %s657_s29, 2048  ;;  %p8245_p13 = scmp.lt.s32.totalorder %s657_s29, %s657_s29 }
 0x1cc   : > { %p8238_p10 = scmp.ne.s32.totalorder %s657_s29, %s8237_s22  ;;  %p8246_p0 = scmp.lt.s32.totalorder %s8237_s22, %s8237_s22 }
 0x1ce   : > { %p8240_p11 = pnand %p8238_p10, %p8772_p7  ;;  %p8247_p2 = por %p8246_p0, %p8245_p13 }
 0x1d0   : > { %p8241_p12 = pneg %p8240_p11 }
 0x1d2   : > { %p8248_p4 = pnand %p8247_p2, %p8241_p12 }
 0x1d4   : > { %8251 = shalt.err (!%p8248_p4)
}
 0x1d5   : > { %7462 = dma.hbm_to_vmem [thread:$0]  (!%p8756_p5), %s10421_s16, 2048, %s657_s29, [#allocation29], %s10351_s23, %s10351_s23, %s8575_s21  }
 0x1d6   : > { %s10422_s17 = sld [smem:[#allocation92_spill]] }
 0x1dc   : > { %s8252_s0 = scalar_lea.hbm %s10422_s17, 16 }
 0x1dd   : > { %p8253_p6 = scmp.ne.s32.totalorder %s10422_s17, %s8252_s0  ;;  %p8259_p1 = scmp.lt.u32.totalorder %s8252_s0, %s10422_s17 }
 0x1df   : > { %p8255_p8 = pnand %p8253_p6, %p8772_p7 }
 0x1e1   : > { %p8256_p9 = pneg %p8255_p8 }
 0x1e3   : > { %p8261_p3 = pnand %p8259_p1, %p8256_p9 }
 0x1e5   : > { %8264 = shalt.err (!%p8261_p3)
}
 0x1e6   : > { %s8265_s29 = scalar_lea.vmem %s9055_s24, 16  ;;  %s8272_s30 = scalar_lea.vmem %s9055_s24, 32 }
 0x1e7   : > { %p8266_p10 = scmp.ne.s32.totalorder %s9055_s24, %s8265_s29  ;;  %p8273_p13 = scmp.lt.s32.totalorder %s9055_s24, %s9055_s24 }
 0x1e8   : > { %p8274_p0 = scmp.lt.s32.totalorder %s8272_s30, %s8265_s29 }
 0x1e9   : > { %p8268_p11 = pnand %p8266_p10, %p8772_p7 }
 0x1ea   : > { %p8275_p2 = por %p8274_p0, %p8273_p13 }
 0x1eb   : > { %p8269_p12 = pneg %p8268_p11 }
 0x1ed   : > { %p8276_p4 = pnand %p8275_p2, %p8269_p12 }
 0x1ef   : > { %8279 = shalt.err (!%p8276_p4)
}
 0x1f0   : > { %s10423_s2 = sld [smem:[#allocation50_spill]]  ;;  %s10424_s9 = sld [smem:[#allocation55_spill]] }
 0x1f1   : > { %s10425_s18 = sld [smem:[#allocation49_spill]]  ;;  %s10426_s3 = sld [smem:[#allocation56_spill]] }
 0x1f2   : > { %s10427_s20 = sld [smem:[#allocation54_spill]]  ;;  %s681_s1 = sand.u32 1, %s8510_s19  }
 0x1f3   : > { %7465 = dma.hbm_to_vmem [thread:$0]  (!%p8756_p5), %s10422_s17, 16, %s9055_s24, [#allocation32]  }
 0x1f4   : > { %s7083_s5 = sshll.u32 %s681_s1, 3  ;;  %s10430_s30 = sld [smem:[#allocation75_spill]] }
 0x1f5   : > { %s685_s24 = scalar_lea.vmem [#allocation4], %s7083_s5 }
 0x1f6   : > { %p71_p7 = scmp.ne.s32.totalorder %s8510_s19, %s10423_s2  ;;  %p10353_p6 = scmp.eq.s32.totalorder %s10424_s9, 0 }
 0x1f7   : > { %p77_p8 = scmp.ne.s32.totalorder %s10423_s2, %s10425_s18  ;;  %p10352_p9 = scmp.lt.s32.totalorder %s10424_s9, 4 }
 0x1f8   : > { %p73_p1 = por %p10353_p6, %p71_p7  ;;  %p10428_p3 = scmp.eq.s32.totalorder %s10426_s3, 0 }
 0x1f9   : > { %s7224_s28 = sshll.u32 %s10427_s20, 7  ;;  %s692_s22 = sshll.u32 %s685_s24, 4  ;;  %s9124_s22 = int_to_ptr.vmem [resolvable:$true] %s692_s22 }
 0x1fa   : > { %p9114_p10 = por %p10428_p3, %p77_p8  ;;  %s10431_s23 = smov %s10430_s30 }
 0x1fb   : > { %s9122_s27 = scalar_lea.hbm %s10430_s30, %s7224_s28  ;;  %p9128_p5 = pnand %p10352_p9, %p73_p1 }
 0x1fc   : > { %s9132_s18 = scalar_lea.sflag [#allocation5], %s681_s1  ;;  %s8280_s7 = scalar_lea.hbm %s9122_s27, 128 }
 0x1fd   : > { %p8281_p11 = scmp.ne.s32.totalorder %s9122_s27, %s8280_s7  ;;  %p8282_p12 = pneg %p9128_p5 }
 0x1fe   : > { %s8285_s29 = scalar_lea.hbm %s10431_s23, 256  ;;  %p8286_p2 = scmp.lt.u32.totalorder %s9122_s27, %s10431_s23 }
 0x1ff   : > { %p8283_p13 = pnand %p8282_p12, %p8281_p11  ;;  %p8287_p4 = scmp.lt.u32.totalorder %s8285_s29, %s8280_s7 }
 0x200   : > { %p8289_p8 = scmp.lt.u32.totalorder %s8280_s7, %s9122_s27 }
 0x201   : > { %p8284_p0 = pneg %p8283_p13  ;;  %p8288_p7 = por %p8287_p4, %p8286_p2 }
 0x203   : > { %p8290_p1 = por %p8289_p8, %p8288_p7 }
 0x205   : > { %p8291_p3 = pnand %p8290_p1, %p8284_p0 }
 0x207   : > { %8294 = shalt.err (!%p8291_p3)
}
 0x208   : > { %s8295_s1 = scalar_lea.vmem %s9124_s22, 128  ;;  %s8580_s5 = smov [#allocation4]  }
 0x209   : > { %p8296_p11 = scmp.ne.s32.totalorder %s9124_s22, %s8295_s1  ;;  %s8300_s28 = sshll.u32 %s8580_s5, 4  ;;  %s8301_s28 = int_to_ptr.vmem [resolvable:$false] %s8300_s28 }
 0x20a   : > { %s8302_s30 = scalar_lea.vmem %s8301_s28, 256  ;;  %p8303_p6 = scmp.lt.s32.totalorder %s9124_s22, %s8301_s28 }
 0x20b   : > { %p8298_p13 = pnand %p8296_p11, %p8282_p12  ;;  %p8304_p2 = scmp.lt.s32.totalorder %s8302_s30, %s8295_s1 }
 0x20d   : > { %p8299_p9 = pneg %p8298_p13  ;;  %p8305_p4 = por %p8304_p2, %p8303_p6 }
 0x20f   : > { %p8306_p7 = pnand %p8305_p4, %p8299_p9 }
 0x211   : > { %8309 = shalt.err (!%p8306_p7)
}
 0x212   : > { %s10433_s7 = smov 64   ;;  %s10434_s29 = sld [smem:[#allocation53_spill]] }
 0x213   : > { %s10435_s24 = sld [smem:[#allocation48_spill]]  ;;  %s10436_s5 = sld [smem:[#allocation47_spill]] }
 0x214   : > { %s10437_s0 = sld [smem:[#allocation46_spill]]  ;;  %s7064_s2 = sadd.s32 4294967294, %s10424_s9  }
 0x215   : > { %7469 = dma.hbm_to_vmem [thread:$0]  (!%p9128_p5), %s9122_s27, 128, %s9124_s22, %s9132_s18, %s10433_s7, %s10433_s7, %s8575_s21  }
 0x216   : > { %s57_s28 = sadd.s32 1, %s10427_s20  ;;  %p10438_p0 = scmp.eq.s32.totalorder %s10424_s9, 0 }
 0x217   : > { %p10440_p1 = scmp.eq.s32.totalorder %s10426_s3, 0  ;;  %p467_p11 = scmp.eq.s32.totalorder %s10426_s3, 3 }
 0x218   : > { %s54_s1 = sadd.s32 1, %s10434_s29  ;;  %p473_p13 = scmp.eq.s32.totalorder %s7064_s2, 3 }
 0x219   : > { %p55_p6 = scmp.ge.s32.totalorder %s54_s1, 2  ;;  %s92_s30 = sadd.s32 1, %s10435_s24 }
 0x21a   : > { %p99_p9 = scmp.ne.s32.totalorder %s10435_s24, %s10436_s5  ;;  %p105_p12 = scmp.ne.s32.totalorder %s10436_s5, %s10437_s0 }
 0x21b   : > { %s10541_s1 = smov (%p55_p6, %s54_s1), 0  ;;  %s10543_s28 = smov (!%p55_p6, %s57_s28), %s10427_s20 }
 0x21c   : > { %s88_s4 = ssub.s32 %s10434_s29, %s10541_s1  ;;  %p9178_p5 = por %p99_p9, %p10438_p0 }
 0x21d   : > { %p59_p8 = scmp.ge.s32.totalorder %s10543_s28, 2  ;;  %p9184_p3 = por %p105_p12, %p10440_p1 }
 0x21e   : > { %p9191_p2 = por %p467_p11, %p99_p9  ;;  %p9195_p4 = por %p473_p13, %p105_p12 }
 0x21f   : > { %s10441_s27 = scalar_select %p9184_p3, 1, 0 }
 0x220   : > { %s10545_s28 = smov (%p59_p8, %s10543_s28), 0  ;;  %s702_s7 = sand.u32 1, %s10424_s9  }
 0x221   : > { %s10442_s0 = scalar_select %p9191_p2, 1, 0 }
 0x222   : > { %s10443_s22 = scalar_select %p9195_p4, 1, 0 }
 0x223   : > { %s61_s18 = ssub.s32 %s10427_s20, %s10545_s28  ;;  %s10444_s3 = sadd.s32 1, %s8510_s19 }
 0x224   : > { %p62_p7 = scmp.eq.s32.totalorder %s61_s18, 0  ;;  %s89_s5 = sor.u32 %s88_s4, %s61_s18 }
 0x225   : > { %p90_p6 = scmp.eq.s32.totalorder %s89_s5, 0  ;;  %s704_s8 = sand.u32 1, %s10435_s24  }
 0x226   : > { %s9205_s2 = scalar_select %p62_p7, %s8510_s19, %s10444_s3  }
 0x227   : > { %s9208_s6 = scalar_select %p90_p6, %s10435_s24, %s92_s30  }
 0x228   : > { %s7087_s10 = sshll.u32 %s10427_s20, 1  ;;  %s7086_s11 = sshll.u32 %s704_s8, 3 }
 0x229   : > { %s711_s12 = sadd.s32 %s10434_s29, %s7087_s10  ;;  %s10445_s16 = sld [smem:[#allocation76_spill]] }
 0x22a   : > { %s7088_s13 = sshll.u32 %s711_s12, 7  ;;  %s706_s4 = scalar_lea.vmem [#allocation7], %s7086_s11 }
 0x22b   : > { %s715_s18 = sshll.u32 %s706_s4, 4  ;;  %p10446_p9 = scmp.lt.s32.totalorder %s10424_s9, 4  ;;  %s9218_s18 = int_to_ptr.vmem [resolvable:$true] %s715_s18 }
 0x22c   : > { %s703_s8 = scalar_lea.sflag [#allocation8], %s702_s7 }
 0x22d   : > { %p9224_p12 = pnand %p10446_p9, %p9178_p5 }
 0x22f   : > { %s9216_s17 = scalar_lea.hbm %s10445_s16, %s7088_s13  ;;  %p8312_p8 = pneg %p9224_p12 }
 0x230   : > { %s8310_s10 = scalar_lea.hbm %s9216_s17, 128  ;;  %s8315_s13 = scalar_lea.hbm %s10445_s16, 512 }
 0x231   : > { %p8311_p0 = scmp.ne.s32.totalorder %s9216_s17, %s8310_s10  ;;  %p8316_p5 = scmp.lt.u32.totalorder %s9216_s17, %s10445_s16 }
 0x232   : > { %p8317_p13 = scmp.lt.u32.totalorder %s8315_s13, %s8310_s10  ;;  %p8319_p6 = scmp.lt.u32.totalorder %s8310_s10, %s9216_s17 }
 0x233   : > { %p8313_p1 = pnand %p8312_p8, %p8311_p0 }
 0x234   : > { %p8318_p7 = por %p8317_p13, %p8316_p5 }
 0x235   : > { %p8314_p11 = pneg %p8313_p1 }
 0x236   : > { %p8320_p9 = por %p8319_p6, %p8318_p7 }
 0x238   : > { %p8321_p4 = pnand %p8320_p9, %p8314_p11 }
 0x23a   : > { %8324 = shalt.err (!%p8321_p4)
}
 0x23b   : > { %s8325_s9 = scalar_lea.vmem %s9218_s18, 128  ;;  %s8581_s29 = smov [#allocation7]  }
 0x23c   : > { %p8326_p0 = scmp.ne.s32.totalorder %s9218_s18, %s8325_s9  ;;  %s8330_s24 = sshll.u32 %s8581_s29, 4  ;;  %s8331_s24 = int_to_ptr.vmem [resolvable:$false] %s8330_s24 }
 0x23d   : > { %s8332_s30 = scalar_lea.vmem %s8331_s24, 256  ;;  %p8333_p3 = scmp.lt.s32.totalorder %s9218_s18, %s8331_s24 }
 0x23e   : > { %p8328_p1 = pnand %p8326_p0, %p8312_p8  ;;  %p8334_p5 = scmp.lt.s32.totalorder %s8332_s30, %s8325_s9 }
 0x240   : > { %p8329_p2 = pneg %p8328_p1  ;;  %p8335_p13 = por %p8334_p5, %p8333_p3 }
 0x242   : > { %p8336_p7 = pnand %p8335_p13, %p8329_p2 }
 0x244   : > { %8339 = shalt.err (!%p8336_p7)
}
 0x245   : > { %7472 = dma.hbm_to_vmem [thread:$0]  (!%p9224_p12), %s9216_s17, 128, %s9218_s18, %s703_s8  }
 0x246   : > { %s10448_s21 = sld [smem:[#allocation57_spill]] }
 0x24c   : > { %p10449_p4 = scmp.ne.s32.totalorder %s10448_s21, 0 }
 0x24e   : > { %724 = sbr.rel (%p10449_p4) target bundleno = 3907 (0xf43), region = 92 }
 0x255   : > { %s10450_s7 = sld [smem:[#allocation50_spill]] }
 0x25b   : > { %s726_s5 = sand.u32 1, %s10450_s7  }
 0x25c   : > { %s9256_s3 = sshll.u32 %s726_s5, 3  ;;  %s727_s4 = scalar_lea.sflag [#allocation5], %s726_s5 }
 0x25d   : > { %s730_s10 = scalar_lea.vmem [#allocation4], %s9256_s3 }
 0x25e   : > { %8441 = dma.done.wait (%p9114_p10), %s727_s4, 128  }
 0x25f   : > { %8443 = vsyncadd (%p9114_p10), %s727_s4, 4294967168  ;;  %s10451_s20 = sld [smem:[#allocation56_spill]]  ;;  %s10452_s11 = sld [smem:[#allocation47_spill]] }
 0x260   : > { %p10453_p3 = scmp.ne.s32.totalorder %s10441_s27, 0 }
 0x265   : > { %s735_s17 = sand.u32 1, %s10451_s20   ;;  %s737_s18 = sand.u32 1, %s10452_s11  }
 0x266   : > { %s9267_s8 = sshll.u32 %s737_s18, 3  ;;  %s736_s12 = scalar_lea.sflag [#allocation8], %s735_s17 }
 0x267   : > { %s739_s13 = scalar_lea.vmem [#allocation7], %s9267_s8 }
 0x268   : > { %8445 = dma.done.wait (%p10453_p3), %s736_s12, 128  }
 0x269   : > { %8447 = vsyncadd (%p10453_p3), %s736_s12, 4294967168  ;;  %p10454_p2 = scmp.eq.s32.totalorder %s10451_s20, 0 }
 0x26b   : > { %8449 = dma.done.wait (%p10454_p2), [#allocation8], 16   ;;  %p10455_p10 = pmov %p10454_p2 }
 0x26c   : > { %p10456_p12 = pmov %p10454_p2 }
 0x26d   : > { %8451 = vsyncadd (%p10455_p10), [#allocation8], 4294967280 }
 0x26e   : > { %8453 = dma.done.wait (%p10456_p12), [#allocation11], 2064   ;;  %p10457_p8 = pmov %p10454_p2 }
 0x26f   : > { %p10458_p11 = pmov %p10454_p2 }
 0x270   : > { %8455 = vsyncadd (%p10457_p8), [#allocation11], 4294965232 }
 0x271   : > { %8457 = dma.done.wait (%p10458_p11), [#allocation14], 2080   ;;  %p10459_p6 = pmov %p10454_p2 }
 0x272   : > { %p10460_p9 = pmov %p10454_p2 }
 0x273   : > { %8459 = vsyncadd (%p10459_p6), [#allocation14], 4294965216 }
 0x274   : > { %8461 = dma.done.wait (%p10460_p9), [#allocation17], 2080   ;;  %p10461_p0 = pmov %p10454_p2 }
 0x276   : > { %8463 = vsyncadd (%p10461_p0), [#allocation17], 4294965216  ;;  %p10462_p1 = pmov %p10461_p0 }
 0x277   : > { %p10463_p5 = pmov %p10461_p0 }
 0x278   : > { %8465 = dma.done.wait (%p10462_p1), [#allocation20], 2080  }
 0x279   : > { %8467 = vsyncadd (%p10463_p5), [#allocation20], 4294965216  ;;  %p10464_p13 = pmov %p10461_p0 }
 0x27a   : > { %p10465_p7 = pmov %p10461_p0 }
 0x27b   : > { %8469 = dma.done.wait (%p10464_p13), [#allocation23], 32  }
 0x27c   : > { %8471 = vsyncadd (%p10465_p7), [#allocation23], 4294967264  ;;  %p10466_p4 = pmov %p10461_p0 }
 0x27d   : > { %p10467_p3 = pmov %p10461_p0 }
 0x27e   : > { %8473 = dma.done.wait (%p10466_p4), [#allocation26], 2064  }
 0x27f   : > { %8475 = vsyncadd (%p10467_p3), [#allocation26], 4294965232  ;;  %p10468_p2 = pmov %p10461_p0 }
 0x280   : > { %p10469_p10 = pmov %p10461_p0 }
 0x281   : > { %8477 = dma.done.wait (%p10468_p2), [#allocation29], 2080  }
 0x282   : > { %8479 = vsyncadd (%p10469_p10), [#allocation29], 4294965216  ;;  %p10470_p12 = pmov %p10461_p0 }
 0x283   : > { %p10471_p8 = pmov %p10461_p0 }
 0x284   : > { %8481 = dma.done.wait (%p10470_p12), [#allocation32], 16  }
 0x285   : > { %8483 = vsyncadd (%p10471_p8), [#allocation32], 4294967280  ;;  %v9310_v0 = vld [vmem:[#allocation9] sm:$0x1]  ;;  %v9312_v1 = vld [vmem:[#allocation10] sm:$0x1] }
 0x286   : > { %s860_s26 = scalar_lea.vmem [#allocation33], %s9267_s8  ;;  %s10472_s27 = sld [smem:[#allocation51_spill]] }
 0x28c   : > { %p7109_p11 = scmp.ne.s32.totalorder %s10472_s27, 0 }
 0x28d   : > { %v7226_v2 = vld [vmem:[%s730_s10] sm:$0xff] (!%p7109_p11)   ;;  %v8582_v39 = vmov (!%p7109_p11), 0   ;;  %v896_v50 = vlaneseq (!%p7109_p11) }
 0x28e   : > { %867 = sbr.rel (%p7109_p11) target bundleno = 1193 (0x4a9), region = 168  ;;  %v7227_v3 = vunpack.c.l.bf16 (!%p7109_p11), %v7226_v2  ;;  %v7228_v4 = vunpack.c.h.bf16 (!%p7109_p11), %v7226_v2  ;;  %v7684_v5 = vld [vmem:[#allocation15 + $0x4] ss:$8 sps:$4 sm:$0xff] (!%p7109_p11)   ;;  %v7688_v7 = vld [vmem:[#allocation15] ss:$8 sps:$4 sm:$0xff] (!%p7109_p11)   ;;  %1052 = vmatprep.mubr.bf16.mxu0 (!%p7109_p11), %v8582_v39  ;;  %1203 = vmatprep.mubr.bf16.mxu1 (!%p7109_p11), %v8582_v39 }
 0x28f   : > { %v7686_v6 = vld [vmem:[#allocation18 + $0x4] ss:$8 sps:$4 sm:$0xff] (!%p7109_p11)   ;;  %v7689_v8 = vld [vmem:[#allocation18] ss:$8 sps:$4 sm:$0xff] (!%p7109_p11)   ;;  %v7690_v9 = vld [vmem:[#allocation15 + $0x14] ss:$8 sps:$4 sm:$0xff] (!%p7109_p11)   ;;  %1020 = vmatprep.subr.bf16.mxu0 (!%p7109_p11), %v7684_v5 }
 0x290   : > { %872 = vadd.xlane.f32.xlu0 (!%p7109_p11), %v7227_v3  ;;  %v7692_v10 = vld [vmem:[#allocation18 + $0x14] ss:$8 sps:$4 sm:$0xff] (!%p7109_p11)   ;;  %1171 = vmatprep.subr.bf16.mxu1 (!%p7109_p11), %v7686_v6  ;;  %v7695_v20 = vld [vmem:[#allocation18 + $0x10] ss:$8 sps:$4 sm:$0xff] (!%p7109_p11)   ;;  %v7696_v21 = vld [vmem:[#allocation15 + $0x24] ss:$8 sps:$4 sm:$0xff] (!%p7109_p11)  }
 0x291   : > { %1021 = vmatpush1.bf16.msra.mxu0 (!%p7109_p11), %v7688_v7  ;;  %1172 = vmatpush1.bf16.msra.mxu1 (!%p7109_p11), %v7689_v8  ;;  %v7694_v19 = vld [vmem:[#allocation15 + $0x10] ss:$8 sps:$4 sm:$0xff] (!%p7109_p11)   ;;  %v7700_v23 = vld [vmem:[#allocation15 + $0x20] ss:$8 sps:$4 sm:$0xff] (!%p7109_p11)   ;;  %v7702_v25 = vld [vmem:[#allocation15 + $0x34] ss:$8 sps:$4 sm:$0xff] (!%p7109_p11)  }
 0x292   : > { %1022 = vmatprep.subr.bf16.mxu0 (!%p7109_p11), %v7690_v9  ;;  %1173 = vmatprep.subr.bf16.mxu1 (!%p7109_p11), %v7692_v10  ;;  %v7698_v22 = vld [vmem:[#allocation18 + $0x24] ss:$8 sps:$4 sm:$0xff] (!%p7109_p11)   ;;  %v7701_v24 = vld [vmem:[#allocation18 + $0x20] ss:$8 sps:$4 sm:$0xff] (!%p7109_p11)   ;;  %v7704_v26 = vld [vmem:[#allocation18 + $0x34] ss:$8 sps:$4 sm:$0xff] (!%p7109_p11)  }
 0x293   : > { %v7706_v27 = vld [vmem:[#allocation15 + $0x30] ss:$8 sps:$4 sm:$0xff] (!%p7109_p11)   ;;  %v7708_v29 = vld [vmem:[#allocation15 + $0x44] ss:$8 sps:$4 sm:$0xff] (!%p7109_p11)   ;;  %v7712_v31 = vld [vmem:[#allocation15 + $0x40] ss:$8 sps:$4 sm:$0xff] (!%p7109_p11)  }
 0x294   : > { %874 = vadd.xlane.f32.xlu0 (!%p7109_p11), %v7228_v4  ;;  %v7707_v28 = vld [vmem:[#allocation18 + $0x30] ss:$8 sps:$4 sm:$0xff] (!%p7109_p11)   ;;  %v7710_v30 = vld [vmem:[#allocation18 + $0x44] ss:$8 sps:$4 sm:$0xff] (!%p7109_p11)   ;;  %v7713_v32 = vld [vmem:[#allocation18 + $0x40] ss:$8 sps:$4 sm:$0xff] (!%p7109_p11)  }
 0x295   : > { %1023 = vmatpush1.bf16.msra.mxu0 %v7694_v19  ;;  %1174 = vmatpush1.bf16.msra.mxu1 %v7695_v20  ;;  %v7714_v33 = vld [vmem:[#allocation15 + $0x54] ss:$8 sps:$4 sm:$0xff]   ;;  %v7718_v35 = vld [vmem:[#allocation15 + $0x50] ss:$8 sps:$4 sm:$0xff]   ;;  %v7720_v37 = vld [vmem:[#allocation15 + $0x64] ss:$8 sps:$4 sm:$0xff]  }
 0x296   : > { %1024 = vmatprep.subr.bf16.mxu0 %v7696_v21  ;;  %1175 = vmatprep.subr.bf16.mxu1 %v7698_v22  ;;  %v7716_v34 = vld [vmem:[#allocation18 + $0x54] ss:$8 sps:$4 sm:$0xff]   ;;  %v7719_v36 = vld [vmem:[#allocation18 + $0x50] ss:$8 sps:$4 sm:$0xff]   ;;  %v7722_v38 = vld [vmem:[#allocation18 + $0x64] ss:$8 sps:$4 sm:$0xff]  }
 0x297   : > { %v7724_v40 = vld [vmem:[#allocation15 + $0x60] ss:$8 sps:$4 sm:$0xff]   ;;  %v7726_v42 = vld [vmem:[#allocation15 + $0x74] ss:$8 sps:$4 sm:$0xff]   ;;  %v7730_v44 = vld [vmem:[#allocation15 + $0x70] ss:$8 sps:$4 sm:$0xff]  }
 0x298   : > { %v7725_v41 = vld [vmem:[#allocation18 + $0x60] ss:$8 sps:$4 sm:$0xff]   ;;  %v7728_v43 = vld [vmem:[#allocation18 + $0x74] ss:$8 sps:$4 sm:$0xff]   ;;  %v7731_v45 = vld [vmem:[#allocation18 + $0x70] ss:$8 sps:$4 sm:$0xff]  }
 0x299   : > { %1025 = vmatpush1.bf16.msra.mxu0 %v7700_v23  ;;  %1176 = vmatpush1.bf16.msra.mxu1 %v7701_v24  ;;  %v897_v53 = vshrl.u32 %v896_v50, 7  ;;  %v1079_v5 = vld [vmem:[#allocation19] sm:$0x3] }
 0x29a   : > { %1026 = vmatprep.subr.bf16.mxu0 %v7702_v25  ;;  %1177 = vmatprep.subr.bf16.mxu1 %v7704_v26 }
 0x29b   : > { %v898_v54 = vsub.s32 0, %v897_v53  ;;  %v936_v6 = vsub.s32 1, %v897_v53 }
 0x29d   : > { %1027 = vmatpush1.bf16.msra.mxu0 %v7706_v27  ;;  %1178 = vmatpush1.bf16.msra.mxu1 %v7707_v28  ;;  %v899_v57 = vrot.slane %v9310_v0, %v898_v54  ;;  %v907_v61 = vrot.slane %v9312_v1, %v898_v54  ;;  %v1084_v8 = vrot.slane %v1079_v5, %v898_v54 }
 0x29e   : > { %1028 = vmatprep.subr.bf16.mxu0 %v7708_v29  ;;  %1179 = vmatprep.subr.bf16.mxu1 %v7710_v30  ;;  %v1088_v10 = vrot.slane %v1079_v5, %v936_v6 }
 0x2a1   : > { %1029 = vmatpush1.bf16.msra.mxu0 %v7712_v31  ;;  %1180 = vmatpush1.bf16.msra.mxu1 %v7713_v32 }
 0x2a2   : > { %1030 = vmatprep.subr.bf16.mxu0 %v7714_v33  ;;  %1181 = vmatprep.subr.bf16.mxu1 %v7716_v34 }
 0x2a5   : > { %1031 = vmatpush1.bf16.msra.mxu0 %v7718_v35  ;;  %1182 = vmatpush1.bf16.msra.mxu1 %v7719_v36 }
 0x2a6   : > { %1032 = vmatprep.subr.bf16.mxu0 %v7720_v37  ;;  %1183 = vmatprep.subr.bf16.mxu1 %v7722_v38 }
 0x2a9   : > { %1033 = vmatpush1.bf16.msra.mxu0 %v7724_v40  ;;  %1184 = vmatpush1.bf16.msra.mxu1 %v7725_v41 }
 0x2aa   : > { %1034 = vmatprep.subr.bf16.mxu0 %v7726_v42  ;;  %1185 = vmatprep.subr.bf16.mxu1 %v7728_v43 }
 0x2ad   : > { %1035 = vmatpush1.bf16.msra.mxu0 %v7730_v44  ;;  %1186 = vmatpush1.bf16.msra.mxu1 %v7731_v45 }
 0x31d   : > { %v873_v11 = vpop.xlane.xlu0 %872 }
 0x31e   : > { %v877_v12 = vmul.f32 0.0078125, %v873_v11 }
 0x320   : > { %v9318_v13 = vsub.f32 %v7227_v3, %v877_v12 }
 0x321   : > { %v875_v14 = vpop.xlane.xlu0 %874 }
 0x322   : > { %v878_v15 = vmul.f32 0.0078125, %v875_v14  ;;  %v881_v16 = vmul.f32 %v9318_v13, %v9318_v13 }
 0x324   : > { %v9322_v17 = vsub.f32 %v7228_v4, %v878_v15  ;;  %883 = vadd.xlane.f32.xlu1 %v881_v16  ;;  %v928_v4 = vld [vmem:[#allocation16] sm:$0x3] }
 0x325   : > { %v933_v7 = vrot.slane %v928_v4, %v898_v54  ;;  %v937_v9 = vrot.slane %v928_v4, %v936_v6 }
 0x326   : > { %v882_v18 = vmul.f32 %v9322_v17, %v9322_v17 }
 0x328   : > { %885 = vadd.xlane.f32.xlu1 %v882_v18 }
 0x3b1   : > { %v884_v46 = vpop.xlane.xlu1 %883 }
 0x3b2   : > { %v887_v47 = vmul.f32 0.0078125, %v884_v46 }
 0x3b4   : > { %v889_v48 = vadd.f32 1e-05, %v887_v47 }
 0x3b5   : > { %v886_v49 = vpop.xlane.xlu1 %885 }
 0x3b6   : > { %7732 = vrsqrt.f32 %v889_v48  ;;  %v888_v51 = vmul.f32 0.0078125, %v886_v49 }
 0x3b8   : > { %v890_v52 = vadd.f32 1e-05, %v888_v51 }
 0x3ba   : > { %7734 = vrsqrt.f32 %v890_v52 }
 0x3c0   : > { %v7733_v55 = vpop.eup %7732 }
 0x3c1   : > { %v893_v56 = vmul.f32 %v7733_v55, %v9318_v13 }
 0x3c3   : > { %v901_v60 = vmul.f32 %v899_v57, %v893_v56 }
 0x3c4   : > { %v7735_v58 = vpop.eup %7734 }
 0x3c5   : > { %v894_v59 = vmul.f32 %v7735_v58, %v9322_v17  ;;  %v909_v63 = vadd.f32 %v907_v61, %v901_v60 }
 0x3c7   : > { %v902_v62 = vmul.f32 %v899_v57, %v894_v59 }
 0x3c9   : > { %v910_v2 = vadd.f32 %v907_v61, %v902_v62 }
 0x3cb   : > { %v911_v3 = vpack.c.bf16 %v910_v2, %v909_v63 }
 0x3cd   : > { %1053 = vmatmul.mubr.bf16.vlgmr.msra.gmra.mrb[0].mxu0 %v911_v3  ;;  %1204 = vmatmul.mubr.bf16.vlgmr.msra.gmra.mrb[0].mxu1 %v911_v3 }
 0x4a0   : > { %v1054_v11 = vpop.f32.mrb[0].mxu0  ;;  %v1205_v12 = vpop.f32.mrb[0].mxu1 }
 0x4a1   : > { %v1055_v13 = vadd.f32 %v1054_v11, %v933_v7  ;;  %v1206_v14 = vadd.f32 %v1205_v12, %v1084_v8  ;;  %v1056_v15 = vpop.f32.mrb[1].mxu0  ;;  %v1207_v16 = vpop.f32.mrb[1].mxu1 }
 0x4a2   : > { %v1057_v17 = vadd.f32 %v1056_v15, %v937_v9  ;;  %v1208_v18 = vadd.f32 %v1207_v16, %v1088_v10  ;;  %v1058_v19 = vpop.f32.mrb[2].mxu0  ;;  %v1209_v20 = vpop.f32.mrb[2].mxu1 }
 0x4a3   : > { %v1059_v21 = vadd.f32 %v1058_v19, %v933_v7  ;;  %v1210_v22 = vadd.f32 %v1209_v20, %v1084_v8  ;;  %v1060_v23 = vpop.f32.mrb[3].mxu0  ;;  %v1211_v24 = vpop.f32.mrb[3].mxu1 }
 0x4a4   : > { %v7142_v25 = vpack.i.bf16 %v1057_v17, %v1055_v13  ;;  %v7144_v26 = vpack.i.bf16 %v1208_v18, %v1206_v14  ;;  %v1061_v27 = vadd.f32 %v1060_v23, %v937_v9  ;;  %v1212_v28 = vadd.f32 %v1211_v24, %v1088_v10 }
 0x4a6   : > { %1226 = vst [vmem:[#allocation2] sm:$0xff] %v7142_v25  ;;  %1240 = vst [vmem:[#allocation3] sm:$0xff] %v7144_v26  ;;  %v7143_v29 = vpack.i.bf16 %v1061_v27, %v1059_v21  ;;  %v7145_v30 = vpack.i.bf16 %v1212_v28, %v1210_v22 }
 0x4a8   : > { %1227 = vst [vmem:[#allocation2 + $0x8] sm:$0xff] %v7143_v29  ;;  %1241 = vst [vmem:[#allocation3 + $0x8] sm:$0xff] %v7145_v30 }
 0x4a9 PF: > { %v9332_v31 = vld [vmem:[%s739_s13] sm:$0xff]  ;;  %v7738_v33 = vld [vmem:[#allocation12] ss:$8 sps:$4 sm:$0xff]   ;;  %v10357_v47 = vmov 0   ;;  %v1256_v55 = vlaneseq  ;;  %v9358_v16 = vmov 0.0   ;;  %v9360_v17 = vmov 0.0  }
 0x4aa   : > { %10473 = vst [vmem:[#allocation58_spill] sm:$0xff] %v9332_v31  ;;  %1243 = vadd.xlane.f32.xlu0 %v9332_v31  ;;  %v7736_v32 = vld [vmem:[#allocation12 + $0x4] ss:$8 sps:$4 sm:$0xff]   ;;  %v7739_v34 = vld [vmem:[#allocation12 + $0x14] ss:$8 sps:$4 sm:$0xff]   ;;  %1410 = vmatprep.mubr.bf16.mxu0 %v10357_v47  ;;  %v9362_v18 = vmov 0.0  }
 0x4ab   : > { %1378 = vmatprep.subr.bf16.mxu0 %v7736_v32  ;;  %v7741_v35 = vld [vmem:[#allocation12 + $0x10] ss:$8 sps:$4 sm:$0xff]   ;;  %v7742_v36 = vld [vmem:[#allocation12 + $0x24] ss:$8 sps:$4 sm:$0xff]   ;;  %v7744_v41 = vld [vmem:[#allocation12 + $0x20] ss:$8 sps:$4 sm:$0xff]  }
 0x4ac   : > { %1379 = vmatpush1.bf16.msra.mxu0 %v7738_v33  ;;  %v7745_v42 = vld [vmem:[#allocation12 + $0x34] ss:$8 sps:$4 sm:$0xff]   ;;  %v7747_v43 = vld [vmem:[#allocation12 + $0x30] ss:$8 sps:$4 sm:$0xff]   ;;  %v7748_v44 = vld [vmem:[#allocation12 + $0x44] ss:$8 sps:$4 sm:$0xff]  }
 0x4ad   : > { %1380 = vmatprep.subr.bf16.mxu0 %v7739_v34  ;;  %v7750_v45 = vld [vmem:[#allocation12 + $0x40] ss:$8 sps:$4 sm:$0xff]   ;;  %v7751_v46 = vld [vmem:[#allocation12 + $0x54] ss:$8 sps:$4 sm:$0xff]   ;;  %v7753_v48 = vld [vmem:[#allocation12 + $0x50] ss:$8 sps:$4 sm:$0xff]  }
 0x4ae   : > { %v7754_v49 = vld [vmem:[#allocation12 + $0x64] ss:$8 sps:$4 sm:$0xff]   ;;  %v7756_v50 = vld [vmem:[#allocation12 + $0x60] ss:$8 sps:$4 sm:$0xff]   ;;  %v7757_v51 = vld [vmem:[#allocation12 + $0x74] ss:$8 sps:$4 sm:$0xff]  }
 0x4af   : > { %v7759_v52 = vld [vmem:[#allocation12 + $0x70] ss:$8 sps:$4 sm:$0xff]   ;;  %v9337_v57 = vshrl.u32 %v1256_v55, 7  ;;  %v1286_v4 = vld [vmem:[#allocation13] sm:$0x3]  ;;  %v9364_v19 = vmov 0.0  }
 0x4b0   : > { %1381 = vmatpush1.bf16.msra.mxu0 %v7741_v35  ;;  %v9366_v20 = vmov -inf   ;;  %v9368_v21 = vmov -inf   ;;  %s9370_s14 = smov 0  }
 0x4b1   : > { %1382 = vmatprep.subr.bf16.mxu0 %v7742_v36  ;;  %v9340_v58 = vsub.s32 0, %v9337_v57  ;;  %v10356_v5 = vsub.s32 1, %v9337_v57 }
 0x4b3   : > { %10474 = vst [vmem:[#allocation59_spill] sm:$0xff] %v9340_v58  ;;  %v1259_v59 = vrot.slane %v9310_v0, %v9340_v58  ;;  %v1266_v62 = vrot.slane %v9312_v1, %v9340_v58  ;;  %v1291_v6 = vrot.slane %v1286_v4, %v9340_v58  ;;  %v1295_v7 = vrot.slane %v1286_v4, %v10356_v5 }
 0x4b4   : > { %1383 = vmatpush1.bf16.msra.mxu0 %v7744_v41 }
 0x4b5   : > { %1384 = vmatprep.subr.bf16.mxu0 %v7745_v42 }
 0x4b8   : > { %1385 = vmatpush1.bf16.msra.mxu0 %v7747_v43 }
 0x4b9   : > { %1386 = vmatprep.subr.bf16.mxu0 %v7748_v44 }
 0x4bc   : > { %1387 = vmatpush1.bf16.msra.mxu0 %v7750_v45 }
 0x4bd   : > { %1388 = vmatprep.subr.bf16.mxu0 %v7751_v46 }
 0x4c0   : > { %1389 = vmatpush1.bf16.msra.mxu0 %v7753_v48 }
 0x4c1   : > { %1390 = vmatprep.subr.bf16.mxu0 %v7754_v49 }
 0x4c4   : > { %1391 = vmatpush1.bf16.msra.mxu0 %v7756_v50 }
 0x4c5   : > { %1392 = vmatprep.subr.bf16.mxu0 %v7757_v51 }
 0x4c8   : > { %1393 = vmatpush1.bf16.msra.mxu0 %v7759_v52 }
 0x537   : > { %v1244_v37 = vpop.xlane.xlu0 %1243 }
 0x538   : > { %v1246_v38 = vmul.f32 0.0078125, %v1244_v37 }
 0x53a   : > { %v1247_v39 = vsub.f32 %v9332_v31, %v1246_v38 }
 0x53c   : > { %v1248_v40 = vmul.f32 %v1247_v39, %v1247_v39 }
 0x53e   : > { %1249 = vadd.xlane.f32.xlu0 %v1248_v40 }
 0x5cb   : > { %v1250_v53 = vpop.xlane.xlu0 %1249 }
 0x5cc   : > { %v1251_v54 = vmul.f32 0.0078125, %v1250_v53 }
 0x5ce   : > { %v1252_v56 = vadd.f32 1e-05, %v1251_v54 }
 0x5d0   : > { %7760 = vrsqrt.f32 %v1252_v56 }
 0x5da   : > { %v7761_v60 = vpop.eup %7760 }
 0x5db   : > { %v1254_v61 = vmul.f32 %v7761_v60, %v1247_v39 }
 0x5dd   : > { %v1261_v63 = vmul.f32 %v1259_v59, %v1254_v61 }
 0x5df   : > { %v1268_v2 = vadd.f32 %v1266_v62, %v1261_v63 }
 0x5e1   : > { %v1269_v3 = vpack.c.bf16 %v1268_v2, %v1268_v2 }
 0x5e3   : > { %1411 = vmatmul.mubr.bf16.vlgmr.msra.gmra.mrb[0].mxu0 %v1269_v3 }
 0x6b6   : > { %v1412_v8 = vpop.f32.mrb[0].mxu0 }
 0x6b7   : > { %v1413_v9 = vadd.f32 %v1412_v8, %v1291_v6  ;;  %v1414_v0 = vpop.f32.mrb[1].mxu0 }
 0x6b8   : > { %v1415_v10 = vadd.f32 %v1414_v0, %v1295_v7  ;;  %v1416_v11 = vpop.f32.mrb[2].mxu0 }
 0x6b9   : > { %v9350_v12 = vmul.f32 0.088388346, %v1413_v9  ;;  %v1417_v1 = vpop.f32.mrb[3].mxu0 }
 0x6ba   : > { %v9352_v13 = vmul.f32 0.088388346, %v1415_v10 }
 0x6bb   : > { %10475 = vst [vmem:[#allocation60_spill] sm:$0xff] %v9350_v12 }
 0x6bc   : > { %10476 = vst [vmem:[#allocation61_spill] sm:$0xff] %v9352_v13 }
 0x6bd LB: >> { %10477 = vst [vmem:[#allocation62_spill] sm:$0xff] %v8534_v16  ;;  %10478 = vst [vmem:[#allocation63_spill] sm:$0xff] %v8538_v17  ;;  %s7162_s15 = sshll.u32 %s8558_s14, 3  ;;  %v8585_v58 = vmov 1934713408   ;;  %vm8588_vm0 = vmmov 0   ;;  %s8558_s14 = sphi %s9370_s14, %s1428_s14   ;;  %v8554_v21 = vphi %v9368_v21, %v5909_v21   ;;  %v8550_v20 = vphi %v9366_v20, %v5910_v20   ;;  %v8546_v19 = vphi %v9364_v19, %v10512_v19   ;;  %v8542_v18 = vphi %v9362_v18, %v10511_v18   ;;  %v8538_v17 = vphi %v9360_v17, %v10510_v17   ;;  %v8534_v16 = vphi %v9358_v16, %v10509_v16  }
 0x6be   : >> { %10479 = vst [vmem:[#allocation64_spill] sm:$0xff] %v8542_v18  ;;  %10480 = vst [vmem:[#allocation65_spill] sm:$0xff] %v8546_v19  ;;  %s1436_s9 = scalar_lea.vmem [#allocation2], %s7162_s15  ;;  %v1873_v31 = vunpack.c.l.s4 %v8585_v58  ;;  %vm5902_vm1 = vcmask 64512   ;;  %s1445_s29 = scalar_lea.vmem [#allocation3], %s7162_s15  ;;  %vm5988_vm2 = vcmask 1043456  }
 0x6bf   : >> { %10481 = vst [vmem:[#allocation66_spill] sm:$0xff] %v8550_v20  ;;  %10482 = vst [vmem:[#allocation67_spill] sm:$0xff] %v8554_v21  ;;  %v1439_v22 = vld [vmem:[%s1436_s9 + $0x2] sm:$0x1]  ;;  %v1437_v23 = vld [vmem:[%s1436_s9] sm:$0x1] }
 0x6c0   : >> { %1486 = vxpose.xlu1.c.b16.start.end [1/1] (short) %v1439_v22, 128  ;;  %1454 = vxpose.xlu0.c.b16.start.end [1/1] (short) %v1437_v23, 128  ;;  %v1440_v24 = vld [vmem:[%s1436_s9 + $0x3] sm:$0x1]  ;;  %v1438_v25 = vld [vmem:[%s1436_s9 + $0x1] sm:$0x1]  ;;  %v1442_v26 = vld [vmem:[%s1436_s9 + $0x5] sm:$0x1] }
 0x6c1   : >> { %v1441_v27 = vld [vmem:[%s1436_s9 + $0x4] sm:$0x1]  ;;  %v1444_v28 = vld [vmem:[%s1436_s9 + $0x7] sm:$0x1]  ;;  %v1443_v29 = vld [vmem:[%s1436_s9 + $0x6] sm:$0x1] }
 0x6c2   : >> { %s1428_s14 = sadd.s32 1, %s8558_s14  }
 0x6c3   : >> { %p1425_p6 = scmp.ge.s32.totalorder %s1428_s14, 2  }
 0x6c4   : > { %s10515_s24 = sld [smem:[#allocation52_spill]] (%p1425_p6)  ;;  %s10518_s30 = sld [smem:[#allocation51_spill]] (%p1425_p6) }
 0x6c5   : > { %s6776_s4 = sshll.u32 (%p1425_p6), %s860_s26, 4  ;;  %s10520_s11 = sld [smem:[#allocation93_spill]] (%p1425_p6)  ;;  %s10249_s4 = int_to_ptr.vmem [resolvable:$true] %s6776_s4 }
 0x6c6   : > { %s6761_s12 = scalar_lea.sflag (%p1425_p6), [#allocation6], %s737_s18  ;;  %s8340_s13 = scalar_lea.vmem (%p1425_p6), %s10249_s4, 128 }
 0x6c7   : > { %p8341_p9 = scmp.ne.s32.totalorder (%p1425_p6), %s10249_s4, %s8340_s13  ;;  %p10521_p0 = scmp.ne.s32.totalorder (%p1425_p6), %s10442_s0, 0 }
 0x6c8   : > { %s8591_s27 = smov (%p1425_p6), [#allocation33]  }
 0x6c9   : > { %p8342_p1 = pnand (%p1425_p6), %p8341_p9, %p10521_p0  ;;  %s8344_s14 = sshll.u32 (%p1425_p6), %s8591_s27, 4  ;;  %s8345_s14 = int_to_ptr.vmem [resolvable:$false] %s8344_s14 }
 0x6ca   : > { %s7220_s7 = sshll.u32 (%p1425_p6), %s10515_s24, 1  ;;  %s8346_s15 = scalar_lea.vmem (%p1425_p6), %s8345_s14, 256 }
 0x6cb   : > { %s6772_s5 = sadd.s32 (%p1425_p6), %s10518_s30, %s7220_s7  ;;  %p8343_p5 = pneg (%p1425_p6), %p8342_p1 }
 0x6cc   : > { %s7221_s3 = sshll.u32 (%p1425_p6), %s6772_s5, 7  ;;  %p8347_p13 = scmp.lt.s32.totalorder (%p1425_p6), %s10249_s4, %s8345_s14 }
 0x6cd   : > { %s10247_s17 = scalar_lea.hbm (%p1425_p6), %s10520_s11, %s7221_s3  ;;  %p8348_p7 = scmp.lt.s32.totalorder (%p1425_p6), %s8346_s15, %s8340_s13 }
 0x6cf   : > { %p8349_p4 = por (%p1425_p6), %p8348_p7, %p8347_p13 }
 0x6d1   : > { %p8350_p3 = pnand (%p1425_p6), %p8349_p4, %p8343_p5 }
 0x6dd   : >> { %1502 = vxpose.xlu1.c.b16.start.end [1/1] (short) %v1440_v24, 128  ;;  %1470 = vxpose.xlu0.c.b16.start.end [1/1] (short) %v1438_v25, 128  ;;  %v8584_v25 = vmov 1983009808  }
 0x6fa   : >> { %1534 = vxpose.xlu1.c.b16.start.end [1/1] (short) %v1442_v26, 128  ;;  %1518 = vxpose.xlu0.c.b16.start.end [1/1] (short) %v1441_v27, 128  ;;  %v1841_v26 = vunpack.c.l.s4 %v8584_v25 }
 0x717   : >> { %1566 = vxpose.xlu1.c.b16.start.end [1/1] (short) %v1444_v28, 128  ;;  %1550 = vxpose.xlu0.c.b16.start.end [1/1] (short) %v1443_v29, 128  ;;  %v1842_v29 = vunpack.c.0.s8 %v1841_v26 }
 0x719   : >> { %v9486_v19 = vsub.s32 %v1842_v29, %v9337_v57 }
 0x71b   : >> { %v10490_v25 = vmov %v9486_v19 }
 0x726   : >> { %v9396_v30 = vpop.trf.xlu1  ;;  %v9398_v32 = vpop.trf.xlu0 }
 0x727   : >> { %v1586_v20 = vshrl.u32 %v9398_v32, 16  ;;  %v1594_v58 = vshrl.u32 %v9396_v30, 16 }
 0x72a   : >> { %v9400_v33 = vpop.trf.xlu1  ;;  %v9402_v34 = vpop.trf.xlu0 }
 0x72e   : >> { %v9404_v35 = vpop.trf.xlu1  ;;  %v9406_v36 = vpop.trf.xlu0 }
 0x732   : >> { %v9408_v37 = vpop.trf.xlu1  ;;  %v9410_v38 = vpop.trf.xlu0 }
 0x736   : >> { %v9412_v39 = vpop.trf.xlu1  ;;  %v9414_v40 = vpop.trf.xlu0 }
 0x73a   : >> { %v9416_v41 = vpop.trf.xlu1  ;;  %v9418_v42 = vpop.trf.xlu0 }
 0x73e   : >> { %v9420_v43 = vpop.trf.xlu1  ;;  %v9422_v44 = vpop.trf.xlu0 }
 0x742   : >> { %v9424_v45 = vpop.trf.xlu1  ;;  %v9426_v46 = vpop.trf.xlu0 }
 0x743   : >> { %10483 = vst [vmem:[#allocation68_spill] sm:$0xff] %v9424_v45  ;;  %10484 = vst [vmem:[#allocation69_spill] sm:$0xff] %v9426_v46 }
 0x746   : >> { %v1510_v48 = vpop.trf.xlu1  ;;  %v1478_v49 = vpop.trf.xlu0 }
 0x747   : >> { %v1587_v17 = vshrl.u32 %v1478_v49, 16  ;;  %v1584_v18 = vpack.i.b16 %v1478_v49, %v9398_v32  ;;  %v1595_v21 = vshrl.u32 %v1510_v48, 16  ;;  %v1592_v46 = vpack.i.b16 %v1510_v48, %v9396_v30 }
 0x749   : >> { %v1596_v45 = vpack.i.b16 %v1595_v21, %v1594_v58  ;;  %v8586_v21 = vmov 0  }
 0x74a   : >> { %v9428_v50 = vpop.trf.xlu1  ;;  %v9430_v51 = vpop.trf.xlu0 }
 0x74e   : >> { %v9432_v52 = vpop.trf.xlu1  ;;  %v9434_v53 = vpop.trf.xlu0 }
 0x752   : >> { %v9436_v54 = vpop.trf.xlu1  ;;  %v9438_v55 = vpop.trf.xlu0 }
 0x756   : >> { %v9440_v56 = vpop.trf.xlu1  ;;  %v9442_v59 = vpop.trf.xlu0 }
 0x75a   : >> { %v9444_v60 = vpop.trf.xlu1  ;;  %v9446_v61 = vpop.trf.xlu0 }
 0x75e   : >> { %v9448_v62 = vpop.trf.xlu1  ;;  %v9450_v63 = vpop.trf.xlu0 }
 0x75f   : >> { %10485 = vst [vmem:[#allocation70_spill] sm:$0xff] %v9450_v63 }
 0x762   : >> { %v9452_v2 = vpop.trf.xlu1  ;;  %v9454_v3 = vpop.trf.xlu0 }
 0x763   : >> { %10486 = vst [vmem:[#allocation71_spill] sm:$0xff] %v9452_v2  ;;  %10487 = vst [vmem:[#allocation72_spill] sm:$0xff] %v9454_v3  ;;  %v1874_v3 = vunpack.c.0.s8 %v1873_v31 }
 0x766   : >> { %v1542_v4 = vpop.trf.xlu1  ;;  %v1526_v6 = vpop.trf.xlu0 }
 0x767   : >> { %v1603_v5 = vshrl.u32 %v1542_v4, 16  ;;  %v1602_v47 = vshrl.u32 %v1526_v6, 16  ;;  %v1600_v16 = vpack.i.b16 %v1542_v4, %v1526_v6  ;;  %v1588_v4 = vpack.i.b16 %v1587_v17, %v1586_v20 }
 0x769   : >> { %v1604_v13 = vpack.i.b16 %v1603_v5, %v1602_v47  ;;  %v9494_v5 = vsub.s32 %v1874_v3, %v9337_v57  ;;  %v1839_v3 = vcombine.high %v1584_v18, %v1600_v16 }
 0x76a   : >> { %v9456_v7 = vpop.trf.xlu1  ;;  %v9458_v8 = vpop.trf.xlu0 }
 0x76b   : >> { %v1906_v19 = vcombine.low %v1588_v4, %v1604_v13 }
 0x76d   : >> { %v1914_v63 = vrot.slane %v1906_v19, %v10490_v25 }
 0x76e   : >> { %v9460_v9 = vpop.trf.xlu1  ;;  %v9462_v0 = vpop.trf.xlu0 }
 0x772   : >> { %v9464_v10 = vpop.trf.xlu1  ;;  %v9466_v11 = vpop.trf.xlu0 }
 0x776   : >> { %v9468_v1 = vpop.trf.xlu1  ;;  %v9470_v22 = vpop.trf.xlu0 }
 0x77a   : >> { %v9472_v23 = vpop.trf.xlu1  ;;  %v9474_v24 = vpop.trf.xlu0 }
 0x77e   : >> { %v9476_v27 = vpop.trf.xlu1  ;;  %v9478_v28 = vpop.trf.xlu0 }
 0x782   : >> { %v9480_v15 = vpop.trf.xlu1  ;;  %v9482_v14 = vpop.trf.xlu0 }
 0x783   : >> { %10488 = vst [vmem:[#allocation73_spill] sm:$0xff] %v9480_v15  ;;  %10489 = vst [vmem:[#allocation74_spill] sm:$0xff] %v9482_v14  ;;  %v1838_v15 = vcombine.low %v1584_v18, %v1600_v16 }
 0x785   : >> { %v1846_v32 = vrot.slane %v1838_v15, %v10490_v25 }
 0x786   : >> { %v1574_v26 = vpop.trf.xlu1  ;;  %v1558_v12 = vpop.trf.xlu0 }
 0x787   : >> { %v1611_v14 = vshrl.u32 %v1574_v26, 16  ;;  %v1608_v2 = vpack.i.b16 %v1574_v26, %v1558_v12  ;;  %v1610_v6 = vshrl.u32 %v1558_v12, 16 }
 0x789   : >> { %v1854_v49 = vcombine.low %v1592_v46, %v1608_v2  ;;  %v1612_v29 = vpack.i.b16 %v1611_v14, %v1610_v6  ;;  %v1855_v20 = vcombine.high %v1592_v46, %v1608_v2  ;;  %v1853_v46 = vrot.slane %v1839_v3, %v10490_v25 }
 0x78a   : >> { %v1559_v16 = vpop.trf.xlu0  ;;  %v1632_v3 = vpack.i.b16 %v9456_v7, %v9458_v8 }
 0x78b   : >> { %v1862_v47 = vrot.slane %v1854_v49, %v10490_v25  ;;  %v1922_v31 = vcombine.low %v1596_v45, %v1612_v29  ;;  %v1923_v49 = vcombine.high %v1596_v45, %v1612_v29  ;;  %v1642_v29 = vshrl.u32 %v1559_v16, 16 }
 0x78d   : >> { %v1870_v48 = vcombine.low %v1846_v32, %v1862_v47  ;;  %v1930_v26 = vrot.slane %v1922_v31, %v10490_v25  ;;  %v1871_v30 = vcombine.high %v1846_v32, %v1862_v47  ;;  %v1869_v31 = vrot.slane %v1855_v20, %v10490_v25  ;;  %v1575_v47 = vpop.trf.xlu1 }
 0x78e   : >> { %v1937_v32 = vrot.slane %v1923_v49, %v10490_v25  ;;  %v1635_v20 = vshrl.u32 %v9456_v7, 16 }
 0x78f   : >> { %v1878_v17 = vrot.slane %v1870_v48, %v9494_v5  ;;  %v1938_v12 = vcombine.low %v1914_v63, %v1930_v26  ;;  %v1939_v6 = vcombine.high %v1914_v63, %v1930_v26  ;;  %v1885_v19 = vrot.slane %v1871_v30, %v9494_v5 }
 0x790   : >> { %v1907_v48 = vcombine.high %v1588_v4, %v1604_v13  ;;  %v1643_v63 = vshrl.u32 %v1575_v47, 16  ;;  %v1640_v26 = vpack.i.b16 %v1575_v47, %v1559_v16  ;;  %v1624_v30 = vpack.i.b16 %v9428_v50, %v9400_v33 }
 0x791   : >> { %2926 = vxpose.xlu0.c.b16.start.end [1/1] (short) (narrow) %v1878_v17, 16  ;;  %v1946_v14 = vrot.slane %v1938_v12, %v9494_v5  ;;  %v1902_v15 = vcombine.high %v1878_v17, %v8586_v21  ;;  %v1953_v2 = vrot.slane %v1939_v6, %v9494_v5  ;;  %v1903_v18 = vcombine.high %v1885_v19, %v8586_v21 }
 0x792   : >> { %v1886_v17 = vcombine.low %v1853_v46, %v1869_v31  ;;  %v1921_v45 = vrot.slane %v1907_v48, %v10490_v25  ;;  %v1619_v6 = vshrl.u32 %v9430_v51, 16  ;;  %v1644_v49 = vpack.i.b16 %v1643_v63, %v1642_v29 }
 0x793   : >> { %2942 = vxpose.xlu1.c.b16.start.end [1/1] (short) (narrow) %v1946_v14, 16  ;;  %v1970_v58 = vcombine.high %v1946_v14, %v8586_v21  ;;  %v1971_v13 = vcombine.high %v1953_v2, %v8586_v21  ;;  %v1627_v14 = vshrl.u32 %v9428_v50, 16  ;;  %v1616_v48 = vpack.i.b16 %v9430_v51, %v9402_v34 }
 0x794   : >> { %v1954_v4 = vcombine.low %v1921_v45, %v1937_v32  ;;  %v1894_v12 = vrot.slane %v1886_v17, %v9494_v5  ;;  %v1887_v16 = vcombine.high %v1853_v46, %v1869_v31  ;;  %v1618_v50 = vshrl.u32 %v9402_v34, 16 }
 0x795   : >> { %2958 = vxpose.xlu0.c.b16.start.end [1/1] (short) (narrow) %v1902_v15, 16  ;;  %v1634_v15 = vshrl.u32 %v9458_v8, 16  ;;  %v1974_v7 = vcombine.low %v1616_v48, %v1632_v3  ;;  %v1955_v63 = vcombine.high %v1921_v45, %v1937_v32 }
 0x796   : >> { %v1904_v47 = vcombine.high %v1894_v12, %v8586_v21 }
 0x797   : >> { %2974 = vxpose.xlu1.c.b16.start.end [1/1] (short) (narrow) %v1970_v58, 16  ;;  %v1626_v58 = vshrl.u32 %v9400_v33, 16  ;;  %v1636_v17 = vpack.i.b16 %v1635_v20, %v1634_v15  ;;  %v1620_v33 = vpack.i.b16 %v1619_v6, %v1618_v50  ;;  %v1982_v31 = vrot.slane %v1974_v7, %v10490_v25 }
 0x798   : >> { %v1969_v34 = vrot.slane %v1955_v63, %v9494_v5  ;;  %v1991_v6 = vcombine.high %v1624_v30, %v1640_v26 }
 0x799   : >> { %2990 = vxpose.xlu0.c.b16.start.end [1/1] (short) (narrow) %v1885_v19, 16  ;;  %v1962_v19 = vrot.slane %v1954_v4, %v9494_v5  ;;  %v2042_v4 = vcombine.low %v1620_v33, %v1636_v17 }
 0x79a   : >> { %v1973_v45 = vcombine.high %v1969_v34, %v8586_v21  ;;  %v2005_v63 = vrot.slane %v1991_v6, %v10490_v25  ;;  %v1651_v6 = vshrl.u32 %v9434_v53, 16 }
 0x79b   : >> { %3006 = vxpose.xlu1.c.b16.start.end [1/1] (short) (narrow) %v1953_v2, 16  ;;  %v1990_v2 = vcombine.low %v1624_v30, %v1640_v26  ;;  %v1972_v8 = vcombine.high %v1962_v19, %v8586_v21  ;;  %v2050_v32 = vrot.slane %v2042_v4, %v10490_v25  ;;  %v8587_v26 = vmov 0.0  }
 0x79c   : >> { %7295 = vmatprep.subr.bf16.mxu0 %v8587_v26  ;;  %7315 = vmatprep.subr.bf16.mxu1 %v8587_v26 }
 0x79d   : >> { %3022 = vxpose.xlu0.c.b16.start.end [1/1] (short) (narrow) %v1903_v18, 16  ;;  %v1628_v18 = vpack.i.b16 %v1627_v14, %v1626_v58  ;;  %v1998_v51 = vrot.slane %v1990_v2, %v10490_v25  ;;  %7311 = vmatprep.mubr.msk.bf16.mxu0 %vm8588_vm0, %v8587_v26 }
 0x79e   : >> { %7331 = vmatprep.mubr.msk.bf16.mxu1 %vm8588_vm0, %v8587_v26 }
 0x79f   : >> { %3038 = vxpose.xlu1.c.b16.start.end [1/1] (short) (narrow) %v1971_v13, 16  ;;  %v2058_v29 = vcombine.low %v1628_v18, %v1644_v49  ;;  %v1901_v13 = vrot.slane %v1887_v16, %v9494_v5  ;;  %v2006_v14 = vcombine.low %v1982_v31, %v1998_v51  ;;  %v2007_v2 = vcombine.high %v1982_v31, %v1998_v51 }
 0x7a0   : >> { %v2059_v7 = vcombine.high %v1628_v18, %v1644_v49  ;;  %v1560_v49 = vpop.trf.xlu0 }
 0x7a1   : >> { %3054 = vxpose.xlu0.c.b16.start.end [1/1] (short) (narrow) %v1894_v12, 16  ;;  %v2066_v46 = vrot.slane %v2058_v29, %v10490_v25  ;;  %v1905_v12 = vcombine.high %v1901_v13, %v8586_v21  ;;  %v2014_v15 = vrot.slane %v2006_v14, %v9494_v5  ;;  %v2043_v29 = vcombine.high %v1620_v33, %v1636_v17 }
 0x7a2   : >> { %v1674_v4 = vshrl.u32 %v1560_v49, 16  ;;  %v1659_v14 = vshrl.u32 %v9432_v52, 16 }
 0x7a3   : >> { %3070 = vxpose.xlu1.c.b16.start.end [1/1] (short) (narrow) %v1962_v19, 16  ;;  %v2074_v20 = vcombine.low %v2050_v32, %v2066_v46  ;;  %v2038_v19 = vcombine.high %v2014_v15, %v8586_v21  ;;  %v2075_v50 = vcombine.high %v2050_v32, %v2066_v46  ;;  %v2057_v17 = vrot.slane %v2043_v29, %v10490_v25 }
 0x7a4   : >> { %v1667_v32 = vshrl.u32 %v9460_v9, 16 }
 0x7a5   : >> { %3086 = vxpose.xlu0.c.b16.start.end [1/1] (short) (narrow) %v1904_v47, 16  ;;  %v2082_v58 = vrot.slane %v2074_v20, %v9494_v5  ;;  %v1975_v47 = vcombine.high %v1616_v48, %v1632_v3  ;;  %v2089_v30 = vrot.slane %v2075_v50, %v9494_v5  ;;  %v2073_v3 = vrot.slane %v2059_v7, %v10490_v25  ;;  %v1576_v48 = vpop.trf.xlu1 }
 0x7a6   : >> { %v1675_v33 = vshrl.u32 %v1576_v48, 16  ;;  %v1672_v46 = vpack.i.b16 %v1576_v48, %v1560_v49  ;;  %v1656_v20 = vpack.i.b16 %v9432_v52, %v9404_v35  ;;  %v1650_v52 = vshrl.u32 %v9406_v36, 16 }
 0x7a7   : >> { %3102 = vxpose.xlu1.c.b16.start.end [1/1] (short) (narrow) %v1972_v8, 16  ;;  %v2106_v16 = vcombine.high %v2082_v58, %v8586_v21  ;;  %v2021_v8 = vrot.slane %v2007_v2, %v9494_v5  ;;  %v2107_v31 = vcombine.high %v2089_v30, %v8586_v21 }
 0x7a9   : >> { %3118 = vxpose.xlu0.c.b16.start.end [1/1] (short) (narrow) %v1901_v13, 16  ;;  %v1989_v13 = vrot.slane %v1975_v47, %v10490_v25  ;;  %v2039_v18 = vcombine.high %v2021_v8, %v8586_v21  ;;  %v1648_v47 = vpack.i.b16 %v9434_v53, %v9406_v36 }
 0x7ab   : >> { %3134 = vxpose.xlu1.c.b16.start.end [1/1] (short) (narrow) %v1969_v34, 16  ;;  %v2022_v51 = vcombine.low %v1989_v13, %v2005_v63  ;;  %v2090_v34 = vcombine.low %v2057_v17, %v2073_v3  ;;  %v2023_v7 = vcombine.high %v1989_v13, %v2005_v63 }
 0x7ad   : >> { %3150 = vxpose.xlu0.c.b16.start.end [1/1] (short) (narrow) %v1905_v12, 16  ;;  %v2030_v12 = vrot.slane %v2022_v51, %v9494_v5  ;;  %v2098_v2 = vrot.slane %v2090_v34, %v9494_v5  ;;  %v2037_v49 = vrot.slane %v2023_v7, %v9494_v5 }
 0x7af   : >> { %3166 = vxpose.xlu1.c.b16.start.end [1/1] (short) (narrow) %v1973_v45, 16  ;;  %v1666_v45 = vshrl.u32 %v9462_v0, 16  ;;  %v2040_v50 = vcombine.high %v2030_v12, %v8586_v21  ;;  %v2041_v51 = vcombine.high %v2037_v49, %v8586_v21 }
 0x7b1   : >> { %3182 = vxpose.xlu0.c.b16.start.end [1/1] (short) (narrow) %v2014_v15, 16  ;;  %v1664_v15 = vpack.i.b16 %v9460_v9, %v9462_v0  ;;  %v1668_v29 = vpack.i.b16 %v1667_v32, %v1666_v45  ;;  %v2108_v0 = vcombine.high %v2098_v2, %v8586_v21 }
 0x7b3   : >> { %3198 = vxpose.xlu1.c.b16.start.end [1/1] (short) (narrow) %v2082_v58, 16  ;;  %v1658_v58 = vshrl.u32 %v9404_v35, 16  ;;  %v2110_v9 = vcombine.low %v1648_v47, %v1664_v15  ;;  %v1652_v35 = vpack.i.b16 %v1651_v6, %v1650_v52  ;;  %v2111_v45 = vcombine.high %v1648_v47, %v1664_v15  ;;  %v1561_v15 = vpop.trf.xlu0 }
 0x7b5   : >> { %3214 = vxpose.xlu0.c.b16.start.end [1/1] (short) (narrow) %v2038_v19, 16  ;;  %v1676_v19 = vpack.i.b16 %v1675_v33, %v1674_v4  ;;  %v2118_v63 = vrot.slane %v2110_v9, %v10490_v25  ;;  %v2179_v7 = vcombine.high %v1652_v35, %v1668_v29  ;;  %v2125_v52 = vrot.slane %v2111_v45, %v10490_v25  ;;  %v1577_v9 = vpop.trf.xlu1 }
 0x7b7   : >> { %3230 = vxpose.xlu1.c.b16.start.end [1/1] (short) (narrow) %v2106_v16, 16  ;;  %v2126_v16 = vcombine.low %v1656_v20, %v1672_v46 }
 0x7b9   : >> { %3246 = vxpose.xlu0.c.b16.start.end [1/1] (short) (narrow) %v2021_v8, 16  ;;  %v1660_v8 = vpack.i.b16 %v1659_v14, %v1658_v58  ;;  %v2134_v53 = vrot.slane %v2126_v16, %v10490_v25 }
 0x7bb   : >> { %3262 = vxpose.xlu1.c.b16.start.end [1/1] (short) (narrow) %v2089_v30, 16  ;;  %v2091_v30 = vcombine.high %v2057_v17, %v2073_v3  ;;  %v2194_v48 = vcombine.low %v1660_v8, %v1676_v19  ;;  %v2142_v33 = vcombine.low %v2118_v63, %v2134_v53  ;;  %v2143_v32 = vcombine.high %v2118_v63, %v2134_v53 }
 0x7bc   : >> { %v2195_v58 = vcombine.high %v1660_v8, %v1676_v19  ;;  %v2193_v8 = vrot.slane %v2179_v7, %v10490_v25  ;;  %v1691_v53 = vshrl.u32 %v9436_v54, 16  ;;  %v1698_v63 = vshrl.u32 %v9466_v11, 16 }
 0x7bd   : >> { %3278 = vxpose.xlu0.c.b16.start.end [1/1] (short) (narrow) %v2039_v18, 16  ;;  %v2178_v18 = vcombine.low %v1652_v35, %v1668_v29  ;;  %v2105_v36 = vrot.slane %v2091_v30, %v9494_v5  ;;  %v2202_v13 = vrot.slane %v2194_v48, %v10490_v25  ;;  %v1706_v30 = vshrl.u32 %v1561_v15, 16 }
 0x7be   : >> { %v9584_v48 = vpack.i.b16 %v1577_v9, %v1561_v15 }
 0x7bf   : >> { %3294 = vxpose.xlu1.c.b16.start.end [1/1] (short) (narrow) %v2107_v31, 16  ;;  %v2186_v3 = vrot.slane %v2178_v18, %v10490_v25  ;;  %v2109_v17 = vcombine.high %v2105_v36, %v8586_v21  ;;  %v2150_v31 = vrot.slane %v2142_v33, %v9494_v5  ;;  %v1699_v18 = vshrl.u32 %v9464_v10, 16 }
 0x7c0   : >> { %v1690_v33 = vshrl.u32 %v9408_v37, 16 }
 0x7c1   : >> { %3310 = vxpose.xlu0.c.b16.start.end [1/1] (short) (narrow) %v2030_v12, 16  ;;  %v2210_v4 = vcombine.low %v2186_v3, %v2202_v13  ;;  %v2127_v12 = vcombine.high %v1656_v20, %v1672_v46  ;;  %v2174_v14 = vcombine.high %v2150_v31, %v8586_v21  ;;  %v2209_v20 = vrot.slane %v2195_v58, %v10490_v25 }
 0x7c3   : >> { %3326 = vxpose.xlu1.c.b16.start.end [1/1] (short) (narrow) %v2098_v2, 16  ;;  %v2218_v34 = vrot.slane %v2210_v4, %v9494_v5  ;;  %v2211_v2 = vcombine.high %v2186_v3, %v2202_v13  ;;  %v2141_v16 = vrot.slane %v2127_v12, %v10490_v25  ;;  %v2226_v35 = vcombine.low %v2193_v8, %v2209_v20 }
 0x7c4   : >> { %v1696_v13 = vpack.i.b16 %v9464_v10, %v9466_v11  ;;  %v1683_v3 = vshrl.u32 %v9438_v55, 16  ;;  %v1682_v10 = vshrl.u32 %v9410_v38, 16  ;;  %v1692_v11 = vpack.i.b16 %v1691_v53, %v1690_v33 }
 0x7c5   : >> { %3342 = vxpose.xlu0.c.b16.start.end [1/1] (short) (narrow) %v2040_v50, 16  ;;  %v2242_v6 = vcombine.high %v2218_v34, %v8586_v21  ;;  %v2157_v50 = vrot.slane %v2143_v32, %v9494_v5  ;;  %v2225_v46 = vrot.slane %v2211_v2, %v9494_v5  ;;  %v2158_v47 = vcombine.low %v2125_v52, %v2141_v16  ;;  %v9604_v32 = vpop.trf.xlu1 }
 0x7c6   : >> { %v2234_v4 = vrot.slane %v2226_v35, %v9494_v5  ;;  %v2159_v12 = vcombine.high %v2125_v52, %v2141_v16  ;;  %v1684_v45 = vpack.i.b16 %v1683_v3, %v1682_v10  ;;  %v2227_v2 = vcombine.high %v2193_v8, %v2209_v20 }
 0x7c7   : >> { %3358 = vxpose.xlu1.c.b16.start.end [1/1] (short) (narrow) %v2108_v0, 16  ;;  %v2175_v19 = vcombine.high %v2157_v50, %v8586_v21  ;;  %v1707_v0 = vshrl.u32 %v1577_v9, 16  ;;  %v2243_v29 = vcombine.high %v2225_v46, %v8586_v21 }
 0x7c8   : >> { %v2173_v16 = vrot.slane %v2159_v12, %v9494_v5 }
 0x7c9   : >> { %3374 = vxpose.xlu0.c.b16.start.end [1/1] (short) (narrow) %v2037_v49, 16  ;;  %v2166_v49 = vrot.slane %v2158_v47, %v9494_v5  ;;  %v9612_v52 = vpop.trf.xlu1 }
 0x7ca   : >> { %v2177_v15 = vcombine.high %v2173_v16, %v8586_v21 }
 0x7cb   : >> { %3390 = vxpose.xlu1.c.b16.start.end [1/1] (short) (narrow) %v2105_v36, 16  ;;  %v1688_v36 = vpack.i.b16 %v9436_v54, %v9408_v37  ;;  %v2176_v54 = vcombine.high %v2166_v49, %v8586_v21 }
 0x7cd   : >> { %3406 = vxpose.xlu0.c.b16.start.end [1/1] (short) (narrow) %v2041_v51, 16  ;;  %v9594_v51 = vpop.trf.xlu0 }
 0x7cf   : >> { %3422 = vxpose.xlu1.c.b16.start.end [1/1] (short) (narrow) %v2109_v17, 16  ;;  %v1708_v17 = vpack.i.b16 %v1707_v0, %v1706_v30 }
 0x7d1   : >> { %3438 = vxpose.xlu0.c.b16.start.end [1/1] (short) (narrow) %v2150_v31, 16  ;;  %v1680_v31 = vpack.i.b16 %v9438_v55, %v9410_v38  ;;  %v2330_v58 = vcombine.low %v1692_v11, %v1708_v17  ;;  %v2331_v3 = vcombine.high %v1692_v11, %v1708_v17 }
 0x7d3   : >> { %3454 = vxpose.xlu1.c.b16.start.end [1/1] (short) (narrow) %v2218_v34, 16  ;;  %v2262_v34 = vcombine.low %v1688_v36, %v9584_v48  ;;  %v2246_v37 = vcombine.low %v1680_v31, %v1696_v13  ;;  %v2338_v9 = vrot.slane %v2330_v58, %v10490_v25  ;;  %v2247_v33 = vcombine.high %v1680_v31, %v1696_v13 }
 0x7d4   : >> { %v2345_v17 = vrot.slane %v2331_v3, %v10490_v25 }
 0x7d5   : >> { %3470 = vxpose.xlu0.c.b16.start.end [1/1] (short) (narrow) %v2174_v14, 16  ;;  %v1700_v14 = vpack.i.b16 %v1699_v18, %v1698_v63  ;;  %v2270_v55 = vrot.slane %v2262_v34, %v10490_v25  ;;  %v2254_v38 = vrot.slane %v2246_v37, %v10490_v25  ;;  %v2261_v37 = vrot.slane %v2247_v33, %v10490_v25 }
 0x7d7   : >> { %3486 = vxpose.xlu1.c.b16.start.end [1/1] (short) (narrow) %v2242_v6, 16  ;;  %v2244_v6 = vcombine.high %v2234_v4, %v8586_v21  ;;  %v2314_v7 = vcombine.low %v1684_v45, %v1700_v14  ;;  %v2278_v20 = vcombine.low %v2254_v38, %v2270_v55  ;;  %v2279_v63 = vcombine.high %v2254_v38, %v2270_v55 }
 0x7d8   : >> { %v9652_v38 = vpack.i.b16 %v9604_v32, %v9594_v51 }
 0x7d9   : >> { %3502 = vxpose.xlu0.c.b16.start.end [1/1] (short) (narrow) %v2157_v50, 16  ;;  %v9608_v50 = vpop.trf.xlu0  ;;  %v2286_v30 = vrot.slane %v2278_v20, %v9494_v5  ;;  %v1731_v20 = vshrl.u32 %v9468_v1, 16 }
 0x7db   : >> { %3518 = vxpose.xlu1.c.b16.start.end [1/1] (short) (narrow) %v2225_v46, 16  ;;  %v2241_v46 = vrot.slane %v2227_v2, %v9494_v5  ;;  %v2310_v18 = vcombine.high %v2286_v30, %v8586_v21 }
 0x7dd   : >> { %3534 = vxpose.xlu0.c.b16.start.end [1/1] (short) (narrow) %v2175_v19, 16  ;;  %v2322_v19 = vrot.slane %v2314_v7, %v10490_v25  ;;  %v9618_v47 = vpop.trf.xlu0  ;;  %v2245_v8 = vcombine.high %v2241_v46, %v8586_v21 }
 0x7df   : >> { %3550 = vxpose.xlu1.c.b16.start.end [1/1] (short) (narrow) %v2243_v29, 16  ;;  %v2346_v0 = vcombine.low %v2322_v19, %v2338_v9  ;;  %v9622_v29 = vpop.trf.xlu1 }
 0x7e1   : >> { %3566 = vxpose.xlu0.c.b16.start.end [1/1] (short) (narrow) %v2166_v49, 16  ;;  %v2354_v35 = vrot.slane %v2346_v0, %v9494_v5  ;;  %v2263_v49 = vcombine.high %v1688_v36, %v9584_v48  ;;  %v9626_v53 = vpop.trf.xlu0  ;;  %v2293_v48 = vrot.slane %v2279_v63, %v9494_v5  ;;  %v2315_v36 = vcombine.high %v1684_v45, %v1700_v14 }
 0x7e2   : >> { %v1739_v14 = vshrl.u32 %v9604_v32, 16  ;;  %v1738_v45 = vshrl.u32 %v9594_v51, 16  ;;  %v9664_v0 = vpack.i.b16 %v9468_v1, %v9470_v22  ;;  %v1722_v51 = vshrl.u32 %v9412_v39, 16 }
 0x7e3   : >> { %3582 = vxpose.xlu1.c.b16.start.end [1/1] (short) (narrow) %v2234_v4, 16  ;;  %v9629_v4 = vpop.trf.xlu1  ;;  %v2378_v34 = vcombine.high %v2354_v35, %v8586_v21  ;;  %v2277_v12 = vrot.slane %v2263_v49, %v10490_v25  ;;  %v2311_v11 = vcombine.high %v2293_v48, %v8586_v21  ;;  %v2329_v2 = vrot.slane %v2315_v36, %v10490_v25 }
 0x7e4   : >> { %v1715_v32 = vshrl.u32 %v9442_v59, 16 }
 0x7e5   : >> { %3598 = vxpose.xlu0.c.b16.start.end [1/1] (short) (narrow) %v2176_v54, 16  ;;  %v2347_v54 = vcombine.high %v2322_v19, %v2338_v9  ;;  %v2362_v7 = vcombine.low %v2329_v2, %v2345_v17  ;;  %v1730_v19 = vshrl.u32 %v9470_v22, 16  ;;  %v2295_v22 = vcombine.high %v2261_v37, %v2277_v12 }
 0x7e7   : >> { %3614 = vxpose.xlu1.c.b16.start.end [1/1] (short) (narrow) %v2244_v6, 16  ;;  %v2361_v13 = vrot.slane %v2347_v54, %v9494_v5  ;;  %v2294_v6 = vcombine.low %v2261_v37, %v2277_v12  ;;  %v2370_v49 = vrot.slane %v2362_v7, %v9494_v5  ;;  %v9682_v3 = vpack.i.b16 %v1731_v20, %v1730_v19 }
 0x7e8   : >> { %v2363_v12 = vcombine.high %v2329_v2, %v2345_v17 }
 0x7e9   : >> { %3630 = vxpose.xlu0.c.b16.start.end [1/1] (short) (narrow) %v2173_v16, 16  ;;  %v2379_v16 = vcombine.high %v2361_v13, %v8586_v21  ;;  %v2302_v9 = vrot.slane %v2294_v6, %v9494_v5  ;;  %v2380_v36 = vcombine.high %v2370_v49, %v8586_v21 }
 0x7eb   : >> { %3646 = vxpose.xlu1.c.b16.start.end [1/1] (short) (narrow) %v2241_v46, 16  ;;  %v2312_v1 = vcombine.high %v2302_v9, %v8586_v21 }
 0x7ed   : >> { %3662 = vxpose.xlu0.c.b16.start.end [1/1] (short) (narrow) %v2177_v15, 16  ;;  %v1723_v15 = vshrl.u32 %v9440_v56, 16 }
 0x7ef   : >> { %3678 = vxpose.xlu1.c.b16.start.end [1/1] (short) (narrow) %v2245_v8, 16  ;;  %v1720_v8 = vpack.i.b16 %v9440_v56, %v9412_v39  ;;  %v1714_v39 = vshrl.u32 %v9414_v40, 16  ;;  %v9680_v33 = vpack.i.b16 %v1723_v15, %v1722_v51 }
 0x7f1   : >> { %3694 = vxpose.xlu0.c.b16.start.end [1/1] (short) (narrow) %v2286_v30, 16  ;;  %v9668_v30 = vpack.i.b16 %v1739_v14, %v1738_v45  ;;  %v2398_v56 = vcombine.low %v1720_v8, %v9652_v38  ;;  %v9686_v54 = vpack.i.b16 %v1715_v32, %v1714_v39  ;;  %v2377_v45 = vrot.slane %v2363_v12, %v9494_v5 }
 0x7f3   : >> { %3710 = vxpose.xlu1.c.b16.start.end [1/1] (short) (narrow) %v2354_v35, 16  ;;  %v2381_v20 = vcombine.high %v2377_v45, %v8586_v21 }
 0x7f5   : >> { %3726 = vxpose.xlu0.c.b16.start.end [1/1] (short) (narrow) %v2310_v18, 16  ;;  %v9675_v18 = vpack.i.b16 %v9442_v59, %v9414_v40  ;;  %v2466_v59 = vcombine.low %v9680_v33, %v9668_v30  ;;  %v2406_v40 = vrot.slane %v2398_v56, %v10490_v25  ;;  %v2399_v56 = vcombine.high %v1720_v8, %v9652_v38 }
 0x7f7   : >> { %v9633_v10 = vpop.trf.xlu0  ;;  %3742 = vxpose.xlu1.c.b16.start.end [1/1] (short) (narrow) %v2378_v34, 16  ;;  %v2382_v34 = vcombine.low %v9675_v18, %v9664_v0  ;;  %v2383_v8 = vcombine.high %v9675_v18, %v9664_v0 }
 0x7f9   : >> { %3758 = vxpose.xlu0.c.b16.start.end [1/1] (short) (narrow) %v2293_v48, 16  ;;  %v9637_v58 = vpop.trf.xlu1  ;;  %v2390_v6 = vrot.slane %v2382_v34, %v10490_v25 }
 0x7fb   : >> { %v9641_v31 = vpop.trf.xlu0  ;;  %3774 = vxpose.xlu1.c.b16.start.end [1/1] (short) (narrow) %v2361_v13, 16  ;;  %v2309_v13 = vrot.slane %v2295_v22, %v9494_v5  ;;  %v2414_v2 = vcombine.low %v2390_v6, %v2406_v40  ;;  %v2415_v38 = vcombine.high %v2390_v6, %v2406_v40 }
 0x7fd   : >> { %3790 = vxpose.xlu0.c.b16.start.end [1/1] (short) (narrow) %v2311_v11, 16  ;;  %v9647_v55 = vpop.trf.xlu1  ;;  %v2450_v11 = vcombine.low %v9686_v54, %v9682_v3  ;;  %v2313_v17 = vcombine.high %v2309_v13, %v8586_v21 }
 0x7ff   : >> { %v9654_v46 = vpop.trf.xlu0  ;;  %3806 = vxpose.xlu1.c.b16.start.end [1/1] (short) (narrow) %v2379_v16, 16  ;;  %v2474_v16 = vrot.slane %v2466_v59, %v10490_v25 }
 0x801   : >> { %3822 = vxpose.xlu0.c.b16.start.end [1/1] (short) (narrow) %v2302_v9, 16  ;;  %v9670_v35 = vpop.trf.xlu1  ;;  %v2458_v9 = vrot.slane %v2450_v11, %v10490_v25 }
 0x803   : >> { %v3030_v63 = vpop.trf.xlu0  ;;  %3838 = vxpose.xlu1.c.b16.start.end [1/1] (short) (narrow) %v2370_v49, 16  ;;  %v2482_v19 = vcombine.low %v2458_v9, %v2474_v16  ;;  %v2422_v49 = vrot.slane %v2414_v2, %v9494_v5  ;;  %v2483_v18 = vcombine.high %v2458_v9, %v2474_v16 }
 0x804   : >> { %v4982_v51 = vcombine.low %v9641_v31, %v3030_v63 }
 0x805   : >> { %3854 = vxpose.xlu0.c.b16.start.end [1/1] (short) (narrow) %v2312_v1, 16  ;;  %v3046_v48 = vpop.trf.xlu1  ;;  %v4974_v1 = vcombine.low %v9633_v10, %v9654_v46  ;;  %v2490_v59 = vrot.slane %v2482_v19, %v9494_v5  ;;  %v2446_v12 = vcombine.high %v2422_v49, %v8586_v21  ;;  %v9715_v10 = vrot.slane %v2399_v56, %v10490_v25 }
 0x806   : >> { %v5031_v22 = vcombine.low %v9647_v55, %v3046_v48  ;;  %v4989_v31 = vrot.slane %v4982_v51, %v10490_v25  ;;  %v2467_v46 = vcombine.high %v9680_v33, %v9668_v30  ;;  %v2429_v30 = vrot.slane %v2415_v38, %v9494_v5 }
 0x807   : >> { %v3062_v37 = vpop.trf.xlu0  ;;  %3870 = vxpose.xlu1.c.b16.start.end [1/1] (short) (narrow) %v2380_v36, 16  ;;  %v5023_v36 = vcombine.low %v9637_v58, %v9670_v35  ;;  %v4981_v48 = vrot.slane %v4974_v1, %v10490_v25  ;;  %v2514_v0 = vcombine.high %v2490_v59, %v8586_v21  ;;  %v2451_v33 = vcombine.high %v9686_v54, %v9682_v3 }
 0x808   : >> { %v5038_v58 = vrot.slane %v5031_v22, %v10490_v25  ;;  %v9740_v51 = vrot.slane %v2467_v46, %v10490_v25  ;;  %v1754_v38 = vshrl.u32 %v9416_v41, 16 }
 0x809   : >> { %3886 = vxpose.xlu0.c.b16.start.end [1/1] (short) (narrow) %v2309_v13, 16  ;;  %v3078_v14 = vpop.trf.xlu1  ;;  %v5030_v11 = vrot.slane %v5023_v36, %v10490_v25  ;;  %v5006_v6 = vcombine.low %v4981_v48, %v4989_v31  ;;  %v2465_v1 = vrot.slane %v2451_v33, %v10490_v25  ;;  %v1770_v36 = vshrl.u32 %v9608_v50, 16 }
 0x80b   : >> { %v3094_v7 = vpop.trf.xlu0  ;;  %3902 = vxpose.xlu1.c.b16.start.end [1/1] (short) (narrow) %v2377_v45, 16  ;;  %v5055_v2 = vcombine.low %v5030_v11, %v5038_v58  ;;  %v5013_v56 = vrot.slane %v5006_v6, %v9494_v5  ;;  %v9767_v58 = vpack.i.b16 %v9444_v60, %v9416_v41  ;;  %v1747_v41 = vshrl.u32 %v9446_v61, 16 }
 0x80d   : >> { %3918 = vxpose.xlu0.c.b16.start.end [1/1] (short) (narrow) %v2313_v17, 16  ;;  %v3110_v15 = vpop.trf.xlu1  ;;  %v9731_v17 = vrot.slane %v2383_v8, %v10490_v25  ;;  %v9760_v8 = vpack.i.b16 %v9612_v52, %v9608_v50  ;;  %v9774_v50 = vpack.i.b16 %v9472_v23, %v9474_v24 }
 0x80f   : >> { %v3126_v32 = vpop.trf.xlu0  ;;  %3934 = vxpose.xlu1.c.b16.start.end [1/1] (short) (narrow) %v2381_v20, 16  ;;  %v2431_v33 = vcombine.high %v9731_v17, %v9715_v10 }
 0x810   : >> { %v4990_v39 = vcombine.low %v3062_v37, %v3126_v32  ;;  %v2447_v32 = vcombine.high %v2429_v30, %v8586_v21 }
 0x811   : >> { %3950 = vxpose.xlu0.c.b16.start.end [1/1] (short) (narrow) %v2422_v49, 16  ;;  %v3142_v34 = vpop.trf.xlu1  ;;  %v2430_v49 = vcombine.low %v9731_v17, %v9715_v10  ;;  %v2499_v17 = vcombine.high %v2465_v1, %v9740_v51 }
 0x812   : >> { %v5039_v35 = vcombine.low %v3078_v14, %v3142_v34  ;;  %v4997_v37 = vrot.slane %v4990_v39, %v10490_v25  ;;  %v5062_v39 = vrot.slane %v5055_v2, %v9494_v5 }
 0x813   : >> { %v3158_v63 = vpop.trf.xlu0  ;;  %3966 = vxpose.xlu1.c.b16.start.end [1/1] (short) (narrow) %v2490_v59, 16  ;;  %v1771_v59 = vshrl.u32 %v9612_v52, 16  ;;  %v2438_v46 = vrot.slane %v2430_v49, %v9494_v5 }
 0x814   : >> { %v4998_v55 = vcombine.low %v3094_v7, %v3158_v63  ;;  %v5046_v20 = vrot.slane %v5039_v35, %v10490_v25  ;;  %v1755_v35 = vshrl.u32 %v9444_v60, 16 }
 0x815   : >> { %3982 = vxpose.xlu0.c.b16.start.end [1/1] (short) (narrow) %v2446_v12, 16  ;;  %v3174_v13 = vpop.trf.xlu1  ;;  %v2498_v12 = vcombine.low %v2465_v1, %v9740_v51  ;;  %v9781_v60 = vpack.i.b16 %v1771_v59, %v1770_v36 }
 0x816   : >> { %v5005_v40 = vrot.slane %v4998_v55, %v10490_v25  ;;  %v5047_v45 = vcombine.low %v3110_v15, %v3174_v13  ;;  %v2497_v15 = vrot.slane %v2483_v18, %v9494_v5  ;;  %v9778_v18 = vpack.i.b16 %v9446_v61, %v9418_v42 }
 0x817   : >> { %v9725_v7 = vpop.trf.xlu0  ;;  %3998 = vxpose.xlu1.c.b16.start.end [1/1] (short) (narrow) %v2514_v0, 16  ;;  %v2506_v6 = vrot.slane %v2498_v12, %v9494_v5  ;;  %v9792_v61 = vpack.i.b16 %v1755_v35, %v1754_v38 }
 0x818   : >> { %v5014_v14 = vcombine.low %v4997_v37, %v5005_v40  ;;  %v5054_v16 = vrot.slane %v5047_v45, %v10490_v25  ;;  %v2515_v63 = vcombine.high %v2497_v15, %v8586_v21  ;;  %v1763_v37 = vshrl.u32 %v9472_v23, 16 }
 0x819   : >> { %4014 = vxpose.xlu0.c.b16.start.end [1/1] (short) (narrow) %v2429_v30, 16  ;;  %v9735_v9 = vpop.trf.xlu1  ;;  %v1762_v40 = vshrl.u32 %v9474_v24, 16  ;;  %v2534_v23 = vcombine.low %v9767_v58, %v9760_v8  ;;  %v2448_v30 = vcombine.high %v2438_v46, %v8586_v21 }
 0x81a   : >> { %v5021_v19 = vrot.slane %v5014_v14, %v9494_v5  ;;  %v5063_v3 = vcombine.low %v5046_v20, %v5054_v16  ;;  %v1746_v14 = vshrl.u32 %v9418_v42, 16  ;;  %v2518_v20 = vcombine.low %v9778_v18, %v9774_v50 }
 0x81b   : >> { %v9742_v54 = vpop.trf.xlu0  ;;  %4030 = vxpose.xlu1.c.b16.start.end [1/1] (short) (narrow) %v2497_v15, 16  ;;  %v9794_v2 = vpack.i.b16 %v1763_v37, %v1762_v40  ;;  %v2602_v15 = vcombine.low %v9792_v61, %v9781_v60  ;;  %v2516_v42 = vcombine.high %v2506_v6, %v8586_v21  ;;  %v2535_v37 = vcombine.high %v9767_v58, %v9760_v8 }
 0x81c   : >> { %v5022_v22 = vcombine.low %v5013_v56, %v5021_v19  ;;  %v5070_v34 = vrot.slane %v5063_v3, %v9494_v5  ;;  %v9799_v16 = vpack.i.b16 %v1747_v41, %v1746_v14  ;;  %v2542_v19 = vrot.slane %v2534_v23, %v10490_v25 }
 0x81d   : >> { %4046 = vxpose.xlu0.c.b16.start.end [1/1] (short) (narrow) %v2447_v32, 16  ;;  %v9753_v31 = vpop.trf.xlu1  ;;  %v2445_v32 = vrot.slane %v2431_v33, %v9494_v5  ;;  %v2526_v56 = vrot.slane %v2518_v20, %v10490_v25  ;;  %v2519_v58 = vcombine.high %v9778_v18, %v9774_v50 }
 0x81e   : >> { %v5071_v48 = vcombine.low %v5062_v39, %v5070_v34  ;;  %v5762_v13 = vshrl.u32 %v5022_v22, 16  ;;  %v2586_v49 = vcombine.low %v9799_v16, %v9794_v2  ;;  %v2513_v39 = vrot.slane %v2499_v17, %v9494_v5 }
 0x81f   : >> { %v9762_v55 = vpop.trf.xlu0  ;;  %4062 = vxpose.xlu1.c.b16.start.end [1/1] (short) (narrow) %v2515_v63, 16  ;;  %v2610_v34 = vrot.slane %v2602_v15, %v10490_v25  ;;  %v2449_v1 = vcombine.high %v2445_v32, %v8586_v21  ;;  %v2550_v59 = vcombine.low %v2526_v56, %v2542_v19  ;;  %v2551_v8 = vcombine.high %v2526_v56, %v2542_v19 }
 0x820   : >> { %v5760_v52 = vpack.i.b16 %v5071_v48, %v5022_v22  ;;  %v5763_v0 = vshrl.u32 %v5071_v48, 16  ;;  %v2594_v36 = vrot.slane %v2586_v49, %v10490_v25  ;;  %v2517_v12 = vcombine.high %v2513_v39, %v8586_v21 }
 0x821   : >> { %4078 = vxpose.xlu0.c.b16.start.end [1/1] (short) (narrow) %v2438_v46, 16  ;;  %v9783_v11 = vpop.trf.xlu1  ;;  %v2558_v35 = vrot.slane %v2550_v59, %v9494_v5  ;;  %v5072_v40 = vcombine.low %v9725_v7, %v9762_v55  ;;  %v9831_v7 = vrot.slane %v2535_v37, %v10490_v25  ;;  %v2603_v55 = vcombine.high %v9792_v61, %v9781_v60 }
 0x822   : >> { %7296 = vmatpush3.bf16.msra.mxu0 %v5760_v52  ;;  %v5764_v45 = vpack.i.b16 %v5763_v0, %v5762_v13  ;;  %v2618_v38 = vcombine.low %v2594_v36, %v2610_v34  ;;  %v2619_v18 = vcombine.high %v2594_v36, %v2610_v34  ;;  %v2565_v60 = vrot.slane %v2551_v8, %v9494_v5 }
 0x823   : >> { %v3286_v24 = vpop.trf.xlu0  ;;  %4094 = vxpose.xlu1.c.b16.start.end [1/1] (short) (narrow) %v2506_v6, 16  ;;  %7297 = vmatprep.subr.bf16.mxu0 %v8587_v26  ;;  %v2587_v61 = vcombine.high %v9799_v16, %v9794_v2  ;;  %v9847_v19 = vrot.slane %v2519_v58, %v10490_v25  ;;  %v9856_v34 = vrot.slane %v2603_v55, %v10490_v25  ;;  %v1794_v8 = vshrl.u32 %v9478_v28, 16  ;;  %v10491_v55 = vld [vmem:[#allocation70_spill] sm:$0xff] }
 0x824   : >> { %7316 = vmatpush3.bf16.msra.mxu1 %v5764_v45  ;;  %v5080_v46 = vcombine.low %v9742_v54, %v3286_v24  ;;  %v2626_v41 = vrot.slane %v2618_v38, %v9494_v5  ;;  %v5121_v54 = vcombine.low %v9735_v9, %v9783_v11  ;;  %v2582_v24 = vcombine.high %v2558_v35, %v8586_v21 }
 0x825   : >> { %4110 = vxpose.xlu0.c.b16.start.end [1/1] (short) (narrow) %v2448_v30, 16  ;;  %v3302_v10 = vpop.trf.xlu1  ;;  %7317 = vmatprep.subr.bf16.mxu1 %v8587_v26  ;;  %v5079_v45 = vrot.slane %v5072_v40, %v10490_v25  ;;  %v2566_v59 = vcombine.low %v9847_v19, %v9831_v7  ;;  %v2601_v36 = vrot.slane %v2587_v61, %v10490_v25 }
 0x826   : >> { %v5129_v52 = vcombine.low %v9753_v31, %v3302_v10  ;;  %v5087_v6 = vrot.slane %v5080_v46, %v10490_v25  ;;  %v2650_v50 = vcombine.high %v2626_v41, %v8586_v21  ;;  %v5128_v20 = vrot.slane %v5121_v54, %v10490_v25 }
 0x827   : >> { %v3318_v3 = vpop.trf.xlu0  ;;  %4126 = vxpose.xlu1.c.b16.start.end [1/1] (short) (narrow) %v2516_v42, 16  ;;  %v1803_v46 = vshrl.u32 %v9622_v29, 16  ;;  %v2634_v40 = vcombine.low %v2601_v36, %v9856_v34  ;;  %v2635_v61 = vcombine.high %v2601_v36, %v9856_v34 }
 0x828   : >> { %v5136_v9 = vrot.slane %v5129_v52, %v10490_v25  ;;  %v5104_v15 = vcombine.low %v5079_v45, %v5087_v6  ;;  %v1786_v52 = vshrl.u32 %v9420_v43, 16  ;;  %v9883_v6 = vpack.i.b16 %v9448_v62, %v9420_v43 }
 0x829   : >> { %4142 = vxpose.xlu0.c.b16.start.end [1/1] (short) (narrow) %v2445_v32, 16  ;;  %v3334_v22 = vpop.trf.xlu1  ;;  %v9894_v45 = vpack.i.b16 %v10491_v55, %v9422_v44  ;;  %v1779_v43 = vshrl.u32 %v10491_v55, 16 }
 0x82a   : >> { %v5111_v2 = vrot.slane %v5104_v15, %v9494_v5 }
 0x82b   : >> { %v3350_v51 = vpop.trf.xlu0  ;;  %4158 = vxpose.xlu1.c.b16.start.end [1/1] (short) (narrow) %v2513_v39, 16  ;;  %v2633_v39 = vrot.slane %v2619_v18, %v9494_v5 }
 0x82d   : >> { %4174 = vxpose.xlu0.c.b16.start.end [1/1] (short) (narrow) %v2449_v1, 16  ;;  %v3366_v63 = vpop.trf.xlu1  ;;  %v2583_v1 = vcombine.high %v2565_v60, %v8586_v21  ;;  %v2651_v37 = vcombine.high %v2633_v39, %v8586_v21 }
 0x82f   : >> { %v3382_v48 = vpop.trf.xlu0  ;;  %4190 = vxpose.xlu1.c.b16.start.end [1/1] (short) (narrow) %v2517_v12, 16 }
 0x830   : >> { %v5088_v13 = vcombine.low %v3318_v3, %v3382_v48  ;;  %v5153_v3 = vcombine.low %v5128_v20, %v5136_v9  ;;  %v1802_v48 = vshrl.u32 %v9618_v47, 16 }
 0x831   : >> { %4206 = vxpose.xlu0.c.b16.start.end [1/1] (short) (narrow) %v2558_v35, 16  ;;  %v3398_v0 = vpop.trf.xlu1 }
 0x832   : >> { %v5137_v11 = vcombine.low %v3334_v22, %v3398_v0  ;;  %v5095_v30 = vrot.slane %v5088_v13, %v10490_v25  ;;  %v9876_v13 = vpack.i.b16 %v9622_v29, %v9618_v47  ;;  %v9890_v47 = vpack.i.b16 %v9476_v27, %v9478_v28 }
 0x833   : >> { %v3414_v23 = vpop.trf.xlu0  ;;  %4222 = vxpose.xlu1.c.b16.start.end [1/1] (short) (narrow) %v2626_v41, 16  ;;  %v2574_v41 = vrot.slane %v2566_v59, %v9494_v5 }
 0x834   : >> { %v5096_v31 = vcombine.low %v3350_v51, %v3414_v23  ;;  %v5144_v32 = vrot.slane %v5137_v11, %v10490_v25  ;;  %v1787_v23 = vshrl.u32 %v9448_v62, 16  ;;  %v9897_v62 = vpack.i.b16 %v1803_v46, %v1802_v48 }
 0x835   : >> { %4238 = vxpose.xlu0.c.b16.start.end [1/1] (short) (narrow) %v2582_v24, 16  ;;  %v3430_v14 = vpop.trf.xlu1  ;;  %v1795_v24 = vshrl.u32 %v9476_v27, 16  ;;  %v2642_v11 = vrot.slane %v2634_v40, %v9494_v5  ;;  %v2670_v27 = vcombine.low %v9883_v6, %v9876_v13  ;;  %v2654_v15 = vcombine.low %v9894_v45, %v9890_v47 }
 0x836   : >> { %v5103_v33 = vrot.slane %v5096_v31, %v10490_v25  ;;  %v5145_v10 = vcombine.low %v3366_v63, %v3430_v14  ;;  %v5160_v63 = vrot.slane %v5153_v3, %v9494_v5  ;;  %v2567_v14 = vcombine.high %v9847_v19, %v9831_v7 }
 0x837   : >> { %v9841_v42 = vpop.trf.xlu0  ;;  %4254 = vxpose.xlu1.c.b16.start.end [1/1] (short) (narrow) %v2650_v50, 16  ;;  %v1778_v50 = vshrl.u32 %v9422_v44, 16  ;;  %v9908_v18 = vpack.i.b16 %v1787_v23, %v1786_v52  ;;  %v9910_v20 = vpack.i.b16 %v1795_v24, %v1794_v8  ;;  %v2652_v44 = vcombine.high %v2642_v11, %v8586_v21 }
 0x838   : >> { %v5112_v17 = vcombine.low %v5095_v30, %v5103_v33  ;;  %v5152_v49 = vrot.slane %v5145_v10, %v10490_v25  ;;  %v2584_v33 = vcombine.high %v2574_v41, %v8586_v21  ;;  %v2581_v3 = vrot.slane %v2567_v14, %v9494_v5 }
 0x839   : >> { %4270 = vxpose.xlu0.c.b16.start.end [1/1] (short) (narrow) %v2565_v60, 16  ;;  %v9852_v22 = vpop.trf.xlu1  ;;  %v9915_v10 = vpack.i.b16 %v1779_v43, %v1778_v50  ;;  %v2738_v60 = vcombine.low %v9908_v18, %v9897_v62 }
 0x83a   : >> { %v5119_v56 = vrot.slane %v5112_v17, %v9494_v5  ;;  %v5161_v16 = vcombine.low %v5144_v32, %v5152_v49  ;;  %v2678_v17 = vrot.slane %v2670_v27, %v10490_v25  ;;  %v2662_v49 = vrot.slane %v2654_v15, %v10490_v25 }
 0x83b   : >> { %v9859_v51 = vpop.trf.xlu0  ;;  %4286 = vxpose.xlu1.c.b16.start.end [1/1] (short) (narrow) %v2633_v39, 16  ;;  %v2722_v32 = vcombine.low %v9915_v10, %v9910_v20  ;;  %v2649_v39 = vrot.slane %v2635_v61, %v9494_v5 }
 0x83c   : >> { %v5168_v12 = vrot.slane %v5161_v16, %v9494_v5  ;;  %v5120_v38 = vcombine.low %v5111_v2, %v5119_v56  ;;  %v2746_v2 = vrot.slane %v2738_v60, %v10490_v25  ;;  %v2585_v16 = vcombine.high %v2581_v3, %v8586_v21 }
 0x83d   : >> { %4302 = vxpose.xlu0.c.b16.start.end [1/1] (short) (narrow) %v2583_v1, 16  ;;  %v9869_v35 = vpop.trf.xlu1  ;;  %v2686_v1 = vcombine.low %v2662_v49, %v2678_v17  ;;  %v2730_v59 = vrot.slane %v2722_v32, %v10490_v25 }
 0x83e   : >> { %v5169_v54 = vcombine.low %v5160_v63, %v5168_v12  ;;  %v5770_v58 = vshrl.u32 %v5120_v38, 16  ;;  %v2653_v63 = vcombine.high %v2649_v39, %v8586_v21 }
 0x83f   : >> { %v9878_v0 = vpop.trf.xlu0  ;;  %4318 = vxpose.xlu1.c.b16.start.end [1/1] (short) (narrow) %v2651_v37, 16  ;;  %v2754_v12 = vcombine.low %v2730_v59, %v2746_v2  ;;  %v2694_v48 = vrot.slane %v2686_v1, %v9494_v5  ;;  %v2671_v37 = vcombine.high %v9883_v6, %v9876_v13  ;;  %v2687_v13 = vcombine.high %v2662_v49, %v2678_v17 }
 0x840   : >> { %v5768_v29 = vpack.i.b16 %v5169_v54, %v5120_v38  ;;  %v5771_v31 = vshrl.u32 %v5169_v54, 16  ;;  %v5170_v40 = vcombine.low %v9841_v42, %v9878_v0  ;;  %v2655_v6 = vcombine.high %v9894_v45, %v9890_v47 }
 0x841   : >> { %4334 = vxpose.xlu0.c.b16.start.end [1/1] (short) (narrow) %v2574_v41, 16  ;;  %v9899_v9 = vpop.trf.xlu1  ;;  %v2762_v23 = vrot.slane %v2754_v12, %v9494_v5  ;;  %v9947_v42 = vrot.slane %v2671_v37, %v10490_v25  ;;  %v2739_v0 = vcombine.high %v9908_v18, %v9897_v62  ;;  %v2755_v45 = vcombine.high %v2730_v59, %v2746_v2 }
 0x842   : >> { %7298 = vmatpush3.bf16.msra.mxu0 %v5768_v29  ;;  %v5772_v30 = vpack.i.b16 %v5771_v31, %v5770_v58  ;;  %v2718_v29 = vcombine.high %v2694_v48, %v8586_v21  ;;  %v5177_v58 = vrot.slane %v5170_v40, %v10490_v25  ;;  %v2701_v62 = vrot.slane %v2687_v13, %v9494_v5  ;;  %v10493_v40 = vld [vmem:[#allocation71_spill] sm:$0xff]  ;;  %v10496_v13 = vld [vmem:[#allocation69_spill] sm:$0xff] }
 0x843   : >> { %v3542_v28 = vpop.trf.xlu0  ;;  %4350 = vxpose.xlu1.c.b16.start.end [1/1] (short) (narrow) %v2642_v11, 16  ;;  %7299 = vmatprep.subr.bf16.mxu0 %v8587_v26  ;;  %v2786_v47 = vcombine.high %v2762_v23, %v8586_v21  ;;  %v9963_v50 = vrot.slane %v2655_v6, %v10490_v25  ;;  %v2769_v61 = vrot.slane %v2755_v45, %v9494_v5  ;;  %v10497_v6 = vld [vmem:[#allocation72_spill] sm:$0xff] }
 0x844   : >> { %7318 = vmatpush3.bf16.msra.mxu1 %v5772_v30  ;;  %v5178_v38 = vcombine.low %v9859_v51, %v3542_v28  ;;  %v5219_v51 = vcombine.low %v9852_v22, %v9899_v9  ;;  %v9972_v17 = vrot.slane %v2739_v0, %v10490_v25  ;;  %v1811_v0 = vshrl.u32 %v10497_v6, 16 }
 0x845   : >> { %4366 = vxpose.xlu0.c.b16.start.end [1/1] (short) (narrow) %v2584_v33, 16  ;;  %v3558_v7 = vpop.trf.xlu1  ;;  %7319 = vmatprep.subr.bf16.mxu1 %v8587_v26  ;;  %v2723_v33 = vcombine.high %v9915_v10, %v9910_v20  ;;  %v2702_v32 = vcombine.low %v9963_v50, %v9947_v42  ;;  %v2787_v59 = vcombine.high %v2769_v61, %v8586_v21 }
 0x846   : >> { %v5227_v52 = vcombine.low %v9869_v35, %v3558_v7  ;;  %v5185_v24 = vrot.slane %v5178_v38, %v10490_v25  ;;  %v5226_v11 = vrot.slane %v5219_v51, %v10490_v25  ;;  %v9992_v38 = vpack.i.b16 %v9629_v4, %v9626_v53  ;;  %v10495_v51 = vld [vmem:[#allocation74_spill] sm:$0xff] }
 0x847   : >> { %v3574_v19 = vpop.trf.xlu0  ;;  %4382 = vxpose.xlu1.c.b16.start.end [1/1] (short) (narrow) %v2652_v44, 16  ;;  %v2737_v49 = vrot.slane %v2723_v33, %v10490_v25  ;;  %v2703_v45 = vcombine.high %v9963_v50, %v9947_v42 }
 0x848   : >> { %v5234_v22 = vrot.slane %v5227_v52, %v10490_v25  ;;  %v5202_v27 = vcombine.low %v5177_v58, %v5185_v24  ;;  %v1826_v24 = vshrl.u32 %v10495_v51, 16 }
 0x849   : >> { %4398 = vxpose.xlu0.c.b16.start.end [1/1] (short) (narrow) %v2581_v3, 16  ;;  %v3590_v56 = vpop.trf.xlu1  ;;  %v2719_v3 = vcombine.high %v2701_v62, %v8586_v21 }
 0x84a   : >> { %v5251_v18 = vcombine.low %v5226_v11, %v5234_v22  ;;  %v5209_v20 = vrot.slane %v5202_v27, %v9494_v5  ;;  %v1810_v11 = vshrl.u32 %v10496_v13, 16 }
 0x84b   : >> { %v3606_v34 = vpop.trf.xlu0  ;;  %4414 = vxpose.xlu1.c.b16.start.end [1/1] (short) (narrow) %v2649_v39, 16 }
 0x84c   : >> { %v10031_v33 = vpack.i.b16 %v1811_v0, %v1810_v11 }
 0x84d   : >> { %4430 = vxpose.xlu0.c.b16.start.end [1/1] (short) (narrow) %v2585_v16, 16  ;;  %v3622_v36 = vpop.trf.xlu1  ;;  %v1834_v16 = vshrl.u32 %v9626_v53, 16 }
 0x84f   : >> { %v3638_v46 = vpop.trf.xlu0  ;;  %4446 = vxpose.xlu1.c.b16.start.end [1/1] (short) (narrow) %v2653_v63, 16  ;;  %v10492_v63 = vld [vmem:[#allocation68_spill] sm:$0xff] }
 0x850   : >> { %v5186_v41 = vcombine.low %v3574_v19, %v3638_v46  ;;  %v1818_v12 = vshrl.u32 %v10492_v63, 16  ;;  %v9999_v52 = vpack.i.b16 %v10493_v40, %v10492_v63 }
 0x851   : >> { %4462 = vxpose.xlu0.c.b16.start.end [1/1] (short) (narrow) %v2694_v48, 16  ;;  %v3654_v54 = vpop.trf.xlu1  ;;  %v2710_v48 = vrot.slane %v2702_v32, %v9494_v5 }
 0x852   : >> { %v5235_v31 = vcombine.low %v3590_v56, %v3654_v54  ;;  %v5193_v55 = vrot.slane %v5186_v41, %v10490_v25  ;;  %v5258_v56 = vrot.slane %v5251_v18, %v9494_v5  ;;  %v1819_v41 = vshrl.u32 %v10493_v40, 16  ;;  %v10494_v54 = vld [vmem:[#allocation73_spill] sm:$0xff] }
 0x853   : >> { %v3670_v8 = vpop.trf.xlu0  ;;  %4478 = vxpose.xlu1.c.b16.start.end [1/1] (short) (narrow) %v2762_v23, 16  ;;  %v1827_v23 = vshrl.u32 %v10494_v54, 16  ;;  %v10006_v53 = vpack.i.b16 %v10494_v54, %v10495_v51  ;;  %v2771_v18 = vcombine.high %v2737_v49, %v9972_v17 }
 0x854   : >> { %v5194_v35 = vcombine.low %v3606_v34, %v3670_v8  ;;  %v5242_v15 = vrot.slane %v5235_v31, %v10490_v25  ;;  %v1835_v34 = vshrl.u32 %v9629_v4, 16  ;;  %v10024_v27 = vpack.i.b16 %v1819_v41, %v1818_v12 }
 0x855   : >> { %4494 = vxpose.xlu0.c.b16.start.end [1/1] (short) (narrow) %v2718_v29, 16  ;;  %v3686_v9 = vpop.trf.xlu1  ;;  %v2807_v12 = vcombine.high %v9999_v52, %v9992_v38 }
 0x856   : >> { %v5201_v43 = vrot.slane %v5194_v35, %v10490_v25  ;;  %v5243_v28 = vcombine.low %v3622_v36, %v3686_v9  ;;  %v2770_v36 = vcombine.low %v2737_v49, %v9972_v17  ;;  %v10010_v35 = vpack.i.b16 %v10497_v6, %v10496_v13 }
 0x857   : >> { %v9957_v30 = vpop.trf.xlu0  ;;  %4510 = vxpose.xlu1.c.b16.start.end [1/1] (short) (narrow) %v2786_v47, 16  ;;  %v10013_v58 = vpack.i.b16 %v1835_v34, %v1834_v16  ;;  %v2720_v47 = vcombine.high %v2710_v48, %v8586_v21 }
 0x858   : >> { %v5210_v14 = vcombine.low %v5193_v55, %v5201_v43  ;;  %v5250_v60 = vrot.slane %v5243_v28, %v10490_v25  ;;  %v2778_v31 = vrot.slane %v2770_v36, %v9494_v5  ;;  %v2806_v55 = vcombine.low %v9999_v52, %v9992_v38 }
 0x859   : >> { %4526 = vxpose.xlu0.c.b16.start.end [1/1] (short) (narrow) %v2701_v62, 16  ;;  %v9968_v44 = vpop.trf.xlu1  ;;  %v10026_v28 = vpack.i.b16 %v1827_v23, %v1826_v24  ;;  %v2790_v62 = vcombine.low %v10010_v35, %v10006_v53  ;;  %v2791_v52 = vcombine.high %v10010_v35, %v10006_v53 }
 0x85a   : >> { %v5217_v7 = vrot.slane %v5210_v14, %v9494_v5  ;;  %v5259_v10 = vcombine.low %v5242_v15, %v5250_v60  ;;  %v2874_v14 = vcombine.low %v10024_v27, %v10013_v58  ;;  %v2788_v50 = vcombine.high %v2778_v31, %v8586_v21 }
 0x85b   : >> { %v9975_v19 = vpop.trf.xlu0  ;;  %4542 = vxpose.xlu1.c.b16.start.end [1/1] (short) (narrow) %v2769_v61, 16  ;;  %v2814_v15 = vrot.slane %v2806_v55, %v10490_v25  ;;  %v2858_v61 = vcombine.low %v10031_v33, %v10026_v28 }
 0x85c   : >> { %v5266_v39 = vrot.slane %v5259_v10, %v9494_v5  ;;  %v5218_v2 = vcombine.low %v5209_v20, %v5217_v7  ;;  %v2717_v7 = vrot.slane %v2703_v45, %v9494_v5  ;;  %v2798_v20 = vrot.slane %v2790_v62, %v10490_v25 }
 0x85d   : >> { %4558 = vxpose.xlu0.c.b16.start.end [1/1] (short) (narrow) %v2719_v3, 16  ;;  %v9985_v1 = vpop.trf.xlu1  ;;  %v2785_v3 = vrot.slane %v2771_v18, %v9494_v5  ;;  %v2882_v32 = vrot.slane %v2874_v14, %v10490_v25 }
 0x85e   : >> { %v5267_v37 = vcombine.low %v5258_v56, %v5266_v39  ;;  %v5778_v8 = vshrl.u32 %v5218_v2, 16  ;;  %v2721_v49 = vcombine.high %v2717_v7, %v8586_v21  ;;  %v2822_v56 = vcombine.low %v2798_v20, %v2814_v15 }
 0x85f   : >> { %v9994_v46 = vpop.trf.xlu0  ;;  %4574 = vxpose.xlu1.c.b16.start.end [1/1] (short) (narrow) %v2787_v59, 16  ;;  %v2866_v39 = vrot.slane %v2858_v61, %v10490_v25  ;;  %v2789_v34 = vcombine.high %v2785_v3, %v8586_v21  ;;  %v2823_v38 = vcombine.high %v2798_v20, %v2814_v15 }
 0x860   : >> { %v5776_v4 = vpack.i.b16 %v5267_v37, %v5218_v2  ;;  %v5779_v29 = vshrl.u32 %v5267_v37, 16  ;;  %v2830_v63 = vrot.slane %v2822_v56, %v9494_v5 }
 0x861   : >> { %4590 = vxpose.xlu0.c.b16.start.end [1/1] (short) (narrow) %v2710_v48, 16  ;;  %v10015_v22 = vpop.trf.xlu1  ;;  %v2890_v16 = vcombine.low %v2866_v39, %v2882_v32  ;;  %v5268_v48 = vcombine.low %v9957_v30, %v9994_v46  ;;  %v10063_v30 = vrot.slane %v2807_v12, %v10490_v25  ;;  %v2875_v46 = vcombine.high %v10024_v27, %v10013_v58 }
 0x862   : >> { %7300 = vmatpush3.bf16.msra.mxu0 %v5776_v4  ;;  %v5780_v9 = vpack.i.b16 %v5779_v29, %v5778_v8  ;;  %v2854_v24 = vcombine.high %v2830_v63, %v8586_v21  ;;  %v2891_v35 = vcombine.high %v2866_v39, %v2882_v32  ;;  %v2837_v58 = vrot.slane %v2823_v38, %v9494_v5 }
 0x863   : >> { %v3798_v43 = vpop.trf.xlu0  ;;  %4606 = vxpose.xlu1.c.b16.start.end [1/1] (short) (narrow) %v2778_v31, 16  ;;  %7301 = vmatprep.subr.bf16.mxu0 %v8587_v26  ;;  %v2898_v54 = vrot.slane %v2890_v16, %v9494_v5  ;;  %v5275_v4 = vrot.slane %v5268_v48, %v10490_v25 }
 0x864   : >> { %7320 = vmatpush3.bf16.msra.mxu1 %v5780_v9  ;;  %v5276_v59 = vcombine.low %v9975_v19, %v3798_v43  ;;  %v5317_v19 = vcombine.low %v9968_v44, %v10015_v22  ;;  %v2859_v43 = vcombine.high %v10031_v33, %v10026_v28  ;;  %v2855_v15 = vcombine.high %v2837_v58, %v8586_v21 }
 0x865   : >> { %4622 = vxpose.xlu0.c.b16.start.end [1/1] (short) (narrow) %v2720_v47, 16  ;;  %v3814_v42 = vpop.trf.xlu1  ;;  %7321 = vmatprep.subr.bf16.mxu1 %v8587_v26  ;;  %v2922_v53 = vcombine.high %v2898_v54, %v8586_v21  ;;  %v2805_v47 = vrot.slane %v2791_v52, %v10490_v25 }
 0x866   : >> { %v5325_v37 = vcombine.low %v9985_v1, %v3814_v42  ;;  %v5283_v23 = vrot.slane %v5276_v59, %v10490_v25  ;;  %v5324_v0 = vrot.slane %v5317_v19, %v10490_v25  ;;  %v2905_v42 = vrot.slane %v2891_v35, %v9494_v5 }
 0x867   : >> { %v3830_v60 = vpop.trf.xlu0  ;;  %4638 = vxpose.xlu1.c.b16.start.end [1/1] (short) (narrow) %v2788_v50, 16  ;;  %v2889_v50 = vrot.slane %v2875_v46, %v10490_v25 }
 0x868   : >> { %v5332_v44 = vrot.slane %v5325_v37, %v10490_v25  ;;  %v5300_v22 = vcombine.low %v5275_v4, %v5283_v23  ;;  %v2923_v32 = vcombine.high %v2905_v42, %v8586_v21  ;;  %v2839_v37 = vcombine.high %v2805_v47, %v10063_v30 }
 0x869   : >> { %4654 = vxpose.xlu0.c.b16.start.end [1/1] (short) (narrow) %v2717_v7, 16  ;;  %v3846_v10 = vpop.trf.xlu1  ;;  %v2873_v7 = vrot.slane %v2859_v43, %v10490_v25 }
 0x86a   : >> { %v5349_v45 = vcombine.low %v5324_v0, %v5332_v44  ;;  %v5307_v28 = vrot.slane %v5300_v22, %v9494_v5  ;;  %v2853_v23 = vrot.slane %v2839_v37, %v9494_v5 }
 0x86b   : >> { %v3862_v17 = vpop.trf.xlu0  ;;  %4670 = vxpose.xlu1.c.b16.start.end [1/1] (short) (narrow) %v2785_v3, 16 }
 0x86c   : >> { %v5356_v61 = vrot.slane %v5349_v45, %v9494_v5  ;;  %v2857_v52 = vcombine.high %v2853_v23, %v8586_v21 }
 0x86d   : >> { %4686 = vxpose.xlu0.c.b16.start.end [1/1] (short) (narrow) %v2721_v49, 16  ;;  %v3878_v2 = vpop.trf.xlu1 }
 0x86f   : >> { %v3894_v36 = vpop.trf.xlu0  ;;  %4702 = vxpose.xlu1.c.b16.start.end [1/1] (short) (narrow) %v2789_v34, 16 }
 0x870   : >> { %v5284_v40 = vcombine.low %v3830_v60, %v3894_v36  ;;  %v2838_v60 = vcombine.low %v2805_v47, %v10063_v30 }
 0x871   : >> { %4718 = vxpose.xlu0.c.b16.start.end [1/1] (short) (narrow) %v2830_v63, 16  ;;  %v3910_v41 = vpop.trf.xlu1 }
 0x872   : >> { %v5333_v8 = vcombine.low %v3846_v10, %v3910_v41  ;;  %v5291_v29 = vrot.slane %v5284_v40, %v10490_v25  ;;  %v2846_v56 = vrot.slane %v2838_v60, %v9494_v5 }
 0x873   : >> { %v3926_v51 = vpop.trf.xlu0  ;;  %4734 = vxpose.xlu1.c.b16.start.end [1/1] (short) (narrow) %v2898_v54, 16  ;;  %v2907_v54 = vcombine.high %v2873_v7, %v2889_v50 }
 0x874   : >> { %v5292_v1 = vcombine.low %v3862_v17, %v3926_v51  ;;  %v5340_v11 = vrot.slane %v5333_v8, %v10490_v25  ;;  %v2906_v17 = vcombine.low %v2873_v7, %v2889_v50  ;;  %v2856_v48 = vcombine.high %v2846_v56, %v8586_v21 }
 0x875   : >> { %4750 = vxpose.xlu0.c.b16.start.end [1/1] (short) (narrow) %v2854_v24, 16  ;;  %v3942_v6 = vpop.trf.xlu1  ;;  %v2921_v24 = vrot.slane %v2907_v54, %v9494_v5 }
 0x876   : >> { %v5299_v13 = vrot.slane %v5292_v1, %v10490_v25  ;;  %v5341_v31 = vcombine.low %v3878_v2, %v3942_v6  ;;  %v2914_v36 = vrot.slane %v2906_v17, %v9494_v5 }
 0x877   : >> { %v10073_v55 = vpop.trf.xlu0  ;;  %4766 = vxpose.xlu1.c.b16.start.end [1/1] (short) (narrow) %v2922_v53, 16  ;;  %v2925_v1 = vcombine.high %v2921_v24, %v8586_v21 }
 0x878   : >> { %v5308_v9 = vcombine.low %v5291_v29, %v5299_v13  ;;  %v5348_v27 = vrot.slane %v5341_v31, %v10490_v25  ;;  %v2924_v41 = vcombine.high %v2914_v36, %v8586_v21 }
 0x879   : >> { %4782 = vxpose.xlu0.c.b16.start.end [1/1] (short) (narrow) %v2837_v58, 16  ;;  %v10082_v14 = vpop.trf.xlu1 }
 0x87a   : >> { %v5315_v62 = vrot.slane %v5308_v9, %v9494_v5  ;;  %v5357_v33 = vcombine.low %v5340_v11, %v5348_v27 }
 0x87b   : >> { %v3990_v18 = vpop.trf.xlu0  ;;  %4798 = vxpose.xlu1.c.b16.start.end [1/1] (short) (narrow) %v2905_v42, 16 }
 0x87c   : >> { %v5364_v20 = vrot.slane %v5357_v33, %v9494_v5  ;;  %v5316_v10 = vcombine.low %v5307_v28, %v5315_v62 }
 0x87d   : >> { %4814 = vxpose.xlu0.c.b16.start.end [1/1] (short) (narrow) %v2855_v15, 16  ;;  %v4006_v3 = vpop.trf.xlu1 }
 0x87e   : >> { %v5365_v39 = vcombine.low %v5356_v61, %v5364_v20  ;;  %v5786_v34 = vshrl.u32 %v5316_v10, 16 }
 0x87f   : >> { %v4022_v49 = vpop.trf.xlu0  ;;  %4830 = vxpose.xlu1.c.b16.start.end [1/1] (short) (narrow) %v2923_v32, 16 }
 0x880   : >> { %v5784_v2 = vpack.i.b16 %v5365_v39, %v5316_v10  ;;  %v5787_v16 = vshrl.u32 %v5365_v39, 16  ;;  %v5366_v44 = vcombine.low %v10073_v55, %v4022_v49 }
 0x881   : >> { %4846 = vxpose.xlu0.c.b16.start.end [1/1] (short) (narrow) %v2846_v56, 16  ;;  %v4038_v59 = vpop.trf.xlu1 }
 0x882   : >> { %7302 = vmatpush3.bf16.msra.mxu0 %v5784_v2  ;;  %v5788_v12 = vpack.i.b16 %v5787_v16, %v5786_v34  ;;  %v5415_v6 = vcombine.low %v10082_v14, %v4038_v59  ;;  %v5373_v22 = vrot.slane %v5366_v44, %v10490_v25 }
 0x883   : >> { %v4054_v63 = vpop.trf.xlu0  ;;  %4862 = vxpose.xlu1.c.b16.start.end [1/1] (short) (narrow) %v2914_v36, 16  ;;  %7303 = vmatprep.subr.bf16.mxu0 %v8587_v26 }
 0x884   : >> { %7322 = vmatpush3.bf16.msra.mxu1 %v5788_v12  ;;  %v5374_v46 = vcombine.low %v3990_v18, %v4054_v63  ;;  %v5422_v55 = vrot.slane %v5415_v6, %v10490_v25 }
 0x885   : >> { %4878 = vxpose.xlu0.c.b16.start.end [1/1] (short) (narrow) %v2856_v48, 16  ;;  %v4070_v40 = vpop.trf.xlu1  ;;  %7323 = vmatprep.subr.bf16.mxu1 %v8587_v26 }
 0x886   : >> { %v5423_v8 = vcombine.low %v4006_v3, %v4070_v40  ;;  %v5381_v53 = vrot.slane %v5374_v46, %v10490_v25 }
 0x887   : >> { %v4086_v19 = vpop.trf.xlu0  ;;  %4894 = vxpose.xlu1.c.b16.start.end [1/1] (short) (narrow) %v2924_v41, 16 }
 0x888   : >> { %v5430_v31 = vrot.slane %v5423_v8, %v10490_v25  ;;  %v5398_v47 = vcombine.low %v5373_v22, %v5381_v53 }
 0x889   : >> { %4910 = vxpose.xlu0.c.b16.start.end [1/1] (short) (narrow) %v2853_v23, 16  ;;  %v4102_v51 = vpop.trf.xlu1 }
 0x88a   : >> { %v5447_v62 = vcombine.low %v5422_v55, %v5430_v31  ;;  %v5405_v33 = vrot.slane %v5398_v47, %v9494_v5 }
 0x88b   : >> { %v4118_v38 = vpop.trf.xlu0  ;;  %4926 = vxpose.xlu1.c.b16.start.end [1/1] (short) (narrow) %v2921_v24, 16 }
 0x88c   : >> { %v5454_v60 = vrot.slane %v5447_v62, %v9494_v5 }
 0x88d   : >> { %4942 = vxpose.xlu0.c.b16.start.end [1/1] (short) (narrow) %v2857_v52, 16  ;;  %v4134_v30 = vpop.trf.xlu1 }
 0x88f   : >> { %v4150_v4 = vpop.trf.xlu0  ;;  %4958 = vxpose.xlu1.c.b16.start.end [1/1] (short) (narrow) %v2925_v1, 16 }
 0x890   : >> { %v5382_v29 = vcombine.low %v4086_v19, %v4150_v4 }
 0x891   : >> { %v4166_v13 = vpop.trf.xlu1 }
 0x892   : >> { %v5431_v58 = vcombine.low %v4102_v51, %v4166_v13  ;;  %v5389_v21 = vrot.slane %v5382_v29, %v10490_v25 }
 0x893   : >> { %v4182_v35 = vpop.trf.xlu0 }
 0x894   : >> { %v5390_v0 = vcombine.low %v4118_v38, %v4182_v35  ;;  %v5438_v14 = vrot.slane %v5431_v58, %v10490_v25 }
 0x895   : >> { %v4198_v9 = vpop.trf.xlu1 }
 0x896   : >> { %v5397_v43 = vrot.slane %v5390_v0, %v10490_v25  ;;  %v5439_v45 = vcombine.low %v4134_v30, %v4198_v9 }
 0x897   : >> { %v4214_v11 = vpop.trf.xlu0 }
 0x898   : >> { %v5406_v27 = vcombine.low %v5389_v21, %v5397_v43  ;;  %v5446_v42 = vrot.slane %v5439_v45, %v10490_v25 }
 0x899   : >> { %v4230_v28 = vpop.trf.xlu1 }
 0x89a   : >> { %v5413_v50 = vrot.slane %v5406_v27, %v9494_v5  ;;  %v5455_v18 = vcombine.low %v5438_v14, %v5446_v42 }
 0x89b   : >> { %v4246_v15 = vpop.trf.xlu0 }
 0x89c   : >> { %v5462_v7 = vrot.slane %v5455_v18, %v9494_v5  ;;  %v5414_v61 = vcombine.low %v5405_v33, %v5413_v50 }
 0x89d   : >> { %v4262_v20 = vpop.trf.xlu1 }
 0x89e   : >> { %v5463_v3 = vcombine.low %v5454_v60, %v5462_v7  ;;  %v5794_v17 = vshrl.u32 %v5414_v61, 16 }
 0x89f   : >> { %v4278_v10 = vpop.trf.xlu0 }
 0x8a0   : >> { %v5792_v32 = vpack.i.b16 %v5463_v3, %v5414_v61  ;;  %v5795_v49 = vshrl.u32 %v5463_v3, 16  ;;  %v5464_v37 = vcombine.low %v4214_v11, %v4278_v10 }
 0x8a1   : >> { %v4294_v56 = vpop.trf.xlu1 }
 0x8a2   : >> { %7304 = vmatpush3.bf16.msra.mxu0 %v5792_v32  ;;  %v5796_v2 = vpack.i.b16 %v5795_v49, %v5794_v17  ;;  %v5513_v19 = vcombine.low %v4230_v28, %v4294_v56  ;;  %v5471_v38 = vrot.slane %v5464_v37, %v10490_v25 }
 0x8a3   : >> { %v4310_v39 = vpop.trf.xlu0  ;;  %7305 = vmatprep.subr.bf16.mxu0 %v8587_v26 }
 0x8a4   : >> { %7324 = vmatpush3.bf16.msra.mxu1 %v5796_v2  ;;  %v5472_v12 = vcombine.low %v4246_v15, %v4310_v39  ;;  %v5520_v44 = vrot.slane %v5513_v19, %v10490_v25 }
 0x8a5   : >> { %v4326_v34 = vpop.trf.xlu1  ;;  %7325 = vmatprep.subr.bf16.mxu1 %v8587_v26 }
 0x8a6   : >> { %v5521_v40 = vcombine.low %v4262_v20, %v4326_v34  ;;  %v5479_v23 = vrot.slane %v5472_v12, %v10490_v25 }
 0x8a7   : >> { %v4342_v16 = vpop.trf.xlu0 }
 0x8a8   : >> { %v5528_v52 = vrot.slane %v5521_v40, %v10490_v25  ;;  %v5496_v8 = vcombine.low %v5471_v38, %v5479_v23 }
 0x8a9   : >> { %v4358_v59 = vpop.trf.xlu1 }
 0x8aa   : >> { %v5545_v53 = vcombine.low %v5520_v44, %v5528_v52  ;;  %v5503_v58 = vrot.slane %v5496_v8, %v9494_v5 }
 0x8ab   : >> { %v4374_v36 = vpop.trf.xlu0 }
 0x8ac   : >> { %v5552_v9 = vrot.slane %v5545_v53, %v9494_v5 }
 0x8ad   : >> { %v4390_v63 = vpop.trf.xlu1 }
 0x8af   : >> { %v4406_v48 = vpop.trf.xlu0 }
 0x8b0   : >> { %v5480_v41 = vcombine.low %v4342_v16, %v4406_v48 }
 0x8b1   : >> { %v4422_v54 = vpop.trf.xlu1 }
 0x8b2   : >> { %v5529_v30 = vcombine.low %v4358_v59, %v4422_v54  ;;  %v5487_v1 = vrot.slane %v5480_v41, %v10490_v25 }
 0x8b3   : >> { %v4438_v51 = vpop.trf.xlu0 }
 0x8b4   : >> { %v5488_v24 = vcombine.low %v4374_v36, %v4438_v51  ;;  %v5536_v35 = vrot.slane %v5529_v30, %v10490_v25 }
 0x8b5   : >> { %v4454_v4 = vpop.trf.xlu1 }
 0x8b6   : >> { %v5495_v46 = vrot.slane %v5488_v24, %v10490_v25  ;;  %v5537_v29 = vcombine.low %v4390_v63, %v4454_v4 }
 0x8b7   : >> { %v4470_v13 = vpop.trf.xlu0 }
 0x8b8   : >> { %v5504_v6 = vcombine.low %v5487_v1, %v5495_v46  ;;  %v5544_v0 = vrot.slane %v5537_v29, %v10490_v25 }
 0x8b9   : >> { %v4486_v31 = vpop.trf.xlu1 }
 0x8ba   : >> { %v5511_v22 = vrot.slane %v5504_v6, %v9494_v5  ;;  %v5553_v21 = vcombine.low %v5536_v35, %v5544_v0 }
 0x8bb   : >> { %v4502_v43 = vpop.trf.xlu0 }
 0x8bc   : >> { %v5560_v55 = vrot.slane %v5553_v21, %v9494_v5  ;;  %v5512_v47 = vcombine.low %v5503_v58, %v5511_v22 }
 0x8bd   : >> { %v4518_v45 = vpop.trf.xlu1 }
 0x8be   : >> { %v5561_v27 = vcombine.low %v5552_v9, %v5560_v55  ;;  %v5802_v14 = vshrl.u32 %v5512_v47, 16 }
 0x8bf   : >> { %v4534_v11 = vpop.trf.xlu0 }
 0x8c0   : >> { %v5800_v62 = vpack.i.b16 %v5561_v27, %v5512_v47  ;;  %v5803_v42 = vshrl.u32 %v5561_v27, 16  ;;  %v5562_v3 = vcombine.low %v4470_v13, %v4534_v11 }
 0x8c1   : >> { %v4550_v50 = vpop.trf.xlu1 }
 0x8c2   : >> { %7306 = vmatpush3.bf16.msra.mxu0 %v5800_v62  ;;  %v5804_v33 = vpack.i.b16 %v5803_v42, %v5802_v14  ;;  %v5611_v56 = vcombine.low %v4486_v31, %v4550_v50  ;;  %v5569_v16 = vrot.slane %v5562_v3, %v10490_v25 }
 0x8c3   : >> { %v4566_v28 = vpop.trf.xlu0  ;;  %7307 = vmatprep.subr.bf16.mxu0 %v8587_v26 }
 0x8c4   : >> { %7326 = vmatpush3.bf16.msra.mxu1 %v5804_v33  ;;  %v5570_v20 = vcombine.low %v4502_v43, %v4566_v28  ;;  %v5618_v37 = vrot.slane %v5611_v56, %v10490_v25 }
 0x8c5   : >> { %v4582_v18 = vpop.trf.xlu1  ;;  %7327 = vmatprep.subr.bf16.mxu1 %v8587_v26 }
 0x8c6   : >> { %v5619_v32 = vcombine.low %v4518_v45, %v4582_v18  ;;  %v5577_v39 = vrot.slane %v5570_v20, %v10490_v25 }
 0x8c7   : >> { %v4598_v15 = vpop.trf.xlu0 }
 0x8c8   : >> { %v5626_v59 = vrot.slane %v5619_v32, %v10490_v25  ;;  %v5594_v40 = vcombine.low %v5569_v16, %v5577_v39 }
 0x8c9   : >> { %v4614_v60 = vpop.trf.xlu1 }
 0x8ca   : >> { %v5643_v23 = vcombine.low %v5618_v37, %v5626_v59  ;;  %v5601_v30 = vrot.slane %v5594_v40, %v9494_v5 }
 0x8cb   : >> { %v4630_v7 = vpop.trf.xlu0 }
 0x8cc   : >> { %v5650_v4 = vrot.slane %v5643_v23, %v9494_v5 }
 0x8cd   : >> { %v4646_v61 = vpop.trf.xlu1 }
 0x8cf   : >> { %v4662_v10 = vpop.trf.xlu0 }
 0x8d0   : >> { %v5578_v17 = vcombine.low %v4598_v15, %v4662_v10 }
 0x8d1   : >> { %v4678_v49 = vpop.trf.xlu1 }
 0x8d2   : >> { %v5627_v36 = vcombine.low %v4614_v60, %v4678_v49  ;;  %v5585_v63 = vrot.slane %v5578_v17, %v10490_v25 }
 0x8d3   : >> { %v4694_v2 = vpop.trf.xlu0 }
 0x8d4   : >> { %v5586_v34 = vcombine.low %v4630_v7, %v4694_v2  ;;  %v5634_v51 = vrot.slane %v5627_v36, %v10490_v25 }
 0x8d5   : >> { %v4710_v48 = vpop.trf.xlu1 }
 0x8d6   : >> { %v5593_v12 = vrot.slane %v5586_v34, %v10490_v25  ;;  %v5635_v41 = vcombine.low %v4646_v61, %v4710_v48 }
 0x8d7   : >> { %v4726_v54 = vpop.trf.xlu0 }
 0x8d8   : >> { %v5602_v19 = vcombine.low %v5585_v63, %v5593_v12  ;;  %v5642_v24 = vrot.slane %v5635_v41, %v10490_v25 }
 0x8d9   : >> { %v4742_v52 = vpop.trf.xlu1 }
 0x8da   : >> { %v5609_v38 = vrot.slane %v5602_v19, %v9494_v5  ;;  %v5651_v1 = vcombine.low %v5634_v51, %v5642_v24  ;;  %v10498_v19 = vld [vmem:[#allocation60_spill] sm:$0xff]  ;;  %v10501_v24 = vld [vmem:[#allocation61_spill] sm:$0xff] }
 0x8db   : >> { %v4758_v46 = vpop.trf.xlu0  ;;  %v10499_v23 = vmov %v10498_v19 }
 0x8dc   : >> { %v5658_v44 = vrot.slane %v5651_v1, %v9494_v5  ;;  %v5610_v8 = vcombine.low %v5601_v30, %v5609_v38  ;;  %v10500_v51 = vpack.c.bf16 %v10498_v19, %v10499_v23  ;;  %v10502_v38 = vpack.c.bf16 %v10501_v24, %v10501_v24  ;;  %v7778_v24 = vld [vmem:[#allocation21 + $0x60] sm:$0xff] (%p1425_p6)  }
 0x8dd   : >> { %v4774_v29 = vpop.trf.xlu1 }
 0x8de   : >> { %v5659_v6 = vcombine.low %v5650_v4, %v5658_v44  ;;  %v5810_v35 = vshrl.u32 %v5610_v8, 16 }
 0x8df   : >> { %v4790_v13 = vpop.trf.xlu0 }
 0x8e0   : >> { %v5808_v53 = vpack.i.b16 %v5659_v6, %v5610_v8  ;;  %v5811_v0 = vshrl.u32 %v5659_v6, 16  ;;  %v5660_v27 = vcombine.low %v4726_v54, %v4790_v13 }
 0x8e1   : >> { %v4806_v22 = vpop.trf.xlu1 }
 0x8e2   : >> { %7308 = vmatpush3.bf16.msra.mxu0 %v5808_v53  ;;  %v5812_v58 = vpack.i.b16 %v5811_v0, %v5810_v35  ;;  %v5709_v50 = vcombine.low %v4742_v52, %v4806_v22  ;;  %v5667_v15 = vrot.slane %v5660_v27, %v10490_v25  ;;  %v1447_v53 = vld [vmem:[%s1445_s29 + $0x1] sm:$0x1]  ;;  %v1448_v35 = vld [vmem:[%s1445_s29 + $0x2] sm:$0x1]  ;;  %v1449_v0 = vld [vmem:[%s1445_s29 + $0x3] sm:$0x1] }
 0x8e3   : >> { %v4822_v31 = vpop.trf.xlu0  ;;  %7309 = vmatprep.subr.bf16.mxu0 %v8587_v26  ;;  %v1450_v22 = vld [vmem:[%s1445_s29 + $0x4] sm:$0x1] }
 0x8e4   : >> { %7328 = vmatpush3.bf16.msra.mxu1 %v5812_v58  ;;  %v5668_v45 = vcombine.low %v4758_v46, %v4822_v31  ;;  %v5716_v3 = vrot.slane %v5709_v50, %v10490_v25  ;;  %v1451_v31 = vld [vmem:[%s1445_s29 + $0x5] sm:$0x1]  ;;  %v5947_v50 = vshrl.u32 %v1449_v0, 16 }
 0x8e5   : >> { %v4838_v21 = vpop.trf.xlu1  ;;  %7329 = vmatprep.subr.bf16.mxu1 %v8587_v26 }
 0x8e6   : >> { %v5717_v62 = vcombine.low %v4774_v29, %v4838_v21  ;;  %v5675_v28 = vrot.slane %v5668_v45, %v10490_v25  ;;  %v1452_v21 = vld [vmem:[%s1445_s29 + $0x6] sm:$0x1]  ;;  %v8589_v45 = vmov 1966171168  }
 0x8e7   : >> { %v4854_v43 = vpop.trf.xlu0 }
 0x8e8   : >> { %v5724_v60 = vrot.slane %v5717_v62, %v10490_v25  ;;  %v5692_v32 = vcombine.low %v5667_v15, %v5675_v28  ;;  %v5953_v15 = vshrl.u32 %v1451_v31, 16 }
 0x8e9   : >> { %v4870_v9 = vpop.trf.xlu1 }
 0x8ea   : >> { %v5741_v56 = vcombine.low %v5716_v3, %v5724_v60  ;;  %v5699_v16 = vrot.slane %v5692_v32, %v9494_v5 }
 0x8eb   : >> { %v4886_v55 = vpop.trf.xlu0 }
 0x8ec   : >> { %v5748_v36 = vrot.slane %v5741_v56, %v9494_v5 }
 0x8ed   : >> { %v4902_v47 = vpop.trf.xlu1 }
 0x8ef   : >> { %v4918_v11 = vpop.trf.xlu0 }
 0x8f0   : >> { %v5676_v14 = vcombine.low %v4854_v43, %v4918_v11  ;;  %v1453_v43 = vld [vmem:[%s1445_s29 + $0x7] sm:$0x1]  ;;  %v5964_v11 = vunpack.c.l.s4 %v8589_v45  ;;  %v10507_v45 = vld [vmem:[#allocation63_spill] sm:$0xff] }
 0x8f1   : >> { %v4934_v42 = vpop.trf.xlu1 }
 0x8f2   : >> { %v5725_v7 = vcombine.low %v4870_v9, %v4934_v42  ;;  %v5683_v61 = vrot.slane %v5676_v14, %v10490_v25  ;;  %v5945_v9 = vpack.i.b16 %v1449_v0, %v1448_v35  ;;  %v5941_v14 = vshrl.u32 %v1447_v53, 16  ;;  %v10505_v0 = vld [vmem:[#allocation65_spill] sm:$0xff] }
 0x8f3   : >> { %v4950_v33 = vpop.trf.xlu0  ;;  %v5946_v42 = vshrl.u32 %v1448_v35, 16 }
 0x8f4   : >> { %v5684_v18 = vcombine.low %v4886_v55, %v4950_v33  ;;  %v5732_v39 = vrot.slane %v5725_v7, %v10490_v25  ;;  %v5951_v55 = vpack.i.b16 %v1451_v31, %v1450_v22  ;;  %v5965_v33 = vunpack.c.0.s8 %v5964_v11 }
 0x8f5   : >> { %v4966_v10 = vpop.trf.xlu1  ;;  %v5948_v7 = vpack.i.b16 %v5947_v50, %v5946_v42  ;;  %v10508_v42 = vld [vmem:[#allocation62_spill] sm:$0xff] }
 0x8f6   : >> { %v5691_v20 = vrot.slane %v5684_v18, %v10490_v25  ;;  %v5733_v17 = vcombine.low %v4902_v47, %v4966_v10  ;;  %v5957_v47 = vpack.i.b16 %v1453_v43, %v1452_v21  ;;  %v5952_v18 = vshrl.u32 %v1450_v22, 16 }
 0x8f7   : >> { %v5968_v10 = vsub.s32 %v5965_v33, %v9337_v57 }
 0x8f8   : >> { %v5700_v49 = vcombine.low %v5683_v61, %v5691_v20  ;;  %v5740_v2 = vrot.slane %v5733_v17, %v10490_v25  ;;  %v5962_v28 = vcombine.low %v5951_v55, %v5957_v47  ;;  %v5958_v61 = vshrl.u32 %v1452_v21, 16 }
 0x8f9   : >> { %v5959_v20 = vshrl.u32 %v1453_v43, 16  ;;  %v5954_v3 = vpack.i.b16 %v5953_v15, %v5952_v18  ;;  %v10506_v43 = vld [vmem:[#allocation64_spill] sm:$0xff] }
 0x8fa   : >> { %v5707_v34 = vrot.slane %v5700_v49, %v9494_v5  ;;  %v5749_v59 = vcombine.low %v5732_v39, %v5740_v2  ;;  %v5976_v56 = vrot.slane %v5962_v28, %v5968_v10 }
 0x8fb   : >> { %v5960_v32 = vpack.i.b16 %v5959_v20, %v5958_v61 }
 0x8fc   : >> { %v5756_v63 = vrot.slane %v5749_v59, %v9494_v5  ;;  %v5708_v12 = vcombine.low %v5699_v16, %v5707_v34 }
 0x8fd   : >> { %v6033_v39 = vcombine.low %v5954_v3, %v5960_v32  ;;  %v10513_v3 = vmov (%p1425_p6), 0   ;;  %v7771_v32 = vld [vmem:[#allocation21] sm:$0xff] (%p1425_p6)  }
 0x8fe   : >> { %v5757_v48 = vcombine.low %v5748_v36, %v5756_v63  ;;  %v5818_v40 = vshrl.u32 %v5708_v12, 16 }
 0x8ff   : >> { %v6047_v16 = vrot.slane %v6033_v39, %v5968_v10  ;;  %v7774_v39 = vld [vmem:[#allocation21 + $0x50] sm:$0xff] (%p1425_p6)  }
 0x900   : >> { %v5816_v37 = vpack.i.b16 %v5757_v48, %v5708_v12  ;;  %v5819_v41 = vshrl.u32 %v5757_v48, 16 }
 0x902   : >> { %7310 = vmatpush3.bf16.msra.mxu0 %v5816_v37  ;;  %v5820_v54 = vpack.i.b16 %v5819_v41, %v5818_v40  ;;  %v10503_v40 = vld [vmem:[#allocation67_spill] sm:$0xff] }
 0x903   : >> { %7335 = vmatprep.subr.bf16.mxu0 %v8587_v26 }
 0x904   : >> { %7330 = vmatpush3.bf16.msra.mxu1 %v5820_v54 }
 0x905   : >> { %7312 = vmatmul.mubr.bf16.vlgmr.msra.gmra.mrb[0].mxu0 %v10500_v51  ;;  %7341 = vmatprep.subr.bf16.mxu1 %v8587_v26  ;;  %v10504_v51 = vld [vmem:[#allocation66_spill] sm:$0xff] }
 0x906   : >> { %7337 = vmatprep.mubr.msk.bf16.mxu0 %vm8588_vm0, %v8587_v26 }
 0x907   : >> { %7332 = vmatmul.mubr.bf16.vlgmr.msra.gmra.mrb[0].mxu1 %v10502_v38 }
 0x908   : >> { %7343 = vmatprep.mubr.msk.bf16.mxu1 %vm8588_vm0, %v8587_v26  ;;  %v1446_v26 = vld [vmem:[%s1445_s29] sm:$0x1] }
 0x909   : >> { %v5939_v58 = vpack.i.b16 %v1447_v53, %v1446_v26  ;;  %v5940_v27 = vshrl.u32 %v1446_v26, 16 }
 0x90b   : >> { %v5961_v62 = vcombine.low %v5939_v58, %v5945_v9  ;;  %v5942_v60 = vpack.i.b16 %v5941_v14, %v5940_v27 }
 0x90d   : >> { %v6032_v17 = vcombine.low %v5942_v60, %v5948_v7  ;;  %v5969_v49 = vrot.slane %v5961_v62, %v5968_v10 }
 0x90f   : >> { %v6040_v2 = vrot.slane %v6032_v17, %v5968_v10  ;;  %v5977_v34 = vcombine.low %v5969_v49, %v5976_v56  ;;  %v7772_v49 = vld [vmem:[#allocation21 + $0x48] sm:$0xff] (%p1425_p6)  }
 0x910   : > { %v7773_v56 = vld [vmem:[#allocation21 + $0x8] sm:$0xff] (%p1425_p6)  }
 0x911   : >> { %v5984_v59 = vrot.slane %v5977_v34, %v5968_v10  ;;  %v6048_v36 = vcombine.low %v6040_v2, %v6047_v16  ;;  %v7775_v2 = vld [vmem:[#allocation21 + $0x10] sm:$0xff] (%p1425_p6)   ;;  %v7776_v34 = vld [vmem:[#allocation21 + $0x58] sm:$0xff] (%p1425_p6)  }
 0x913   : >> { %v5990_v63 = vsel %vm5988_vm2, %v5984_v59, 0  ;;  %v6055_v12 = vrot.slane %v6048_v36, %v5968_v10  ;;  %v7770_v10 = vld [vmem:[#allocation21 + $0x40] sm:$0xff] (%p1425_p6)   ;;  %v7777_v36 = vld [vmem:[#allocation21 + $0x18] sm:$0xff] (%p1425_p6)  }
 0x914   : >> { %7336 = vmatpush3.bf16.msra.mxu0 %v5990_v63 }
 0x915   : >> { %v6060_v48 = vsel %vm5988_vm2, %v6055_v12, 0  ;;  %7251 = vmatprep.subr.bf16.mxu0 (%p1425_p6), %v7770_v10  ;;  %v7779_v12 = vld [vmem:[#allocation21 + $0x20] sm:$0xff] (%p1425_p6)  }
 0x916   : >> { %7342 = vmatpush3.bf16.msra.mxu1 %v6060_v48  ;;  %v7789_v10 = vld [vmem:[#allocation27 + $0x14] ss:$8 sps:$4 sm:$0xff] (%p1425_p6)  }
 0x9d8   : >> { %v10176_v52 = vpop.f32.mrb[0].mxu0 }
 0x9d9   : >> { %v7313_v30 = vpop.f32.mrb[1].mxu0  ;;  %v5903_v1 = vsel %vm5902_vm1, %v10176_v52, -inf }
 0x9da   : >> { %v10180_v46 = vpop.f32.mrb[0].mxu1  ;;  %5904 = vmax.xlane.f32.xlu0 %v5903_v1  ;;  %v5859_v4 = vpop.f32.mrb[2].mxu0 }
 0x9db   : >> { %v7314_v44 = vpop.f32.mrb[3].mxu0  ;;  %v7333_v8 = vpop.f32.mrb[1].mxu1  ;;  %v5906_v29 = vsel %vm5902_vm1, %v10180_v46, -inf }
 0x9dc   : >> { %5907 = vmax.xlane.f32.xlu1 %v5906_v29  ;;  %v5899_v13 = vpop.f32.mrb[2].mxu1 }
 0x9dd   : >> { %v7334_v6 = vpop.f32.mrb[3].mxu1 }
 0xa67   : >> { %v5905_v37 = vpop.xlane.xlu0 %5904 }
 0xa68   : >> { %v5909_v21 = vmax.f32 %v10503_v40, %v5905_v37  }
 0xa69   : >> { %v5908_v41 = vpop.xlane.xlu1 %5907 }
 0xa6a   : >> { %v5911_v54 = vsub.f32 %v10503_v40, %v5909_v21  ;;  %v5917_v19 = vsub.f32 %v10176_v52, %v5909_v21  ;;  %v5910_v20 = vmax.f32 %v10504_v51, %v5908_v41   ;;  %v7780_v40 = vld [vmem:[#allocation21 + $0x68] sm:$0xff] (%p1425_p6)  }
 0xa6c   : >> { %v5919_v38 = vmul.f32 1.442695, %v5917_v19  ;;  %v5912_v30 = vsub.f32 %v10504_v51, %v5910_v20  ;;  %v5918_v1 = vsub.f32 %v10180_v46, %v5910_v20  ;;  %v5913_v26 = vmul.f32 1.442695, %v5911_v54 }
 0xa6e   : >> { %v5921_v4 = vmul.f32 1.442695, %v5918_v1  ;;  %7762 = vpow2.f32 %v5919_v38  ;;  %v5915_v53 = vmul.f32 1.442695, %v5912_v30  ;;  %v7781_v38 = vld [vmem:[#allocation21 + $0x28] sm:$0xff] (%p1425_p6)   ;;  %v7782_v30 = vld [vmem:[#allocation21 + $0x70] sm:$0xff] (%p1425_p6)  }
 0xa70   : >> { %7764 = vpow2.f32 %v5921_v4 }
 0xa71   : >> { %7766 = vpow2.f32 %v5913_v26  ;;  %v7783_v26 = vld [vmem:[#allocation21 + $0x30] sm:$0xff] (%p1425_p6)  }
 0xa72   : >> { %7768 = vpow2.f32 %v5915_v53  ;;  %v7784_v53 = vld [vmem:[#allocation21 + $0x78] sm:$0xff] (%p1425_p6)  }
 0xa78   : >> { %v7763_v44 = vpop.eup %7762 }
 0xa79   : >> { %v5925_v8 = vsel %vm5902_vm1, %v7763_v44, 0.0  ;;  %v5935_v29 = vpack.c.bf16 %v7763_v44, %v7763_v44 }
 0xa7a   : >> { %v7765_v13 = vpop.eup %7764  ;;  %5926 = vadd.xlane.f32.xlu0 %v5925_v8 }
 0xa7b   : >> { %7338 = vmatmul.mubr.msk.bf16.vlgmr.msra.gmra.mrb[4].mxu0 %vm5902_vm1, %v5935_v29  ;;  %v5928_v52 = vsel %vm5902_vm1, %v7765_v13, 0.0  ;;  %v5936_v6 = vpack.c.bf16 %v7765_v13, %v7765_v13  ;;  %v7767_v46 = vpop.eup %7766 }
 0xa7c   : >> { %5929 = vadd.xlane.f32.xlu1 %v5928_v52  ;;  %v7769_v35 = vpop.eup %7768  ;;  %v5923_v22 = vmul.f32 %v10505_v0, %v7767_v46  ;;  %v5933_v11 = vmul.f32 %v10507_v45, %v7767_v46  ;;  %7252 = vmatpush3.bf16.msra.mxu0 (%p1425_p6), %v7771_v32  ;;  %v7792_v32 = vld [vmem:[#allocation27 + $0x24] ss:$8 sps:$4 sm:$0xff] (%p1425_p6)  }
 0xa7d   : >> { %7344 = vmatmul.mubr.msk.bf16.vlgmr.msra.gmra.mrb[4].mxu1 %vm5902_vm1, %v5936_v6  ;;  %v5924_v9 = vmul.f32 %v10506_v43, %v7769_v35  ;;  %v5934_v50 = vmul.f32 %v10508_v42, %v7769_v35  ;;  %7253 = vmatprep.subr.bf16.mxu0 (%p1425_p6), %v7772_v49 }
 0xa7e   : > { %6570 = vmatprep.mubr.bf16.mxu1 (%p1425_p6), %v10513_v3  ;;  %v7791_v3 = vld [vmem:[#allocation27 + $0x10] ss:$8 sps:$4 sm:$0xff] (%p1425_p6)  }
 0xa80   : > { %7254 = vmatpush3.bf16.msra.mxu0 (%p1425_p6), %v7773_v56 }
 0xa81   : > { %7255 = vmatprep.subr.bf16.mxu0 (%p1425_p6), %v7774_v39 }
 0xa84   : > { %7256 = vmatpush3.bf16.msra.mxu0 (%p1425_p6), %v7775_v2 }
 0xa85   : > { %7257 = vmatprep.subr.bf16.mxu0 (%p1425_p6), %v7776_v34  ;;  %v7794_v34 = vld [vmem:[#allocation27 + $0x20] ss:$8 sps:$4 sm:$0xff] (%p1425_p6)  }
 0xa88   : > { %7258 = vmatpush3.bf16.msra.mxu0 (%p1425_p6), %v7777_v36  ;;  %v7798_v36 = vld [vmem:[#allocation27 + $0x44] ss:$8 sps:$4 sm:$0xff] (%p1425_p6)  }
 0xa89   : > { %7259 = vmatprep.subr.bf16.mxu0 (%p1425_p6), %v7778_v24  ;;  %v7801_v24 = vld [vmem:[#allocation27 + $0x54] ss:$8 sps:$4 sm:$0xff] (%p1425_p6)  }
 0xa8c   : > { %7260 = vmatpush3.bf16.msra.mxu0 (%p1425_p6), %v7779_v12  ;;  %v7809_v12 = vld [vmem:[#allocation27 + $0x70] ss:$8 sps:$4 sm:$0xff] (%p1425_p6)  }
 0xa8d   : > { %7261 = vmatprep.subr.bf16.mxu0 (%p1425_p6), %v7780_v40  ;;  %v7812_v40 = vld [vmem:[#allocation30 + $0x48] sm:$0xff] (%p1425_p6)  }
 0xa90   : > { %7262 = vmatpush3.bf16.msra.mxu0 (%p1425_p6), %v7781_v38  ;;  %v7817_v38 = vld [vmem:[#allocation30 + $0x18] sm:$0xff] (%p1425_p6)  }
 0xa91   : > { %7263 = vmatprep.subr.bf16.mxu0 (%p1425_p6), %v7782_v30  ;;  %v7818_v30 = vld [vmem:[#allocation30 + $0x60] sm:$0xff] (%p1425_p6)  }
 0xa94   : > { %7264 = vmatpush3.bf16.msra.mxu0 (%p1425_p6), %v7783_v26 }
 0xa95   : > { %7265 = vmatprep.subr.bf16.mxu0 (%p1425_p6), %v7784_v53  ;;  %v7185_v53 = vld [vmem:[#allocation25] ss:$0 sm:$0xff] (%p1425_p6) }
 0xb07   : >> { %v5927_v31 = vpop.xlane.xlu0 %5926 }
 0xb08   : >> { %v5931_v58 = vadd.f32 %v5927_v31, %v5923_v22  }
 0xb09   : >> { %v5930_v55 = vpop.xlane.xlu1 %5929 }
 0xb0a   : >> { %v5932_v47 = vadd.f32 %v5930_v55, %v5924_v9   ;;  %v10512_v19 = vmov %v5931_v58  ;;  %7826 = vrcp.f32 (%p1425_p6), %v5931_v58  ;;  %v7785_v9 = vld [vmem:[#allocation21 + $0x38] sm:$0xff] (%p1425_p6)  }
 0xb0b   : > { %7266 = vmatpush3.bf16.msra.mxu0 (%p1425_p6), %v7785_v9  ;;  %v6446_v9 = vld [vmem:[#allocation28] sm:$0x3] (%p1425_p6) }
 0xb0c   : > { %7828 = vrcp.f32 (%p1425_p6), %v5932_v47 }
 0xb14   : > { %v7827_v21 = vpop.eup (%p1425_p6), %7826 }
 0xb16   : > { %v7829_v59 = vpop.eup (%p1425_p6), %7828 }
 0xb4d   : > { %1427 = sbr.rel (!%p1425_p6) target bundleno = 1725 (0x6bd), region = 227 }
 0xb4e   : >> { %v6026_v27 = vpop.f32.mrb[4].mxu0 }
 0xb4f   : >> { %v6102_v62 = vadd.f32 %v6026_v27, %v5933_v11   ;;  %v7339_v14 = vpop.f32.mrb[5].mxu0 }
 0xb50   : >> { %v6029_v28 = vpop.f32.mrb[6].mxu0  ;;  %v6096_v33 = vpop.f32.mrb[4].mxu1 }
 0xb51   : >> { %v6103_v15 = vadd.f32 %v6096_v33, %v5934_v50   ;;  %v7340_v18 = vpop.f32.mrb[7].mxu0  ;;  %v7345_v60 = vpop.f32.mrb[5].mxu1  ;;  %v10510_v17 = vmov %v6102_v62  ;;  %v6106_v23 = vmul.f32 (%p1425_p6), %v7827_v21, %v6102_v62  ;;  %v7167_v50 = vld [vmem:[#allocation22] ss:$0 sm:$0xff] (%p1425_p6)  ;;  %v7795_v21 = vld [vmem:[#allocation27 + $0x34] ss:$8 sps:$4 sm:$0xff] (%p1425_p6)  }
 0xb52   : >> { %v6099_v7 = vpop.f32.mrb[6].mxu1  ;;  %v10511_v18 = vmov %v5932_v47  ;;  %v8590_v17 = vmov (%p1425_p6), 0.0   ;;  %v10514_v60 = vld [vmem:[#allocation58_spill] sm:$0xff] (%p1425_p6) }
 0xb53   : >> { %v7346_v61 = vpop.f32.mrb[7].mxu1  ;;  %v10509_v16 = vmov %v6103_v15  ;;  %v6107_v20 = vmul.f32 (%p1425_p6), %v7829_v59, %v6103_v15  ;;  %v6115_v63 = vrot.slane (%p1425_p6), %v6106_v23, %v10490_v25  ;;  %v7797_v59 = vld [vmem:[#allocation27 + $0x30] ss:$8 sps:$4 sm:$0xff] (%p1425_p6)  }
 0xb54   : > { %v6108_v16 = vcombine.high %v6106_v23, %v8590_v17  ;;  %v7788_v61 = vld [vmem:[#allocation27] ss:$8 sps:$4 sm:$0xff]  }
 0xb55   : > { %v6123_v48 = vcombine.high %v6107_v20, %v8590_v17  ;;  %v6130_v37 = vrot.slane %v6107_v20, %v10490_v25  ;;  %v7800_v23 = vld [vmem:[#allocation27 + $0x40] ss:$8 sps:$4 sm:$0xff]   ;;  %v7803_v20 = vld [vmem:[#allocation27 + $0x50] ss:$8 sps:$4 sm:$0xff]   ;;  %v7804_v17 = vld [vmem:[#allocation27 + $0x64] ss:$8 sps:$4 sm:$0xff]  }
 0xb56   : > { %v6122_v41 = vrot.slane %v6108_v16, %v10490_v25  ;;  %v7806_v16 = vld [vmem:[#allocation27 + $0x60] ss:$8 sps:$4 sm:$0xff]  }
 0xb57   : > { %v6137_v54 = vrot.slane %v6123_v48, %v10490_v25  ;;  %v6138_v19 = vcombine.low %v6115_v63, %v6130_v37  ;;  %v6139_v51 = vcombine.high %v6115_v63, %v6130_v37  ;;  %v7807_v63 = vld [vmem:[#allocation27 + $0x74] ss:$8 sps:$4 sm:$0xff]   ;;  %v7810_v48 = vld [vmem:[#allocation30 + $0x40] sm:$0xff]  }
 0xb58   : > { %v7811_v37 = vld [vmem:[#allocation30] sm:$0xff]   ;;  %7273 = vmatprep.subr.bf16.mxu0 %v7810_v48 }
 0xb59   : > { %v6146_v1 = vrot.slane %v6138_v19, %v9494_v5  ;;  %v6153_v4 = vrot.slane %v6139_v51, %v9494_v5  ;;  %v6154_v44 = vcombine.low %v6122_v41, %v6137_v54  ;;  %v6155_v8 = vcombine.high %v6122_v41, %v6137_v54  ;;  %v7813_v41 = vld [vmem:[#allocation30 + $0x8] sm:$0xff]   ;;  %v7814_v54 = vld [vmem:[#allocation30 + $0x50] sm:$0xff]   ;;  %v7816_v51 = vld [vmem:[#allocation30 + $0x58] sm:$0xff]  }
 0xb5a   : > { %v7815_v19 = vld [vmem:[#allocation30 + $0x10] sm:$0xff]  }
 0xb5b   : > { %v6162_v29 = vrot.slane %v6154_v44, %v9494_v5  ;;  %v6169_v13 = vrot.slane %v6155_v8, %v9494_v5  ;;  %v6174_v52 = vcombine.low %v6146_v1, %v6153_v4  ;;  %v7165_v6 = vcombine.high %v6146_v1, %v6153_v4  ;;  %v7819_v1 = vld [vmem:[#allocation30 + $0x20] sm:$0xff]   ;;  %v7820_v4 = vld [vmem:[#allocation30 + $0x68] sm:$0xff]  }
 0xb5c   : > { %v7821_v44 = vld [vmem:[#allocation30 + $0x28] sm:$0xff]  }
 0xb5d   : > { %v6181_v46 = vrot.slane %v6174_v52, %v10490_v25  ;;  %v6189_v35 = vrot.slane %v7165_v6, %v10490_v25  ;;  %v6190_v0 = vcombine.low %v6162_v29, %v6169_v13  ;;  %v7166_v22 = vcombine.high %v6162_v29, %v6169_v13  ;;  %v7184_v6 = vld [vmem:[#allocation24] ss:$0 sm:$0xff] }
 0xb5f   : > { %v6197_v31 = vrot.slane %v6190_v0, %v10490_v25  ;;  %v6205_v58 = vrot.slane %v7166_v22, %v10490_v25  ;;  %v6206_v43 = vcombine.low %v6181_v46, %v6189_v35  ;;  %v7822_v22 = vld [vmem:[#allocation30 + $0x70] sm:$0xff]  }
 0xb61   : > { %v6213_v55 = vrot.slane %v6206_v43, %v9494_v5  ;;  %v6214_v47 = vcombine.low %v6197_v31, %v6205_v58  ;;  %v7823_v31 = vld [vmem:[#allocation30 + $0x30] sm:$0xff]   ;;  %v7824_v58 = vld [vmem:[#allocation30 + $0x78] sm:$0xff]  }
 0xb62   : > { %v7825_v43 = vld [vmem:[#allocation30 + $0x38] sm:$0xff]  }
 0xb63   : > { %v6221_v45 = vrot.slane %v6214_v47, %v9494_v5  ;;  %v7786_v5 = vld [vmem:[#allocation27 + $0x4] ss:$8 sps:$4 sm:$0xff]  }
 0xb64   : > { %6538 = vmatprep.subr.bf16.mxu1 %v7786_v5 }
 0xb65   : > { %v6223_v11 = vcombine.high %v6213_v55, %v6221_v45  ;;  %v6222_v27 = vcombine.low %v6213_v55, %v6221_v45  ;;  %6539 = vmatpush1.bf16.msra.mxu1 %v7788_v61  ;;  %v10516_v55 = vld [vmem:[#allocation59_spill] sm:$0xff]  ;;  %v10517_v45 = vsub.s32 1, %v9337_v57 }
 0xb66   : > { %6540 = vmatprep.subr.bf16.mxu1 %v7789_v10  ;;  %v6451_v47 = vrot.slane %v6446_v9, %v10516_v55  ;;  %v7202_v57 = vld [vmem:[#allocation31] ss:$0 sm:$0xff] }
 0xb67   : > { %v6225_v62 = vpack.c.bf16 %v6223_v11, %v6223_v11  ;;  %v6224_v14 = vpack.c.bf16 %v6222_v27, %v6222_v27  ;;  %v6455_v11 = vrot.slane %v6446_v9, %v10517_v45 }
 0xb69   : > { %6393 = vmatprep.mubr.bf16.mxu0 %v6225_v62  ;;  %6541 = vmatpush1.bf16.msra.mxu1 %v7791_v3 }
 0xb6a   : > { %6394 = vmatmul.mubr.bf16.vlgmr.msra.gmra.mrb[0].mxu0 %v6224_v14  ;;  %6542 = vmatprep.subr.bf16.mxu1 %v7792_v32 }
 0xb6b   : > { %7274 = vmatpush3.bf16.msra.mxu0 %v7811_v37 }
 0xb6c   : > { %7275 = vmatprep.subr.bf16.mxu0 %v7812_v40 }
 0xb6d   : > { %6543 = vmatpush1.bf16.msra.mxu1 %v7794_v34 }
 0xb6e   : > { %6544 = vmatprep.subr.bf16.mxu1 %v7795_v21 }
 0xb6f   : > { %7276 = vmatpush3.bf16.msra.mxu0 %v7813_v41 }
 0xb70   : > { %7277 = vmatprep.subr.bf16.mxu0 %v7814_v54 }
 0xb71   : > { %6545 = vmatpush1.bf16.msra.mxu1 %v7797_v59 }
 0xb72   : > { %6546 = vmatprep.subr.bf16.mxu1 %v7798_v36 }
 0xb73   : > { %7278 = vmatpush3.bf16.msra.mxu0 %v7815_v19 }
 0xb74   : > { %7279 = vmatprep.subr.bf16.mxu0 %v7816_v51 }
 0xb75   : > { %6547 = vmatpush1.bf16.msra.mxu1 %v7800_v23 }
 0xb76   : > { %6548 = vmatprep.subr.bf16.mxu1 %v7801_v24 }
 0xb77   : > { %7280 = vmatpush3.bf16.msra.mxu0 %v7817_v38 }
 0xb78   : > { %7281 = vmatprep.subr.bf16.mxu0 %v7818_v30 }
 0xb79   : > { %6549 = vmatpush1.bf16.msra.mxu1 %v7803_v20 }
 0xb7a   : > { %6550 = vmatprep.subr.bf16.mxu1 %v7804_v17 }
 0xb7b   : > { %7282 = vmatpush3.bf16.msra.mxu0 %v7819_v1 }
 0xb7c   : > { %7283 = vmatprep.subr.bf16.mxu0 %v7820_v4 }
 0xb7d   : > { %6551 = vmatpush1.bf16.msra.mxu1 %v7806_v16 }
 0xb7e   : > { %6552 = vmatprep.subr.bf16.mxu1 %v7807_v63 }
 0xb7f   : > { %7284 = vmatpush3.bf16.msra.mxu0 %v7821_v44 }
 0xb80   : > { %7285 = vmatprep.subr.bf16.mxu0 %v7822_v22 }
 0xb81   : > { %6553 = vmatpush1.bf16.msra.mxu1 %v7809_v12 }
 0xb83   : > { %7286 = vmatpush3.bf16.msra.mxu0 %v7823_v31 }
 0xb84   : > { %7287 = vmatprep.subr.bf16.mxu0 %v7824_v58 }
 0xb87   : > { %7288 = vmatpush3.bf16.msra.mxu0 %v7825_v43 }
 0xc3d   : > { %v7267_v42 = vpop.f32.mrb[0].mxu0 }
 0xc3e   : > { %v7268_v28 = vpop.f32.mrb[1].mxu0 }
 0xc3f   : > { %v7269_v25 = vadd.f32 %v7268_v28, %v7267_v42  ;;  %v7270_v33 = vpop.f32.mrb[2].mxu0 }
 0xc40   : > { %v7271_v15 = vpop.f32.mrb[3].mxu0 }
 0xc41   : > { %v6396_v18 = vadd.f32 %v7269_v25, %v7167_v50 }
 0xc43   : > { %v10232_v7 = vadd.f32 %v6396_v18, %v10514_v60 }
 0xc45   : > { %6404 = vadd.xlane.f32.xlu0 %v10232_v7 }
 0xcd2   : > { %v6405_v49 = vpop.xlane.xlu0 %6404 }
 0xcd3   : > { %v6406_v56 = vmul.f32 0.0078125, %v6405_v49 }
 0xcd5   : > { %v6407_v39 = vsub.f32 %v10232_v7, %v6406_v56 }
 0xcd7   : > { %v6408_v2 = vmul.f32 %v6407_v39, %v6407_v39 }
 0xcd9   : > { %6409 = vadd.xlane.f32.xlu0 %v6408_v2 }
 0xd66   : > { %v6410_v8 = vpop.xlane.xlu0 %6409 }
 0xd67   : > { %v6411_v29 = vmul.f32 0.0078125, %v6410_v8 }
 0xd69   : > { %v6412_v13 = vadd.f32 1e-05, %v6411_v29 }
 0xd6b   : > { %7830 = vrsqrt.f32 %v6412_v13 }
 0xd75   : > { %v7831_v52 = vpop.eup %7830 }
 0xd76   : > { %v6414_v26 = vmul.f32 %v7831_v52, %v6407_v39 }
 0xd78   : > { %v6421_v46 = vmul.f32 %v7184_v6, %v6414_v26 }
 0xd7a   : > { %v6428_v35 = vadd.f32 %v7185_v53, %v6421_v46 }
 0xd7c   : > { %v6429_v0 = vpack.c.bf16 %v6428_v35, %v6428_v35 }
 0xd7e   : > { %6571 = vmatmul.mubr.bf16.vlgmr.msra.gmra.mrb[0].mxu1 %v6429_v0 }
 0xe51   : > { %v6572_v27 = vpop.f32.mrb[0].mxu1 }
 0xe52   : > { %v6573_v62 = vadd.f32 %v6572_v27, %v6451_v47  ;;  %v6574_v14 = vpop.f32.mrb[1].mxu1 }
 0xe53   : > { %v6575_v42 = vadd.f32 %v6574_v14, %v6455_v11  ;;  %v6576_v50 = vpop.f32.mrb[2].mxu1 }
 0xe54   : > { %v6579_v28 = vmax.f32 %v6573_v62, 0.0  ;;  %v6577_v25 = vpop.f32.mrb[3].mxu1 }
 0xe55   : > { %v6580_v33 = vmax.f32 %v6575_v42, 0.0 }
 0xe56   : > { %v6581_v18 = vpack.c.bf16 %v6579_v28, %v6579_v28 }
 0xe57   : > { %v6582_v15 = vpack.c.bf16 %v6580_v33, %v6580_v33 }
 0xe59   : > { %6750 = vmatprep.mubr.bf16.mxu0 %v6582_v15 }
 0xe5a   : > { %6751 = vmatmul.mubr.bf16.vlgmr.msra.gmra.mrb[4].mxu0 %v6581_v18 }
 0xf2d   : > { %v7289_v60 = vpop.f32.mrb[4].mxu0 }
 0xf2e   : > { %v7290_v5 = vpop.f32.mrb[5].mxu0 }
 0xf2f   : > { %v7291_v61 = vadd.f32 %v7290_v5, %v7289_v60  ;;  %v7292_v10 = vpop.f32.mrb[6].mxu0 }
 0xf30   : > { %v7293_v3 = vpop.f32.mrb[7].mxu0 }
 0xf31   : > { %v6753_v32 = vadd.f32 %v7291_v61, %v7202_v57 }
 0xf33   : > { %v6758_v49 = vadd.f32 %v6753_v32, %v10232_v7 }
 0xf35   : > { %6759 = vst [vmem:[%s860_s26] sm:$0xff] %v6758_v49 }
 0xf36   : > { %8353 = shalt.err (!%p8350_p3)
}
 0xf37   : > { %s8354_s18 = scalar_lea.hbm %s10247_s17, 128  ;;  %s8358_s9 = scalar_lea.hbm %s10520_s11, 512 }
 0xf38   : > { %p8355_p2 = scmp.ne.s32.totalorder %s10247_s17, %s8354_s18  ;;  %p8359_p8 = scmp.lt.u32.totalorder %s10247_s17, %s10520_s11 }
 0xf39   : > { %p8360_p11 = scmp.lt.u32.totalorder %s8358_s9, %s8354_s18  ;;  %p8362_p9 = scmp.lt.u32.totalorder %s8354_s18, %s10247_s17 }
 0xf3a   : > { %p8356_p10 = pnand %p8355_p2, %p10521_p0 }
 0xf3b   : > { %p8361_p6 = por %p8360_p11, %p8359_p8 }
 0xf3c   : > { %p8357_p12 = pneg %p8356_p10 }
 0xf3d   : > { %p8363_p1 = por %p8362_p9, %p8361_p6 }
 0xf3f   : > { %p8364_p5 = pnand %p8363_p1, %p8357_p12 }
 0xf41   : > { %8367 = shalt.err (!%p8364_p5)
}
 0xf42   : > { %7415 = dma.vmem_to_hbm [thread:$0]  (%p10521_p0), %s10249_s4, 128, %s10247_s17, %s6761_s12  }
 0xf43 PF: > { %s10522_s30 = sld [smem:[#allocation55_spill]]  ;;  %s10523_s21 = sld [smem:[#allocation46_spill]] }
 0xf44   : > { %p10524_p7 = scmp.ne.s32.totalorder %s10443_s22, 0 }
 0xf49   : > { %p7510_p13 = scmp.ge.s32.totalorder %s10522_s30, 2  ;;  %s6788_s7 = sand.u32 1, %s10523_s21  }
 0xf4a   : > { %s6789_s5 = scalar_lea.sflag [#allocation6], %s6788_s7 }
 0xf4b   : > { %p7474_p4 = pnand %p7510_p13, %p10524_p7 }
 0xf4d   : > { %8485 = dma.done.wait (!%p7474_p4), %s6789_s5, 128  }
 0xf4e   : > { %8487 = vsyncadd (!%p7474_p4), %s6789_s5, 4294967168  ;;  %s45_s3 = sadd.s32 1, %s10522_s30   ;;  %s10525_s27 = sld [smem:[#allocation47_spill]] }
 0xf4f   : > { %p42_p3 = scmp.ge.s32.totalorder %s45_s3, 6   ;;  %s10526_s10 = sld [smem:[#allocation48_spill]] }
 0xf50   : > { %s10527_s30 = sld [smem:[#allocation50_spill]]  ;;  %s10528_s4 = sld [smem:[#allocation53_spill]] }
 0xf51   : > { %s10529_s20 = sld [smem:[#allocation54_spill]]  ;;  %s10530_s17 = smov %s10541_s1 }
 0xf52   : > { %s10531_s12 = smov %s10545_s28  ;;  %s10533_s29 = smov %s9208_s6 }
 0xf53   : > { %s10534_s0 = smov %s8510_s19  ;;  %s10535_s19 = smov %s9205_s2 }
 0xf54   : > { %s10537_s21 = smov %s10530_s17  ;;  %s10538_s22 = smov %s10531_s12 }
 0xf55   : > { %s10532_s28 = smov %s10526_s10  ;;  %s10539_s2 = smov %s45_s3 }
 0xf56   : > { %s10536_s1 = smov %s10528_s4  ;;  %44 = sbr.rel (!%p42_p3) target bundleno = 39 (0x27), region = 238 }
 0xf5d   :  { %6794 = vsyncpa [#allocation5], 1 }
 0xf5e   :  { %6796 = vsyncpa [#allocation5 + $0x1], 1 }
 0xf5f   :  { %6797 = vsyncpa [#allocation8], 1 }
 0xf60   :  { %6799 = vsyncpa [#allocation8 + $0x1], 1 }
 0xf61   :  { %6800 = vsyncpa [#allocation11], 1 }
 0xf62   :  { %6801 = vsyncpa [#allocation14], 1 }
 0xf63   :  { %6802 = vsyncpa [#allocation17], 1 }
 0xf64   :  { %6803 = vsyncpa [#allocation20], 1 }
 0xf65   :  { %6804 = vsyncpa [#allocation23], 1 }
 0xf66   :  { %6805 = vsyncpa [#allocation26], 1 }
 0xf67   :  { %6806 = vsyncpa [#allocation29], 1 }
 0xf68   :  { %6807 = vsyncpa [#allocation32], 1 }
 0xf69   :  { %6808 = vsyncpa [#allocation6], 1 }
 0xf6a   :  { %6810 = vsyncpa [#allocation6 + $0x1], 1 }

// kernel: tpu_custom_call.1
= control target key start
LH: loop header
LB: loop body
LE: loop exit
PB: predicated region body
PF: predicated region fallthrough
CT: control target
= control target key end

     0   :  { %s10313_s0 = inlined_call_operand.hbm [shape: bf16[2,16,128], index: 0, kind: input, shape index: {}]   ;;  %s10314_s1 = inlined_call_operand.hbm [shape: f32[2,16,128], index: 1, kind: input, shape index: {}]   ;;  %s10315_s2 = inlined_call_operand.hbm [shape: f32[1,128], index: 2, kind: input, shape index: {}]   ;;  %s10316_s3 = inlined_call_operand.hbm [shape: f32[1,128], index: 3, kind: input, shape index: {}]   ;;  %s10317_s4 = inlined_call_operand.hbm [shape: bf16[128,256], index: 4, kind: input, shape index: {}]   ;;  %s10318_s5 = inlined_call_operand.hbm [shape: f32[1,256], index: 5, kind: input, shape index: {}]   ;;  %s10319_s6 = inlined_call_operand.hbm [shape: bf16[128,256], index: 6, kind: input, shape index: {}]   ;;  %s10320_s7 = inlined_call_operand.hbm [shape: f32[1,256], index: 7, kind: input, shape index: {}]   ;;  %s10321_s8 = inlined_call_operand.hbm [shape: bf16[128,256], index: 8, kind: input, shape index: {}]   ;;  %s10322_s9 = inlined_call_operand.hbm [shape: f32[1,256], index: 9, kind: input, shape index: {}]   ;;  %s10323_s10 = inlined_call_operand.hbm [shape: bf16[256,128], index: 10, kind: input, shape index: {}]   ;;  %s10324_s11 = inlined_call_operand.hbm [shape: f32[1,128], index: 11, kind: input, shape index: {}]   ;;  %s10325_s12 = inlined_call_operand.hbm [shape: f32[1,128], index: 12, kind: input, shape index: {}]   ;;  %s10326_s13 = inlined_call_operand.hbm [shape: f32[1,128], index: 13, kind: input, shape index: {}]   ;;  %s10327_s14 = inlined_call_operand.hbm [shape: bf16[128,256], index: 14, kind: input, shape index: {}]   ;;  %s10328_s15 = inlined_call_operand.hbm [shape: f32[1,256], index: 15, kind: input, shape index: {}]   ;;  %s10329_s16 = inlined_call_operand.hbm [shape: bf16[256,128], index: 16, kind: input, shape index: {}]   ;;  %s10330_s17 = inlined_call_operand.hbm [shape: f32[1,128], index: 17, kind: input, shape index: {}]   ;;  %s10331_s18 = inlined_call_operand.hbm [shape: f32[2,16,128], index: 18, kind: output, shape index: {}]  }
   0x1   :  { %10373 = sst [smem:[#allocation75_spill]] %s10313_s0 }
   0x2   :  { %10374 = sst [smem:[#allocation76_spill]] %s10314_s1 }
   0x3   :  { %10375 = sst [smem:[#allocation77_spill]] %s10315_s2 }
   0x4   :  { %10376 = sst [smem:[#allocation78_spill]] %s10316_s3 }
   0x5   :  { %10377 = sst [smem:[#allocation79_spill]] %s10317_s4 }
   0x6   :  { %10378 = sst [smem:[#allocation80_spill]] %s10318_s5 }
   0x7   :  { %10379 = sst [smem:[#allocation81_spill]] %s10319_s6 }
   0x8   :  { %10380 = sst [smem:[#allocation82_spill]] %s10320_s7 }
   0x9   :  { %10381 = sst [smem:[#allocation83_spill]] %s10321_s8 }
   0xa   :  { %10382 = sst [smem:[#allocation84_spill]] %s10322_s9 }
   0xb   :  { %10383 = sst [smem:[#allocation85_spill]] %s10323_s10 }
   0xc   :  { %10384 = sst [smem:[#allocation86_spill]] %s10324_s11 }
   0xd   :  { %10385 = sst [smem:[#allocation87_spill]] %s10325_s12 }
   0xe   :  { %10386 = sst [smem:[#allocation88_spill]] %s10326_s13 }
   0xf   :  { %10387 = sst [smem:[#allocation89_spill]] %s10327_s14 }
  0x10   :  { %10388 = sst [smem:[#allocation90_spill]] %s10328_s15 }
  0x11   :  { %10389 = sst [smem:[#allocation91_spill]] %s10329_s16 }
  0x12   :  { %10390 = sst [smem:[#allocation92_spill]] %s10330_s17 }
  0x13   :  { %10391 = sst [smem:[#allocation93_spill]] %s10331_s18 }
  0x14   :  { %23 = vsyncpa [#allocation5], 0 }
  0x15   :  { %25 = vsyncpa [#allocation5 + $0x1], 0 }
  0x16   :  { %26 = vsyncpa [#allocation8], 0 }
  0x17   :  { %28 = vsyncpa [#allocation8 + $0x1], 0 }
  0x18   :  { %29 = vsyncpa [#allocation11], 0 }
  0x19   :  { %30 = vsyncpa [#allocation14], 0 }
  0x1a   :  { %31 = vsyncpa [#allocation17], 0 }
  0x1b   :  { %32 = vsyncpa [#allocation20], 0 }
  0x1c   :  { %33 = vsyncpa [#allocation23], 0 }
  0x1d   :  { %34 = vsyncpa [#allocation26], 0 }
  0x1e   :  { %35 = vsyncpa [#allocation29], 0 }
  0x1f   :  { %36 = vsyncpa [#allocation32], 0 }
  0x20   :  { %37 = vsyncpa [#allocation6], 0 }
  0x21   :  { %39 = vsyncpa [#allocation6 + $0x1], 0  ;;  %s8687_s27 = smov 0   ;;  %s8689_s28 = smov 0  }
  0x22   :  { %s8691_s29 = smov 0   ;;  %s8693_s30 = smov 0  }
  0x23   :  { %s8695_s0 = smov 0   ;;  %s8697_s19 = smov 0  }
  0x24   :  { %s8699_s1 = smov 0   ;;  %s8701_s20 = smov 0  }
  0x25   :  { %s8703_s21 = smov 0   ;;  %s8705_s22 = smov 0  }
  0x26   :  { %s8707_s2 = smov 0  }
  0x27 LB: > { %10392 = sst [smem:[#allocation46_spill]] %s8490_s27  ;;  %s8743_s23 = sadd.s32 4294967295, %s8530_s2   ;;  %s8530_s2 = sphi %s8707_s2, %s10539_s2   ;;  %s8526_s22 = sphi %s8705_s22, %s10538_s22   ;;  %s8522_s21 = sphi %s8703_s21, %s10537_s21   ;;  %s8518_s20 = sphi %s8701_s20, %s10529_s20   ;;  %s8514_s1 = sphi %s8699_s1, %s10536_s1   ;;  %s8510_s19 = sphi %s8697_s19, %s10535_s19   ;;  %s8506_s0 = sphi %s8695_s0, %s10534_s0   ;;  %s8502_s30 = sphi %s8693_s30, %s10527_s30   ;;  %s8498_s29 = sphi %s8691_s29, %s10533_s29   ;;  %s8494_s28 = sphi %s8689_s28, %s10532_s28   ;;  %s8490_s27 = sphi %s8687_s27, %s10525_s27  }
  0x28   : > { %10393 = sst [smem:[#allocation47_spill]] %s8494_s28  ;;  %p7065_p0 = scmp.ge.s32.totalorder %s8530_s2, 1 }
  0x29   : > { %10394 = sst [smem:[#allocation48_spill]] %s8498_s29  ;;  %p10345_p1 = scmp.eq.s32.totalorder %s8743_s23, 0 }
  0x2a   : > { %10395 = sst [smem:[#allocation49_spill]] %s8502_s30  ;;  %p480_p2 = scmp.lt.s32.totalorder %s8530_s2, 5 }
  0x2b   : > { %10396 = sst [smem:[#allocation50_spill]] %s8506_s0  ;;  %s8560_s25 = smov [#allocation9]  }
  0x2c   : > { %10397 = sst [smem:[#allocation51_spill]] %s8514_s1  ;;  %p8748_p3 = pnand %p7065_p0, %p480_p2 }
  0x2d   : > { %10398 = sst [smem:[#allocation52_spill]] %s8518_s20  ;;  %s493_s26 = sshll.u32 %s8560_s25, 4  ;;  %s494_s26 = int_to_ptr.vmem [resolvable:$true] %s493_s26 }
  0x2e   : > { %10399 = sst [smem:[#allocation53_spill]] %s8522_s21  ;;  %p7417_p4 = pneg %p8748_p3 }
  0x2f   : > { %10400 = sst [smem:[#allocation54_spill]] %s8526_s22  ;;  %s8561_s18 = smov [#allocation10]  }
  0x30   : > { %10401 = sst [smem:[#allocation55_spill]] %s8530_s2  ;;  %s504_s20 = sshll.u32 %s8561_s18, 4  ;;  %s8760_s20 = int_to_ptr.vmem [resolvable:$true] %s504_s20 }
  0x31   : > { %10402 = sst [smem:[#allocation56_spill]] %s8743_s23  ;;  %p8756_p5 = pnand %p7417_p4, %p10345_p1 }
  0x32   : > { %s10403_s24 = scalar_select %p8748_p3, 1, 0 }
  0x33   : > { %s8562_s27 = smov [#allocation13]   ;;  %s10406_s25 = sld [smem:[#allocation77_spill]] }
  0x34   : > { %10404 = sst [smem:[#allocation57_spill]] %s10403_s24  ;;  %s528_s28 = sshll.u32 %s8562_s27, 4  ;;  %s8762_s28 = int_to_ptr.vmem [resolvable:$true] %s528_s28 }
  0x35   : > { %p8772_p7 = pneg %p8756_p5 }
  0x39   : > { %s7832_s22 = scalar_lea.hbm %s10406_s25, 16 }
  0x3a   : > { %p7833_p6 = scmp.ne.s32.totalorder %s10406_s25, %s7832_s22  ;;  %p7839_p10 = scmp.lt.u32.totalorder %s7832_s22, %s10406_s25 }
  0x3c   : > { %p7835_p8 = pnand %p8772_p7, %p7833_p6 }
  0x3e   : > { %p7836_p9 = pneg %p7835_p8 }
  0x40   : > { %p7841_p11 = pnand %p7839_p10, %p7836_p9 }
  0x42   : > { %7844 = shalt.err (!%p7841_p11)
}
  0x43   : > { %s7845_s29 = scalar_lea.vmem %s494_s26, 16  ;;  %s7852_s30 = scalar_lea.vmem %s494_s26, 32 }
  0x44   : > { %p7846_p12 = scmp.ne.s32.totalorder %s494_s26, %s7845_s29  ;;  %p7853_p2 = scmp.lt.s32.totalorder %s494_s26, %s494_s26 }
  0x45   : > { %p7854_p4 = scmp.lt.s32.totalorder %s7852_s30, %s7845_s29 }
  0x46   : > { %p7848_p13 = pnand %p7846_p12, %p8772_p7 }
  0x47   : > { %p7855_p1 = por %p7854_p4, %p7853_p2 }
  0x48   : > { %p7849_p0 = pneg %p7848_p13 }
  0x4a   : > { %p7856_p3 = pnand %p7855_p1, %p7849_p0 }
  0x4c   : > { %7859 = shalt.err (!%p7856_p3)
}
  0x4d   : > { %7420 = dma.hbm_to_vmem [thread:$0]  (!%p8756_p5), %s10406_s25, 16, %s494_s26, [#allocation8]  }
  0x4e   : > { %s10408_s3 = sld [smem:[#allocation78_spill]] }
  0x54   : > { %s7860_s27 = scalar_lea.hbm %s10408_s3, 16 }
  0x55   : > { %p7861_p6 = scmp.ne.s32.totalorder %s10408_s3, %s7860_s27  ;;  %p7867_p1 = scmp.lt.u32.totalorder %s7860_s27, %s10408_s3 }
  0x57   : > { %p7863_p8 = pnand %p7861_p6, %p8772_p7 }
  0x59   : > { %p7864_p9 = pneg %p7863_p8 }
  0x5b   : > { %p7869_p3 = pnand %p7867_p1, %p7864_p9 }
  0x5d   : > { %7872 = shalt.err (!%p7869_p3)
}
  0x5e   : > { %s7873_s26 = scalar_lea.vmem %s8760_s20, 16  ;;  %s7880_s0 = scalar_lea.vmem %s8760_s20, 32 }
  0x5f   : > { %p7874_p10 = scmp.ne.s32.totalorder %s8760_s20, %s7873_s26  ;;  %p7881_p13 = scmp.lt.s32.totalorder %s8760_s20, %s8760_s20 }
  0x60   : > { %p7882_p0 = scmp.lt.s32.totalorder %s7880_s0, %s7873_s26 }
  0x61   : > { %p7876_p11 = pnand %p7874_p10, %p8772_p7 }
  0x62   : > { %p7883_p2 = por %p7882_p0, %p7881_p13 }
  0x63   : > { %p7877_p12 = pneg %p7876_p11 }
  0x65   : > { %p7884_p4 = pnand %p7883_p2, %p7877_p12 }
  0x67   : > { %7887 = shalt.err (!%p7884_p4)
}
  0x68   : > { %7423 = dma.hbm_to_vmem [thread:$0]  (!%p8756_p5), %s10408_s3, 16, %s8760_s20, [#allocation11]  }
  0x69   : > { %s10409_s5 = sld [smem:[#allocation80_spill]] }
  0x6f   : > { %s7888_s23 = scalar_lea.hbm %s10409_s5, 32 }
  0x70   : > { %p7889_p6 = scmp.ne.s32.totalorder %s10409_s5, %s7888_s23  ;;  %p7895_p1 = scmp.lt.u32.totalorder %s7888_s23, %s10409_s5 }
  0x72   : > { %p7891_p8 = pnand %p7889_p6, %p8772_p7 }
  0x74   : > { %p7892_p9 = pneg %p7891_p8 }
  0x76   : > { %p7897_p3 = pnand %p7895_p1, %p7892_p9 }
  0x78   : > { %7900 = shalt.err (!%p7897_p3)
}
  0x79   : > { %s7901_s20 = scalar_lea.vmem %s8762_s28, 32  ;;  %p7909_p13 = scmp.lt.s32.totalorder %s8762_s28, %s8762_s28 }
  0x7a   : > { %p7902_p10 = scmp.ne.s32.totalorder %s8762_s28, %s7901_s20  ;;  %p7910_p0 = scmp.lt.s32.totalorder %s7901_s20, %s7901_s20 }
  0x7c   : > { %p7904_p11 = pnand %p7902_p10, %p8772_p7  ;;  %p7911_p2 = por %p7910_p0, %p7909_p13 }
  0x7e   : > { %p7905_p12 = pneg %p7904_p11 }
  0x80   : > { %p7912_p4 = pnand %p7911_p2, %p7905_p12 }
  0x82   : > { %7915 = shalt.err (!%p7912_p4)
}
  0x83   : > { %7429 = dma.hbm_to_vmem [thread:$0]  (!%p8756_p5), %s10409_s5, 32, %s8762_s28, [#allocation14]  }
  0x84   : > { %s8563_s21 = smov [#allocation16]   ;;  %s8564_s22 = smov [#allocation19]  }
  0x85   : > { %s552_s24 = sshll.u32 %s8563_s21, 4  ;;  %s576_s23 = sshll.u32 %s8564_s22, 4  ;;  %s553_s24 = int_to_ptr.vmem [resolvable:$true] %s552_s24  ;;  %s577_s23 = int_to_ptr.vmem [resolvable:$true] %s576_s23 }
  0x86   : > { %s10410_s7 = sld [smem:[#allocation82_spill]] }
  0x8c   : > { %s7916_s30 = scalar_lea.hbm %s10410_s7, 32 }
  0x8d   : > { %p7917_p6 = scmp.ne.s32.totalorder %s10410_s7, %s7916_s30  ;;  %p7923_p1 = scmp.lt.u32.totalorder %s7916_s30, %s10410_s7 }
  0x8f   : > { %p7919_p8 = pnand %p7917_p6, %p8772_p7 }
  0x91   : > { %p7920_p9 = pneg %p7919_p8 }
  0x93   : > { %p7925_p3 = pnand %p7923_p1, %p7920_p9 }
  0x95   : > { %7928 = shalt.err (!%p7925_p3)
}
  0x96   : > { %s7929_s28 = scalar_lea.vmem %s553_s24, 32  ;;  %p7937_p13 = scmp.lt.s32.totalorder %s553_s24, %s553_s24 }
  0x97   : > { %p7930_p10 = scmp.ne.s32.totalorder %s553_s24, %s7929_s28  ;;  %p7938_p0 = scmp.lt.s32.totalorder %s7929_s28, %s7929_s28 }
  0x99   : > { %p7932_p11 = pnand %p7930_p10, %p8772_p7  ;;  %p7939_p2 = por %p7938_p0, %p7937_p13 }
  0x9b   : > { %p7933_p12 = pneg %p7932_p11 }
  0x9d   : > { %p7940_p4 = pnand %p7939_p2, %p7933_p12 }
  0x9f   : > { %7943 = shalt.err (!%p7940_p4)
}
  0xa0   : > { %7435 = dma.hbm_to_vmem [thread:$0]  (!%p8756_p5), %s10410_s7, 32, %s553_s24, [#allocation17]  }
  0xa1   : > { %s10411_s9 = sld [smem:[#allocation84_spill]] }
  0xa7   : > { %s7944_s27 = scalar_lea.hbm %s10411_s9, 32 }
  0xa8   : > { %p7945_p6 = scmp.ne.s32.totalorder %s10411_s9, %s7944_s27  ;;  %p7951_p1 = scmp.lt.u32.totalorder %s7944_s27, %s10411_s9 }
  0xaa   : > { %p7947_p8 = pnand %p7945_p6, %p8772_p7 }
  0xac   : > { %p7948_p9 = pneg %p7947_p8 }
  0xae   : > { %p7953_p3 = pnand %p7951_p1, %p7948_p9 }
  0xb0   : > { %7956 = shalt.err (!%p7953_p3)
}
  0xb1   : > { %s7957_s0 = scalar_lea.vmem %s577_s23, 32  ;;  %p7965_p13 = scmp.lt.s32.totalorder %s577_s23, %s577_s23 }
  0xb2   : > { %p7958_p10 = scmp.ne.s32.totalorder %s577_s23, %s7957_s0  ;;  %p7966_p0 = scmp.lt.s32.totalorder %s7957_s0, %s7957_s0 }
  0xb4   : > { %p7960_p11 = pnand %p7958_p10, %p8772_p7  ;;  %p7967_p2 = por %p7966_p0, %p7965_p13 }
  0xb6   : > { %p7961_p12 = pneg %p7960_p11 }
  0xb8   : > { %p7968_p4 = pnand %p7967_p2, %p7961_p12 }
  0xba   : > { %7971 = shalt.err (!%p7968_p4)
}
  0xbb   : > { %7441 = dma.hbm_to_vmem [thread:$0]  (!%p8756_p5), %s10411_s9, 32, %s577_s23, [#allocation20]  }
  0xbc   : > { %s8565_s2 = smov [#allocation22]   ;;  %s8566_s3 = smov [#allocation25]  }
  0xbd   : > { %s600_s21 = sshll.u32 %s8565_s2, 4  ;;  %s622_s22 = sshll.u32 %s8566_s3, 4  ;;  %s601_s21 = int_to_ptr.vmem [resolvable:$true] %s600_s21  ;;  %s623_s22 = int_to_ptr.vmem [resolvable:$true] %s622_s22 }
  0xbe   : > { %s10412_s11 = sld [smem:[#allocation86_spill]] }
  0xc4   : > { %s7972_s30 = scalar_lea.hbm %s10412_s11, 16 }
  0xc5   : > { %p7973_p6 = scmp.ne.s32.totalorder %s10412_s11, %s7972_s30  ;;  %p7979_p1 = scmp.lt.u32.totalorder %s7972_s30, %s10412_s11 }
  0xc7   : > { %p7975_p8 = pnand %p7973_p6, %p8772_p7 }
  0xc9   : > { %p7976_p9 = pneg %p7975_p8 }
  0xcb   : > { %p7981_p3 = pnand %p7979_p1, %p7976_p9 }
  0xcd   : > { %7984 = shalt.err (!%p7981_p3)
}
  0xce   : > { %s7985_s23 = scalar_lea.vmem %s601_s21, 16  ;;  %s7992_s28 = scalar_lea.vmem %s601_s21, 32 }
  0xcf   : > { %p7986_p10 = scmp.ne.s32.totalorder %s601_s21, %s7985_s23  ;;  %p7993_p13 = scmp.lt.s32.totalorder %s601_s21, %s601_s21 }
  0xd0   : > { %p7994_p0 = scmp.lt.s32.totalorder %s7992_s28, %s7985_s23 }
  0xd1   : > { %p7988_p11 = pnand %p7986_p10, %p8772_p7 }
  0xd2   : > { %p7995_p2 = por %p7994_p0, %p7993_p13 }
  0xd3   : > { %p7989_p12 = pneg %p7988_p11 }
  0xd5   : > { %p7996_p4 = pnand %p7995_p2, %p7989_p12 }
  0xd7   : > { %7999 = shalt.err (!%p7996_p4)
}
  0xd8   : > { %7447 = dma.hbm_to_vmem [thread:$0]  (!%p8756_p5), %s10412_s11, 16, %s601_s21, [#allocation23]  }
  0xd9   : > { %s10413_s13 = sld [smem:[#allocation88_spill]] }
  0xdf   : > { %s8000_s30 = scalar_lea.hbm %s10413_s13, 16 }
  0xe0   : > { %p8001_p6 = scmp.ne.s32.totalorder %s10413_s13, %s8000_s30  ;;  %p8007_p1 = scmp.lt.u32.totalorder %s8000_s30, %s10413_s13 }
  0xe2   : > { %p8003_p8 = pnand %p8001_p6, %p8772_p7 }
  0xe4   : > { %p8004_p9 = pneg %p8003_p8 }
  0xe6   : > { %p8009_p3 = pnand %p8007_p1, %p8004_p9 }
  0xe8   : > { %8012 = shalt.err (!%p8009_p3)
}
  0xe9   : > { %s8013_s23 = scalar_lea.vmem %s623_s22, 16  ;;  %s8020_s21 = scalar_lea.vmem %s623_s22, 32 }
  0xea   : > { %p8014_p10 = scmp.ne.s32.totalorder %s623_s22, %s8013_s23  ;;  %p8021_p13 = scmp.lt.s32.totalorder %s623_s22, %s623_s22 }
  0xeb   : > { %p8022_p0 = scmp.lt.s32.totalorder %s8020_s21, %s8013_s23 }
  0xec   : > { %p8016_p11 = pnand %p8014_p10, %p8772_p7 }
  0xed   : > { %p8023_p2 = por %p8022_p0, %p8021_p13 }
  0xee   : > { %p8017_p12 = pneg %p8016_p11 }
  0xf0   : > { %p8024_p4 = pnand %p8023_p2, %p8017_p12 }
  0xf2   : > { %8027 = shalt.err (!%p8024_p4)
}
  0xf3   : > { %7453 = dma.hbm_to_vmem [thread:$0]  (!%p8756_p5), %s10413_s13, 16, %s623_s22, [#allocation26]  }
  0xf4   : > { %s8567_s3 = smov [#allocation28]   ;;  %s8568_s29 = smov [#allocation12]  }
  0xf5   : > { %s646_s27 = sshll.u32 %s8567_s3, 4  ;;  %s514_s30 = sshll.u32 %s8568_s29, 4  ;;  %s647_s27 = int_to_ptr.vmem [resolvable:$true] %s646_s27  ;;  %s515_s30 = int_to_ptr.vmem [resolvable:$true] %s514_s30 }
  0xf6   : > { %s10414_s15 = sld [smem:[#allocation90_spill]] }
  0xfc   : > { %s8028_s0 = scalar_lea.hbm %s10414_s15, 32 }
  0xfd   : > { %p8029_p6 = scmp.ne.s32.totalorder %s10414_s15, %s8028_s0  ;;  %p8035_p1 = scmp.lt.u32.totalorder %s8028_s0, %s10414_s15 }
  0xff   : > { %p8031_p8 = pnand %p8029_p6, %p8772_p7 }
 0x101   : > { %p8032_p9 = pneg %p8031_p8 }
 0x103   : > { %p8037_p3 = pnand %p8035_p1, %p8032_p9 }
 0x105   : > { %8040 = shalt.err (!%p8037_p3)
}
 0x106   : > { %s8041_s22 = scalar_lea.vmem %s647_s27, 32  ;;  %p8049_p13 = scmp.lt.s32.totalorder %s647_s27, %s647_s27 }
 0x107   : > { %p8042_p10 = scmp.ne.s32.totalorder %s647_s27, %s8041_s22  ;;  %p8050_p0 = scmp.lt.s32.totalorder %s8041_s22, %s8041_s22 }
 0x109   : > { %p8044_p11 = pnand %p8042_p10, %p8772_p7  ;;  %p8051_p2 = por %p8050_p0, %p8049_p13 }
 0x10b   : > { %p8045_p12 = pneg %p8044_p11 }
 0x10d   : > { %p8052_p4 = pnand %p8051_p2, %p8045_p12 }
 0x10f   : > { %8055 = shalt.err (!%p8052_p4)
}
 0x110   : > { %7459 = dma.hbm_to_vmem [thread:$0]  (!%p8756_p5), %s10414_s15, 32, %s647_s27, [#allocation29]  }
 0x111   : > { %s10415_s4 = sld [smem:[#allocation79_spill]] }
 0x117   : > { %s8056_s20 = scalar_lea.hbm %s10415_s4, 2048 }
 0x118   : > { %p8057_p6 = scmp.ne.s32.totalorder %s10415_s4, %s8056_s20  ;;  %p8063_p1 = scmp.lt.u32.totalorder %s8056_s20, %s10415_s4 }
 0x11a   : > { %p8059_p8 = pnand %p8057_p6, %p8772_p7 }
 0x11c   : > { %p8060_p9 = pneg %p8059_p8 }
 0x11e   : > { %p8065_p3 = pnand %p8063_p1, %p8060_p9 }
 0x120   : > { %8068 = shalt.err (!%p8065_p3)
}
 0x121   : > { %s8069_s28 = scalar_lea.vmem %s515_s30, 2048  ;;  %p8077_p13 = scmp.lt.s32.totalorder %s515_s30, %s515_s30 }
 0x122   : > { %p8070_p10 = scmp.ne.s32.totalorder %s515_s30, %s8069_s28  ;;  %p8078_p0 = scmp.lt.s32.totalorder %s8069_s28, %s8069_s28 }
 0x124   : > { %p8072_p11 = pnand %p8070_p10, %p8772_p7  ;;  %p8079_p2 = por %p8078_p0, %p8077_p13 }
 0x126   : > { %p8073_p12 = pneg %p8072_p11 }
 0x128   : > { %p8080_p4 = pnand %p8079_p2, %p8073_p12 }
 0x12a   : > { %8083 = shalt.err (!%p8080_p4)
}
 0x12b   : > { %s8569_s27 = smov 128   ;;  %s8570_s22 = smov 8  }
 0x12c   : > { %7426 = dma.hbm_to_vmem [thread:$0]  (!%p8756_p5), %s10415_s4, 2048, %s515_s30, [#allocation11], %s8569_s27, %s8569_s27, %s8570_s22  }
 0x12d   : > { %s8571_s29 = smov [#allocation15]   ;;  %s8572_s20 = smov [#allocation18]  }
 0x12e   : > { %s538_s26 = sshll.u32 %s8571_s29, 4  ;;  %s562_s0 = sshll.u32 %s8572_s20, 4  ;;  %s539_s26 = int_to_ptr.vmem [resolvable:$true] %s538_s26  ;;  %s563_s0 = int_to_ptr.vmem [resolvable:$true] %s562_s0 }
 0x12f   : > { %s10416_s6 = sld [smem:[#allocation81_spill]] }
 0x135   : > { %s8084_s21 = scalar_lea.hbm %s10416_s6, 2048 }
 0x136   : > { %p8085_p6 = scmp.ne.s32.totalorder %s10416_s6, %s8084_s21  ;;  %p8091_p1 = scmp.lt.u32.totalorder %s8084_s21, %s10416_s6 }
 0x138   : > { %p8087_p8 = pnand %p8085_p6, %p8772_p7 }
 0x13a   : > { %p8088_p9 = pneg %p8087_p8 }
 0x13c   : > { %p8093_p3 = pnand %p8091_p1, %p8088_p9 }
 0x13e   : > { %8096 = shalt.err (!%p8093_p3)
}
 0x13f   : > { %s8097_s30 = scalar_lea.vmem %s539_s26, 2048  ;;  %p8105_p13 = scmp.lt.s32.totalorder %s539_s26, %s539_s26 }
 0x140   : > { %p8098_p10 = scmp.ne.s32.totalorder %s539_s26, %s8097_s30  ;;  %p8106_p0 = scmp.lt.s32.totalorder %s8097_s30, %s8097_s30 }
 0x142   : > { %p8100_p11 = pnand %p8098_p10, %p8772_p7  ;;  %p8107_p2 = por %p8106_p0, %p8105_p13 }
 0x144   : > { %p8101_p12 = pneg %p8100_p11 }
 0x146   : > { %p8108_p4 = pnand %p8107_p2, %p8101_p12 }
 0x148   : > { %8111 = shalt.err (!%p8108_p4)
}
 0x149   : > { %7432 = dma.hbm_to_vmem [thread:$0]  (!%p8756_p5), %s10416_s6, 2048, %s539_s26, [#allocation14], %s8569_s27, %s8569_s27, %s8570_s22  }
 0x14a   : > { %s10417_s8 = sld [smem:[#allocation83_spill]] }
 0x150   : > { %s8112_s3 = scalar_lea.hbm %s10417_s8, 2048 }
 0x151   : > { %p8113_p6 = scmp.ne.s32.totalorder %s10417_s8, %s8112_s3  ;;  %p8119_p1 = scmp.lt.u32.totalorder %s8112_s3, %s10417_s8 }
 0x153   : > { %p8115_p8 = pnand %p8113_p6, %p8772_p7 }
 0x155   : > { %p8116_p9 = pneg %p8115_p8 }
 0x157   : > { %p8121_p3 = pnand %p8119_p1, %p8116_p9 }
 0x159   : > { %8124 = shalt.err (!%p8121_p3)
}
 0x15a   : > { %s8125_s21 = scalar_lea.vmem %s563_s0, 2048  ;;  %p8133_p13 = scmp.lt.s32.totalorder %s563_s0, %s563_s0 }
 0x15b   : > { %p8126_p10 = scmp.ne.s32.totalorder %s563_s0, %s8125_s21  ;;  %p8134_p0 = scmp.lt.s32.totalorder %s8125_s21, %s8125_s21 }
 0x15d   : > { %p8128_p11 = pnand %p8126_p10, %p8772_p7  ;;  %p8135_p2 = por %p8134_p0, %p8133_p13 }
 0x15f   : > { %p8129_p12 = pneg %p8128_p11 }
 0x161   : > { %p8136_p4 = pnand %p8135_p2, %p8129_p12 }
 0x163   : > { %8139 = shalt.err (!%p8136_p4)
}
 0x164   : > { %7438 = dma.hbm_to_vmem [thread:$0]  (!%p8756_p5), %s10417_s8, 2048, %s563_s0, [#allocation17], %s8569_s27, %s8569_s27, %s8570_s22  }
 0x165   : > { %s8573_s30 = smov [#allocation21]   ;;  %s10418_s10 = sld [smem:[#allocation85_spill]] }
 0x166   : > { %s586_s5 = sshll.u32 %s8573_s30, 4  ;;  %s587_s5 = int_to_ptr.vmem [resolvable:$true] %s586_s5 }
 0x16b   : > { %s8140_s2 = scalar_lea.hbm %s10418_s10, 2048 }
 0x16c   : > { %p8141_p6 = scmp.ne.s32.totalorder %s10418_s10, %s8140_s2  ;;  %p8147_p1 = scmp.lt.u32.totalorder %s8140_s2, %s10418_s10 }
 0x16e   : > { %p8143_p8 = pnand %p8141_p6, %p8772_p7 }
 0x170   : > { %p8144_p9 = pneg %p8143_p8 }
 0x172   : > { %p8149_p3 = pnand %p8147_p1, %p8144_p9 }
 0x174   : > { %8152 = shalt.err (!%p8149_p3)
}
 0x175   : > { %s8153_s0 = scalar_lea.vmem %s587_s5, 2048  ;;  %p8161_p13 = scmp.lt.s32.totalorder %s587_s5, %s587_s5 }
 0x176   : > { %p8154_p10 = scmp.ne.s32.totalorder %s587_s5, %s8153_s0  ;;  %p8162_p0 = scmp.lt.s32.totalorder %s8153_s0, %s8153_s0 }
 0x178   : > { %p8156_p11 = pnand %p8154_p10, %p8772_p7  ;;  %p8163_p2 = por %p8162_p0, %p8161_p13 }
 0x17a   : > { %p8157_p12 = pneg %p8156_p11 }
 0x17c   : > { %p8164_p4 = pnand %p8163_p2, %p8157_p12 }
 0x17e   : > { %8167 = shalt.err (!%p8164_p4)
}
 0x17f   : > { %s10351_s23 = smov 64   ;;  %s8575_s21 = smov 4  }
 0x180   : > { %7444 = dma.hbm_to_vmem [thread:$0]  (!%p8756_p5), %s10418_s10, 2048, %s587_s5, [#allocation20], %s10351_s23, %s10351_s23, %s8575_s21  }
 0x181   : > { %s8576_s30 = smov [#allocation24]   ;;  %s8577_s9 = smov [#allocation27]  }
 0x182   : > { %s611_s7 = sshll.u32 %s8576_s30, 4  ;;  %s632_s2 = sshll.u32 %s8577_s9, 4  ;;  %s612_s7 = int_to_ptr.vmem [resolvable:$true] %s611_s7  ;;  %s9009_s2 = int_to_ptr.vmem [resolvable:$true] %s632_s2 }
 0x183   : > { %s10419_s12 = sld [smem:[#allocation87_spill]] }
 0x189   : > { %s8168_s20 = scalar_lea.hbm %s10419_s12, 16 }
 0x18a   : > { %p8169_p6 = scmp.ne.s32.totalorder %s10419_s12, %s8168_s20  ;;  %p8175_p1 = scmp.lt.u32.totalorder %s8168_s20, %s10419_s12 }
 0x18c   : > { %p8171_p8 = pnand %p8169_p6, %p8772_p7 }
 0x18e   : > { %p8172_p9 = pneg %p8171_p8 }
 0x190   : > { %p8177_p3 = pnand %p8175_p1, %p8172_p9 }
 0x192   : > { %8180 = shalt.err (!%p8177_p3)
}
 0x193   : > { %s8181_s28 = scalar_lea.vmem %s612_s7, 16  ;;  %s8188_s30 = scalar_lea.vmem %s612_s7, 32 }
 0x194   : > { %p8182_p10 = scmp.ne.s32.totalorder %s612_s7, %s8181_s28  ;;  %p8189_p13 = scmp.lt.s32.totalorder %s612_s7, %s612_s7 }
 0x195   : > { %p8190_p0 = scmp.lt.s32.totalorder %s8188_s30, %s8181_s28 }
 0x196   : > { %p8184_p11 = pnand %p8182_p10, %p8772_p7 }
 0x197   : > { %p8191_p2 = por %p8190_p0, %p8189_p13 }
 0x198   : > { %p8185_p12 = pneg %p8184_p11 }
 0x19a   : > { %p8192_p4 = pnand %p8191_p2, %p8185_p12 }
 0x19c   : > { %8195 = shalt.err (!%p8192_p4)
}
 0x19d   : > { %7450 = dma.hbm_to_vmem [thread:$0]  (!%p8756_p5), %s10419_s12, 16, %s612_s7, [#allocation23]  }
 0x19e   : > { %s10420_s14 = sld [smem:[#allocation89_spill]] }
 0x1a4   : > { %s8196_s24 = scalar_lea.hbm %s10420_s14, 2048 }
 0x1a5   : > { %p8197_p6 = scmp.ne.s32.totalorder %s10420_s14, %s8196_s24  ;;  %p8203_p1 = scmp.lt.u32.totalorder %s8196_s24, %s10420_s14 }
 0x1a7   : > { %p8199_p8 = pnand %p8197_p6, %p8772_p7 }
 0x1a9   : > { %p8200_p9 = pneg %p8199_p8 }
 0x1ab   : > { %p8205_p3 = pnand %p8203_p1, %p8200_p9 }
 0x1ad   : > { %8208 = shalt.err (!%p8205_p3)
}
 0x1ae   : > { %s8209_s7 = scalar_lea.vmem %s9009_s2, 2048  ;;  %p8217_p13 = scmp.lt.s32.totalorder %s9009_s2, %s9009_s2 }
 0x1af   : > { %p8210_p10 = scmp.ne.s32.totalorder %s9009_s2, %s8209_s7  ;;  %p8218_p0 = scmp.lt.s32.totalorder %s8209_s7, %s8209_s7 }
 0x1b1   : > { %p8212_p11 = pnand %p8210_p10, %p8772_p7  ;;  %p8219_p2 = por %p8218_p0, %p8217_p13 }
 0x1b3   : > { %p8213_p12 = pneg %p8212_p11 }
 0x1b5   : > { %p8220_p4 = pnand %p8219_p2, %p8213_p12 }
 0x1b7   : > { %8223 = shalt.err (!%p8220_p4)
}
 0x1b8   : > { %7456 = dma.hbm_to_vmem [thread:$0]  (!%p8756_p5), %s10420_s14, 2048, %s9009_s2, [#allocation26], %s8569_s27, %s8569_s27, %s8570_s22  }
 0x1b9   : > { %s8578_s3 = smov [#allocation30]   ;;  %s8579_s20 = smov [#allocation31]  }
 0x1ba   : > { %s656_s29 = sshll.u32 %s8578_s3, 4  ;;  %s670_s24 = sshll.u32 %s8579_s20, 4  ;;  %s657_s29 = int_to_ptr.vmem [resolvable:$true] %s656_s29  ;;  %s9055_s24 = int_to_ptr.vmem [resolvable:$true] %s670_s24 }
 0x1bb   : > { %s10421_s16 = sld [smem:[#allocation91_spill]] }
 0x1c1   : > { %s8224_s5 = scalar_lea.hbm %s10421_s16, 2048 }
 0x1c2   : > { %p8225_p6 = scmp.ne.s32.totalorder %s10421_s16, %s8224_s5  ;;  %p8231_p1 = scmp.lt.u32.totalorder %s8224_s5, %s10421_s16 }
 0x1c4   : > { %p8227_p8 = pnand %p8225_p6, %p8772_p7 }
 0x1c6   : > { %p8228_p9 = pneg %p8227_p8 }
 0x1c8   : > { %p8233_p3 = pnand %p8231_p1, %p8228_p9 }
 0x1ca   : > { %8236 = shalt.err (!%p8233_p3)
}
 0x1cb   : > { %s8237_s22 = scalar_lea.vmem %s657_s29, 2048  ;;  %p8245_p13 = scmp.lt.s32.totalorder %s657_s29, %s657_s29 }
 0x1cc   : > { %p8238_p10 = scmp.ne.s32.totalorder %s657_s29, %s8237_s22  ;;  %p8246_p0 = scmp.lt.s32.totalorder %s8237_s22, %s8237_s22 }
 0x1ce   : > { %p8240_p11 = pnand %p8238_p10, %p8772_p7  ;;  %p8247_p2 = por %p8246_p0, %p8245_p13 }
 0x1d0   : > { %p8241_p12 = pneg %p8240_p11 }
 0x1d2   : > { %p8248_p4 = pnand %p8247_p2, %p8241_p12 }
 0x1d4   : > { %8251 = shalt.err (!%p8248_p4)
}
 0x1d5   : > { %7462 = dma.hbm_to_vmem [thread:$0]  (!%p8756_p5), %s10421_s16, 2048, %s657_s29, [#allocation29], %s10351_s23, %s10351_s23, %s8575_s21  }
 0x1d6   : > { %s10422_s17 = sld [smem:[#allocation92_spill]] }
 0x1dc   : > { %s8252_s0 = scalar_lea.hbm %s10422_s17, 16 }
 0x1dd   : > { %p8253_p6 = scmp.ne.s32.totalorder %s10422_s17, %s8252_s0  ;;  %p8259_p1 = scmp.lt.u32.totalorder %s8252_s0, %s10422_s17 }
 0x1df   : > { %p8255_p8 = pnand %p8253_p6, %p8772_p7 }
 0x1e1   : > { %p8256_p9 = pneg %p8255_p8 }
 0x1e3   : > { %p8261_p3 = pnand %p8259_p1, %p8256_p9 }
 0x1e5   : > { %8264 = shalt.err (!%p8261_p3)
}
 0x1e6   : > { %s8265_s29 = scalar_lea.vmem %s9055_s24, 16  ;;  %s8272_s30 = scalar_lea.vmem %s9055_s24, 32 }
 0x1e7   : > { %p8266_p10 = scmp.ne.s32.totalorder %s9055_s24, %s8265_s29  ;;  %p8273_p13 = scmp.lt.s32.totalorder %s9055_s24, %s9055_s24 }
 0x1e8   : > { %p8274_p0 = scmp.lt.s32.totalorder %s8272_s30, %s8265_s29 }
 0x1e9   : > { %p8268_p11 = pnand %p8266_p10, %p8772_p7 }
 0x1ea   : > { %p8275_p2 = por %p8274_p0, %p8273_p13 }
 0x1eb   : > { %p8269_p12 = pneg %p8268_p11 }
 0x1ed   : > { %p8276_p4 = pnand %p8275_p2, %p8269_p12 }
 0x1ef   : > { %8279 = shalt.err (!%p8276_p4)
}
 0x1f0   : > { %s10423_s2 = sld [smem:[#allocation50_spill]]  ;;  %s10424_s9 = sld [smem:[#allocation55_spill]] }
 0x1f1   : > { %s10425_s18 = sld [smem:[#allocation49_spill]]  ;;  %s10426_s3 = sld [smem:[#allocation56_spill]] }
 0x1f2   : > { %s10427_s20 = sld [smem:[#allocation54_spill]]  ;;  %s681_s1 = sand.u32 1, %s8510_s19  }
 0x1f3   : > { %7465 = dma.hbm_to_vmem [thread:$0]  (!%p8756_p5), %s10422_s17, 16, %s9055_s24, [#allocation32]  }
 0x1f4   : > { %s7083_s5 = sshll.u32 %s681_s1, 3  ;;  %s10430_s30 = sld [smem:[#allocation75_spill]] }
 0x1f5   : > { %s685_s24 = scalar_lea.vmem [#allocation4], %s7083_s5 }
 0x1f6   : > { %p71_p7 = scmp.ne.s32.totalorder %s8510_s19, %s10423_s2  ;;  %p10353_p6 = scmp.eq.s32.totalorder %s10424_s9, 0 }
 0x1f7   : > { %p77_p8 = scmp.ne.s32.totalorder %s10423_s2, %s10425_s18  ;;  %p10352_p9 = scmp.lt.s32.totalorder %s10424_s9, 4 }
 0x1f8   : > { %p73_p1 = por %p10353_p6, %p71_p7  ;;  %p10428_p3 = scmp.eq.s32.totalorder %s10426_s3, 0 }
 0x1f9   : > { %s7224_s28 = sshll.u32 %s10427_s20, 7  ;;  %s692_s22 = sshll.u32 %s685_s24, 4  ;;  %s9124_s22 = int_to_ptr.vmem [resolvable:$true] %s692_s22 }
 0x1fa   : > { %p9114_p10 = por %p10428_p3, %p77_p8  ;;  %s10431_s23 = smov %s10430_s30 }
 0x1fb   : > { %s9122_s27 = scalar_lea.hbm %s10430_s30, %s7224_s28  ;;  %p9128_p5 = pnand %p10352_p9, %p73_p1 }
 0x1fc   : > { %s9132_s18 = scalar_lea.sflag [#allocation5], %s681_s1  ;;  %s8280_s7 = scalar_lea.hbm %s9122_s27, 128 }
 0x1fd   : > { %p8281_p11 = scmp.ne.s32.totalorder %s9122_s27, %s8280_s7  ;;  %p8282_p12 = pneg %p9128_p5 }
 0x1fe   : > { %s8285_s29 = scalar_lea.hbm %s10431_s23, 256  ;;  %p8286_p2 = scmp.lt.u32.totalorder %s9122_s27, %s10431_s23 }
 0x1ff   : > { %p8283_p13 = pnand %p8282_p12, %p8281_p11  ;;  %p8287_p4 = scmp.lt.u32.totalorder %s8285_s29, %s8280_s7 }
 0x200   : > { %p8289_p8 = scmp.lt.u32.totalorder %s8280_s7, %s9122_s27 }
 0x201   : > { %p8284_p0 = pneg %p8283_p13  ;;  %p8288_p7 = por %p8287_p4, %p8286_p2 }
 0x203   : > { %p8290_p1 = por %p8289_p8, %p8288_p7 }
 0x205   : > { %p8291_p3 = pnand %p8290_p1, %p8284_p0 }
 0x207   : > { %8294 = shalt.err (!%p8291_p3)
}
 0x208   : > { %s8295_s1 = scalar_lea.vmem %s9124_s22, 128  ;;  %s8580_s5 = smov [#allocation4]  }
 0x209   : > { %p8296_p11 = scmp.ne.s32.totalorder %s9124_s22, %s8295_s1  ;;  %s8300_s28 = sshll.u32 %s8580_s5, 4  ;;  %s8301_s28 = int_to_ptr.vmem [resolvable:$false] %s8300_s28 }
 0x20a   : > { %s8302_s30 = scalar_lea.vmem %s8301_s28, 256  ;;  %p8303_p6 = scmp.lt.s32.totalorder %s9124_s22, %s8301_s28 }
 0x20b   : > { %p8298_p13 = pnand %p8296_p11, %p8282_p12  ;;  %p8304_p2 = scmp.lt.s32.totalorder %s8302_s30, %s8295_s1 }
 0x20d   : > { %p8299_p9 = pneg %p8298_p13  ;;  %p8305_p4 = por %p8304_p2, %p8303_p6 }
 0x20f   : > { %p8306_p7 = pnand %p8305_p4, %p8299_p9 }
 0x211   : > { %8309 = shalt.err (!%p8306_p7)
}
 0x212   : > { %s10433_s7 = smov 64   ;;  %s10434_s29 = sld [smem:[#allocation53_spill]] }
 0x213   : > { %s10435_s24 = sld [smem:[#allocation48_spill]]  ;;  %s10436_s5 = sld [smem:[#allocation47_spill]] }
 0x214   : > { %s10437_s0 = sld [smem:[#allocation46_spill]]  ;;  %s7064_s2 = sadd.s32 4294967294, %s10424_s9  }
 0x215   : > { %7469 = dma.hbm_to_vmem [thread:$0]  (!%p9128_p5), %s9122_s27, 128, %s9124_s22, %s9132_s18, %s10433_s7, %s10433_s7, %s8575_s21  }
 0x216   : > { %s57_s28 = sadd.s32 1, %s10427_s20  ;;  %p10438_p0 = scmp.eq.s32.totalorder %s10424_s9, 0 }
 0x217   : > { %p10440_p1 = scmp.eq.s32.totalorder %s10426_s3, 0  ;;  %p467_p11 = scmp.eq.s32.totalorder %s10426_s3, 3 }
 0x218   : > { %s54_s1 = sadd.s32 1, %s10434_s29  ;;  %p473_p13 = scmp.eq.s32.totalorder %s7064_s2, 3 }
 0x219   : > { %p55_p6 = scmp.ge.s32.totalorder %s54_s1, 2  ;;  %s92_s30 = sadd.s32 1, %s10435_s24 }
 0x21a   : > { %p99_p9 = scmp.ne.s32.totalorder %s10435_s24, %s10436_s5  ;;  %p105_p12 = scmp.ne.s32.totalorder %s10436_s5, %s10437_s0 }
 0x21b   : > { %s10541_s1 = smov (%p55_p6, %s54_s1), 0  ;;  %s10543_s28 = smov (!%p55_p6, %s57_s28), %s10427_s20 }
 0x21c   : > { %s88_s4 = ssub.s32 %s10434_s29, %s10541_s1  ;;  %p9178_p5 = por %p99_p9, %p10438_p0 }
 0x21d   : > { %p59_p8 = scmp.ge.s32.totalorder %s10543_s28, 2  ;;  %p9184_p3 = por %p105_p12, %p10440_p1 }
 0x21e   : > { %p9191_p2 = por %p467_p11, %p99_p9  ;;  %p9195_p4 = por %p473_p13, %p105_p12 }
 0x21f   : > { %s10441_s27 = scalar_select %p9184_p3, 1, 0 }
 0x220   : > { %s10545_s28 = smov (%p59_p8, %s10543_s28), 0  ;;  %s702_s7 = sand.u32 1, %s10424_s9  }
 0x221   : > { %s10442_s0 = scalar_select %p9191_p2, 1, 0 }
 0x222   : > { %s10443_s22 = scalar_select %p9195_p4, 1, 0 }
 0x223   : > { %s61_s18 = ssub.s32 %s10427_s20, %s10545_s28  ;;  %s10444_s3 = sadd.s32 1, %s8510_s19 }
 0x224   : > { %p62_p7 = scmp.eq.s32.totalorder %s61_s18, 0  ;;  %s89_s5 = sor.u32 %s88_s4, %s61_s18 }
 0x225   : > { %p90_p6 = scmp.eq.s32.totalorder %s89_s5, 0  ;;  %s704_s8 = sand.u32 1, %s10435_s24  }
 0x226   : > { %s9205_s2 = scalar_select %p62_p7, %s8510_s19, %s10444_s3  }
 0x227   : > { %s9208_s6 = scalar_select %p90_p6, %s10435_s24, %s92_s30  }
 0x228   : > { %s7087_s10 = sshll.u32 %s10427_s20, 1  ;;  %s7086_s11 = sshll.u32 %s704_s8, 3 }
 0x229   : > { %s711_s12 = sadd.s32 %s10434_s29, %s7087_s10  ;;  %s10445_s16 = sld [smem:[#allocation76_spill]] }
 0x22a   : > { %s7088_s13 = sshll.u32 %s711_s12, 7  ;;  %s706_s4 = scalar_lea.vmem [#allocation7], %s7086_s11 }
 0x22b   : > { %s715_s18 = sshll.u32 %s706_s4, 4  ;;  %p10446_p9 = scmp.lt.s32.totalorder %s10424_s9, 4  ;;  %s9218_s18 = int_to_ptr.vmem [resolvable:$true] %s715_s18 }
 0x22c   : > { %s703_s8 = scalar_lea.sflag [#allocation8], %s702_s7 }
 0x22d   : > { %p9224_p12 = pnand %p10446_p9, %p9178_p5 }
 0x22f   : > { %s9216_s17 = scalar_lea.hbm %s10445_s16, %s7088_s13  ;;  %p8312_p8 = pneg %p9224_p12 }
 0x230   : > { %s8310_s10 = scalar_lea.hbm %s9216_s17, 128  ;;  %s8315_s13 = scalar_lea.hbm %s10445_s16, 512 }
 0x231   : > { %p8311_p0 = scmp.ne.s32.totalorder %s9216_s17, %s8310_s10  ;;  %p8316_p5 = scmp.lt.u32.totalorder %s9216_s17, %s10445_s16 }
 0x232   : > { %p8317_p13 = scmp.lt.u32.totalorder %s8315_s13, %s8310_s10  ;;  %p8319_p6 = scmp.lt.u32.totalorder %s8310_s10, %s9216_s17 }
 0x233   : > { %p8313_p1 = pnand %p8312_p8, %p8311_p0 }
 0x234   : > { %p8318_p7 = por %p8317_p13, %p8316_p5 }
 0x235   : > { %p8314_p11 = pneg %p8313_p1 }
 0x236   : > { %p8320_p9 = por %p8319_p6, %p8318_p7 }
 0x238   : > { %p8321_p4 = pnand %p8320_p9, %p8314_p11 }
 0x23a   : > { %8324 = shalt.err (!%p8321_p4)
}
 0x23b   : > { %s8325_s9 = scalar_lea.vmem %s9218_s18, 128  ;;  %s8581_s29 = smov [#allocation7]  }
 0x23c   : > { %p8326_p0 = scmp.ne.s32.totalorder %s9218_s18, %s8325_s9  ;;  %s8330_s24 = sshll.u32 %s8581_s29, 4  ;;  %s8331_s24 = int_to_ptr.vmem [resolvable:$false] %s8330_s24 }
 0x23d   : > { %s8332_s30 = scalar_lea.vmem %s8331_s24, 256  ;;  %p8333_p3 = scmp.lt.s32.totalorder %s9218_s18, %s8331_s24 }
 0x23e   : > { %p8328_p1 = pnand %p8326_p0, %p8312_p8  ;;  %p8334_p5 = scmp.lt.s32.totalorder %s8332_s30, %s8325_s9 }
 0x240   : > { %p8329_p2 = pneg %p8328_p1  ;;  %p8335_p13 = por %p8334_p5, %p8333_p3 }
 0x242   : > { %p8336_p7 = pnand %p8335_p13, %p8329_p2 }
 0x244   : > { %8339 = shalt.err (!%p8336_p7)
}
 0x245   : > { %7472 = dma.hbm_to_vmem [thread:$0]  (!%p9224_p12), %s9216_s17, 128, %s9218_s18, %s703_s8  }
 0x246   : > { %s10448_s21 = sld [smem:[#allocation57_spill]] }
 0x24c   : > { %p10449_p4 = scmp.ne.s32.totalorder %s10448_s21, 0 }
 0x24e   : > { %724 = sbr.rel (%p10449_p4) target bundleno = 3907 (0xf43), region = 92 }
 0x255   : > { %s10450_s7 = sld [smem:[#allocation50_spill]] }
 0x25b   : > { %s726_s5 = sand.u32 1, %s10450_s7  }
 0x25c   : > { %s9256_s3 = sshll.u32 %s726_s5, 3  ;;  %s727_s4 = scalar_lea.sflag [#allocation5], %s726_s5 }
 0x25d   : > { %s730_s10 = scalar_lea.vmem [#allocation4], %s9256_s3 }
 0x25e   : > { %8441 = dma.done.wait (%p9114_p10), %s727_s4, 128  }
 0x25f   : > { %8443 = vsyncadd (%p9114_p10), %s727_s4, 4294967168  ;;  %s10451_s20 = sld [smem:[#allocation56_spill]]  ;;  %s10452_s11 = sld [smem:[#allocation47_spill]] }
 0x260   : > { %p10453_p3 = scmp.ne.s32.totalorder %s10441_s27, 0 }
 0x265   : > { %s735_s17 = sand.u32 1, %s10451_s20   ;;  %s737_s18 = sand.u32 1, %s10452_s11  }
 0x266   : > { %s9267_s8 = sshll.u32 %s737_s18, 3  ;;  %s736_s12 = scalar_lea.sflag [#allocation8], %s735_s17 }
 0x267   : > { %s739_s13 = scalar_lea.vmem [#allocation7], %s9267_s8 }
 0x268   : > { %8445 = dma.done.wait (%p10453_p3), %s736_s12, 128  }
 0x269   : > { %8447 = vsyncadd (%p10453_p3), %s736_s12, 4294967168  ;;  %p10454_p2 = scmp.eq.s32.totalorder %s10451_s20, 0 }
 0x26b   : > { %8449 = dma.done.wait (%p10454_p2), [#allocation8], 16   ;;  %p10455_p10 = pmov %p10454_p2 }
 0x26c   : > { %p10456_p12 = pmov %p10454_p2 }
 0x26d   : > { %8451 = vsyncadd (%p10455_p10), [#allocation8], 4294967280 }
 0x26e   : > { %8453 = dma.done.wait (%p10456_p12), [#allocation11], 2064   ;;  %p10457_p8 = pmov %p10454_p2 }
 0x26f   : > { %p10458_p11 = pmov %p10454_p2 }
 0x270   : > { %8455 = vsyncadd (%p10457_p8), [#allocation11], 4294965232 }
 0x271   : > { %8457 = dma.done.wait (%p10458_p11), [#allocation14], 2080   ;;  %p10459_p6 = pmov %p10454_p2 }
 0x272   : > { %p10460_p9 = pmov %p10454_p2 }
 0x273   : > { %8459 = vsyncadd (%p10459_p6), [#allocation14], 4294965216 }
 0x274   : > { %8461 = dma.done.wait (%p10460_p9), [#allocation17], 2080   ;;  %p10461_p0 = pmov %p10454_p2 }
 0x276   : > { %8463 = vsyncadd (%p10461_p0), [#allocation17], 4294965216  ;;  %p10462_p1 = pmov %p10461_p0 }
 0x277   : > { %p10463_p5 = pmov %p10461_p0 }
 0x278   : > { %8465 = dma.done.wait (%p10462_p1), [#allocation20], 2080  }
 0x279   : > { %8467 = vsyncadd (%p10463_p5), [#allocation20], 4294965216  ;;  %p10464_p13 = pmov %p10461_p0 }
 0x27a   : > { %p10465_p7 = pmov %p10461_p0 }
 0x27b   : > { %8469 = dma.done.wait (%p10464_p13), [#allocation23], 32  }
 0x27c   : > { %8471 = vsyncadd (%p10465_p7), [#allocation23], 4294967264  ;;  %p10466_p4 = pmov %p10461_p0 }
 0x27d   : > { %p10467_p3 = pmov %p10461_p0 }
 0x27e   : > { %8473 = dma.done.wait (%p10466_p4), [#allocation26], 2064  }
 0x27f   : > { %8475 = vsyncadd (%p10467_p3), [#allocation26], 4294965232  ;;  %p10468_p2 = pmov %p10461_p0 }
 0x280   : > { %p10469_p10 = pmov %p10461_p0 }
 0x281   : > { %8477 = dma.done.wait (%p10468_p2), [#allocation29], 2080  }
 0x282   : > { %8479 = vsyncadd (%p10469_p10), [#allocation29], 4294965216  ;;  %p10470_p12 = pmov %p10461_p0 }
 0x283   : > { %p10471_p8 = pmov %p10461_p0 }
 0x284   : > { %8481 = dma.done.wait (%p10470_p12), [#allocation32], 16  }
 0x285   : > { %8483 = vsyncadd (%p10471_p8), [#allocation32], 4294967280  ;;  %v9310_v0 = vld [vmem:[#allocation9] sm:$0x1]  ;;  %v9312_v1 = vld [vmem:[#allocation10] sm:$0x1] }
 0x286   : > { %s860_s26 = scalar_lea.vmem [#allocation33], %s9267_s8  ;;  %s10472_s27 = sld [smem:[#allocation51_spill]] }
 0x28c   : > { %p7109_p11 = scmp.ne.s32.totalorder %s10472_s27, 0 }
 0x28d   : > { %v7226_v2 = vld [vmem:[%s730_s10] sm:$0xff] (!%p7109_p11)   ;;  %v8582_v39 = vmov (!%p7109_p11), 0   ;;  %v896_v50 = vlaneseq (!%p7109_p11) }
 0x28e   : > { %867 = sbr.rel (%p7109_p11) target bundleno = 1193 (0x4a9), region = 168  ;;  %v7227_v3 = vunpack.c.l.bf16 (!%p7109_p11), %v7226_v2  ;;  %v7228_v4 = vunpack.c.h.bf16 (!%p7109_p11), %v7226_v2  ;;  %v7684_v5 = vld [vmem:[#allocation15 + $0x4] ss:$8 sps:$4 sm:$0xff] (!%p7109_p11)   ;;  %v7688_v7 = vld [vmem:[#allocation15] ss:$8 sps:$4 sm:$0xff] (!%p7109_p11)   ;;  %1052 = vmatprep.mubr.bf16.mxu0 (!%p7109_p11), %v8582_v39  ;;  %1203 = vmatprep.mubr.bf16.mxu1 (!%p7109_p11), %v8582_v39 }
 0x28f   : > { %v7686_v6 = vld [vmem:[#allocation18 + $0x4] ss:$8 sps:$4 sm:$0xff] (!%p7109_p11)   ;;  %v7689_v8 = vld [vmem:[#allocation18] ss:$8 sps:$4 sm:$0xff] (!%p7109_p11)   ;;  %v7690_v9 = vld [vmem:[#allocation15 + $0x14] ss:$8 sps:$4 sm:$0xff] (!%p7109_p11)   ;;  %1020 = vmatprep.subr.bf16.mxu0 (!%p7109_p11), %v7684_v5 }
 0x290   : > { %872 = vadd.xlane.f32.xlu0 (!%p7109_p11), %v7227_v3  ;;  %v7692_v10 = vld [vmem:[#allocation18 + $0x14] ss:$8 sps:$4 sm:$0xff] (!%p7109_p11)   ;;  %1171 = vmatprep.subr.bf16.mxu1 (!%p7109_p11), %v7686_v6  ;;  %v7695_v20 = vld [vmem:[#allocation18 + $0x10] ss:$8 sps:$4 sm:$0xff] (!%p7109_p11)   ;;  %v7696_v21 = vld [vmem:[#allocation15 + $0x24] ss:$8 sps:$4 sm:$0xff] (!%p7109_p11)  }
 0x291   : > { %1021 = vmatpush1.bf16.msra.mxu0 (!%p7109_p11), %v7688_v7  ;;  %1172 = vmatpush1.bf16.msra.mxu1 (!%p7109_p11), %v7689_v8  ;;  %v7694_v19 = vld [vmem:[#allocation15 + $0x10] ss:$8 sps:$4 sm:$0xff] (!%p7109_p11)   ;;  %v7700_v23 = vld [vmem:[#allocation15 + $0x20] ss:$8 sps:$4 sm:$0xff] (!%p7109_p11)   ;;  %v7702_v25 = vld [vmem:[#allocation15 + $0x34] ss:$8 sps:$4 sm:$0xff] (!%p7109_p11)  }
 0x292   : > { %1022 = vmatprep.subr.bf16.mxu0 (!%p7109_p11), %v7690_v9  ;;  %1173 = vmatprep.subr.bf16.mxu1 (!%p7109_p11), %v7692_v10  ;;  %v7698_v22 = vld [vmem:[#allocation18 + $0x24] ss:$8 sps:$4 sm:$0xff] (!%p7109_p11)   ;;  %v7701_v24 = vld [vmem:[#allocation18 + $0x20] ss:$8 sps:$4 sm:$0xff] (!%p7109_p11)   ;;  %v7704_v26 = vld [vmem:[#allocation18 + $0x34] ss:$8 sps:$4 sm:$0xff] (!%p7109_p11)  }
 0x293   : > { %v7706_v27 = vld [vmem:[#allocation15 + $0x30] ss:$8 sps:$4 sm:$0xff] (!%p7109_p11)   ;;  %v7708_v29 = vld [vmem:[#allocation15 + $0x44] ss:$8 sps:$4 sm:$0xff] (!%p7109_p11)   ;;  %v7712_v31 = vld [vmem:[#allocation15 + $0x40] ss:$8 sps:$4 sm:$0xff] (!%p7109_p11)  }
 0x294   : > { %874 = vadd.xlane.f32.xlu0 (!%p7109_p11), %v7228_v4  ;;  %v7707_v28 = vld [vmem:[#allocation18 + $0x30] ss:$8 sps:$4 sm:$0xff] (!%p7109_p11)   ;;  %v7710_v30 = vld [vmem:[#allocation18 + $0x44] ss:$8 sps:$4 sm:$0xff] (!%p7109_p11)   ;;  %v7713_v32 = vld [vmem:[#allocation18 + $0x40] ss:$8 sps:$4 sm:$0xff] (!%p7109_p11)  }
 0x295   : > { %1023 = vmatpush1.bf16.msra.mxu0 %v7694_v19  ;;  %1174 = vmatpush1.bf16.msra.mxu1 %v7695_v20  ;;  %v7714_v33 = vld [vmem:[#allocation15 + $0x54] ss:$8 sps:$4 sm:$0xff]   ;;  %v7718_v35 = vld [vmem:[#allocation15 + $0x50] ss:$8 sps:$4 sm:$0xff]   ;;  %v7720_v37 = vld [vmem:[#allocation15 + $0x64] ss:$8 sps:$4 sm:$0xff]  }
 0x296   : > { %1024 = vmatprep.subr.bf16.mxu0 %v7696_v21  ;;  %1175 = vmatprep.subr.bf16.mxu1 %v7698_v22  ;;  %v7716_v34 = vld [vmem:[#allocation18 + $0x54] ss:$8 sps:$4 sm:$0xff]   ;;  %v7719_v36 = vld [vmem:[#allocation18 + $0x50] ss:$8 sps:$4 sm:$0xff]   ;;  %v7722_v38 = vld [vmem:[#allocation18 + $0x64] ss:$8 sps:$4 sm:$0xff]  }
 0x297   : > { %v7724_v40 = vld [vmem:[#allocation15 + $0x60] ss:$8 sps:$4 sm:$0xff]   ;;  %v7726_v42 = vld [vmem:[#allocation15 + $0x74] ss:$8 sps:$4 sm:$0xff]   ;;  %v7730_v44 = vld [vmem:[#allocation15 + $0x70] ss:$8 sps:$4 sm:$0xff]  }
 0x298   : > { %v7725_v41 = vld [vmem:[#allocation18 + $0x60] ss:$8 sps:$4 sm:$0xff]   ;;  %v7728_v43 = vld [vmem:[#allocation18 + $0x74] ss:$8 sps:$4 sm:$0xff]   ;;  %v7731_v45 = vld [vmem:[#allocation18 + $0x70] ss:$8 sps:$4 sm:$0xff]  }
 0x299   : > { %1025 = vmatpush1.bf16.msra.mxu0 %v7700_v23  ;;  %1176 = vmatpush1.bf16.msra.mxu1 %v7701_v24  ;;  %v897_v53 = vshrl.u32 %v896_v50, 7  ;;  %v1079_v5 = vld [vmem:[#allocation19] sm:$0x3] }
 0x29a   : > { %1026 = vmatprep.subr.bf16.mxu0 %v7702_v25  ;;  %1177 = vmatprep.subr.bf16.mxu1 %v7704_v26 }
 0x29b   : > { %v898_v54 = vsub.s32 0, %v897_v53  ;;  %v936_v6 = vsub.s32 1, %v897_v53 }
 0x29d   : > { %1027 = vmatpush1.bf16.msra.mxu0 %v7706_v27  ;;  %1178 = vmatpush1.bf16.msra.mxu1 %v7707_v28  ;;  %v899_v57 = vrot.slane %v9310_v0, %v898_v54  ;;  %v907_v61 = vrot.slane %v9312_v1, %v898_v54  ;;  %v1084_v8 = vrot.slane %v1079_v5, %v898_v54 }
 0x29e   : > { %1028 = vmatprep.subr.bf16.mxu0 %v7708_v29  ;;  %1179 = vmatprep.subr.bf16.mxu1 %v7710_v30  ;;  %v1088_v10 = vrot.slane %v1079_v5, %v936_v6 }
 0x2a1   : > { %1029 = vmatpush1.bf16.msra.mxu0 %v7712_v31  ;;  %1180 = vmatpush1.bf16.msra.mxu1 %v7713_v32 }
 0x2a2   : > { %1030 = vmatprep.subr.bf16.mxu0 %v7714_v33  ;;  %1181 = vmatprep.subr.bf16.mxu1 %v7716_v34 }
 0x2a5   : > { %1031 = vmatpush1.bf16.msra.mxu0 %v7718_v35  ;;  %1182 = vmatpush1.bf16.msra.mxu1 %v7719_v36 }
 0x2a6   : > { %1032 = vmatprep.subr.bf16.mxu0 %v7720_v37  ;;  %1183 = vmatprep.subr.bf16.mxu1 %v7722_v38 }
 0x2a9   : > { %1033 = vmatpush1.bf16.msra.mxu0 %v7724_v40  ;;  %1184 = vmatpush1.bf16.msra.mxu1 %v7725_v41 }
 0x2aa   : > { %1034 = vmatprep.subr.bf16.mxu0 %v7726_v42  ;;  %1185 = vmatprep.subr.bf16.mxu1 %v7728_v43 }
 0x2ad   : > { %1035 = vmatpush1.bf16.msra.mxu0 %v7730_v44  ;;  %1186 = vmatpush1.bf16.msra.mxu1 %v7731_v45 }
 0x31d   : > { %v873_v11 = vpop.xlane.xlu0 %872 }
 0x31e   : > { %v877_v12 = vmul.f32 0.0078125, %v873_v11 }
 0x320   : > { %v9318_v13 = vsub.f32 %v7227_v3, %v877_v12 }
 0x321   : > { %v875_v14 = vpop.xlane.xlu0 %874 }
 0x322   : > { %v878_v15 = vmul.f32 0.0078125, %v875_v14  ;;  %v881_v16 = vmul.f32 %v9318_v13, %v9318_v13 }
 0x324   : > { %v9322_v17 = vsub.f32 %v7228_v4, %v878_v15  ;;  %883 = vadd.xlane.f32.xlu1 %v881_v16  ;;  %v928_v4 = vld [vmem:[#allocation16] sm:$0x3] }
 0x325   : > { %v933_v7 = vrot.slane %v928_v4, %v898_v54  ;;  %v937_v9 = vrot.slane %v928_v4, %v936_v6 }
 0x326   : > { %v882_v18 = vmul.f32 %v9322_v17, %v9322_v17 }
 0x328   : > { %885 = vadd.xlane.f32.xlu1 %v882_v18 }
 0x3b1   : > { %v884_v46 = vpop.xlane.xlu1 %883 }
 0x3b2   : > { %v887_v47 = vmul.f32 0.0078125, %v884_v46 }
 0x3b4   : > { %v889_v48 = vadd.f32 1e-05, %v887_v47 }
 0x3b5   : > { %v886_v49 = vpop.xlane.xlu1 %885 }
 0x3b6   : > { %7732 = vrsqrt.f32 %v889_v48  ;;  %v888_v51 = vmul.f32 0.0078125, %v886_v49 }
 0x3b8   : > { %v890_v52 = vadd.f32 1e-05, %v888_v51 }
 0x3ba   : > { %7734 = vrsqrt.f32 %v890_v52 }
 0x3c0   : > { %v7733_v55 = vpop.eup %7732 }
 0x3c1   : > { %v893_v56 = vmul.f32 %v7733_v55, %v9318_v13 }
 0x3c3   : > { %v901_v60 = vmul.f32 %v899_v57, %v893_v56 }
 0x3c4   : > { %v7735_v58 = vpop.eup %7734 }
 0x3c5   : > { %v894_v59 = vmul.f32 %v7735_v58, %v9322_v17  ;;  %v909_v63 = vadd.f32 %v907_v61, %v901_v60 }
 0x3c7   : > { %v902_v62 = vmul.f32 %v899_v57, %v894_v59 }
 0x3c9   : > { %v910_v2 = vadd.f32 %v907_v61, %v902_v62 }
 0x3cb   : > { %v911_v3 = vpack.c.bf16 %v910_v2, %v909_v63 }
 0x3cd   : > { %1053 = vmatmul.mubr.bf16.vlgmr.msra.gmra.mrb[0].mxu0 %v911_v3  ;;  %1204 = vmatmul.mubr.bf16.vlgmr.msra.gmra.mrb[0].mxu1 %v911_v3 }
 0x4a0   : > { %v1054_v11 = vpop.f32.mrb[0].mxu0  ;;  %v1205_v12 = vpop.f32.mrb[0].mxu1 }
 0x4a1   : > { %v1055_v13 = vadd.f32 %v1054_v11, %v933_v7  ;;  %v1206_v14 = vadd.f32 %v1205_v12, %v1084_v8  ;;  %v1056_v15 = vpop.f32.mrb[1].mxu0  ;;  %v1207_v16 = vpop.f32.mrb[1].mxu1 }
 0x4a2   : > { %v1057_v17 = vadd.f32 %v1056_v15, %v937_v9  ;;  %v1208_v18 = vadd.f32 %v1207_v16, %v1088_v10  ;;  %v1058_v19 = vpop.f32.mrb[2].mxu0  ;;  %v1209_v20 = vpop.f32.mrb[2].mxu1 }
 0x4a3   : > { %v1059_v21 = vadd.f32 %v1058_v19, %v933_v7  ;;  %v1210_v22 = vadd.f32 %v1209_v20, %v1084_v8  ;;  %v1060_v23 = vpop.f32.mrb[3].mxu0  ;;  %v1211_v24 = vpop.f32.mrb[3].mxu1 }
 0x4a4   : > { %v7142_v25 = vpack.i.bf16 %v1057_v17, %v1055_v13  ;;  %v7144_v26 = vpack.i.bf16 %v1208_v18, %v1206_v14  ;;  %v1061_v27 = vadd.f32 %v1060_v23, %v937_v9  ;;  %v1212_v28 = vadd.f32 %v1211_v24, %v1088_v10 }
 0x4a6   : > { %1226 = vst [vmem:[#allocation2] sm:$0xff] %v7142_v25  ;;  %1240 = vst [vmem:[#allocation3] sm:$0xff] %v7144_v26  ;;  %v7143_v29 = vpack.i.bf16 %v1061_v27, %v1059_v21  ;;  %v7145_v30 = vpack.i.bf16 %v1212_v28, %v1210_v22 }
 0x4a8   : > { %1227 = vst [vmem:[#allocation2 + $0x8] sm:$0xff] %v7143_v29  ;;  %1241 = vst [vmem:[#allocation3 + $0x8] sm:$0xff] %v7145_v30 }
 0x4a9 PF: > { %v9332_v31 = vld [vmem:[%s739_s13] sm:$0xff]  ;;  %v7738_v33 = vld [vmem:[#allocation12] ss:$8 sps:$4 sm:$0xff]   ;;  %v10357_v47 = vmov 0   ;;  %v1256_v55 = vlaneseq  ;;  %v9358_v16 = vmov 0.0   ;;  %v9360_v17 = vmov 0.0  }
 0x4aa   : > { %10473 = vst [vmem:[#allocation58_spill] sm:$0xff] %v9332_v31  ;;  %1243 = vadd.xlane.f32.xlu0 %v9332_v31  ;;  %v7736_v32 = vld [vmem:[#allocation12 + $0x4] ss:$8 sps:$4 sm:$0xff]   ;;  %v7739_v34 = vld [vmem:[#allocation12 + $0x14] ss:$8 sps:$4 sm:$0xff]   ;;  %1410 = vmatprep.mubr.bf16.mxu0 %v10357_v47  ;;  %v9362_v18 = vmov 0.0  }
 0x4ab   : > { %1378 = vmatprep.subr.bf16.mxu0 %v7736_v32  ;;  %v7741_v35 = vld [vmem:[#allocation12 + $0x10] ss:$8 sps:$4 sm:$0xff]   ;;  %v7742_v36 = vld [vmem:[#allocation12 + $0x24] ss:$8 sps:$4 sm:$0xff]   ;;  %v7744_v41 = vld [vmem:[#allocation12 + $0x20] ss:$8 sps:$4 sm:$0xff]  }
 0x4ac   : > { %1379 = vmatpush1.bf16.msra.mxu0 %v7738_v33  ;;  %v7745_v42 = vld [vmem:[#allocation12 + $0x34] ss:$8 sps:$4 sm:$0xff]   ;;  %v7747_v43 = vld [vmem:[#allocation12 + $0x30] ss:$8 sps:$4 sm:$0xff]   ;;  %v7748_v44 = vld [vmem:[#allocation12 + $0x44] ss:$8 sps:$4 sm:$0xff]  }
 0x4ad   : > { %1380 = vmatprep.subr.bf16.mxu0 %v7739_v34  ;;  %v7750_v45 = vld [vmem:[#allocation12 + $0x40] ss:$8 sps:$4 sm:$0xff]   ;;  %v7751_v46 = vld [vmem:[#allocation12 + $0x54] ss:$8 sps:$4 sm:$0xff]   ;;  %v7753_v48 = vld [vmem:[#allocation12 + $0x50] ss:$8 sps:$4 sm:$0xff]  }
 0x4ae   : > { %v7754_v49 = vld [vmem:[#allocation12 + $0x64] ss:$8 sps:$4 sm:$0xff]   ;;  %v7756_v50 = vld [vmem:[#allocation12 + $0x60] ss:$8 sps:$4 sm:$0xff]   ;;  %v7757_v51 = vld [vmem:[#allocation12 + $0x74] ss:$8 sps:$4 sm:$0xff]  }
 0x4af   : > { %v7759_v52 = vld [vmem:[#allocation12 + $0x70] ss:$8 sps:$4 sm:$0xff]   ;;  %v9337_v57 = vshrl.u32 %v1256_v55, 7  ;;  %v1286_v4 = vld [vmem:[#allocation13] sm:$0x3]  ;;  %v9364_v19 = vmov 0.0  }
 0x4b0   : > { %1381 = vmatpush1.bf16.msra.mxu0 %v7741_v35  ;;  %v9366_v20 = vmov -inf   ;;  %v9368_v21 = vmov -inf   ;;  %s9370_s14 = smov 0  }
 0x4b1   : > { %1382 = vmatprep.subr.bf16.mxu0 %v7742_v36  ;;  %v9340_v58 = vsub.s32 0, %v9337_v57  ;;  %v10356_v5 = vsub.s32 1, %v9337_v57 }
 0x4b3   : > { %10474 = vst [vmem:[#allocation59_spill] sm:$0xff] %v9340_v58  ;;  %v1259_v59 = vrot.slane %v9310_v0, %v9340_v58  ;;  %v1266_v62 = vrot.slane %v9312_v1, %v9340_v58  ;;  %v1291_v6 = vrot.slane %v1286_v4, %v9340_v58  ;;  %v1295_v7 = vrot.slane %v1286_v4, %v10356_v5 }
 0x4b4   : > { %1383 = vmatpush1.bf16.msra.mxu0 %v7744_v41 }
 0x4b5   : > { %1384 = vmatprep.subr.bf16.mxu0 %v7745_v42 }
 0x4b8   : > { %1385 = vmatpush1.bf16.msra.mxu0 %v7747_v43 }
 0x4b9   : > { %1386 = vmatprep.subr.bf16.mxu0 %v7748_v44 }
 0x4bc   : > { %1387 = vmatpush1.bf16.msra.mxu0 %v7750_v45 }
 0x4bd   : > { %1388 = vmatprep.subr.bf16.mxu0 %v7751_v46 }
 0x4c0   : > { %1389 = vmatpush1.bf16.msra.mxu0 %v7753_v48 }
 0x4c1   : > { %1390 = vmatprep.subr.bf16.mxu0 %v7754_v49 }
 0x4c4   : > { %1391 = vmatpush1.bf16.msra.mxu0 %v7756_v50 }
 0x4c5   : > { %1392 = vmatprep.subr.bf16.mxu0 %v7757_v51 }
 0x4c8   : > { %1393 = vmatpush1.bf16.msra.mxu0 %v7759_v52 }
 0x537   : > { %v1244_v37 = vpop.xlane.xlu0 %1243 }
 0x538   : > { %v1246_v38 = vmul.f32 0.0078125, %v1244_v37 }
 0x53a   : > { %v1247_v39 = vsub.f32 %v9332_v31, %v1246_v38 }
 0x53c   : > { %v1248_v40 = vmul.f32 %v1247_v39, %v1247_v39 }
 0x53e   : > { %1249 = vadd.xlane.f32.xlu0 %v1248_v40 }
 0x5cb   : > { %v1250_v53 = vpop.xlane.xlu0 %1249 }
 0x5cc   : > { %v1251_v54 = vmul.f32 0.0078125, %v1250_v53 }
 0x5ce   : > { %v1252_v56 = vadd.f32 1e-05, %v1251_v54 }
 0x5d0   : > { %7760 = vrsqrt.f32 %v1252_v56 }
 0x5da   : > { %v7761_v60 = vpop.eup %7760 }
 0x5db   : > { %v1254_v61 = vmul.f32 %v7761_v60, %v1247_v39 }
 0x5dd   : > { %v1261_v63 = vmul.f32 %v1259_v59, %v1254_v61 }
 0x5df   : > { %v1268_v2 = vadd.f32 %v1266_v62, %v1261_v63 }
 0x5e1   : > { %v1269_v3 = vpack.c.bf16 %v1268_v2, %v1268_v2 }
 0x5e3   : > { %1411 = vmatmul.mubr.bf16.vlgmr.msra.gmra.mrb[0].mxu0 %v1269_v3 }
 0x6b6   : > { %v1412_v8 = vpop.f32.mrb[0].mxu0 }
 0x6b7   : > { %v1413_v9 = vadd.f32 %v1412_v8, %v1291_v6  ;;  %v1414_v0 = vpop.f32.mrb[1].mxu0 }
 0x6b8   : > { %v1415_v10 = vadd.f32 %v1414_v0, %v1295_v7  ;;  %v1416_v11 = vpop.f32.mrb[2].mxu0 }
 0x6b9   : > { %v9350_v12 = vmul.f32 0.088388346, %v1413_v9  ;;  %v1417_v1 = vpop.f32.mrb[3].mxu0 }
 0x6ba   : > { %v9352_v13 = vmul.f32 0.088388346, %v1415_v10 }
 0x6bb   : > { %10475 = vst [vmem:[#allocation60_spill] sm:$0xff] %v9350_v12 }
 0x6bc   : > { %10476 = vst [vmem:[#allocation61_spill] sm:$0xff] %v9352_v13 }
 0x6bd LB: >> { %10477 = vst [vmem:[#allocation62_spill] sm:$0xff] %v8534_v16  ;;  %10478 = vst [vmem:[#allocation63_spill] sm:$0xff] %v8538_v17  ;;  %s7162_s15 = sshll.u32 %s8558_s14, 3  ;;  %v8585_v58 = vmov 1934713408   ;;  %vm8588_vm0 = vmmov 0   ;;  %s8558_s14 = sphi %s9370_s14, %s1428_s14   ;;  %v8554_v21 = vphi %v9368_v21, %v5909_v21   ;;  %v8550_v20 = vphi %v9366_v20, %v5910_v20   ;;  %v8546_v19 = vphi %v9364_v19, %v10512_v19   ;;  %v8542_v18 = vphi %v9362_v18, %v10511_v18   ;;  %v8538_v17 = vphi %v9360_v17, %v10510_v17   ;;  %v8534_v16 = vphi %v9358_v16, %v10509_v16  }
 0x6be   : >> { %10479 = vst [vmem:[#allocation64_spill] sm:$0xff] %v8542_v18  ;;  %10480 = vst [vmem:[#allocation65_spill] sm:$0xff] %v8546_v19  ;;  %s1436_s9 = scalar_lea.vmem [#allocation2], %s7162_s15  ;;  %v1873_v31 = vunpack.c.l.s4 %v8585_v58  ;;  %vm5902_vm1 = vcmask 64512   ;;  %s1445_s29 = scalar_lea.vmem [#allocation3], %s7162_s15  ;;  %vm5988_vm2 = vcmask 1043456  }
 0x6bf   : >> { %10481 = vst [vmem:[#allocation66_spill] sm:$0xff] %v8550_v20  ;;  %10482 = vst [vmem:[#allocation67_spill] sm:$0xff] %v8554_v21  ;;  %v1439_v22 = vld [vmem:[%s1436_s9 + $0x2] sm:$0x1]  ;;  %v1437_v23 = vld [vmem:[%s1436_s9] sm:$0x1] }
 0x6c0   : >> { %1486 = vxpose.xlu1.c.b16.start.end [1/1] (short) %v1439_v22, 128  ;;  %1454 = vxpose.xlu0.c.b16.start.end [1/1] (short) %v1437_v23, 128  ;;  %v1440_v24 = vld [vmem:[%s1436_s9 + $0x3] sm:$0x1]  ;;  %v1438_v25 = vld [vmem:[%s1436_s9 + $0x1] sm:$0x1]  ;;  %v1442_v26 = vld [vmem:[%s1436_s9 + $0x5] sm:$0x1] }
 0x6c1   : >> { %v1441_v27 = vld [vmem:[%s1436_s9 + $0x4] sm:$0x1]  ;;  %v1444_v28 = vld [vmem:[%s1436_s9 + $0x7] sm:$0x1]  ;;  %v1443_v29 = vld [vmem:[%s1436_s9 + $0x6] sm:$0x1] }
 0x6c2   : >> { %s1428_s14 = sadd.s32 1, %s8558_s14  }
 0x6c3   : >> { %p1425_p6 = scmp.ge.s32.totalorder %s1428_s14, 2  }
 0x6c4   : > { %s10515_s24 = sld [smem:[#allocation52_spill]] (%p1425_p6)  ;;  %s10518_s30 = sld [smem:[#allocation51_spill]] (%p1425_p6) }
 0x6c5   : > { %s6776_s4 = sshll.u32 (%p1425_p6), %s860_s26, 4  ;;  %s10520_s11 = sld [smem:[#allocation93_spill]] (%p1425_p6)  ;;  %s10249_s4 = int_to_ptr.vmem [resolvable:$true] %s6776_s4 }
 0x6c6   : > { %s6761_s12 = scalar_lea.sflag (%p1425_p6), [#allocation6], %s737_s18  ;;  %s8340_s13 = scalar_lea.vmem (%p1425_p6), %s10249_s4, 128 }
 0x6c7   : > { %p8341_p9 = scmp.ne.s32.totalorder (%p1425_p6), %s10249_s4, %s8340_s13  ;;  %p10521_p0 = scmp.ne.s32.totalorder (%p1425_p6), %s10442_s0, 0 }
 0x6c8   : > { %s8591_s27 = smov (%p1425_p6), [#allocation33]  }
 0x6c9   : > { %p8342_p1 = pnand (%p1425_p6), %p8341_p9, %p10521_p0  ;;  %s8344_s14 = sshll.u32 (%p1425_p6), %s8591_s27, 4  ;;  %s8345_s14 = int_to_ptr.vmem [resolvable:$false] %s8344_s14 }
 0x6ca   : > { %s7220_s7 = sshll.u32 (%p1425_p6), %s10515_s24, 1  ;;  %s8346_s15 = scalar_lea.vmem (%p1425_p6), %s8345_s14, 256 }
 0x6cb   : > { %s6772_s5 = sadd.s32 (%p1425_p6), %s10518_s30, %s7220_s7  ;;  %p8343_p5 = pneg (%p1425_p6), %p8342_p1 }
 0x6cc   : > { %s7221_s3 = sshll.u32 (%p1425_p6), %s6772_s5, 7  ;;  %p8347_p13 = scmp.lt.s32.totalorder (%p1425_p6), %s10249_s4, %s8345_s14 }
 0x6cd   : > { %s10247_s17 = scalar_lea.hbm (%p1425_p6), %s10520_s11, %s7221_s3  ;;  %p8348_p7 = scmp.lt.s32.totalorder (%p1425_p6), %s8346_s15, %s8340_s13 }
 0x6cf   : > { %p8349_p4 = por (%p1425_p6), %p8348_p7, %p8347_p13 }
 0x6d1   : > { %p8350_p3 = pnand (%p1425_p6), %p8349_p4, %p8343_p5 }
 0x6dd   : >> { %1502 = vxpose.xlu1.c.b16.start.end [1/1] (short) %v1440_v24, 128  ;;  %1470 = vxpose.xlu0.c.b16.start.end [1/1] (short) %v1438_v25, 128  ;;  %v8584_v25 = vmov 1983009808  }
 0x6fa   : >> { %1534 = vxpose.xlu1.c.b16.start.end [1/1] (short) %v1442_v26, 128  ;;  %1518 = vxpose.xlu0.c.b16.start.end [1/1] (short) %v1441_v27, 128  ;;  %v1841_v26 = vunpack.c.l.s4 %v8584_v25 }
 0x717   : >> { %1566 = vxpose.xlu1.c.b16.start.end [1/1] (short) %v1444_v28, 128  ;;  %1550 = vxpose.xlu0.c.b16.start.end [1/1] (short) %v1443_v29, 128  ;;  %v1842_v29 = vunpack.c.0.s8 %v1841_v26 }
 0x719   : >> { %v9486_v19 = vsub.s32 %v1842_v29, %v9337_v57 }
 0x71b   : >> { %v10490_v25 = vmov %v9486_v19 }
 0x726   : >> { %v9396_v30 = vpop.trf.xlu1  ;;  %v9398_v32 = vpop.trf.xlu0 }
 0x727   : >> { %v1586_v20 = vshrl.u32 %v9398_v32, 16  ;;  %v1594_v58 = vshrl.u32 %v9396_v30, 16 }
 0x72a   : >> { %v9400_v33 = vpop.trf.xlu1  ;;  %v9402_v34 = vpop.trf.xlu0 }
 0x72e   : >> { %v9404_v35 = vpop.trf.xlu1  ;;  %v9406_v36 = vpop.trf.xlu0 }
 0x732   : >> { %v9408_v37 = vpop.trf.xlu1  ;;  %v9410_v38 = vpop.trf.xlu0 }
 0x736   : >> { %v9412_v39 = vpop.trf.xlu1  ;;  %v9414_v40 = vpop.trf.xlu0 }
 0x73a   : >> { %v9416_v41 = vpop.trf.xlu1  ;;  %v9418_v42 = vpop.trf.xlu0 }
 0x73e   : >> { %v9420_v43 = vpop.trf.xlu1  ;;  %v9422_v44 = vpop.trf.xlu0 }
 0x742   : >> { %v9424_v45 = vpop.trf.xlu1  ;;  %v9426_v46 = vpop.trf.xlu0 }
 0x743   : >> { %10483 = vst [vmem:[#allocation68_spill] sm:$0xff] %v9424_v45  ;;  %10484 = vst [vmem:[#allocation69_spill] sm:$0xff] %v9426_v46 }
 0x746   : >> { %v1510_v48 = vpop.trf.xlu1  ;;  %v1478_v49 = vpop.trf.xlu0 }
 0x747   : >> { %v1587_v17 = vshrl.u32 %v1478_v49, 16  ;;  %v1584_v18 = vpack.i.b16 %v1478_v49, %v9398_v32  ;;  %v1595_v21 = vshrl.u32 %v1510_v48, 16  ;;  %v1592_v46 = vpack.i.b16 %v1510_v48, %v9396_v30 }
 0x749   : >> { %v1596_v45 = vpack.i.b16 %v1595_v21, %v1594_v58  ;;  %v8586_v21 = vmov 0  }
 0x74a   : >> { %v9428_v50 = vpop.trf.xlu1  ;;  %v9430_v51 = vpop.trf.xlu0 }
 0x74e   : >> { %v9432_v52 = vpop.trf.xlu1  ;;  %v9434_v53 = vpop.trf.xlu0 }
 0x752   : >> { %v9436_v54 = vpop.trf.xlu1  ;;  %v9438_v55 = vpop.trf.xlu0 }
 0x756   : >> { %v9440_v56 = vpop.trf.xlu1  ;;  %v9442_v59 = vpop.trf.xlu0 }
 0x75a   : >> { %v9444_v60 = vpop.trf.xlu1  ;;  %v9446_v61 = vpop.trf.xlu0 }
 0x75e   : >> { %v9448_v62 = vpop.trf.xlu1  ;;  %v9450_v63 = vpop.trf.xlu0 }
 0x75f   : >> { %10485 = vst [vmem:[#allocation70_spill] sm:$0xff] %v9450_v63 }
 0x762   : >> { %v9452_v2 = vpop.trf.xlu1  ;;  %v9454_v3 = vpop.trf.xlu0 }
 0x763   : >> { %10486 = vst [vmem:[#allocation71_spill] sm:$0xff] %v9452_v2  ;;  %10487 = vst [vmem:[#allocation72_spill] sm:$0xff] %v9454_v3  ;;  %v1874_v3 = vunpack.c.0.s8 %v1873_v31 }
 0x766   : >> { %v1542_v4 = vpop.trf.xlu1  ;;  %v1526_v6 = vpop.trf.xlu0 }
 0x767   : >> { %v1603_v5 = vshrl.u32 %v1542_v4, 16  ;;  %v1602_v47 = vshrl.u32 %v1526_v6, 16  ;;  %v1600_v16 = vpack.i.b16 %v1542_v4, %v1526_v6  ;;  %v1588_v4 = vpack.i.b16 %v1587_v17, %v1586_v20 }
 0x769   : >> { %v1604_v13 = vpack.i.b16 %v1603_v5, %v1602_v47  ;;  %v9494_v5 = vsub.s32 %v1874_v3, %v9337_v57  ;;  %v1839_v3 = vcombine.high %v1584_v18, %v1600_v16 }
 0x76a   : >> { %v9456_v7 = vpop.trf.xlu1  ;;  %v9458_v8 = vpop.trf.xlu0 }
 0x76b   : >> { %v1906_v19 = vcombine.low %v1588_v4, %v1604_v13 }
 0x76d   : >> { %v1914_v63 = vrot.slane %v1906_v19, %v10490_v25 }
 0x76e   : >> { %v9460_v9 = vpop.trf.xlu1  ;;  %v9462_v0 = vpop.trf.xlu0 }
 0x772   : >> { %v9464_v10 = vpop.trf.xlu1  ;;  %v9466_v11 = vpop.trf.xlu0 }
 0x776   : >> { %v9468_v1 = vpop.trf.xlu1  ;;  %v9470_v22 = vpop.trf.xlu0 }
 0x77a   : >> { %v9472_v23 = vpop.trf.xlu1  ;;  %v9474_v24 = vpop.trf.xlu0 }
 0x77e   : >> { %v9476_v27 = vpop.trf.xlu1  ;;  %v9478_v28 = vpop.trf.xlu0 }
 0x782   : >> { %v9480_v15 = vpop.trf.xlu1  ;;  %v9482_v14 = vpop.trf.xlu0 }
 0x783   : >> { %10488 = vst [vmem:[#allocation73_spill] sm:$0xff] %v9480_v15  ;;  %10489 = vst [vmem:[#allocation74_spill] sm:$0xff] %v9482_v14  ;;  %v1838_v15 = vcombine.low %v1584_v18, %v1600_v16 }
 0x785   : >> { %v1846_v32 = vrot.slane %v1838_v15, %v10490_v25 }
 0x786   : >> { %v1574_v26 = vpop.trf.xlu1  ;;  %v1558_v12 = vpop.trf.xlu0 }
 0x787   : >> { %v1611_v14 = vshrl.u32 %v1574_v26, 16  ;;  %v1608_v2 = vpack.i.b16 %v1574_v26, %v1558_v12  ;;  %v1610_v6 = vshrl.u32 %v1558_v12, 16 }
 0x789   : >> { %v1854_v49 = vcombine.low %v1592_v46, %v1608_v2  ;;  %v1612_v29 = vpack.i.b16 %v1611_v14, %v1610_v6  ;;  %v1855_v20 = vcombine.high %v1592_v46, %v1608_v2  ;;  %v1853_v46 = vrot.slane %v1839_v3, %v10490_v25 }
 0x78a   : >> { %v1559_v16 = vpop.trf.xlu0  ;;  %v1632_v3 = vpack.i.b16 %v9456_v7, %v9458_v8 }
 0x78b   : >> { %v1862_v47 = vrot.slane %v1854_v49, %v10490_v25  ;;  %v1922_v31 = vcombine.low %v1596_v45, %v1612_v29  ;;  %v1923_v49 = vcombine.high %v1596_v45, %v1612_v29  ;;  %v1642_v29 = vshrl.u32 %v1559_v16, 16 }
 0x78d   : >> { %v1870_v48 = vcombine.low %v1846_v32, %v1862_v47  ;;  %v1930_v26 = vrot.slane %v1922_v31, %v10490_v25  ;;  %v1871_v30 = vcombine.high %v1846_v32, %v1862_v47  ;;  %v1869_v31 = vrot.slane %v1855_v20, %v10490_v25  ;;  %v1575_v47 = vpop.trf.xlu1 }
 0x78e   : >> { %v1937_v32 = vrot.slane %v1923_v49, %v10490_v25  ;;  %v1635_v20 = vshrl.u32 %v9456_v7, 16 }
 0x78f   : >> { %v1878_v17 = vrot.slane %v1870_v48, %v9494_v5  ;;  %v1938_v12 = vcombine.low %v1914_v63, %v1930_v26  ;;  %v1939_v6 = vcombine.high %v1914_v63, %v1930_v26  ;;  %v1885_v19 = vrot.slane %v1871_v30, %v9494_v5 }
 0x790   : >> { %v1907_v48 = vcombine.high %v1588_v4, %v1604_v13  ;;  %v1643_v63 = vshrl.u32 %v1575_v47, 16  ;;  %v1640_v26 = vpack.i.b16 %v1575_v47, %v1559_v16  ;;  %v1624_v30 = vpack.i.b16 %v9428_v50, %v9400_v33 }
 0x791   : >> { %2926 = vxpose.xlu0.c.b16.start.end [1/1] (short) (narrow) %v1878_v17, 16  ;;  %v1946_v14 = vrot.slane %v1938_v12, %v9494_v5  ;;  %v1902_v15 = vcombine.high %v1878_v17, %v8586_v21  ;;  %v1953_v2 = vrot.slane %v1939_v6, %v9494_v5  ;;  %v1903_v18 = vcombine.high %v1885_v19, %v8586_v21 }
 0x792   : >> { %v1886_v17 = vcombine.low %v1853_v46, %v1869_v31  ;;  %v1921_v45 = vrot.slane %v1907_v48, %v10490_v25  ;;  %v1619_v6 = vshrl.u32 %v9430_v51, 16  ;;  %v1644_v49 = vpack.i.b16 %v1643_v63, %v1642_v29 }
 0x793   : >> { %2942 = vxpose.xlu1.c.b16.start.end [1/1] (short) (narrow) %v1946_v14, 16  ;;  %v1970_v58 = vcombine.high %v1946_v14, %v8586_v21  ;;  %v1971_v13 = vcombine.high %v1953_v2, %v8586_v21  ;;  %v1627_v14 = vshrl.u32 %v9428_v50, 16  ;;  %v1616_v48 = vpack.i.b16 %v9430_v51, %v9402_v34 }
 0x794   : >> { %v1954_v4 = vcombine.low %v1921_v45, %v1937_v32  ;;  %v1894_v12 = vrot.slane %v1886_v17, %v9494_v5  ;;  %v1887_v16 = vcombine.high %v1853_v46, %v1869_v31  ;;  %v1618_v50 = vshrl.u32 %v9402_v34, 16 }
 0x795   : >> { %2958 = vxpose.xlu0.c.b16.start.end [1/1] (short) (narrow) %v1902_v15, 16  ;;  %v1634_v15 = vshrl.u32 %v9458_v8, 16  ;;  %v1974_v7 = vcombine.low %v1616_v48, %v1632_v3  ;;  %v1955_v63 = vcombine.high %v1921_v45, %v1937_v32 }
 0x796   : >> { %v1904_v47 = vcombine.high %v1894_v12, %v8586_v21 }
 0x797   : >> { %2974 = vxpose.xlu1.c.b16.start.end [1/1] (short) (narrow) %v1970_v58, 16  ;;  %v1626_v58 = vshrl.u32 %v9400_v33, 16  ;;  %v1636_v17 = vpack.i.b16 %v1635_v20, %v1634_v15  ;;  %v1620_v33 = vpack.i.b16 %v1619_v6, %v1618_v50  ;;  %v1982_v31 = vrot.slane %v1974_v7, %v10490_v25 }
 0x798   : >> { %v1969_v34 = vrot.slane %v1955_v63, %v9494_v5  ;;  %v1991_v6 = vcombine.high %v1624_v30, %v1640_v26 }
 0x799   : >> { %2990 = vxpose.xlu0.c.b16.start.end [1/1] (short) (narrow) %v1885_v19, 16  ;;  %v1962_v19 = vrot.slane %v1954_v4, %v9494_v5  ;;  %v2042_v4 = vcombine.low %v1620_v33, %v1636_v17 }
 0x79a   : >> { %v1973_v45 = vcombine.high %v1969_v34, %v8586_v21  ;;  %v2005_v63 = vrot.slane %v1991_v6, %v10490_v25  ;;  %v1651_v6 = vshrl.u32 %v9434_v53, 16 }
 0x79b   : >> { %3006 = vxpose.xlu1.c.b16.start.end [1/1] (short) (narrow) %v1953_v2, 16  ;;  %v1990_v2 = vcombine.low %v1624_v30, %v1640_v26  ;;  %v1972_v8 = vcombine.high %v1962_v19, %v8586_v21  ;;  %v2050_v32 = vrot.slane %v2042_v4, %v10490_v25  ;;  %v8587_v26 = vmov 0.0  }
 0x79c   : >> { %7295 = vmatprep.subr.bf16.mxu0 %v8587_v26  ;;  %7315 = vmatprep.subr.bf16.mxu1 %v8587_v26 }
 0x79d   : >> { %3022 = vxpose.xlu0.c.b16.start.end [1/1] (short) (narrow) %v1903_v18, 16  ;;  %v1628_v18 = vpack.i.b16 %v1627_v14, %v1626_v58  ;;  %v1998_v51 = vrot.slane %v1990_v2, %v10490_v25  ;;  %7311 = vmatprep.mubr.msk.bf16.mxu0 %vm8588_vm0, %v8587_v26 }
 0x79e   : >> { %7331 = vmatprep.mubr.msk.bf16.mxu1 %vm8588_vm0, %v8587_v26 }
 0x79f   : >> { %3038 = vxpose.xlu1.c.b16.start.end [1/1] (short) (narrow) %v1971_v13, 16  ;;  %v2058_v29 = vcombine.low %v1628_v18, %v1644_v49  ;;  %v1901_v13 = vrot.slane %v1887_v16, %v9494_v5  ;;  %v2006_v14 = vcombine.low %v1982_v31, %v1998_v51  ;;  %v2007_v2 = vcombine.high %v1982_v31, %v1998_v51 }
 0x7a0   : >> { %v2059_v7 = vcombine.high %v1628_v18, %v1644_v49  ;;  %v1560_v49 = vpop.trf.xlu0 }
 0x7a1   : >> { %3054 = vxpose.xlu0.c.b16.start.end [1/1] (short) (narrow) %v1894_v12, 16  ;;  %v2066_v46 = vrot.slane %v2058_v29, %v10490_v25  ;;  %v1905_v12 = vcombine.high %v1901_v13, %v8586_v21  ;;  %v2014_v15 = vrot.slane %v2006_v14, %v9494_v5  ;;  %v2043_v29 = vcombine.high %v1620_v33, %v1636_v17 }
 0x7a2   : >> { %v1674_v4 = vshrl.u32 %v1560_v49, 16  ;;  %v1659_v14 = vshrl.u32 %v9432_v52, 16 }
 0x7a3   : >> { %3070 = vxpose.xlu1.c.b16.start.end [1/1] (short) (narrow) %v1962_v19, 16  ;;  %v2074_v20 = vcombine.low %v2050_v32, %v2066_v46  ;;  %v2038_v19 = vcombine.high %v2014_v15, %v8586_v21  ;;  %v2075_v50 = vcombine.high %v2050_v32, %v2066_v46  ;;  %v2057_v17 = vrot.slane %v2043_v29, %v10490_v25 }
 0x7a4   : >> { %v1667_v32 = vshrl.u32 %v9460_v9, 16 }
 0x7a5   : >> { %3086 = vxpose.xlu0.c.b16.start.end [1/1] (short) (narrow) %v1904_v47, 16  ;;  %v2082_v58 = vrot.slane %v2074_v20, %v9494_v5  ;;  %v1975_v47 = vcombine.high %v1616_v48, %v1632_v3  ;;  %v2089_v30 = vrot.slane %v2075_v50, %v9494_v5  ;;  %v2073_v3 = vrot.slane %v2059_v7, %v10490_v25  ;;  %v1576_v48 = vpop.trf.xlu1 }
 0x7a6   : >> { %v1675_v33 = vshrl.u32 %v1576_v48, 16  ;;  %v1672_v46 = vpack.i.b16 %v1576_v48, %v1560_v49  ;;  %v1656_v20 = vpack.i.b16 %v9432_v52, %v9404_v35  ;;  %v1650_v52 = vshrl.u32 %v9406_v36, 16 }
 0x7a7   : >> { %3102 = vxpose.xlu1.c.b16.start.end [1/1] (short) (narrow) %v1972_v8, 16  ;;  %v2106_v16 = vcombine.high %v2082_v58, %v8586_v21  ;;  %v2021_v8 = vrot.slane %v2007_v2, %v9494_v5  ;;  %v2107_v31 = vcombine.high %v2089_v30, %v8586_v21 }
 0x7a9   : >> { %3118 = vxpose.xlu0.c.b16.start.end [1/1] (short) (narrow) %v1901_v13, 16  ;;  %v1989_v13 = vrot.slane %v1975_v47, %v10490_v25  ;;  %v2039_v18 = vcombine.high %v2021_v8, %v8586_v21  ;;  %v1648_v47 = vpack.i.b16 %v9434_v53, %v9406_v36 }
 0x7ab   : >> { %3134 = vxpose.xlu1.c.b16.start.end [1/1] (short) (narrow) %v1969_v34, 16  ;;  %v2022_v51 = vcombine.low %v1989_v13, %v2005_v63  ;;  %v2090_v34 = vcombine.low %v2057_v17, %v2073_v3  ;;  %v2023_v7 = vcombine.high %v1989_v13, %v2005_v63 }
 0x7ad   : >> { %3150 = vxpose.xlu0.c.b16.start.end [1/1] (short) (narrow) %v1905_v12, 16  ;;  %v2030_v12 = vrot.slane %v2022_v51, %v9494_v5  ;;  %v2098_v2 = vrot.slane %v2090_v34, %v9494_v5  ;;  %v2037_v49 = vrot.slane %v2023_v7, %v9494_v5 }
 0x7af   : >> { %3166 = vxpose.xlu1.c.b16.start.end [1/1] (short) (narrow) %v1973_v45, 16  ;;  %v1666_v45 = vshrl.u32 %v9462_v0, 16  ;;  %v2040_v50 = vcombine.high %v2030_v12, %v8586_v21  ;;  %v2041_v51 = vcombine.high %v2037_v49, %v8586_v21 }
 0x7b1   : >> { %3182 = vxpose.xlu0.c.b16.start.end [1/1] (short) (narrow) %v2014_v15, 16  ;;  %v1664_v15 = vpack.i.b16 %v9460_v9, %v9462_v0  ;;  %v1668_v29 = vpack.i.b16 %v1667_v32, %v1666_v45  ;;  %v2108_v0 = vcombine.high %v2098_v2, %v8586_v21 }
 0x7b3   : >> { %3198 = vxpose.xlu1.c.b16.start.end [1/1] (short) (narrow) %v2082_v58, 16  ;;  %v1658_v58 = vshrl.u32 %v9404_v35, 16  ;;  %v2110_v9 = vcombine.low %v1648_v47, %v1664_v15  ;;  %v1652_v35 = vpack.i.b16 %v1651_v6, %v1650_v52  ;;  %v2111_v45 = vcombine.high %v1648_v47, %v1664_v15  ;;  %v1561_v15 = vpop.trf.xlu0 }
 0x7b5   : >> { %3214 = vxpose.xlu0.c.b16.start.end [1/1] (short) (narrow) %v2038_v19, 16  ;;  %v1676_v19 = vpack.i.b16 %v1675_v33, %v1674_v4  ;;  %v2118_v63 = vrot.slane %v2110_v9, %v10490_v25  ;;  %v2179_v7 = vcombine.high %v1652_v35, %v1668_v29  ;;  %v2125_v52 = vrot.slane %v2111_v45, %v10490_v25  ;;  %v1577_v9 = vpop.trf.xlu1 }
 0x7b7   : >> { %3230 = vxpose.xlu1.c.b16.start.end [1/1] (short) (narrow) %v2106_v16, 16  ;;  %v2126_v16 = vcombine.low %v1656_v20, %v1672_v46 }
 0x7b9   : >> { %3246 = vxpose.xlu0.c.b16.start.end [1/1] (short) (narrow) %v2021_v8, 16  ;;  %v1660_v8 = vpack.i.b16 %v1659_v14, %v1658_v58  ;;  %v2134_v53 = vrot.slane %v2126_v16, %v10490_v25 }
 0x7bb   : >> { %3262 = vxpose.xlu1.c.b16.start.end [1/1] (short) (narrow) %v2089_v30, 16  ;;  %v2091_v30 = vcombine.high %v2057_v17, %v2073_v3  ;;  %v2194_v48 = vcombine.low %v1660_v8, %v1676_v19  ;;  %v2142_v33 = vcombine.low %v2118_v63, %v2134_v53  ;;  %v2143_v32 = vcombine.high %v2118_v63, %v2134_v53 }
 0x7bc   : >> { %v2195_v58 = vcombine.high %v1660_v8, %v1676_v19  ;;  %v2193_v8 = vrot.slane %v2179_v7, %v10490_v25  ;;  %v1691_v53 = vshrl.u32 %v9436_v54, 16  ;;  %v1698_v63 = vshrl.u32 %v9466_v11, 16 }
 0x7bd   : >> { %3278 = vxpose.xlu0.c.b16.start.end [1/1] (short) (narrow) %v2039_v18, 16  ;;  %v2178_v18 = vcombine.low %v1652_v35, %v1668_v29  ;;  %v2105_v36 = vrot.slane %v2091_v30, %v9494_v5  ;;  %v2202_v13 = vrot.slane %v2194_v48, %v10490_v25  ;;  %v1706_v30 = vshrl.u32 %v1561_v15, 16 }
 0x7be   : >> { %v9584_v48 = vpack.i.b16 %v1577_v9, %v1561_v15 }
 0x7bf   : >> { %3294 = vxpose.xlu1.c.b16.start.end [1/1] (short) (narrow) %v2107_v31, 16  ;;  %v2186_v3 = vrot.slane %v2178_v18, %v10490_v25  ;;  %v2109_v17 = vcombine.high %v2105_v36, %v8586_v21  ;;  %v2150_v31 = vrot.slane %v2142_v33, %v9494_v5  ;;  %v1699_v18 = vshrl.u32 %v9464_v10, 16 }
 0x7c0   : >> { %v1690_v33 = vshrl.u32 %v9408_v37, 16 }
 0x7c1   : >> { %3310 = vxpose.xlu0.c.b16.start.end [1/1] (short) (narrow) %v2030_v12, 16  ;;  %v2210_v4 = vcombine.low %v2186_v3, %v2202_v13  ;;  %v2127_v12 = vcombine.high %v1656_v20, %v1672_v46  ;;  %v2174_v14 = vcombine.high %v2150_v31, %v8586_v21  ;;  %v2209_v20 = vrot.slane %v2195_v58, %v10490_v25 }
 0x7c3   : >> { %3326 = vxpose.xlu1.c.b16.start.end [1/1] (short) (narrow) %v2098_v2, 16  ;;  %v2218_v34 = vrot.slane %v2210_v4, %v9494_v5  ;;  %v2211_v2 = vcombine.high %v2186_v3, %v2202_v13  ;;  %v2141_v16 = vrot.slane %v2127_v12, %v10490_v25  ;;  %v2226_v35 = vcombine.low %v2193_v8, %v2209_v20 }
 0x7c4   : >> { %v1696_v13 = vpack.i.b16 %v9464_v10, %v9466_v11  ;;  %v1683_v3 = vshrl.u32 %v9438_v55, 16  ;;  %v1682_v10 = vshrl.u32 %v9410_v38, 16  ;;  %v1692_v11 = vpack.i.b16 %v1691_v53, %v1690_v33 }
 0x7c5   : >> { %3342 = vxpose.xlu0.c.b16.start.end [1/1] (short) (narrow) %v2040_v50, 16  ;;  %v2242_v6 = vcombine.high %v2218_v34, %v8586_v21  ;;  %v2157_v50 = vrot.slane %v2143_v32, %v9494_v5  ;;  %v2225_v46 = vrot.slane %v2211_v2, %v9494_v5  ;;  %v2158_v47 = vcombine.low %v2125_v52, %v2141_v16  ;;  %v9604_v32 = vpop.trf.xlu1 }
 0x7c6   : >> { %v2234_v4 = vrot.slane %v2226_v35, %v9494_v5  ;;  %v2159_v12 = vcombine.high %v2125_v52, %v2141_v16  ;;  %v1684_v45 = vpack.i.b16 %v1683_v3, %v1682_v10  ;;  %v2227_v2 = vcombine.high %v2193_v8, %v2209_v20 }
 0x7c7   : >> { %3358 = vxpose.xlu1.c.b16.start.end [1/1] (short) (narrow) %v2108_v0, 16  ;;  %v2175_v19 = vcombine.high %v2157_v50, %v8586_v21  ;;  %v1707_v0 = vshrl.u32 %v1577_v9, 16  ;;  %v2243_v29 = vcombine.high %v2225_v46, %v8586_v21 }
 0x7c8   : >> { %v2173_v16 = vrot.slane %v2159_v12, %v9494_v5 }
 0x7c9   : >> { %3374 = vxpose.xlu0.c.b16.start.end [1/1] (short) (narrow) %v2037_v49, 16  ;;  %v2166_v49 = vrot.slane %v2158_v47, %v9494_v5  ;;  %v9612_v52 = vpop.trf.xlu1 }
 0x7ca   : >> { %v2177_v15 = vcombine.high %v2173_v16, %v8586_v21 }
 0x7cb   : >> { %3390 = vxpose.xlu1.c.b16.start.end [1/1] (short) (narrow) %v2105_v36, 16  ;;  %v1688_v36 = vpack.i.b16 %v9436_v54, %v9408_v37  ;;  %v2176_v54 = vcombine.high %v2166_v49, %v8586_v21 }
 0x7cd   : >> { %3406 = vxpose.xlu0.c.b16.start.end [1/1] (short) (narrow) %v2041_v51, 16  ;;  %v9594_v51 = vpop.trf.xlu0 }
 0x7cf   : >> { %3422 = vxpose.xlu1.c.b16.start.end [1/1] (short) (narrow) %v2109_v17, 16  ;;  %v1708_v17 = vpack.i.b16 %v1707_v0, %v1706_v30 }
 0x7d1   : >> { %3438 = vxpose.xlu0.c.b16.start.end [1/1] (short) (narrow) %v2150_v31, 16  ;;  %v1680_v31 = vpack.i.b16 %v9438_v55, %v9410_v38  ;;  %v2330_v58 = vcombine.low %v1692_v11, %v1708_v17  ;;  %v2331_v3 = vcombine.high %v1692_v11, %v1708_v17 }
 0x7d3   : >> { %3454 = vxpose.xlu1.c.b16.start.end [1/1] (short) (narrow) %v2218_v34, 16  ;;  %v2262_v34 = vcombine.low %v1688_v36, %v9584_v48  ;;  %v2246_v37 = vcombine.low %v1680_v31, %v1696_v13  ;;  %v2338_v9 = vrot.slane %v2330_v58, %v10490_v25  ;;  %v2247_v33 = vcombine.high %v1680_v31, %v1696_v13 }
 0x7d4   : >> { %v2345_v17 = vrot.slane %v2331_v3, %v10490_v25 }
 0x7d5   : >> { %3470 = vxpose.xlu0.c.b16.start.end [1/1] (short) (narrow) %v2174_v14, 16  ;;  %v1700_v14 = vpack.i.b16 %v1699_v18, %v1698_v63  ;;  %v2270_v55 = vrot.slane %v2262_v34, %v10490_v25  ;;  %v2254_v38 = vrot.slane %v2246_v37, %v10490_v25  ;;  %v2261_v37 = vrot.slane %v2247_v33, %v10490_v25 }
 0x7d7   : >> { %3486 = vxpose.xlu1.c.b16.start.end [1/1] (short) (narrow) %v2242_v6, 16  ;;  %v2244_v6 = vcombine.high %v2234_v4, %v8586_v21  ;;  %v2314_v7 = vcombine.low %v1684_v45, %v1700_v14  ;;  %v2278_v20 = vcombine.low %v2254_v38, %v2270_v55  ;;  %v2279_v63 = vcombine.high %v2254_v38, %v2270_v55 }
 0x7d8   : >> { %v9652_v38 = vpack.i.b16 %v9604_v32, %v9594_v51 }
 0x7d9   : >> { %3502 = vxpose.xlu0.c.b16.start.end [1/1] (short) (narrow) %v2157_v50, 16  ;;  %v9608_v50 = vpop.trf.xlu0  ;;  %v2286_v30 = vrot.slane %v2278_v20, %v9494_v5  ;;  %v1731_v20 = vshrl.u32 %v9468_v1, 16 }
 0x7db   : >> { %3518 = vxpose.xlu1.c.b16.start.end [1/1] (short) (narrow) %v2225_v46, 16  ;;  %v2241_v46 = vrot.slane %v2227_v2, %v9494_v5  ;;  %v2310_v18 = vcombine.high %v2286_v30, %v8586_v21 }
 0x7dd   : >> { %3534 = vxpose.xlu0.c.b16.start.end [1/1] (short) (narrow) %v2175_v19, 16  ;;  %v2322_v19 = vrot.slane %v2314_v7, %v10490_v25  ;;  %v9618_v47 = vpop.trf.xlu0  ;;  %v2245_v8 = vcombine.high %v2241_v46, %v8586_v21 }
 0x7df   : >> { %3550 = vxpose.xlu1.c.b16.start.end [1/1] (short) (narrow) %v2243_v29, 16  ;;  %v2346_v0 = vcombine.low %v2322_v19, %v2338_v9  ;;  %v9622_v29 = vpop.trf.xlu1 }
 0x7e1   : >> { %3566 = vxpose.xlu0.c.b16.start.end [1/1] (short) (narrow) %v2166_v49, 16  ;;  %v2354_v35 = vrot.slane %v2346_v0, %v9494_v5  ;;  %v2263_v49 = vcombine.high %v1688_v36, %v9584_v48  ;;  %v9626_v53 = vpop.trf.xlu0  ;;  %v2293_v48 = vrot.slane %v2279_v63, %v9494_v5  ;;  %v2315_v36 = vcombine.high %v1684_v45, %v1700_v14 }
 0x7e2   : >> { %v1739_v14 = vshrl.u32 %v9604_v32, 16  ;;  %v1738_v45 = vshrl.u32 %v9594_v51, 16  ;;  %v9664_v0 = vpack.i.b16 %v9468_v1, %v9470_v22  ;;  %v1722_v51 = vshrl.u32 %v9412_v39, 16 }
 0x7e3   : >> { %3582 = vxpose.xlu1.c.b16.start.end [1/1] (short) (narrow) %v2234_v4, 16  ;;  %v9629_v4 = vpop.trf.xlu1  ;;  %v2378_v34 = vcombine.high %v2354_v35, %v8586_v21  ;;  %v2277_v12 = vrot.slane %v2263_v49, %v10490_v25  ;;  %v2311_v11 = vcombine.high %v2293_v48, %v8586_v21  ;;  %v2329_v2 = vrot.slane %v2315_v36, %v10490_v25 }
 0x7e4   : >> { %v1715_v32 = vshrl.u32 %v9442_v59, 16 }
 0x7e5   : >> { %3598 = vxpose.xlu0.c.b16.start.end [1/1] (short) (narrow) %v2176_v54, 16  ;;  %v2347_v54 = vcombine.high %v2322_v19, %v2338_v9  ;;  %v2362_v7 = vcombine.low %v2329_v2, %v2345_v17  ;;  %v1730_v19 = vshrl.u32 %v9470_v22, 16  ;;  %v2295_v22 = vcombine.high %v2261_v37, %v2277_v12 }
 0x7e7   : >> { %3614 = vxpose.xlu1.c.b16.start.end [1/1] (short) (narrow) %v2244_v6, 16  ;;  %v2361_v13 = vrot.slane %v2347_v54, %v9494_v5  ;;  %v2294_v6 = vcombine.low %v2261_v37, %v2277_v12  ;;  %v2370_v49 = vrot.slane %v2362_v7, %v9494_v5  ;;  %v9682_v3 = vpack.i.b16 %v1731_v20, %v1730_v19 }
 0x7e8   : >> { %v2363_v12 = vcombine.high %v2329_v2, %v2345_v17 }
 0x7e9   : >> { %3630 = vxpose.xlu0.c.b16.start.end [1/1] (short) (narrow) %v2173_v16, 16  ;;  %v2379_v16 = vcombine.high %v2361_v13, %v8586_v21  ;;  %v2302_v9 = vrot.slane %v2294_v6, %v9494_v5  ;;  %v2380_v36 = vcombine.high %v2370_v49, %v8586_v21 }
 0x7eb   : >> { %3646 = vxpose.xlu1.c.b16.start.end [1/1] (short) (narrow) %v2241_v46, 16  ;;  %v2312_v1 = vcombine.high %v2302_v9, %v8586_v21 }
 0x7ed   : >> { %3662 = vxpose.xlu0.c.b16.start.end [1/1] (short) (narrow) %v2177_v15, 16  ;;  %v1723_v15 = vshrl.u32 %v9440_v56, 16 }
 0x7ef   : >> { %3678 = vxpose.xlu1.c.b16.start.end [1/1] (short) (narrow) %v2245_v8, 16  ;;  %v1720_v8 = vpack.i.b16 %v9440_v56, %v9412_v39  ;;  %v1714_v39 = vshrl.u32 %v9414_v40, 16  ;;  %v9680_v33 = vpack.i.b16 %v1723_v15, %v1722_v51 }
 0x7f1   : >> { %3694 = vxpose.xlu0.c.b16.start.end [1/1] (short) (narrow) %v2286_v30, 16  ;;  %v9668_v30 = vpack.i.b16 %v1739_v14, %v1738_v45  ;;  %v2398_v56 = vcombine.low %v1720_v8, %v9652_v38  ;;  %v9686_v54 = vpack.i.b16 %v1715_v32, %v1714_v39  ;;  %v2377_v45 = vrot.slane %v2363_v12, %v9494_v5 }
 0x7f3   : >> { %3710 = vxpose.xlu1.c.b16.start.end [1/1] (short) (narrow) %v2354_v35, 16  ;;  %v2381_v20 = vcombine.high %v2377_v45, %v8586_v21 }
 0x7f5   : >> { %3726 = vxpose.xlu0.c.b16.start.end [1/1] (short) (narrow) %v2310_v18, 16  ;;  %v9675_v18 = vpack.i.b16 %v9442_v59, %v9414_v40  ;;  %v2466_v59 = vcombine.low %v9680_v33, %v9668_v30  ;;  %v2406_v40 = vrot.slane %v2398_v56, %v10490_v25  ;;  %v2399_v56 = vcombine.high %v1720_v8, %v9652_v38 }
 0x7f7   : >> { %v9633_v10 = vpop.trf.xlu0  ;;  %3742 = vxpose.xlu1.c.b16.start.end [1/1] (short) (narrow) %v2378_v34, 16  ;;  %v2382_v34 = vcombine.low %v9675_v18, %v9664_v0  ;;  %v2383_v8 = vcombine.high %v9675_v18, %v9664_v0 }
 0x7f9   : >> { %3758 = vxpose.xlu0.c.b16.start.end [1/1] (short) (narrow) %v2293_v48, 16  ;;  %v9637_v58 = vpop.trf.xlu1  ;;  %v2390_v6 = vrot.slane %v2382_v34, %v10490_v25 }
 0x7fb   : >> { %v9641_v31 = vpop.trf.xlu0  ;;  %3774 = vxpose.xlu1.c.b16.start.end [1/1] (short) (narrow) %v2361_v13, 16  ;;  %v2309_v13 = vrot.slane %v2295_v22, %v9494_v5  ;;  %v2414_v2 = vcombine.low %v2390_v6, %v2406_v40  ;;  %v2415_v38 = vcombine.high %v2390_v6, %v2406_v40 }
 0x7fd   : >> { %3790 = vxpose.xlu0.c.b16.start.end [1/1] (short) (narrow) %v2311_v11, 16  ;;  %v9647_v55 = vpop.trf.xlu1  ;;  %v2450_v11 = vcombine.low %v9686_v54, %v9682_v3  ;;  %v2313_v17 = vcombine.high %v2309_v13, %v8586_v21 }
 0x7ff   : >> { %v9654_v46 = vpop.trf.xlu0  ;;  %3806 = vxpose.xlu1.c.b16.start.end [1/1] (short) (narrow) %v2379_v16, 16  ;;  %v2474_v16 = vrot.slane %v2466_v59, %v10490_v25 }
 0x801   : >> { %3822 = vxpose.xlu0.c.b16.start.end [1/1] (short) (narrow) %v2302_v9, 16  ;;  %v9670_v35 = vpop.trf.xlu1  ;;  %v2458_v9 = vrot.slane %v2450_v11, %v10490_v25 }
 0x803   : >> { %v3030_v63 = vpop.trf.xlu0  ;;  %3838 = vxpose.xlu1.c.b16.start.end [1/1] (short) (narrow) %v2370_v49, 16  ;;  %v2482_v19 = vcombine.low %v2458_v9, %v2474_v16  ;;  %v2422_v49 = vrot.slane %v2414_v2, %v9494_v5  ;;  %v2483_v18 = vcombine.high %v2458_v9, %v2474_v16 }
 0x804   : >> { %v4982_v51 = vcombine.low %v9641_v31, %v3030_v63 }
 0x805   : >> { %3854 = vxpose.xlu0.c.b16.start.end [1/1] (short) (narrow) %v2312_v1, 16  ;;  %v3046_v48 = vpop.trf.xlu1  ;;  %v4974_v1 = vcombine.low %v9633_v10, %v9654_v46  ;;  %v2490_v59 = vrot.slane %v2482_v19, %v9494_v5  ;;  %v2446_v12 = vcombine.high %v2422_v49, %v8586_v21  ;;  %v9715_v10 = vrot.slane %v2399_v56, %v10490_v25 }
 0x806   : >> { %v5031_v22 = vcombine.low %v9647_v55, %v3046_v48  ;;  %v4989_v31 = vrot.slane %v4982_v51, %v10490_v25  ;;  %v2467_v46 = vcombine.high %v9680_v33, %v9668_v30  ;;  %v2429_v30 = vrot.slane %v2415_v38, %v9494_v5 }
 0x807   : >> { %v3062_v37 = vpop.trf.xlu0  ;;  %3870 = vxpose.xlu1.c.b16.start.end [1/1] (short) (narrow) %v2380_v36, 16  ;;  %v5023_v36 = vcombine.low %v9637_v58, %v9670_v35  ;;  %v4981_v48 = vrot.slane %v4974_v1, %v10490_v25  ;;  %v2514_v0 = vcombine.high %v2490_v59, %v8586_v21  ;;  %v2451_v33 = vcombine.high %v9686_v54, %v9682_v3 }
 0x808   : >> { %v5038_v58 = vrot.slane %v5031_v22, %v10490_v25  ;;  %v9740_v51 = vrot.slane %v2467_v46, %v10490_v25  ;;  %v1754_v38 = vshrl.u32 %v9416_v41, 16 }
 0x809   : >> { %3886 = vxpose.xlu0.c.b16.start.end [1/1] (short) (narrow) %v2309_v13, 16  ;;  %v3078_v14 = vpop.trf.xlu1  ;;  %v5030_v11 = vrot.slane %v5023_v36, %v10490_v25  ;;  %v5006_v6 = vcombine.low %v4981_v48, %v4989_v31  ;;  %v2465_v1 = vrot.slane %v2451_v33, %v10490_v25  ;;  %v1770_v36 = vshrl.u32 %v9608_v50, 16 }
 0x80b   : >> { %v3094_v7 = vpop.trf.xlu0  ;;  %3902 = vxpose.xlu1.c.b16.start.end [1/1] (short) (narrow) %v2377_v45, 16  ;;  %v5055_v2 = vcombine.low %v5030_v11, %v5038_v58  ;;  %v5013_v56 = vrot.slane %v5006_v6, %v9494_v5  ;;  %v9767_v58 = vpack.i.b16 %v9444_v60, %v9416_v41  ;;  %v1747_v41 = vshrl.u32 %v9446_v61, 16 }
 0x80d   : >> { %3918 = vxpose.xlu0.c.b16.start.end [1/1] (short) (narrow) %v2313_v17, 16  ;;  %v3110_v15 = vpop.trf.xlu1  ;;  %v9731_v17 = vrot.slane %v2383_v8, %v10490_v25  ;;  %v9760_v8 = vpack.i.b16 %v9612_v52, %v9608_v50  ;;  %v9774_v50 = vpack.i.b16 %v9472_v23, %v9474_v24 }
 0x80f   : >> { %v3126_v32 = vpop.trf.xlu0  ;;  %3934 = vxpose.xlu1.c.b16.start.end [1/1] (short) (narrow) %v2381_v20, 16  ;;  %v2431_v33 = vcombine.high %v9731_v17, %v9715_v10 }
 0x810   : >> { %v4990_v39 = vcombine.low %v3062_v37, %v3126_v32  ;;  %v2447_v32 = vcombine.high %v2429_v30, %v8586_v21 }
 0x811   : >> { %3950 = vxpose.xlu0.c.b16.start.end [1/1] (short) (narrow) %v2422_v49, 16  ;;  %v3142_v34 = vpop.trf.xlu1  ;;  %v2430_v49 = vcombine.low %v9731_v17, %v9715_v10  ;;  %v2499_v17 = vcombine.high %v2465_v1, %v9740_v51 }
 0x812   : >> { %v5039_v35 = vcombine.low %v3078_v14, %v3142_v34  ;;  %v4997_v37 = vrot.slane %v4990_v39, %v10490_v25  ;;  %v5062_v39 = vrot.slane %v5055_v2, %v9494_v5 }
 0x813   : >> { %v3158_v63 = vpop.trf.xlu0  ;;  %3966 = vxpose.xlu1.c.b16.start.end [1/1] (short) (narrow) %v2490_v59, 16  ;;  %v1771_v59 = vshrl.u32 %v9612_v52, 16  ;;  %v2438_v46 = vrot.slane %v2430_v49, %v9494_v5 }
 0x814   : >> { %v4998_v55 = vcombine.low %v3094_v7, %v3158_v63  ;;  %v5046_v20 = vrot.slane %v5039_v35, %v10490_v25  ;;  %v1755_v35 = vshrl.u32 %v9444_v60, 16 }
 0x815   : >> { %3982 = vxpose.xlu0.c.b16.start.end [1/1] (short) (narrow) %v2446_v12, 16  ;;  %v3174_v13 = vpop.trf.xlu1  ;;  %v2498_v12 = vcombine.low %v2465_v1, %v9740_v51  ;;  %v9781_v60 = vpack.i.b16 %v1771_v59, %v1770_v36 }
 0x816   : >> { %v5005_v40 = vrot.slane %v4998_v55, %v10490_v25  ;;  %v5047_v45 = vcombine.low %v3110_v15, %v3174_v13  ;;  %v2497_v15 = vrot.slane %v2483_v18, %v9494_v5  ;;  %v9778_v18 = vpack.i.b16 %v9446_v61, %v9418_v42 }
 0x817   : >> { %v9725_v7 = vpop.trf.xlu0  ;;  %3998 = vxpose.xlu1.c.b16.start.end [1/1] (short) (narrow) %v2514_v0, 16  ;;  %v2506_v6 = vrot.slane %v2498_v12, %v9494_v5  ;;  %v9792_v61 = vpack.i.b16 %v1755_v35, %v1754_v38 }
 0x818   : >> { %v5014_v14 = vcombine.low %v4997_v37, %v5005_v40  ;;  %v5054_v16 = vrot.slane %v5047_v45, %v10490_v25  ;;  %v2515_v63 = vcombine.high %v2497_v15, %v8586_v21  ;;  %v1763_v37 = vshrl.u32 %v9472_v23, 16 }
 0x819   : >> { %4014 = vxpose.xlu0.c.b16.start.end [1/1] (short) (narrow) %v2429_v30, 16  ;;  %v9735_v9 = vpop.trf.xlu1  ;;  %v1762_v40 = vshrl.u32 %v9474_v24, 16  ;;  %v2534_v23 = vcombine.low %v9767_v58, %v9760_v8  ;;  %v2448_v30 = vcombine.high %v2438_v46, %v8586_v21 }
 0x81a   : >> { %v5021_v19 = vrot.slane %v5014_v14, %v9494_v5  ;;  %v5063_v3 = vcombine.low %v5046_v20, %v5054_v16  ;;  %v1746_v14 = vshrl.u32 %v9418_v42, 16  ;;  %v2518_v20 = vcombine.low %v9778_v18, %v9774_v50 }
 0x81b   : >> { %v9742_v54 = vpop.trf.xlu0  ;;  %4030 = vxpose.xlu1.c.b16.start.end [1/1] (short) (narrow) %v2497_v15, 16  ;;  %v9794_v2 = vpack.i.b16 %v1763_v37, %v1762_v40  ;;  %v2602_v15 = vcombine.low %v9792_v61, %v9781_v60  ;;  %v2516_v42 = vcombine.high %v2506_v6, %v8586_v21  ;;  %v2535_v37 = vcombine.high %v9767_v58, %v9760_v8 }
 0x81c   : >> { %v5022_v22 = vcombine.low %v5013_v56, %v5021_v19  ;;  %v5070_v34 = vrot.slane %v5063_v3, %v9494_v5  ;;  %v9799_v16 = vpack.i.b16 %v1747_v41, %v1746_v14  ;;  %v2542_v19 = vrot.slane %v2534_v23, %v10490_v25 }
 0x81d   : >> { %4046 = vxpose.xlu0.c.b16.start.end [1/1] (short) (narrow) %v2447_v32, 16  ;;  %v9753_v31 = vpop.trf.xlu1  ;;  %v2445_v32 = vrot.slane %v2431_v33, %v9494_v5  ;;  %v2526_v56 = vrot.slane %v2518_v20, %v10490_v25  ;;  %v2519_v58 = vcombine.high %v9778_v18, %v9774_v50 }
 0x81e   : >> { %v5071_v48 = vcombine.low %v5062_v39, %v5070_v34  ;;  %v5762_v13 = vshrl.u32 %v5022_v22, 16  ;;  %v2586_v49 = vcombine.low %v9799_v16, %v9794_v2  ;;  %v2513_v39 = vrot.slane %v2499_v17, %v9494_v5 }
 0x81f   : >> { %v9762_v55 = vpop.trf.xlu0  ;;  %4062 = vxpose.xlu1.c.b16.start.end [1/1] (short) (narrow) %v2515_v63, 16  ;;  %v2610_v34 = vrot.slane %v2602_v15, %v10490_v25  ;;  %v2449_v1 = vcombine.high %v2445_v32, %v8586_v21  ;;  %v2550_v59 = vcombine.low %v2526_v56, %v2542_v19  ;;  %v2551_v8 = vcombine.high %v2526_v56, %v2542_v19 }
 0x820   : >> { %v5760_v52 = vpack.i.b16 %v5071_v48, %v5022_v22  ;;  %v5763_v0 = vshrl.u32 %v5071_v48, 16  ;;  %v2594_v36 = vrot.slane %v2586_v49, %v10490_v25  ;;  %v2517_v12 = vcombine.high %v2513_v39, %v8586_v21 }
 0x821   : >> { %4078 = vxpose.xlu0.c.b16.start.end [1/1] (short) (narrow) %v2438_v46, 16  ;;  %v9783_v11 = vpop.trf.xlu1  ;;  %v2558_v35 = vrot.slane %v2550_v59, %v9494_v5  ;;  %v5072_v40 = vcombine.low %v9725_v7, %v9762_v55  ;;  %v9831_v7 = vrot.slane %v2535_v37, %v10490_v25  ;;  %v2603_v55 = vcombine.high %v9792_v61, %v9781_v60 }
 0x822   : >> { %7296 = vmatpush3.bf16.msra.mxu0 %v5760_v52  ;;  %v5764_v45 = vpack.i.b16 %v5763_v0, %v5762_v13  ;;  %v2618_v38 = vcombine.low %v2594_v36, %v2610_v34  ;;  %v2619_v18 = vcombine.high %v2594_v36, %v2610_v34  ;;  %v2565_v60 = vrot.slane %v2551_v8, %v9494_v5 }
 0x823   : >> { %v3286_v24 = vpop.trf.xlu0  ;;  %4094 = vxpose.xlu1.c.b16.start.end [1/1] (short) (narrow) %v2506_v6, 16  ;;  %7297 = vmatprep.subr.bf16.mxu0 %v8587_v26  ;;  %v2587_v61 = vcombine.high %v9799_v16, %v9794_v2  ;;  %v9847_v19 = vrot.slane %v2519_v58, %v10490_v25  ;;  %v9856_v34 = vrot.slane %v2603_v55, %v10490_v25  ;;  %v1794_v8 = vshrl.u32 %v9478_v28, 16  ;;  %v10491_v55 = vld [vmem:[#allocation70_spill] sm:$0xff] }
 0x824   : >> { %7316 = vmatpush3.bf16.msra.mxu1 %v5764_v45  ;;  %v5080_v46 = vcombine.low %v9742_v54, %v3286_v24  ;;  %v2626_v41 = vrot.slane %v2618_v38, %v9494_v5  ;;  %v5121_v54 = vcombine.low %v9735_v9, %v9783_v11  ;;  %v2582_v24 = vcombine.high %v2558_v35, %v8586_v21 }
 0x825   : >> { %4110 = vxpose.xlu0.c.b16.start.end [1/1] (short) (narrow) %v2448_v30, 16  ;;  %v3302_v10 = vpop.trf.xlu1  ;;  %7317 = vmatprep.subr.bf16.mxu1 %v8587_v26  ;;  %v5079_v45 = vrot.slane %v5072_v40, %v10490_v25  ;;  %v2566_v59 = vcombine.low %v9847_v19, %v9831_v7  ;;  %v2601_v36 = vrot.slane %v2587_v61, %v10490_v25 }
 0x826   : >> { %v5129_v52 = vcombine.low %v9753_v31, %v3302_v10  ;;  %v5087_v6 = vrot.slane %v5080_v46, %v10490_v25  ;;  %v2650_v50 = vcombine.high %v2626_v41, %v8586_v21  ;;  %v5128_v20 = vrot.slane %v5121_v54, %v10490_v25 }
 0x827   : >> { %v3318_v3 = vpop.trf.xlu0  ;;  %4126 = vxpose.xlu1.c.b16.start.end [1/1] (short) (narrow) %v2516_v42, 16  ;;  %v1803_v46 = vshrl.u32 %v9622_v29, 16  ;;  %v2634_v40 = vcombine.low %v2601_v36, %v9856_v34  ;;  %v2635_v61 = vcombine.high %v2601_v36, %v9856_v34 }
 0x828   : >> { %v5136_v9 = vrot.slane %v5129_v52, %v10490_v25  ;;  %v5104_v15 = vcombine.low %v5079_v45, %v5087_v6  ;;  %v1786_v52 = vshrl.u32 %v9420_v43, 16  ;;  %v9883_v6 = vpack.i.b16 %v9448_v62, %v9420_v43 }
 0x829   : >> { %4142 = vxpose.xlu0.c.b16.start.end [1/1] (short) (narrow) %v2445_v32, 16  ;;  %v3334_v22 = vpop.trf.xlu1  ;;  %v9894_v45 = vpack.i.b16 %v10491_v55, %v9422_v44  ;;  %v1779_v43 = vshrl.u32 %v10491_v55, 16 }
 0x82a   : >> { %v5111_v2 = vrot.slane %v5104_v15, %v9494_v5 }
 0x82b   : >> { %v3350_v51 = vpop.trf.xlu0  ;;  %4158 = vxpose.xlu1.c.b16.start.end [1/1] (short) (narrow) %v2513_v39, 16  ;;  %v2633_v39 = vrot.slane %v2619_v18, %v9494_v5 }
 0x82d   : >> { %4174 = vxpose.xlu0.c.b16.start.end [1/1] (short) (narrow) %v2449_v1, 16  ;;  %v3366_v63 = vpop.trf.xlu1  ;;  %v2583_v1 = vcombine.high %v2565_v60, %v8586_v21  ;;  %v2651_v37 = vcombine.high %v2633_v39, %v8586_v21 }
 0x82f   : >> { %v3382_v48 = vpop.trf.xlu0  ;;  %4190 = vxpose.xlu1.c.b16.start.end [1/1] (short) (narrow) %v2517_v12, 16 }
 0x830   : >> { %v5088_v13 = vcombine.low %v3318_v3, %v3382_v48  ;;  %v5153_v3 = vcombine.low %v5128_v20, %v5136_v9  ;;  %v1802_v48 = vshrl.u32 %v9618_v47, 16 }
 0x831   : >> { %4206 = vxpose.xlu0.c.b16.start.end [1/1] (short) (narrow) %v2558_v35, 16  ;;  %v3398_v0 = vpop.trf.xlu1 }
 0x832   : >> { %v5137_v11 = vcombine.low %v3334_v22, %v3398_v0  ;;  %v5095_v30 = vrot.slane %v5088_v13, %v10490_v25  ;;  %v9876_v13 = vpack.i.b16 %v9622_v29, %v9618_v47  ;;  %v9890_v47 = vpack.i.b16 %v9476_v27, %v9478_v28 }
 0x833   : >> { %v3414_v23 = vpop.trf.xlu0  ;;  %4222 = vxpose.xlu1.c.b16.start.end [1/1] (short) (narrow) %v2626_v41, 16  ;;  %v2574_v41 = vrot.slane %v2566_v59, %v9494_v5 }
 0x834   : >> { %v5096_v31 = vcombine.low %v3350_v51, %v3414_v23  ;;  %v5144_v32 = vrot.slane %v5137_v11, %v10490_v25  ;;  %v1787_v23 = vshrl.u32 %v9448_v62, 16  ;;  %v9897_v62 = vpack.i.b16 %v1803_v46, %v1802_v48 }
 0x835   : >> { %4238 = vxpose.xlu0.c.b16.start.end [1/1] (short) (narrow) %v2582_v24, 16  ;;  %v3430_v14 = vpop.trf.xlu1  ;;  %v1795_v24 = vshrl.u32 %v9476_v27, 16  ;;  %v2642_v11 = vrot.slane %v2634_v40, %v9494_v5  ;;  %v2670_v27 = vcombine.low %v9883_v6, %v9876_v13  ;;  %v2654_v15 = vcombine.low %v9894_v45, %v9890_v47 }
 0x836   : >> { %v5103_v33 = vrot.slane %v5096_v31, %v10490_v25  ;;  %v5145_v10 = vcombine.low %v3366_v63, %v3430_v14  ;;  %v5160_v63 = vrot.slane %v5153_v3, %v9494_v5  ;;  %v2567_v14 = vcombine.high %v9847_v19, %v9831_v7 }
 0x837   : >> { %v9841_v42 = vpop.trf.xlu0  ;;  %4254 = vxpose.xlu1.c.b16.start.end [1/1] (short) (narrow) %v2650_v50, 16  ;;  %v1778_v50 = vshrl.u32 %v9422_v44, 16  ;;  %v9908_v18 = vpack.i.b16 %v1787_v23, %v1786_v52  ;;  %v9910_v20 = vpack.i.b16 %v1795_v24, %v1794_v8  ;;  %v2652_v44 = vcombine.high %v2642_v11, %v8586_v21 }
 0x838   : >> { %v5112_v17 = vcombine.low %v5095_v30, %v5103_v33  ;;  %v5152_v49 = vrot.slane %v5145_v10, %v10490_v25  ;;  %v2584_v33 = vcombine.high %v2574_v41, %v8586_v21  ;;  %v2581_v3 = vrot.slane %v2567_v14, %v9494_v5 }
 0x839   : >> { %4270 = vxpose.xlu0.c.b16.start.end [1/1] (short) (narrow) %v2565_v60, 16  ;;  %v9852_v22 = vpop.trf.xlu1  ;;  %v9915_v10 = vpack.i.b16 %v1779_v43, %v1778_v50  ;;  %v2738_v60 = vcombine.low %v9908_v18, %v9897_v62 }
 0x83a   : >> { %v5119_v56 = vrot.slane %v5112_v17, %v9494_v5  ;;  %v5161_v16 = vcombine.low %v5144_v32, %v5152_v49  ;;  %v2678_v17 = vrot.slane %v2670_v27, %v10490_v25  ;;  %v2662_v49 = vrot.slane %v2654_v15, %v10490_v25 }
 0x83b   : >> { %v9859_v51 = vpop.trf.xlu0  ;;  %4286 = vxpose.xlu1.c.b16.start.end [1/1] (short) (narrow) %v2633_v39, 16  ;;  %v2722_v32 = vcombine.low %v9915_v10, %v9910_v20  ;;  %v2649_v39 = vrot.slane %v2635_v61, %v9494_v5 }
 0x83c   : >> { %v5168_v12 = vrot.slane %v5161_v16, %v9494_v5  ;;  %v5120_v38 = vcombine.low %v5111_v2, %v5119_v56  ;;  %v2746_v2 = vrot.slane %v2738_v60, %v10490_v25  ;;  %v2585_v16 = vcombine.high %v2581_v3, %v8586_v21 }
 0x83d   : >> { %4302 = vxpose.xlu0.c.b16.start.end [1/1] (short) (narrow) %v2583_v1, 16  ;;  %v9869_v35 = vpop.trf.xlu1  ;;  %v2686_v1 = vcombine.low %v2662_v49, %v2678_v17  ;;  %v2730_v59 = vrot.slane %v2722_v32, %v10490_v25 }
 0x83e   : >> { %v5169_v54 = vcombine.low %v5160_v63, %v5168_v12  ;;  %v5770_v58 = vshrl.u32 %v5120_v38, 16  ;;  %v2653_v63 = vcombine.high %v2649_v39, %v8586_v21 }
 0x83f   : >> { %v9878_v0 = vpop.trf.xlu0  ;;  %4318 = vxpose.xlu1.c.b16.start.end [1/1] (short) (narrow) %v2651_v37, 16  ;;  %v2754_v12 = vcombine.low %v2730_v59, %v2746_v2  ;;  %v2694_v48 = vrot.slane %v2686_v1, %v9494_v5  ;;  %v2671_v37 = vcombine.high %v9883_v6, %v9876_v13  ;;  %v2687_v13 = vcombine.high %v2662_v49, %v2678_v17 }
 0x840   : >> { %v5768_v29 = vpack.i.b16 %v5169_v54, %v5120_v38  ;;  %v5771_v31 = vshrl.u32 %v5169_v54, 16  ;;  %v5170_v40 = vcombine.low %v9841_v42, %v9878_v0  ;;  %v2655_v6 = vcombine.high %v9894_v45, %v9890_v47 }
 0x841   : >> { %4334 = vxpose.xlu0.c.b16.start.end [1/1] (short) (narrow) %v2574_v41, 16  ;;  %v9899_v9 = vpop.trf.xlu1  ;;  %v2762_v23 = vrot.slane %v2754_v12, %v9494_v5  ;;  %v9947_v42 = vrot.slane %v2671_v37, %v10490_v25  ;;  %v2739_v0 = vcombine.high %v9908_v18, %v9897_v62  ;;  %v2755_v45 = vcombine.high %v2730_v59, %v2746_v2 }
 0x842   : >> { %7298 = vmatpush3.bf16.msra.mxu0 %v5768_v29  ;;  %v5772_v30 = vpack.i.b16 %v5771_v31, %v5770_v58  ;;  %v2718_v29 = vcombine.high %v2694_v48, %v8586_v21  ;;  %v5177_v58 = vrot.slane %v5170_v40, %v10490_v25  ;;  %v2701_v62 = vrot.slane %v2687_v13, %v9494_v5  ;;  %v10493_v40 = vld [vmem:[#allocation71_spill] sm:$0xff]  ;;  %v10496_v13 = vld [vmem:[#allocation69_spill] sm:$0xff] }
 0x843   : >> { %v3542_v28 = vpop.trf.xlu0  ;;  %4350 = vxpose.xlu1.c.b16.start.end [1/1] (short) (narrow) %v2642_v11, 16  ;;  %7299 = vmatprep.subr.bf16.mxu0 %v8587_v26  ;;  %v2786_v47 = vcombine.high %v2762_v23, %v8586_v21  ;;  %v9963_v50 = vrot.slane %v2655_v6, %v10490_v25  ;;  %v2769_v61 = vrot.slane %v2755_v45, %v9494_v5  ;;  %v10497_v6 = vld [vmem:[#allocation72_spill] sm:$0xff] }
 0x844   : >> { %7318 = vmatpush3.bf16.msra.mxu1 %v5772_v30  ;;  %v5178_v38 = vcombine.low %v9859_v51, %v3542_v28  ;;  %v5219_v51 = vcombine.low %v9852_v22, %v9899_v9  ;;  %v9972_v17 = vrot.slane %v2739_v0, %v10490_v25  ;;  %v1811_v0 = vshrl.u32 %v10497_v6, 16 }
 0x845   : >> { %4366 = vxpose.xlu0.c.b16.start.end [1/1] (short) (narrow) %v2584_v33, 16  ;;  %v3558_v7 = vpop.trf.xlu1  ;;  %7319 = vmatprep.subr.bf16.mxu1 %v8587_v26  ;;  %v2723_v33 = vcombine.high %v9915_v10, %v9910_v20  ;;  %v2702_v32 = vcombine.low %v9963_v50, %v9947_v42  ;;  %v2787_v59 = vcombine.high %v2769_v61, %v8586_v21 }
 0x846   : >> { %v5227_v52 = vcombine.low %v9869_v35, %v3558_v7  ;;  %v5185_v24 = vrot.slane %v5178_v38, %v10490_v25  ;;  %v5226_v11 = vrot.slane %v5219_v51, %v10490_v25  ;;  %v9992_v38 = vpack.i.b16 %v9629_v4, %v9626_v53  ;;  %v10495_v51 = vld [vmem:[#allocation74_spill] sm:$0xff] }
 0x847   : >> { %v3574_v19 = vpop.trf.xlu0  ;;  %4382 = vxpose.xlu1.c.b16.start.end [1/1] (short) (narrow) %v2652_v44, 16  ;;  %v2737_v49 = vrot.slane %v2723_v33, %v10490_v25  ;;  %v2703_v45 = vcombine.high %v9963_v50, %v9947_v42 }
 0x848   : >> { %v5234_v22 = vrot.slane %v5227_v52, %v10490_v25  ;;  %v5202_v27 = vcombine.low %v5177_v58, %v5185_v24  ;;  %v1826_v24 = vshrl.u32 %v10495_v51, 16 }
 0x849   : >> { %4398 = vxpose.xlu0.c.b16.start.end [1/1] (short) (narrow) %v2581_v3, 16  ;;  %v3590_v56 = vpop.trf.xlu1  ;;  %v2719_v3 = vcombine.high %v2701_v62, %v8586_v21 }
 0x84a   : >> { %v5251_v18 = vcombine.low %v5226_v11, %v5234_v22  ;;  %v5209_v20 = vrot.slane %v5202_v27, %v9494_v5  ;;  %v1810_v11 = vshrl.u32 %v10496_v13, 16 }
 0x84b   : >> { %v3606_v34 = vpop.trf.xlu0  ;;  %4414 = vxpose.xlu1.c.b16.start.end [1/1] (short) (narrow) %v2649_v39, 16 }
 0x84c   : >> { %v10031_v33 = vpack.i.b16 %v1811_v0, %v1810_v11 }
 0x84d   : >> { %4430 = vxpose.xlu0.c.b16.start.end [1/1] (short) (narrow) %v2585_v16, 16  ;;  %v3622_v36 = vpop.trf.xlu1  ;;  %v1834_v16 = vshrl.u32 %v9626_v53, 16 }
 0x84f   : >> { %v3638_v46 = vpop.trf.xlu0  ;;  %4446 = vxpose.xlu1.c.b16.start.end [1/1] (short) (narrow) %v2653_v63, 16  ;;  %v10492_v63 = vld [vmem:[#allocation68_spill] sm:$0xff] }
 0x850   : >> { %v5186_v41 = vcombine.low %v3574_v19, %v3638_v46  ;;  %v1818_v12 = vshrl.u32 %v10492_v63, 16  ;;  %v9999_v52 = vpack.i.b16 %v10493_v40, %v10492_v63 }
 0x851   : >> { %4462 = vxpose.xlu0.c.b16.start.end [1/1] (short) (narrow) %v2694_v48, 16  ;;  %v3654_v54 = vpop.trf.xlu1  ;;  %v2710_v48 = vrot.slane %v2702_v32, %v9494_v5 }
 0x852   : >> { %v5235_v31 = vcombine.low %v3590_v56, %v3654_v54  ;;  %v5193_v55 = vrot.slane %v5186_v41, %v10490_v25  ;;  %v5258_v56 = vrot.slane %v5251_v18, %v9494_v5  ;;  %v1819_v41 = vshrl.u32 %v10493_v40, 16  ;;  %v10494_v54 = vld [vmem:[#allocation73_spill] sm:$0xff] }
 0x853   : >> { %v3670_v8 = vpop.trf.xlu0  ;;  %4478 = vxpose.xlu1.c.b16.start.end [1/1] (short) (narrow) %v2762_v23, 16  ;;  %v1827_v23 = vshrl.u32 %v10494_v54, 16  ;;  %v10006_v53 = vpack.i.b16 %v10494_v54, %v10495_v51  ;;  %v2771_v18 = vcombine.high %v2737_v49, %v9972_v17 }
 0x854   : >> { %v5194_v35 = vcombine.low %v3606_v34, %v3670_v8  ;;  %v5242_v15 = vrot.slane %v5235_v31, %v10490_v25  ;;  %v1835_v34 = vshrl.u32 %v9629_v4, 16  ;;  %v10024_v27 = vpack.i.b16 %v1819_v41, %v1818_v12 }
 0x855   : >> { %4494 = vxpose.xlu0.c.b16.start.end [1/1] (short) (narrow) %v2718_v29, 16  ;;  %v3686_v9 = vpop.trf.xlu1  ;;  %v2807_v12 = vcombine.high %v9999_v52, %v9992_v38 }
 0x856   : >> { %v5201_v43 = vrot.slane %v5194_v35, %v10490_v25  ;;  %v5243_v28 = vcombine.low %v3622_v36, %v3686_v9  ;;  %v2770_v36 = vcombine.low %v2737_v49, %v9972_v17  ;;  %v10010_v35 = vpack.i.b16 %v10497_v6, %v10496_v13 }
 0x857   : >> { %v9957_v30 = vpop.trf.xlu0  ;;  %4510 = vxpose.xlu1.c.b16.start.end [1/1] (short) (narrow) %v2786_v47, 16  ;;  %v10013_v58 = vpack.i.b16 %v1835_v34, %v1834_v16  ;;  %v2720_v47 = vcombine.high %v2710_v48, %v8586_v21 }
 0x858   : >> { %v5210_v14 = vcombine.low %v5193_v55, %v5201_v43  ;;  %v5250_v60 = vrot.slane %v5243_v28, %v10490_v25  ;;  %v2778_v31 = vrot.slane %v2770_v36, %v9494_v5  ;;  %v2806_v55 = vcombine.low %v9999_v52, %v9992_v38 }
 0x859   : >> { %4526 = vxpose.xlu0.c.b16.start.end [1/1] (short) (narrow) %v2701_v62, 16  ;;  %v9968_v44 = vpop.trf.xlu1  ;;  %v10026_v28 = vpack.i.b16 %v1827_v23, %v1826_v24  ;;  %v2790_v62 = vcombine.low %v10010_v35, %v10006_v53  ;;  %v2791_v52 = vcombine.high %v10010_v35, %v10006_v53 }
 0x85a   : >> { %v5217_v7 = vrot.slane %v5210_v14, %v9494_v5  ;;  %v5259_v10 = vcombine.low %v5242_v15, %v5250_v60  ;;  %v2874_v14 = vcombine.low %v10024_v27, %v10013_v58  ;;  %v2788_v50 = vcombine.high %v2778_v31, %v8586_v21 }
 0x85b   : >> { %v9975_v19 = vpop.trf.xlu0  ;;  %4542 = vxpose.xlu1.c.b16.start.end [1/1] (short) (narrow) %v2769_v61, 16  ;;  %v2814_v15 = vrot.slane %v2806_v55, %v10490_v25  ;;  %v2858_v61 = vcombine.low %v10031_v33, %v10026_v28 }
 0x85c   : >> { %v5266_v39 = vrot.slane %v5259_v10, %v9494_v5  ;;  %v5218_v2 = vcombine.low %v5209_v20, %v5217_v7  ;;  %v2717_v7 = vrot.slane %v2703_v45, %v9494_v5  ;;  %v2798_v20 = vrot.slane %v2790_v62, %v10490_v25 }
 0x85d   : >> { %4558 = vxpose.xlu0.c.b16.start.end [1/1] (short) (narrow) %v2719_v3, 16  ;;  %v9985_v1 = vpop.trf.xlu1  ;;  %v2785_v3 = vrot.slane %v2771_v18, %v9494_v5  ;;  %v2882_v32 = vrot.slane %v2874_v14, %v10490_v25 }
 0x85e   : >> { %v5267_v37 = vcombine.low %v5258_v56, %v5266_v39  ;;  %v5778_v8 = vshrl.u32 %v5218_v2, 16  ;;  %v2721_v49 = vcombine.high %v2717_v7, %v8586_v21  ;;  %v2822_v56 = vcombine.low %v2798_v20, %v2814_v15 }
 0x85f   : >> { %v9994_v46 = vpop.trf.xlu0  ;;  %4574 = vxpose.xlu1.c.b16.start.end [1/1] (short) (narrow) %v2787_v59, 16  ;;  %v2866_v39 = vrot.slane %v2858_v61, %v10490_v25  ;;  %v2789_v34 = vcombine.high %v2785_v3, %v8586_v21  ;;  %v2823_v38 = vcombine.high %v2798_v20, %v2814_v15 }
 0x860   : >> { %v5776_v4 = vpack.i.b16 %v5267_v37, %v5218_v2  ;;  %v5779_v29 = vshrl.u32 %v5267_v37, 16  ;;  %v2830_v63 = vrot.slane %v2822_v56, %v9494_v5 }
 0x861   : >> { %4590 = vxpose.xlu0.c.b16.start.end [1/1] (short) (narrow) %v2710_v48, 16  ;;  %v10015_v22 = vpop.trf.xlu1  ;;  %v2890_v16 = vcombine.low %v2866_v39, %v2882_v32  ;;  %v5268_v48 = vcombine.low %v9957_v30, %v9994_v46  ;;  %v10063_v30 = vrot.slane %v2807_v12, %v10490_v25  ;;  %v2875_v46 = vcombine.high %v10024_v27, %v10013_v58 }
 0x862   : >> { %7300 = vmatpush3.bf16.msra.mxu0 %v5776_v4  ;;  %v5780_v9 = vpack.i.b16 %v5779_v29, %v5778_v8  ;;  %v2854_v24 = vcombine.high %v2830_v63, %v8586_v21  ;;  %v2891_v35 = vcombine.high %v2866_v39, %v2882_v32  ;;  %v2837_v58 = vrot.slane %v2823_v38, %v9494_v5 }
 0x863   : >> { %v3798_v43 = vpop.trf.xlu0  ;;  %4606 = vxpose.xlu1.c.b16.start.end [1/1] (short) (narrow) %v2778_v31, 16  ;;  %7301 = vmatprep.subr.bf16.mxu0 %v8587_v26  ;;  %v2898_v54 = vrot.slane %v2890_v16, %v9494_v5  ;;  %v5275_v4 = vrot.slane %v5268_v48, %v10490_v25 }
 0x864   : >> { %7320 = vmatpush3.bf16.msra.mxu1 %v5780_v9  ;;  %v5276_v59 = vcombine.low %v9975_v19, %v3798_v43  ;;  %v5317_v19 = vcombine.low %v9968_v44, %v10015_v22  ;;  %v2859_v43 = vcombine.high %v10031_v33, %v10026_v28  ;;  %v2855_v15 = vcombine.high %v2837_v58, %v8586_v21 }
 0x865   : >> { %4622 = vxpose.xlu0.c.b16.start.end [1/1] (short) (narrow) %v2720_v47, 16  ;;  %v3814_v42 = vpop.trf.xlu1  ;;  %7321 = vmatprep.subr.bf16.mxu1 %v8587_v26  ;;  %v2922_v53 = vcombine.high %v2898_v54, %v8586_v21  ;;  %v2805_v47 = vrot.slane %v2791_v52, %v10490_v25 }
 0x866   : >> { %v5325_v37 = vcombine.low %v9985_v1, %v3814_v42  ;;  %v5283_v23 = vrot.slane %v5276_v59, %v10490_v25  ;;  %v5324_v0 = vrot.slane %v5317_v19, %v10490_v25  ;;  %v2905_v42 = vrot.slane %v2891_v35, %v9494_v5 }
 0x867   : >> { %v3830_v60 = vpop.trf.xlu0  ;;  %4638 = vxpose.xlu1.c.b16.start.end [1/1] (short) (narrow) %v2788_v50, 16  ;;  %v2889_v50 = vrot.slane %v2875_v46, %v10490_v25 }
 0x868   : >> { %v5332_v44 = vrot.slane %v5325_v37, %v10490_v25  ;;  %v5300_v22 = vcombine.low %v5275_v4, %v5283_v23  ;;  %v2923_v32 = vcombine.high %v2905_v42, %v8586_v21  ;;  %v2839_v37 = vcombine.high %v2805_v47, %v10063_v30 }
 0x869   : >> { %4654 = vxpose.xlu0.c.b16.start.end [1/1] (short) (narrow) %v2717_v7, 16  ;;  %v3846_v10 = vpop.trf.xlu1  ;;  %v2873_v7 = vrot.slane %v2859_v43, %v10490_v25 }
 0x86a   : >> { %v5349_v45 = vcombine.low %v5324_v0, %v5332_v44  ;;  %v5307_v28 = vrot.slane %v5300_v22, %v9494_v5  ;;  %v2853_v23 = vrot.slane %v2839_v37, %v9494_v5 }
 0x86b   : >> { %v3862_v17 = vpop.trf.xlu0  ;;  %4670 = vxpose.xlu1.c.b16.start.end [1/1] (short) (narrow) %v2785_v3, 16 }
 0x86c   : >> { %v5356_v61 = vrot.slane %v5349_v45, %v9494_v5  ;;  %v2857_v52 = vcombine.high %v2853_v23, %v8586_v21 }
 0x86d   : >> { %4686 = vxpose.xlu0.c.b16.start.end [1/1] (short) (narrow) %v2721_v49, 16  ;;  %v3878_v2 = vpop.trf.xlu1 }
 0x86f   : >> { %v3894_v36 = vpop.trf.xlu0  ;;  %4702 = vxpose.xlu1.c.b16.start.end [1/1] (short) (narrow) %v2789_v34, 16 }
 0x870   : >> { %v5284_v40 = vcombine.low %v3830_v60, %v3894_v36  ;;  %v2838_v60 = vcombine.low %v2805_v47, %v10063_v30 }
 0x871   : >> { %4718 = vxpose.xlu0.c.b16.start.end [1/1] (short) (narrow) %v2830_v63, 16  ;;  %v3910_v41 = vpop.trf.xlu1 }
 0x872   : >> { %v5333_v8 = vcombine.low %v3846_v10, %v3910_v41  ;;  %v5291_v29 = vrot.slane %v5284_v40, %v10490_v25  ;;  %v2846_v56 = vrot.slane %v2838_v60, %v9494_v5 }
 0x873   : >> { %v3926_v51 = vpop.trf.xlu0  ;;  %4734 = vxpose.xlu1.c.b16.start.end [1/1] (short) (narrow) %v2898_v54, 16  ;;  %v2907_v54 = vcombine.high %v2873_v7, %v2889_v50 }
 0x874   : >> { %v5292_v1 = vcombine.low %v3862_v17, %v3926_v51  ;;  %v5340_v11 = vrot.slane %v5333_v8, %v10490_v25  ;;  %v2906_v17 = vcombine.low %v2873_v7, %v2889_v50  ;;  %v2856_v48 = vcombine.high %v2846_v56, %v8586_v21 }
 0x875   : >> { %4750 = vxpose.xlu0.c.b16.start.end [1/1] (short) (narrow) %v2854_v24, 16  ;;  %v3942_v6 = vpop.trf.xlu1  ;;  %v2921_v24 = vrot.slane %v2907_v54, %v9494_v5 }
 0x876   : >> { %v5299_v13 = vrot.slane %v5292_v1, %v10490_v25  ;;  %v5341_v31 = vcombine.low %v3878_v2, %v3942_v6  ;;  %v2914_v36 = vrot.slane %v2906_v17, %v9494_v5 }
 0x877   : >> { %v10073_v55 = vpop.trf.xlu0  ;;  %4766 = vxpose.xlu1.c.b16.start.end [1/1] (short) (narrow) %v2922_v53, 16  ;;  %v2925_v1 = vcombine.high %v2921_v24, %v8586_v21 }
 0x878   : >> { %v5308_v9 = vcombine.low %v5291_v29, %v5299_v13  ;;  %v5348_v27 = vrot.slane %v5341_v31, %v10490_v25  ;;  %v2924_v41 = vcombine.high %v2914_v36, %v8586_v21 }
 0x879   : >> { %4782 = vxpose.xlu0.c.b16.start.end [1/1] (short) (narrow) %v2837_v58, 16  ;;  %v10082_v14 = vpop.trf.xlu1 }
 0x87a   : >> { %v5315_v62 = vrot.slane %v5308_v9, %v9494_v5  ;;  %v5357_v33 = vcombine.low %v5340_v11, %v5348_v27 }
 0x87b   : >> { %v3990_v18 = vpop.trf.xlu0  ;;  %4798 = vxpose.xlu1.c.b16.start.end [1/1] (short) (narrow) %v2905_v42, 16 }
 0x87c   : >> { %v5364_v20 = vrot.slane %v5357_v33, %v9494_v5  ;;  %v5316_v10 = vcombine.low %v5307_v28, %v5315_v62 }
 0x87d   : >> { %4814 = vxpose.xlu0.c.b16.start.end [1/1] (short) (narrow) %v2855_v15, 16  ;;  %v4006_v3 = vpop.trf.xlu1 }
 0x87e   : >> { %v5365_v39 = vcombine.low %v5356_v61, %v5364_v20  ;;  %v5786_v34 = vshrl.u32 %v5316_v10, 16 }
 0x87f   : >> { %v4022_v49 = vpop.trf.xlu0  ;;  %4830 = vxpose.xlu1.c.b16.start.end [1/1] (short) (narrow) %v2923_v32, 16 }
 0x880   : >> { %v5784_v2 = vpack.i.b16 %v5365_v39, %v5316_v10  ;;  %v5787_v16 = vshrl.u32 %v5365_v39, 16  ;;  %v5366_v44 = vcombine.low %v10073_v55, %v4022_v49 }
 0x881   : >> { %4846 = vxpose.xlu0.c.b16.start.end [1/1] (short) (narrow) %v2846_v56, 16  ;;  %v4038_v59 = vpop.trf.xlu1 }
 0x882   : >> { %7302 = vmatpush3.bf16.msra.mxu0 %v5784_v2  ;;  %v5788_v12 = vpack.i.b16 %v5787_v16, %v5786_v34  ;;  %v5415_v6 = vcombine.low %v10082_v14, %v4038_v59  ;;  %v5373_v22 = vrot.slane %v5366_v44, %v10490_v25 }
 0x883   : >> { %v4054_v63 = vpop.trf.xlu0  ;;  %4862 = vxpose.xlu1.c.b16.start.end [1/1] (short) (narrow) %v2914_v36, 16  ;;  %7303 = vmatprep.subr.bf16.mxu0 %v8587_v26 }
 0x884   : >> { %7322 = vmatpush3.bf16.msra.mxu1 %v5788_v12  ;;  %v5374_v46 = vcombine.low %v3990_v18, %v4054_v63  ;;  %v5422_v55 = vrot.slane %v5415_v6, %v10490_v25 }
 0x885   : >> { %4878 = vxpose.xlu0.c.b16.start.end [1/1] (short) (narrow) %v2856_v48, 16  ;;  %v4070_v40 = vpop.trf.xlu1  ;;  %7323 = vmatprep.subr.bf16.mxu1 %v8587_v26 }
 0x886   : >> { %v5423_v8 = vcombine.low %v4006_v3, %v4070_v40  ;;  %v5381_v53 = vrot.slane %v5374_v46, %v10490_v25 }
 0x887   : >> { %v4086_v19 = vpop.trf.xlu0  ;;  %4894 = vxpose.xlu1.c.b16.start.end [1/1] (short) (narrow) %v2924_v41, 16 }
 0x888   : >> { %v5430_v31 = vrot.slane %v5423_v8, %v10490_v25  ;;  %v5398_v47 = vcombine.low %v5373_v22, %v5381_v53 }
 0x889   : >> { %4910 = vxpose.xlu0.c.b16.start.end [1/1] (short) (narrow) %v2853_v23, 16  ;;  %v4102_v51 = vpop.trf.xlu1 }
 0x88a   : >> { %v5447_v62 = vcombine.low %v5422_v55, %v5430_v31  ;;  %v5405_v33 = vrot.slane %v5398_v47, %v9494_v5 }
 0x88b   : >> { %v4118_v38 = vpop.trf.xlu0  ;;  %4926 = vxpose.xlu1.c.b16.start.end [1/1] (short) (narrow) %v2921_v24, 16 }
 0x88c   : >> { %v5454_v60 = vrot.slane %v5447_v62, %v9494_v5 }
 0x88d   : >> { %4942 = vxpose.xlu0.c.b16.start.end [1/1] (short) (narrow) %v2857_v52, 16  ;;  %v4134_v30 = vpop.trf.xlu1 }
 0x88f   : >> { %v4150_v4 = vpop.trf.xlu0  ;;  %4958 = vxpose.xlu1.c.b16.start.end [1/1] (short) (narrow) %v2925_v1, 16 }
 0x890   : >> { %v5382_v29 = vcombine.low %v4086_v19, %v4150_v4 }
 0x891   : >> { %v4166_v13 = vpop.trf.xlu1 }
 0x892   : >> { %v5431_v58 = vcombine.low %v4102_v51, %v4166_v13  ;;  %v5389_v21 = vrot.slane %v5382_v29, %v10490_v25 }
 0x893   : >> { %v4182_v35 = vpop.trf.xlu0 }
 0x894   : >> { %v5390_v0 = vcombine.low %v4118_v38, %v4182_v35  ;;  %v5438_v14 = vrot.slane %v5431_v58, %v10490_v25 }
 0x895   : >> { %v4198_v9 = vpop.trf.xlu1 }
 0x896   : >> { %v5397_v43 = vrot.slane %v5390_v0, %v10490_v25  ;;  %v5439_v45 = vcombine.low %v4134_v30, %v4198_v9 }
 0x897   : >> { %v4214_v11 = vpop.trf.xlu0 }
 0x898   : >> { %v5406_v27 = vcombine.low %v5389_v21, %v5397_v43  ;;  %v5446_v42 = vrot.slane %v5439_v45, %v10490_v25 }
 0x899   : >> { %v4230_v28 = vpop.trf.xlu1 }
 0x89a   : >> { %v5413_v50 = vrot.slane %v5406_v27, %v9494_v5  ;;  %v5455_v18 = vcombine.low %v5438_v14, %v5446_v42 }
 0x89b   : >> { %v4246_v15 = vpop.trf.xlu0 }
 0x89c   : >> { %v5462_v7 = vrot.slane %v5455_v18, %v9494_v5  ;;  %v5414_v61 = vcombine.low %v5405_v33, %v5413_v50 }
 0x89d   : >> { %v4262_v20 = vpop.trf.xlu1 }
 0x89e   : >> { %v5463_v3 = vcombine.low %v5454_v60, %v5462_v7  ;;  %v5794_v17 = vshrl.u32 %v5414_v61, 16 }
 0x89f   : >> { %v4278_v10 = vpop.trf.xlu0 }
 0x8a0   : >> { %v5792_v32 = vpack.i.b16 %v5463_v3, %v5414_v61  ;;  %v5795_v49 = vshrl.u32 %v5463_v3, 16  ;;  %v5464_v37 = vcombine.low %v4214_v11, %v4278_v10 }
 0x8a1   : >> { %v4294_v56 = vpop.trf.xlu1 }
 0x8a2   : >> { %7304 = vmatpush3.bf16.msra.mxu0 %v5792_v32  ;;  %v5796_v2 = vpack.i.b16 %v5795_v49, %v5794_v17  ;;  %v5513_v19 = vcombine.low %v4230_v28, %v4294_v56  ;;  %v5471_v38 = vrot.slane %v5464_v37, %v10490_v25 }
 0x8a3   : >> { %v4310_v39 = vpop.trf.xlu0  ;;  %7305 = vmatprep.subr.bf16.mxu0 %v8587_v26 }
 0x8a4   : >> { %7324 = vmatpush3.bf16.msra.mxu1 %v5796_v2  ;;  %v5472_v12 = vcombine.low %v4246_v15, %v4310_v39  ;;  %v5520_v44 = vrot.slane %v5513_v19, %v10490_v25 }
 0x8a5   : >> { %v4326_v34 = vpop.trf.xlu1  ;;  %7325 = vmatprep.subr.bf16.mxu1 %v8587_v26 }
 0x8a6   : >> { %v5521_v40 = vcombine.low %v4262_v20, %v4326_v34  ;;  %v5479_v23 = vrot.slane %v5472_v12, %v10490_v25 }
 0x8a7   : >> { %v4342_v16 = vpop.trf.xlu0 }
 0x8a8   : >> { %v5528_v52 = vrot.slane %v5521_v40, %v10490_v25  ;;  %v5496_v8 = vcombine.low %v5471_v38, %v5479_v23 }
 0x8a9   : >> { %v4358_v59 = vpop.trf.xlu1 }
 0x8aa   : >> { %v5545_v53 = vcombine.low %v5520_v44, %v5528_v52  ;;  %v5503_v58 = vrot.slane %v5496_v8, %v9494_v5 }
 0x8ab   : >> { %v4374_v36 = vpop.trf.xlu0 }
 0x8ac   : >> { %v5552_v9 = vrot.slane %v5545_v53, %v9494_v5 }
 0x8ad   : >> { %v4390_v63 = vpop.trf.xlu1 }
 0x8af   : >> { %v4406_v48 = vpop.trf.xlu0 }
 0x8b0   : >> { %v5480_v41 = vcombine.low %v4342_v16, %v4406_v48 }
 0x8b1   : >> { %v4422_v54 = vpop.trf.xlu1 }
 0x8b2   : >> { %v5529_v30 = vcombine.low %v4358_v59, %v4422_v54  ;;  %v5487_v1 = vrot.slane %v5480_v41, %v10490_v25 }
 0x8b3   : >> { %v4438_v51 = vpop.trf.xlu0 }
 0x8b4   : >> { %v5488_v24 = vcombine.low %v4374_v36, %v4438_v51  ;;  %v5536_v35 = vrot.slane %v5529_v30, %v10490_v25 }
 0x8b5   : >> { %v4454_v4 = vpop.trf.xlu1 }
 0x8b6   : >> { %v5495_v46 = vrot.slane %v5488_v24, %v10490_v25  ;;  %v5537_v29 = vcombine.low %v4390_v63, %v4454_v4 }
 0x8b7   : >> { %v4470_v13 = vpop.trf.xlu0 }
 0x8b8   : >> { %v5504_v6 = vcombine.low %v5487_v1, %v5495_v46  ;;  %v5544_v0 = vrot.slane %v5537_v29, %v10490_v25 }
 0x8b9   : >> { %v4486_v31 = vpop.trf.xlu1 }
 0x8ba   : >> { %v5511_v22 = vrot.slane %v5504_v6, %v9494_v5  ;;  %v5553_v21 = vcombine.low %v5536_v35, %v5544_v0 }
 0x8bb   : >> { %v4502_v43 = vpop.trf.xlu0 }
 0x8bc   : >> { %v5560_v55 = vrot.slane %v5553_v21, %v9494_v5  ;;  %v5512_v47 = vcombine.low %v5503_v58, %v5511_v22 }
 0x8bd   : >> { %v4518_v45 = vpop.trf.xlu1 }
 0x8be   : >> { %v5561_v27 = vcombine.low %v5552_v9, %v5560_v55  ;;  %v5802_v14 = vshrl.u32 %v5512_v47, 16 }
 0x8bf   : >> { %v4534_v11 = vpop.trf.xlu0 }
 0x8c0   : >> { %v5800_v62 = vpack.i.b16 %v5561_v27, %v5512_v47  ;;  %v5803_v42 = vshrl.u32 %v5561_v27, 16  ;;  %v5562_v3 = vcombine.low %v4470_v13, %v4534_v11 }
 0x8c1   : >> { %v4550_v50 = vpop.trf.xlu1 }
 0x8c2   : >> { %7306 = vmatpush3.bf16.msra.mxu0 %v5800_v62  ;;  %v5804_v33 = vpack.i.b16 %v5803_v42, %v5802_v14  ;;  %v5611_v56 = vcombine.low %v4486_v31, %v4550_v50  ;;  %v5569_v16 = vrot.slane %v5562_v3, %v10490_v25 }
 0x8c3   : >> { %v4566_v28 = vpop.trf.xlu0  ;;  %7307 = vmatprep.subr.bf16.mxu0 %v8587_v26 }
 0x8c4   : >> { %7326 = vmatpush3.bf16.msra.mxu1 %v5804_v33  ;;  %v5570_v20 = vcombine.low %v4502_v43, %v4566_v28  ;;  %v5618_v37 = vrot.slane %v5611_v56, %v10490_v25 }
 0x8c5   : >> { %v4582_v18 = vpop.trf.xlu1  ;;  %7327 = vmatprep.subr.bf16.mxu1 %v8587_v26 }
 0x8c6   : >> { %v5619_v32 = vcombine.low %v4518_v45, %v4582_v18  ;;  %v5577_v39 = vrot.slane %v5570_v20, %v10490_v25 }
 0x8c7   : >> { %v4598_v15 = vpop.trf.xlu0 }
 0x8c8   : >> { %v5626_v59 = vrot.slane %v5619_v32, %v10490_v25  ;;  %v5594_v40 = vcombine.low %v5569_v16, %v5577_v39 }
 0x8c9   : >> { %v4614_v60 = vpop.trf.xlu1 }
 0x8ca   : >> { %v5643_v23 = vcombine.low %v5618_v37, %v5626_v59  ;;  %v5601_v30 = vrot.slane %v5594_v40, %v9494_v5 }
 0x8cb   : >> { %v4630_v7 = vpop.trf.xlu0 }
 0x8cc   : >> { %v5650_v4 = vrot.slane %v5643_v23, %v9494_v5 }
 0x8cd   : >> { %v4646_v61 = vpop.trf.xlu1 }
 0x8cf   : >> { %v4662_v10 = vpop.trf.xlu0 }
 0x8d0   : >> { %v5578_v17 = vcombine.low %v4598_v15, %v4662_v10 }
 0x8d1   : >> { %v4678_v49 = vpop.trf.xlu1 }
 0x8d2   : >> { %v5627_v36 = vcombine.low %v4614_v60, %v4678_v49  ;;  %v5585_v63 = vrot.slane %v5578_v17, %v10490_v25 }
 0x8d3   : >> { %v4694_v2 = vpop.trf.xlu0 }
 0x8d4   : >> { %v5586_v34 = vcombine.low %v4630_v7, %v4694_v2  ;;  %v5634_v51 = vrot.slane %v5627_v36, %v10490_v25 }
 0x8d5   : >> { %v4710_v48 = vpop.trf.xlu1 }
 0x8d6   : >> { %v5593_v12 = vrot.slane %v5586_v34, %v10490_v25  ;;  %v5635_v41 = vcombine.low %v4646_v61, %v4710_v48 }
 0x8d7   : >> { %v4726_v54 = vpop.trf.xlu0 }
 0x8d8   : >> { %v5602_v19 = vcombine.low %v5585_v63, %v5593_v12  ;;  %v5642_v24 = vrot.slane %v5635_v41, %v10490_v25 }
 0x8d9   : >> { %v4742_v52 = vpop.trf.xlu1 }
 0x8da   : >> { %v5609_v38 = vrot.slane %v5602_v19, %v9494_v5  ;;  %v5651_v1 = vcombine.low %v5634_v51, %v5642_v24  ;;  %v10498_v19 = vld [vmem:[#allocation60_spill] sm:$0xff]  ;;  %v10501_v24 = vld [vmem:[#allocation61_spill] sm:$0xff] }
 0x8db   : >> { %v4758_v46 = vpop.trf.xlu0  ;;  %v10499_v23 = vmov %v10498_v19 }
 0x8dc   : >> { %v5658_v44 = vrot.slane %v5651_v1, %v9494_v5  ;;  %v5610_v8 = vcombine.low %v5601_v30, %v5609_v38  ;;  %v10500_v51 = vpack.c.bf16 %v10498_v19, %v10499_v23  ;;  %v10502_v38 = vpack.c.bf16 %v10501_v24, %v10501_v24  ;;  %v7778_v24 = vld [vmem:[#allocation21 + $0x60] sm:$0xff] (%p1425_p6)  }
 0x8dd   : >> { %v4774_v29 = vpop.trf.xlu1 }
 0x8de   : >> { %v5659_v6 = vcombine.low %v5650_v4, %v5658_v44  ;;  %v5810_v35 = vshrl.u32 %v5610_v8, 16 }
 0x8df   : >> { %v4790_v13 = vpop.trf.xlu0 }
 0x8e0   : >> { %v5808_v53 = vpack.i.b16 %v5659_v6, %v5610_v8  ;;  %v5811_v0 = vshrl.u32 %v5659_v6, 16  ;;  %v5660_v27 = vcombine.low %v4726_v54, %v4790_v13 }
 0x8e1   : >> { %v4806_v22 = vpop.trf.xlu1 }
 0x8e2   : >> { %7308 = vmatpush3.bf16.msra.mxu0 %v5808_v53  ;;  %v5812_v58 = vpack.i.b16 %v5811_v0, %v5810_v35  ;;  %v5709_v50 = vcombine.low %v4742_v52, %v4806_v22  ;;  %v5667_v15 = vrot.slane %v5660_v27, %v10490_v25  ;;  %v1447_v53 = vld [vmem:[%s1445_s29 + $0x1] sm:$0x1]  ;;  %v1448_v35 = vld [vmem:[%s1445_s29 + $0x2] sm:$0x1]  ;;  %v1449_v0 = vld [vmem:[%s1445_s29 + $0x3] sm:$0x1] }
 0x8e3   : >> { %v4822_v31 = vpop.trf.xlu0  ;;  %7309 = vmatprep.subr.bf16.mxu0 %v8587_v26  ;;  %v1450_v22 = vld [vmem:[%s1445_s29 + $0x4] sm:$0x1] }
 0x8e4   : >> { %7328 = vmatpush3.bf16.msra.mxu1 %v5812_v58  ;;  %v5668_v45 = vcombine.low %v4758_v46, %v4822_v31  ;;  %v5716_v3 = vrot.slane %v5709_v50, %v10490_v25  ;;  %v1451_v31 = vld [vmem:[%s1445_s29 + $0x5] sm:$0x1]  ;;  %v5947_v50 = vshrl.u32 %v1449_v0, 16 }
 0x8e5   : >> { %v4838_v21 = vpop.trf.xlu1  ;;  %7329 = vmatprep.subr.bf16.mxu1 %v8587_v26 }
 0x8e6   : >> { %v5717_v62 = vcombine.low %v4774_v29, %v4838_v21  ;;  %v5675_v28 = vrot.slane %v5668_v45, %v10490_v25  ;;  %v1452_v21 = vld [vmem:[%s1445_s29 + $0x6] sm:$0x1]  ;;  %v8589_v45 = vmov 1966171168  }
 0x8e7   : >> { %v4854_v43 = vpop.trf.xlu0 }
 0x8e8   : >> { %v5724_v60 = vrot.slane %v5717_v62, %v10490_v25  ;;  %v5692_v32 = vcombine.low %v5667_v15, %v5675_v28  ;;  %v5953_v15 = vshrl.u32 %v1451_v31, 16 }
 0x8e9   : >> { %v4870_v9 = vpop.trf.xlu1 }
 0x8ea   : >> { %v5741_v56 = vcombine.low %v5716_v3, %v5724_v60  ;;  %v5699_v16 = vrot.slane %v5692_v32, %v9494_v5 }
 0x8eb   : >> { %v4886_v55 = vpop.trf.xlu0 }
 0x8ec   : >> { %v5748_v36 = vrot.slane %v5741_v56, %v9494_v5 }
 0x8ed   : >> { %v4902_v47 = vpop.trf.xlu1 }
 0x8ef   : >> { %v4918_v11 = vpop.trf.xlu0 }
 0x8f0   : >> { %v5676_v14 = vcombine.low %v4854_v43, %v4918_v11  ;;  %v1453_v43 = vld [vmem:[%s1445_s29 + $0x7] sm:$0x1]  ;;  %v5964_v11 = vunpack.c.l.s4 %v8589_v45  ;;  %v10507_v45 = vld [vmem:[#allocation63_spill] sm:$0xff] }
 0x8f1   : >> { %v4934_v42 = vpop.trf.xlu1 }
 0x8f2   : >> { %v5725_v7 = vcombine.low %v4870_v9, %v4934_v42  ;;  %v5683_v61 = vrot.slane %v5676_v14, %v10490_v25  ;;  %v5945_v9 = vpack.i.b16 %v1449_v0, %v1448_v35  ;;  %v5941_v14 = vshrl.u32 %v1447_v53, 16  ;;  %v10505_v0 = vld [vmem:[#allocation65_spill] sm:$0xff] }
 0x8f3   : >> { %v4950_v33 = vpop.trf.xlu0  ;;  %v5946_v42 = vshrl.u32 %v1448_v35, 16 }
 0x8f4   : >> { %v5684_v18 = vcombine.low %v4886_v55, %v4950_v33  ;;  %v5732_v39 = vrot.slane %v5725_v7, %v10490_v25  ;;  %v5951_v55 = vpack.i.b16 %v1451_v31, %v1450_v22  ;;  %v5965_v33 = vunpack.c.0.s8 %v5964_v11 }
 0x8f5   : >> { %v4966_v10 = vpop.trf.xlu1  ;;  %v5948_v7 = vpack.i.b16 %v5947_v50, %v5946_v42  ;;  %v10508_v42 = vld [vmem:[#allocation62_spill] sm:$0xff] }
 0x8f6   : >> { %v5691_v20 = vrot.slane %v5684_v18, %v10490_v25  ;;  %v5733_v17 = vcombine.low %v4902_v47, %v4966_v10  ;;  %v5957_v47 = vpack.i.b16 %v1453_v43, %v1452_v21  ;;  %v5952_v18 = vshrl.u32 %v1450_v22, 16 }
 0x8f7   : >> { %v5968_v10 = vsub.s32 %v5965_v33, %v9337_v57 }
 0x8f8   : >> { %v5700_v49 = vcombine.low %v5683_v61, %v5691_v20  ;;  %v5740_v2 = vrot.slane %v5733_v17, %v10490_v25  ;;  %v5962_v28 = vcombine.low %v5951_v55, %v5957_v47  ;;  %v5958_v61 = vshrl.u32 %v1452_v21, 16 }
 0x8f9   : >> { %v5959_v20 = vshrl.u32 %v1453_v43, 16  ;;  %v5954_v3 = vpack.i.b16 %v5953_v15, %v5952_v18  ;;  %v10506_v43 = vld [vmem:[#allocation64_spill] sm:$0xff] }
 0x8fa   : >> { %v5707_v34 = vrot.slane %v5700_v49, %v9494_v5  ;;  %v5749_v59 = vcombine.low %v5732_v39, %v5740_v2  ;;  %v5976_v56 = vrot.slane %v5962_v28, %v5968_v10 }
 0x8fb   : >> { %v5960_v32 = vpack.i.b16 %v5959_v20, %v5958_v61 }
 0x8fc   : >> { %v5756_v63 = vrot.slane %v5749_v59, %v9494_v5  ;;  %v5708_v12 = vcombine.low %v5699_v16, %v5707_v34 }
 0x8fd   : >> { %v6033_v39 = vcombine.low %v5954_v3, %v5960_v32  ;;  %v10513_v3 = vmov (%p1425_p6), 0   ;;  %v7771_v32 = vld [vmem:[#allocation21] sm:$0xff] (%p1425_p6)  }
 0x8fe   : >> { %v5757_v48 = vcombine.low %v5748_v36, %v5756_v63  ;;  %v5818_v40 = vshrl.u32 %v5708_v12, 16 }
 0x8ff   : >> { %v6047_v16 = vrot.slane %v6033_v39, %v5968_v10  ;;  %v7774_v39 = vld [vmem:[#allocation21 + $0x50] sm:$0xff] (%p1425_p6)  }
 0x900   : >> { %v5816_v37 = vpack.i.b16 %v5757_v48, %v5708_v12  ;;  %v5819_v41 = vshrl.u32 %v5757_v48, 16 }
 0x902   : >> { %7310 = vmatpush3.bf16.msra.mxu0 %v5816_v37  ;;  %v5820_v54 = vpack.i.b16 %v5819_v41, %v5818_v40  ;;  %v10503_v40 = vld [vmem:[#allocation67_spill] sm:$0xff] }
 0x903   : >> { %7335 = vmatprep.subr.bf16.mxu0 %v8587_v26 }
 0x904   : >> { %7330 = vmatpush3.bf16.msra.mxu1 %v5820_v54 }
 0x905   : >> { %7312 = vmatmul.mubr.bf16.vlgmr.msra.gmra.mrb[0].mxu0 %v10500_v51  ;;  %7341 = vmatprep.subr.bf16.mxu1 %v8587_v26  ;;  %v10504_v51 = vld [vmem:[#allocation66_spill] sm:$0xff] }
 0x906   : >> { %7337 = vmatprep.mubr.msk.bf16.mxu0 %vm8588_vm0, %v8587_v26 }
 0x907   : >> { %7332 = vmatmul.mubr.bf16.vlgmr.msra.gmra.mrb[0].mxu1 %v10502_v38 }
 0x908   : >> { %7343 = vmatprep.mubr.msk.bf16.mxu1 %vm8588_vm0, %v8587_v26  ;;  %v1446_v26 = vld [vmem:[%s1445_s29] sm:$0x1] }
 0x909   : >> { %v5939_v58 = vpack.i.b16 %v1447_v53, %v1446_v26  ;;  %v5940_v27 = vshrl.u32 %v1446_v26, 16 }
 0x90b   : >> { %v5961_v62 = vcombine.low %v5939_v58, %v5945_v9  ;;  %v5942_v60 = vpack.i.b16 %v5941_v14, %v5940_v27 }
 0x90d   : >> { %v6032_v17 = vcombine.low %v5942_v60, %v5948_v7  ;;  %v5969_v49 = vrot.slane %v5961_v62, %v5968_v10 }
 0x90f   : >> { %v6040_v2 = vrot.slane %v6032_v17, %v5968_v10  ;;  %v5977_v34 = vcombine.low %v5969_v49, %v5976_v56  ;;  %v7772_v49 = vld [vmem:[#allocation21 + $0x48] sm:$0xff] (%p1425_p6)  }
 0x910   : > { %v7773_v56 = vld [vmem:[#allocation21 + $0x8] sm:$0xff] (%p1425_p6)  }
 0x911   : >> { %v5984_v59 = vrot.slane %v5977_v34, %v5968_v10  ;;  %v6048_v36 = vcombine.low %v6040_v2, %v6047_v16  ;;  %v7775_v2 = vld [vmem:[#allocation21 + $0x10] sm:$0xff] (%p1425_p6)   ;;  %v7776_v34 = vld [vmem:[#allocation21 + $0x58] sm:$0xff] (%p1425_p6)  }
 0x913   : >> { %v5990_v63 = vsel %vm5988_vm2, %v5984_v59, 0  ;;  %v6055_v12 = vrot.slane %v6048_v36, %v5968_v10  ;;  %v7770_v10 = vld [vmem:[#allocation21 + $0x40] sm:$0xff] (%p1425_p6)   ;;  %v7777_v36 = vld [vmem:[#allocation21 + $0x18] sm:$0xff] (%p1425_p6)  }
 0x914   : >> { %7336 = vmatpush3.bf16.msra.mxu0 %v5990_v63 }
 0x915   : >> { %v6060_v48 = vsel %vm5988_vm2, %v6055_v12, 0  ;;  %7251 = vmatprep.subr.bf16.mxu0 (%p1425_p6), %v7770_v10  ;;  %v7779_v12 = vld [vmem:[#allocation21 + $0x20] sm:$0xff] (%p1425_p6)  }
 0x916   : >> { %7342 = vmatpush3.bf16.msra.mxu1 %v6060_v48  ;;  %v7789_v10 = vld [vmem:[#allocation27 + $0x14] ss:$8 sps:$4 sm:$0xff] (%p1425_p6)  }
 0x9d8   : >> { %v10176_v52 = vpop.f32.mrb[0].mxu0 }
 0x9d9   : >> { %v7313_v30 = vpop.f32.mrb[1].mxu0  ;;  %v5903_v1 = vsel %vm5902_vm1, %v10176_v52, -inf }
 0x9da   : >> { %v10180_v46 = vpop.f32.mrb[0].mxu1  ;;  %5904 = vmax.xlane.f32.xlu0 %v5903_v1  ;;  %v5859_v4 = vpop.f32.mrb[2].mxu0 }
 0x9db   : >> { %v7314_v44 = vpop.f32.mrb[3].mxu0  ;;  %v7333_v8 = vpop.f32.mrb[1].mxu1  ;;  %v5906_v29 = vsel %vm5902_vm1, %v10180_v46, -inf }
 0x9dc   : >> { %5907 = vmax.xlane.f32.xlu1 %v5906_v29  ;;  %v5899_v13 = vpop.f32.mrb[2].mxu1 }
 0x9dd   : >> { %v7334_v6 = vpop.f32.mrb[3].mxu1 }
 0xa67   : >> { %v5905_v37 = vpop.xlane.xlu0 %5904 }
 0xa68   : >> { %v5909_v21 = vmax.f32 %v10503_v40, %v5905_v37  }
 0xa69   : >> { %v5908_v41 = vpop.xlane.xlu1 %5907 }
 0xa6a   : >> { %v5911_v54 = vsub.f32 %v10503_v40, %v5909_v21  ;;  %v5917_v19 = vsub.f32 %v10176_v52, %v5909_v21  ;;  %v5910_v20 = vmax.f32 %v10504_v51, %v5908_v41   ;;  %v7780_v40 = vld [vmem:[#allocation21 + $0x68] sm:$0xff] (%p1425_p6)  }
 0xa6c   : >> { %v5919_v38 = vmul.f32 1.442695, %v5917_v19  ;;  %v5912_v30 = vsub.f32 %v10504_v51, %v5910_v20  ;;  %v5918_v1 = vsub.f32 %v10180_v46, %v5910_v20  ;;  %v5913_v26 = vmul.f32 1.442695, %v5911_v54 }
 0xa6e   : >> { %v5921_v4 = vmul.f32 1.442695, %v5918_v1  ;;  %7762 = vpow2.f32 %v5919_v38  ;;  %v5915_v53 = vmul.f32 1.442695, %v5912_v30  ;;  %v7781_v38 = vld [vmem:[#allocation21 + $0x28] sm:$0xff] (%p1425_p6)   ;;  %v7782_v30 = vld [vmem:[#allocation21 + $0x70] sm:$0xff] (%p1425_p6)  }
 0xa70   : >> { %7764 = vpow2.f32 %v5921_v4 }
 0xa71   : >> { %7766 = vpow2.f32 %v5913_v26  ;;  %v7783_v26 = vld [vmem:[#allocation21 + $0x30] sm:$0xff] (%p1425_p6)  }
 0xa72   : >> { %7768 = vpow2.f32 %v5915_v53  ;;  %v7784_v53 = vld [vmem:[#allocation21 + $0x78] sm:$0xff] (%p1425_p6)  }
 0xa78   : >> { %v7763_v44 = vpop.eup %7762 }
 0xa79   : >> { %v5925_v8 = vsel %vm5902_vm1, %v7763_v44, 0.0  ;;  %v5935_v29 = vpack.c.bf16 %v7763_v44, %v7763_v44 }
 0xa7a   : >> { %v7765_v13 = vpop.eup %7764  ;;  %5926 = vadd.xlane.f32.xlu0 %v5925_v8 }
 0xa7b   : >> { %7338 = vmatmul.mubr.msk.bf16.vlgmr.msra.gmra.mrb[4].mxu0 %vm5902_vm1, %v5935_v29  ;;  %v5928_v52 = vsel %vm5902_vm1, %v7765_v13, 0.0  ;;  %v5936_v6 = vpack.c.bf16 %v7765_v13, %v7765_v13  ;;  %v7767_v46 = vpop.eup %7766 }
 0xa7c   : >> { %5929 = vadd.xlane.f32.xlu1 %v5928_v52  ;;  %v7769_v35 = vpop.eup %7768  ;;  %v5923_v22 = vmul.f32 %v10505_v0, %v7767_v46  ;;  %v5933_v11 = vmul.f32 %v10507_v45, %v7767_v46  ;;  %7252 = vmatpush3.bf16.msra.mxu0 (%p1425_p6), %v7771_v32  ;;  %v7792_v32 = vld [vmem:[#allocation27 + $0x24] ss:$8 sps:$4 sm:$0xff] (%p1425_p6)  }
 0xa7d   : >> { %7344 = vmatmul.mubr.msk.bf16.vlgmr.msra.gmra.mrb[4].mxu1 %vm5902_vm1, %v5936_v6  ;;  %v5924_v9 = vmul.f32 %v10506_v43, %v7769_v35  ;;  %v5934_v50 = vmul.f32 %v10508_v42, %v7769_v35  ;;  %7253 = vmatprep.subr.bf16.mxu0 (%p1425_p6), %v7772_v49 }
 0xa7e   : > { %6570 = vmatprep.mubr.bf16.mxu1 (%p1425_p6), %v10513_v3  ;;  %v7791_v3 = vld [vmem:[#allocation27 + $0x10] ss:$8 sps:$4 sm:$0xff] (%p1425_p6)  }
 0xa80   : > { %7254 = vmatpush3.bf16.msra.mxu0 (%p1425_p6), %v7773_v56 }
 0xa81   : > { %7255 = vmatprep.subr.bf16.mxu0 (%p1425_p6), %v7774_v39 }
 0xa84   : > { %7256 = vmatpush3.bf16.msra.mxu0 (%p1425_p6), %v7775_v2 }
 0xa85   : > { %7257 = vmatprep.subr.bf16.mxu0 (%p1425_p6), %v7776_v34  ;;  %v7794_v34 = vld [vmem:[#allocation27 + $0x20] ss:$8 sps:$4 sm:$0xff] (%p1425_p6)  }
 0xa88   : > { %7258 = vmatpush3.bf16.msra.mxu0 (%p1425_p6), %v7777_v36  ;;  %v7798_v36 = vld [vmem:[#allocation27 + $0x44] ss:$8 sps:$4 sm:$0xff] (%p1425_p6)  }
 0xa89   : > { %7259 = vmatprep.subr.bf16.mxu0 (%p1425_p6), %v7778_v24  ;;  %v7801_v24 = vld [vmem:[#allocation27 + $0x54] ss:$8 sps:$4 sm:$0xff] (%p1425_p6)  }
 0xa8c   : > { %7260 = vmatpush3.bf16.msra.mxu0 (%p1425_p6), %v7779_v12  ;;  %v7809_v12 = vld [vmem:[#allocation27 + $0x70] ss:$8 sps:$4 sm:$0xff] (%p1425_p6)  }
 0xa8d   : > { %7261 = vmatprep.subr.bf16.mxu0 (%p1425_p6), %v7780_v40  ;;  %v7812_v40 = vld [vmem:[#allocation30 + $0x48] sm:$0xff] (%p1425_p6)  }
 0xa90   : > { %7262 = vmatpush3.bf16.msra.mxu0 (%p1425_p6), %v7781_v38  ;;  %v7817_v38 = vld [vmem:[#allocation30 + $0x18] sm:$0xff] (%p1425_p6)  }
 0xa91   : > { %7263 = vmatprep.subr.bf16.mxu0 (%p1425_p6), %v7782_v30  ;;  %v7818_v30 = vld [vmem:[#allocation30 + $0x60] sm:$0xff] (%p1425_p6)  }
 0xa94   : > { %7264 = vmatpush3.bf16.msra.mxu0 (%p1425_p6), %v7783_v26 }
 0xa95   : > { %7265 = vmatprep.subr.bf16.mxu0 (%p1425_p6), %v7784_v53  ;;  %v7185_v53 = vld [vmem:[#allocation25] ss:$0 sm:$0xff] (%p1425_p6) }
 0xb07   : >> { %v5927_v31 = vpop.xlane.xlu0 %5926 }
 0xb08   : >> { %v5931_v58 = vadd.f32 %v5927_v31, %v5923_v22  }
 0xb09   : >> { %v5930_v55 = vpop.xlane.xlu1 %5929 }
 0xb0a   : >> { %v5932_v47 = vadd.f32 %v5930_v55, %v5924_v9   ;;  %v10512_v19 = vmov %v5931_v58  ;;  %7826 = vrcp.f32 (%p1425_p6), %v5931_v58  ;;  %v7785_v9 = vld [vmem:[#allocation21 + $0x38] sm:$0xff] (%p1425_p6)  }
 0xb0b   : > { %7266 = vmatpush3.bf16.msra.mxu0 (%p1425_p6), %v7785_v9  ;;  %v6446_v9 = vld [vmem:[#allocation28] sm:$0x3] (%p1425_p6) }
 0xb0c   : > { %7828 = vrcp.f32 (%p1425_p6), %v5932_v47 }
 0xb14   : > { %v7827_v21 = vpop.eup (%p1425_p6), %7826 }
 0xb16   : > { %v7829_v59 = vpop.eup (%p1425_p6), %7828 }
 0xb4d   : > { %1427 = sbr.rel (!%p1425_p6) target bundleno = 1725 (0x6bd), region = 227 }
 0xb4e   : >> { %v6026_v27 = vpop.f32.mrb[4].mxu0 }
 0xb4f   : >> { %v6102_v62 = vadd.f32 %v6026_v27, %v5933_v11   ;;  %v7339_v14 = vpop.f32.mrb[5].mxu0 }
 0xb50   : >> { %v6029_v28 = vpop.f32.mrb[6].mxu0  ;;  %v6096_v33 = vpop.f32.mrb[4].mxu1 }
 0xb51   : >> { %v6103_v15 = vadd.f32 %v6096_v33, %v5934_v50   ;;  %v7340_v18 = vpop.f32.mrb[7].mxu0  ;;  %v7345_v60 = vpop.f32.mrb[5].mxu1  ;;  %v10510_v17 = vmov %v6102_v62  ;;  %v6106_v23 = vmul.f32 (%p1425_p6), %v7827_v21, %v6102_v62  ;;  %v7167_v50 = vld [vmem:[#allocation22] ss:$0 sm:$0xff] (%p1425_p6)  ;;  %v7795_v21 = vld [vmem:[#allocation27 + $0x34] ss:$8 sps:$4 sm:$0xff] (%p1425_p6)  }
 0xb52   : >> { %v6099_v7 = vpop.f32.mrb[6].mxu1  ;;  %v10511_v18 = vmov %v5932_v47  ;;  %v8590_v17 = vmov (%p1425_p6), 0.0   ;;  %v10514_v60 = vld [vmem:[#allocation58_spill] sm:$0xff] (%p1425_p6) }
 0xb53   : >> { %v7346_v61 = vpop.f32.mrb[7].mxu1  ;;  %v10509_v16 = vmov %v6103_v15  ;;  %v6107_v20 = vmul.f32 (%p1425_p6), %v7829_v59, %v6103_v15  ;;  %v6115_v63 = vrot.slane (%p1425_p6), %v6106_v23, %v10490_v25  ;;  %v7797_v59 = vld [vmem:[#allocation27 + $0x30] ss:$8 sps:$4 sm:$0xff] (%p1425_p6)  }
 0xb54   : > { %v6108_v16 = vcombine.high %v6106_v23, %v8590_v17  ;;  %v7788_v61 = vld [vmem:[#allocation27] ss:$8 sps:$4 sm:$0xff]  }
 0xb55   : > { %v6123_v48 = vcombine.high %v6107_v20, %v8590_v17  ;;  %v6130_v37 = vrot.slane %v6107_v20, %v10490_v25  ;;  %v7800_v23 = vld [vmem:[#allocation27 + $0x40] ss:$8 sps:$4 sm:$0xff]   ;;  %v7803_v20 = vld [vmem:[#allocation27 + $0x50] ss:$8 sps:$4 sm:$0xff]   ;;  %v7804_v17 = vld [vmem:[#allocation27 + $0x64] ss:$8 sps:$4 sm:$0xff]  }
 0xb56   : > { %v6122_v41 = vrot.slane %v6108_v16, %v10490_v25  ;;  %v7806_v16 = vld [vmem:[#allocation27 + $0x60] ss:$8 sps:$4 sm:$0xff]  }
 0xb57   : > { %v6137_v54 = vrot.slane %v6123_v48, %v10490_v25  ;;  %v6138_v19 = vcombine.low %v6115_v63, %v6130_v37  ;;  %v6139_v51 = vcombine.high %v6115_v63, %v6130_v37  ;;  %v7807_v63 = vld [vmem:[#allocation27 + $0x74] ss:$8 sps:$4 sm:$0xff]   ;;  %v7810_v48 = vld [vmem:[#allocation30 + $0x40] sm:$0xff]  }
 0xb58   : > { %v7811_v37 = vld [vmem:[#allocation30] sm:$0xff]   ;;  %7273 = vmatprep.subr.bf16.mxu0 %v7810_v48 }
 0xb59   : > { %v6146_v1 = vrot.slane %v6138_v19, %v9494_v5  ;;  %v6153_v4 = vrot.slane %v6139_v51, %v9494_v5  ;;  %v6154_v44 = vcombine.low %v6122_v41, %v6137_v54  ;;  %v6155_v8 = vcombine.high %v6122_v41, %v6137_v54  ;;  %v7813_v41 = vld [vmem:[#allocation30 + $0x8] sm:$0xff]   ;;  %v7814_v54 = vld [vmem:[#allocation30 + $0x50] sm:$0xff]   ;;  %v7816_v51 = vld [vmem:[#allocation30 + $0x58] sm:$0xff]  }
 0xb5a   : > { %v7815_v19 = vld [vmem:[#allocation30 + $0x10] sm:$0xff]  }
 0xb5b   : > { %v6162_v29 = vrot.slane %v6154_v44, %v9494_v5  ;;  %v6169_v13 = vrot.slane %v6155_v8, %v9494_v5  ;;  %v6174_v52 = vcombine.low %v6146_v1, %v6153_v4  ;;  %v7165_v6 = vcombine.high %v6146_v1, %v6153_v4  ;;  %v7819_v1 = vld [vmem:[#allocation30 + $0x20] sm:$0xff]   ;;  %v7820_v4 = vld [vmem:[#allocation30 + $0x68] sm:$0xff]  }
 0xb5c   : > { %v7821_v44 = vld [vmem:[#allocation30 + $0x28] sm:$0xff]  }
 0xb5d   : > { %v6181_v46 = vrot.slane %v6174_v52, %v10490_v25  ;;  %v6189_v35 = vrot.slane %v7165_v6, %v10490_v25  ;;  %v6190_v0 = vcombine.low %v6162_v29, %v6169_v13  ;;  %v7166_v22 = vcombine.high %v6162_v29, %v6169_v13  ;;  %v7184_v6 = vld [vmem:[#allocation24] ss:$0 sm:$0xff] }
 0xb5f   : > { %v6197_v31 = vrot.slane %v6190_v0, %v10490_v25  ;;  %v6205_v58 = vrot.slane %v7166_v22, %v10490_v25  ;;  %v6206_v43 = vcombine.low %v6181_v46, %v6189_v35  ;;  %v7822_v22 = vld [vmem:[#allocation30 + $0x70] sm:$0xff]  }
 0xb61   : > { %v6213_v55 = vrot.slane %v6206_v43, %v9494_v5  ;;  %v6214_v47 = vcombine.low %v6197_v31, %v6205_v58  ;;  %v7823_v31 = vld [vmem:[#allocation30 + $0x30] sm:$0xff]   ;;  %v7824_v58 = vld [vmem:[#allocation30 + $0x78] sm:$0xff]  }
 0xb62   : > { %v7825_v43 = vld [vmem:[#allocation30 + $0x38] sm:$0xff]  }
 0xb63   : > { %v6221_v45 = vrot.slane %v6214_v47, %v9494_v5  ;;  %v7786_v5 = vld [vmem:[#allocation27 + $0x4] ss:$8 sps:$4 sm:$0xff]  }
 0xb64   : > { %6538 = vmatprep.subr.bf16.mxu1 %v7786_v5 }
 0xb65   : > { %v6223_v11 = vcombine.high %v6213_v55, %v6221_v45  ;;  %v6222_v27 = vcombine.low %v6213_v55, %v6221_v45  ;;  %6539 = vmatpush1.bf16.msra.mxu1 %v7788_v61  ;;  %v10516_v55 = vld [vmem:[#allocation59_spill] sm:$0xff]  ;;  %v10517_v45 = vsub.s32 1, %v9337_v57 }
 0xb66   : > { %6540 = vmatprep.subr.bf16.mxu1 %v7789_v10  ;;  %v6451_v47 = vrot.slane %v6446_v9, %v10516_v55  ;;  %v7202_v57 = vld [vmem:[#allocation31] ss:$0 sm:$0xff] }
 0xb67   : > { %v6225_v62 = vpack.c.bf16 %v6223_v11, %v6223_v11  ;;  %v6224_v14 = vpack.c.bf16 %v6222_v27, %v6222_v27  ;;  %v6455_v11 = vrot.slane %v6446_v9, %v10517_v45 }
 0xb69   : > { %6393 = vmatprep.mubr.bf16.mxu0 %v6225_v62  ;;  %6541 = vmatpush1.bf16.msra.mxu1 %v7791_v3 }
 0xb6a   : > { %6394 = vmatmul.mubr.bf16.vlgmr.msra.gmra.mrb[0].mxu0 %v6224_v14  ;;  %6542 = vmatprep.subr.bf16.mxu1 %v7792_v32 }
 0xb6b   : > { %7274 = vmatpush3.bf16.msra.mxu0 %v7811_v37 }
 0xb6c   : > { %7275 = vmatprep.subr.bf16.mxu0 %v7812_v40 }
 0xb6d   : > { %6543 = vmatpush1.bf16.msra.mxu1 %v7794_v34 }
 0xb6e   : > { %6544 = vmatprep.subr.bf16.mxu1 %v7795_v21 }
 0xb6f   : > { %7276 = vmatpush3.bf16.msra.mxu0 %v7813_v41 }
 0xb70   : > { %7277 = vmatprep.subr.bf16.mxu0 %v7814_v54 }
 0xb71   : > { %6545 = vmatpush1.bf16.msra.mxu1 %v7797_v59 }
 0xb72   : > { %6546 = vmatprep.subr.bf16.mxu1 %v7798_v36 }
 0xb73   : > { %7278 = vmatpush3.bf16.msra.mxu0 %v7815_v19 }
 0xb74   : > { %7279 = vmatprep.subr.bf16.mxu0 %v7816_v51 }
 0xb75   : > { %6547 = vmatpush1.bf16.msra.mxu1 %v7800_v23 }
 0xb76   : > { %6548 = vmatprep.subr.bf16.mxu1 %v7801_v24 }
 0xb77   : > { %7280 = vmatpush3.bf16.msra.mxu0 %v7817_v38 }
 0xb78   : > { %7281 = vmatprep.subr.bf16.mxu0 %v7818_v30 }
 0xb79   : > { %6549 = vmatpush1.bf16.msra.mxu1 %v7803_v20 }
 0xb7a   : > { %6550 = vmatprep.subr.bf16.mxu1 %v7804_v17 }
 0xb7b   : > { %7282 = vmatpush3.bf16.msra.mxu0 %v7819_v1 }
 0xb7c   : > { %7283 = vmatprep.subr.bf16.mxu0 %v7820_v4 }
 0xb7d   : > { %6551 = vmatpush1.bf16.msra.mxu1 %v7806_v16 }
 0xb7e   : > { %6552 = vmatprep.subr.bf16.mxu1 %v7807_v63 }
 0xb7f   : > { %7284 = vmatpush3.bf16.msra.mxu0 %v7821_v44 }
 0xb80   : > { %7285 = vmatprep.subr.bf16.mxu0 %v7822_v22 }
 0xb81   : > { %6553 = vmatpush1.bf16.msra.mxu1 %v7809_v12 }
 0xb83   : > { %7286 = vmatpush3.bf16.msra.mxu0 %v7823_v31 }
 0xb84   : > { %7287 = vmatprep.subr.bf16.mxu0 %v7824_v58 }
 0xb87   : > { %7288 = vmatpush3.bf16.msra.mxu0 %v7825_v43 }
 0xc3d   : > { %v7267_v42 = vpop.f32.mrb[0].mxu0 }
 0xc3e   : > { %v7268_v28 = vpop.f32.mrb[1].mxu0 }
 0xc3f   : > { %v7269_v25 = vadd.f32 %v7268_v28, %v7267_v42  ;;  %v7270_v33 = vpop.f32.mrb[2].mxu0 }
 0xc40   : > { %v7271_v15 = vpop.f32.mrb[3].mxu0 }
 0xc41   : > { %v6396_v18 = vadd.f32 %v7269_v25, %v7167_v50 }
 0xc43   : > { %v10232_v7 = vadd.f32 %v6396_v18, %v10514_v60 }
 0xc45   : > { %6404 = vadd.xlane.f32.xlu0 %v10232_v7 }
 0xcd2   : > { %v6405_v49 = vpop.xlane.xlu0 %6404 }
 0xcd3   : > { %v6406_v56 = vmul.f32 0.0078125, %v6405_v49 }
 0xcd5   : > { %v6407_v39 = vsub.f32 %v10232_v7, %v6406_v56 }
 0xcd7   : > { %v6408_v2 = vmul.f32 %v6407_v39, %v6407_v39 }
 0xcd9   : > { %6409 = vadd.xlane.f32.xlu0 %v6408_v2 }
 0xd66   : > { %v6410_v8 = vpop.xlane.xlu0 %6409 }
 0xd67   : > { %v6411_v29 = vmul.f32 0.0078125, %v6410_v8 }
 0xd69   : > { %v6412_v13 = vadd.f32 1e-05, %v6411_v29 }
 0xd6b   : > { %7830 = vrsqrt.f32 %v6412_v13 }
 0xd75   : > { %v7831_v52 = vpop.eup %7830 }
 0xd76   : > { %v6414_v26 = vmul.f32 %v7831_v52, %v6407_v39 }
 0xd78   : > { %v6421_v46 = vmul.f32 %v7184_v6, %v6414_v26 }
 0xd7a   : > { %v6428_v35 = vadd.f32 %v7185_v53, %v6421_v46 }
 0xd7c   : > { %v6429_v0 = vpack.c.bf16 %v6428_v35, %v6428_v35 }
 0xd7e   : > { %6571 = vmatmul.mubr.bf16.vlgmr.msra.gmra.mrb[0].mxu1 %v6429_v0 }
 0xe51   : > { %v6572_v27 = vpop.f32.mrb[0].mxu1 }
 0xe52   : > { %v6573_v62 = vadd.f32 %v6572_v27, %v6451_v47  ;;  %v6574_v14 = vpop.f32.mrb[1].mxu1 }
 0xe53   : > { %v6575_v42 = vadd.f32 %v6574_v14, %v6455_v11  ;;  %v6576_v50 = vpop.f32.mrb[2].mxu1 }
 0xe54   : > { %v6579_v28 = vmax.f32 %v6573_v62, 0.0  ;;  %v6577_v25 = vpop.f32.mrb[3].mxu1 }
 0xe55   : > { %v6580_v33 = vmax.f32 %v6575_v42, 0.0 }
 0xe56   : > { %v6581_v18 = vpack.c.bf16 %v6579_v28, %v6579_v28 }
 0xe57   : > { %v6582_v15 = vpack.c.bf16 %v6580_v33, %v6580_v33 }
 0xe59   : > { %6750 = vmatprep.mubr.bf16.mxu0 %v6582_v15 }
 0xe5a   : > { %6751 = vmatmul.mubr.bf16.vlgmr.msra.gmra.mrb[4].mxu0 %v6581_v18 }
 0xf2d   : > { %v7289_v60 = vpop.f32.mrb[4].mxu0 }
 0xf2e   : > { %v7290_v5 = vpop.f32.mrb[5].mxu0 }
 0xf2f   : > { %v7291_v61 = vadd.f32 %v7290_v5, %v7289_v60  ;;  %v7292_v10 = vpop.f32.mrb[6].mxu0 }
 0xf30   : > { %v7293_v3 = vpop.f32.mrb[7].mxu0 }
 0xf31   : > { %v6753_v32 = vadd.f32 %v7291_v61, %v7202_v57 }
 0xf33   : > { %v6758_v49 = vadd.f32 %v6753_v32, %v10232_v7 }
 0xf35   : > { %6759 = vst [vmem:[%s860_s26] sm:$0xff] %v6758_v49 }
 0xf36   : > { %8353 = shalt.err (!%p8350_p3)
}
 0xf37   : > { %s8354_s18 = scalar_lea.hbm %s10247_s17, 128  ;;  %s8358_s9 = scalar_lea.hbm %s10520_s11, 512 }
 0xf38   : > { %p8355_p2 = scmp.ne.s32.totalorder %s10247_s17, %s8354_s18  ;;  %p8359_p8 = scmp.lt.u32.totalorder %s10247_s17, %s10520_s11 }
 0xf39   : > { %p8360_p11 = scmp.lt.u32.totalorder %s8358_s9, %s8354_s18  ;;  %p8362_p9 = scmp.lt.u32.totalorder %s8354_s18, %s10247_s17 }
 0xf3a   : > { %p8356_p10 = pnand %p8355_p2, %p10521_p0 }
 0xf3b   : > { %p8361_p6 = por %p8360_p11, %p8359_p8 }
 0xf3c   : > { %p8357_p12 = pneg %p8356_p10 }
 0xf3d   : > { %p8363_p1 = por %p8362_p9, %p8361_p6 }
 0xf3f   : > { %p8364_p5 = pnand %p8363_p1, %p8357_p12 }
 0xf41   : > { %8367 = shalt.err (!%p8364_p5)
}
 0xf42   : > { %7415 = dma.vmem_to_hbm [thread:$0]  (%p10521_p0), %s10249_s4, 128, %s10247_s17, %s6761_s12  }
 0xf43 PF: > { %s10522_s30 = sld [smem:[#allocation55_spill]]  ;;  %s10523_s21 = sld [smem:[#allocation46_spill]] }
 0xf44   : > { %p10524_p7 = scmp.ne.s32.totalorder %s10443_s22, 0 }
 0xf49   : > { %p7510_p13 = scmp.ge.s32.totalorder %s10522_s30, 2  ;;  %s6788_s7 = sand.u32 1, %s10523_s21  }
 0xf4a   : > { %s6789_s5 = scalar_lea.sflag [#allocation6], %s6788_s7 }
 0xf4b   : > { %p7474_p4 = pnand %p7510_p13, %p10524_p7 }
 0xf4d   : > { %8485 = dma.done.wait (!%p7474_p4), %s6789_s5, 128  }
 0xf4e   : > { %8487 = vsyncadd (!%p7474_p4), %s6789_s5, 4294967168  ;;  %s45_s3 = sadd.s32 1, %s10522_s30   ;;  %s10525_s27 = sld [smem:[#allocation47_spill]] }
 0xf4f   : > { %p42_p3 = scmp.ge.s32.totalorder %s45_s3, 6   ;;  %s10526_s10 = sld [smem:[#allocation48_spill]] }
 0xf50   : > { %s10527_s30 = sld [smem:[#allocation50_spill]]  ;;  %s10528_s4 = sld [smem:[#allocation53_spill]] }
 0xf51   : > { %s10529_s20 = sld [smem:[#allocation54_spill]]  ;;  %s10530_s17 = smov %s10541_s1 }
 0xf52   : > { %s10531_s12 = smov %s10545_s28  ;;  %s10533_s29 = smov %s9208_s6 }
 0xf53   : > { %s10534_s0 = smov %s8510_s19  ;;  %s10535_s19 = smov %s9205_s2 }
 0xf54   : > { %s10537_s21 = smov %s10530_s17  ;;  %s10538_s22 = smov %s10531_s12 }
 0xf55   : > { %s10532_s28 = smov %s10526_s10  ;;  %s10539_s2 = smov %s45_s3 }
 0xf56   : > { %s10536_s1 = smov %s10528_s4  ;;  %44 = sbr.rel (!%p42_p3) target bundleno = 39 (0x27), region = 238 }
 0xf5d   :  { %6794 = vsyncpa [#allocation5], 1 }
 0xf5e   :  { %6796 = vsyncpa [#allocation5 + $0x1], 1 }
 0xf5f   :  { %6797 = vsyncpa [#allocation8], 1 }
 0xf60   :  { %6799 = vsyncpa [#allocation8 + $0x1], 1 }
 0xf61   :  { %6800 = vsyncpa [#allocation11], 1 }
 0xf62   :  { %6801 = vsyncpa [#allocation14], 1 }
 0xf63   :  { %6802 = vsyncpa [#allocation17], 1 }
 0xf64   :  { %6803 = vsyncpa [#allocation20], 1 }
 0xf65   :  { %6804 = vsyncpa [#allocation23], 1 }
 0xf66   :  { %6805 = vsyncpa [#allocation26], 1 }
 0xf67   :  { %6806 = vsyncpa [#allocation29], 1 }
 0xf68   :  { %6807 = vsyncpa [#allocation32], 1 }
 0xf69   :  { %6808 = vsyncpa [#allocation6], 1 }
 0xf6a   :  { %6810 = vsyncpa [#allocation6 + $0x1], 1 }

</bundles_post_ra>
